<compile_context>
chip_gen: v5e
topology: v5e:2x2
jax: 0.10.0
libtpu: 0.0.40
codegen_flags: <defaults>
</compile_context>

<pallas_src>
import functools

import jax
import jax.numpy as jnp
from jax import lax
from jax.experimental import pallas as pl
from jax.experimental.pallas import tpu as pltpu

EPS_LN = 1e-5            # nn.LayerNorm default
EPS_BN = 1e-5            # nn.BatchNorm3d default
_INV_SQRT2 = 0.7071067811865476


def _pick_tile(n, cap):
    """Largest hardware-friendly tile <= cap that divides n (fallback: n)."""
    for c in (1024, 512, 256, 128, 64, 32, 16, 8):
        if c <= cap and c <= n and n % c == 0:
            return c
    return n


# ------------------------------ kernels -------------------------------------
def _ln_kv_kernel(x_ref, g_ref, b_ref, wk_ref, wv_ref, ln_ref, k_ref, v_ref):
    """Fused LayerNorm(norm1) + k/v projections for one tile of tokens."""
    x = x_ref[...].astype(jnp.float32)
    mean = jnp.mean(x, axis=-1, keepdims=True)
    var = jnp.mean((x - mean) ** 2, axis=-1, keepdims=True)
    xn = (x - mean) * lax.rsqrt(var + EPS_LN)
    xn = xn * g_ref[...] + b_ref[...]
    ln_ref[...] = xn.astype(ln_ref.dtype)
    # qkv_bias=False -> no bias add.
    k_ref[...] = jnp.dot(xn, wk_ref[...],
                         preferred_element_type=jnp.float32).astype(k_ref.dtype)
    v_ref[...] = jnp.dot(xn, wv_ref[...],
                         preferred_element_type=jnp.float32).astype(v_ref.dtype)


def _dwconv_kernel(xp_ref, w_ref, o_ref, *, out_spatial):
    """Depthwise 3x3x3 conv, stride 1, input pre-padded.

    No bias / BatchNorm here: both are folded into the pointwise 1x1x1 conv
    that is applied inside the attention kernel (saves one full VPU pass and
    one HBM round-trip of the depthwise output).
    """
    L, W, D = out_spatial
    xp = xp_ref[0].astype(jnp.float32)          # (L+2, W+2, D+2, C)
    wdw = w_ref[...].astype(jnp.float32)        # (3, 3, 3, C)
    C = xp.shape[-1]
    acc = jnp.zeros((L, W, D, C), jnp.float32)
    for dl in range(3):
        for dw in range(3):
            for dd in range(3):
                win = xp[dl:dl + L, dw:dw + W, dd:dd + D, :]
                acc = acc + win * wdw[dl, dw, dd, :][None, None, None, :]
    o_ref[0] = acc.astype(o_ref.dtype)


def _attn_kernel(qdw_ref, k_ref, v_ref, we_ref, be_ref, wp_ref, bp_ref,
                 xres_ref, o_ref, q_sc, m_sc, l_sc, acc_sc,
                 *, num_heads, head_dim, scale):
    """Per-batch attention, flash-tiled over kv blocks.

    Fuses: pointwise q conv (with BN + dw-bias folded), online softmax over kv
    tiles for all heads, output projection, and the first residual add.
    All blocks are lane-dense (last dim = C); heads are split by column slices.
    """
    kv_i = pl.program_id(1)

    @pl.when(kv_i == 0)
    def _init():
        # pointwise 1x1x1 conv of the q path (BN + depthwise bias pre-folded)
        q_sc[...] = (jnp.dot(qdw_ref[0].astype(jnp.float32), we_ref[...],
                             preferred_element_type=jnp.float32) + be_ref[...])
        m_sc[...] = jnp.full_like(m_sc, -jnp.inf)
        l_sc[...] = jnp.zeros_like(l_sc)
        acc_sc[...] = jnp.zeros_like(acc_sc)

    k = k_ref[0].astype(jnp.float32)            # (tkv, C)
    v = v_ref[0].astype(jnp.float32)            # (tkv, C)
    q = q_sc[...]                               # (N, C)

    for h in range(num_heads):
        lo = h * head_dim
        hi = lo + head_dim
        q_h = q[:, lo:hi]                       # (N, dh)
        k_h = k[:, lo:hi]                       # (tkv, dh)
        v_h = v[:, lo:hi]                       # (tkv, dh)
        s = jnp.dot(q_h, k_h.T, preferred_element_type=jnp.float32) * scale
        m_prev = m_sc[:, h:h + 1]
        m_new = jnp.maximum(m_prev, jnp.max(s, axis=-1, keepdims=True))
        alpha = jnp.exp(m_prev - m_new)
        p = jnp.exp(s - m_new)
        l_sc[:, h:h + 1] = alpha * l_sc[:, h:h + 1] + jnp.sum(p, axis=-1,
                                                              keepdims=True)
        acc_sc[:, lo:hi] = alpha * acc_sc[:, lo:hi] + jnp.dot(
            p, v_h, preferred_element_type=jnp.float32)
        m_sc[:, h:h + 1] = m_new

    @pl.when(kv_i == pl.num_programs(1) - 1)
    def _finalize():
        inv_l = pl.reciprocal(l_sc[...], approx=False)      # (N, num_heads)
        for h in range(num_heads):
            lo = h * head_dim
            hi = lo + head_dim
            acc_sc[:, lo:hi] = acc_sc[:, lo:hi] * inv_l[:, h:h + 1]
        ctx = acc_sc[...]                                    # (N, C)
        proj = jnp.dot(ctx, wp_ref[...],
                       preferred_element_type=jnp.float32) + bp_ref[...]
        o_ref[0] = (xres_ref[0].astype(jnp.float32) + proj).astype(o_ref.dtype)


def _ln_mlp_kernel(x_ref, g_ref, b_ref, w1_ref, b1_ref, w2_ref, b2_ref, o_ref):
    """Fused LayerNorm(norm2) + MLP (erf-GELU) + residual for one token tile."""
    x = x_ref[...].astype(jnp.float32)
    mean = jnp.mean(x, axis=-1, keepdims=True)
    var = jnp.mean((x - mean) ** 2, axis=-1, keepdims=True)
    xn = (x - mean) * lax.rsqrt(var + EPS_LN) * g_ref[...] + b_ref[...]
    hpre = jnp.dot(xn, w1_ref[...], preferred_element_type=jnp.float32) + b1_ref[...]
    hact = 0.5 * hpre * (1.0 + lax.erf(hpre * _INV_SQRT2))   # exact GELU, in f32
    out = jnp.dot(hact, w2_ref[...], preferred_element_type=jnp.float32) + b2_ref[...]
    o_ref[...] = (x + out).astype(o_ref.dtype)


# ------------------------------ forward --------------------------------------
def _block_forward(x, params, image_size, num_heads):
    """Matches Block.forward(x, H, W, L) with sr_ratio=1, apply_transform=False."""
    B, N, C = x.shape
    L, W, D = image_size
    assert N == L * W * D and C % num_heads == 0
    dh = C // num_heads
    scale = dh ** (-0.5)
    M = B * N
    f32 = jnp.float32

    tm = _pick_tile(M, 256)                               # token-row tile
    tkv = _pick_tile(N, min(512, max(8, N // 2)))         # kv tile (>=2 steps when possible)

    xf = x.reshape(M, C)

    # Fold BatchNorm3d (eval, running stats) + depthwise bias into the
    # pointwise 1x1x1 conv:  pw(BN(dw(x)+cb)) == dw(x) @ w_eff + b_eff
    s = params["q_bn_g"] * lax.rsqrt(params["q_bn_var"] + EPS_BN)
    t = params["q_dw_b"] * s + params["q_bn_b"] - params["q_bn_mean"] * s
    w_eff = (s[:, None] * params["q_pw_w"]).astype(f32)             # (C, C)
    b_eff = (t @ params["q_pw_w"] + params["q_pw_b"]).astype(f32)   # (C,)

    # k / v column halves of the kv projection (head-major within each half).
    wk = params["kv_w"][:, :C]
    wv = params["kv_w"][:, C:]

    row_parallel = pltpu.CompilerParams(dimension_semantics=("parallel",))

    # -------- 1) fused LayerNorm1 + k/v projections (single token pass) -----
    ln1, k, v = pl.pallas_call(
        _ln_kv_kernel,
        out_shape=(jax.ShapeDtypeStruct((M, C), x.dtype),
                   jax.ShapeDtypeStruct((M, C), x.dtype),
                   jax.ShapeDtypeStruct((M, C), x.dtype)),
        grid=(M // tm,),
        in_specs=[
            pl.BlockSpec((tm, C), lambda i: (i, 0)),
            pl.BlockSpec((1, C), lambda i: (0, 0)),
            pl.BlockSpec((1, C), lambda i: (0, 0)),
            pl.BlockSpec((C, C), lambda i: (0, 0)),
            pl.BlockSpec((C, C), lambda i: (0, 0)),
        ],
        out_specs=(pl.BlockSpec((tm, C), lambda i: (i, 0)),
                   pl.BlockSpec((tm, C), lambda i: (i, 0)),
                   pl.BlockSpec((tm, C), lambda i: (i, 0))),
        compiler_params=row_parallel,
    )(xf, params["ln1_g"].reshape(1, C), params["ln1_b"].reshape(1, C), wk, wv)

    # -------- 2) depthwise 3x3x3 conv of the q path --------------------------
    # TODO(synk): read halos from the unpadded tensor via an overlapping
    # index_map instead of materializing a padded copy in HBM.
    xq = ln1.reshape(B, L, W, D, C)                       # 'b (l w d) n -> b l w d n'
    xp = jnp.pad(xq, ((0, 0), (1, 1), (1, 1), (1, 1), (0, 0)))
    qdw = pl.pallas_call(
        functools.partial(_dwconv_kernel, out_spatial=(L, W, D)),
        out_shape=jax.ShapeDtypeStruct((B, L, W, D, C), x.dtype),
        grid=(B,),
        in_specs=[
            pl.BlockSpec((1, L + 2, W + 2, D + 2, C), lambda b: (b, 0, 0, 0, 0)),
            pl.BlockSpec((3, 3, 3, C), lambda b: (0, 0, 0, 0)),
        ],
        out_specs=pl.BlockSpec((1, L, W, D, C), lambda b: (b, 0, 0, 0, 0)),
        compiler_params=row_parallel,
    )(xp, params["q_dw_w"])
    qdw = qdw.reshape(B, N, C)    # free reshape: collapse (l w d), channels stay minor

    # -------- 3) flash attention + pointwise-q + proj + residual -------------
    x1 = pl.pallas_call(
        functools.partial(_attn_kernel, num_heads=num_heads, head_dim=dh,
                          scale=scale),
        out_shape=jax.ShapeDtypeStruct((B, N, C), x.dtype),
        grid=(B, N // tkv),
        in_specs=[
            pl.BlockSpec((1, N, C), lambda b, j: (b, 0, 0)),     # depthwise-conv q
            pl.BlockSpec((1, tkv, C), lambda b, j: (b, j, 0)),   # k tile
            pl.BlockSpec((1, tkv, C), lambda b, j: (b, j, 0)),   # v tile
            pl.BlockSpec((C, C), lambda b, j: (0, 0)),           # folded pointwise w
            pl.BlockSpec((1, C), lambda b, j: (0, 0)),           # folded pointwise b
            pl.BlockSpec((C, C), lambda b, j: (0, 0)),           # proj w
            pl.BlockSpec((1, C), lambda b, j: (0, 0)),           # proj b
            pl.BlockSpec((1, N, C), lambda b, j: (b, 0, 0)),     # residual x
        ],
        out_specs=pl.BlockSpec((1, N, C), lambda b, j: (b, 0, 0)),
        scratch_shapes=[
            pltpu.VMEM((N, C), jnp.float32),            # q after pointwise conv
            pltpu.VMEM((N, num_heads), jnp.float32),    # running max
            pltpu.VMEM((N, num_heads), jnp.float32),    # running denominator
            pltpu.VMEM((N, C), jnp.float32),            # output accumulator
        ],
        compiler_params=pltpu.CompilerParams(
            dimension_semantics=("parallel", "arbitrary")),
    )(qdw, k.reshape(B, N, C), v.reshape(B, N, C), w_eff, b_eff.reshape(1, C),
      params["proj_w"], params["proj_b"].reshape(1, C), x)

    # -------- 4) fused LayerNorm2 + MLP + residual (single token pass) -------
    Hd = params["fc1_w"].shape[1]
    x1f = x1.reshape(M, C)
    out = pl.pallas_call(
        _ln_mlp_kernel,
        out_shape=jax.ShapeDtypeStruct((M, C), x.dtype),
        grid=(M // tm,),
        in_specs=[
            pl.BlockSpec((tm, C), lambda i: (i, 0)),
            pl.BlockSpec((1, C), lambda i: (0, 0)),
            pl.BlockSpec((1, C), lambda i: (0, 0)),
            pl.BlockSpec((C, Hd), lambda i: (0, 0)),
            pl.BlockSpec((1, Hd), lambda i: (0, 0)),
            pl.BlockSpec((Hd, C), lambda i: (0, 0)),
            pl.BlockSpec((1, C), lambda i: (0, 0)),
        ],
        out_specs=pl.BlockSpec((tm, C), lambda i: (i, 0)),
        compiler_params=row_parallel,
    )(x1f, params["ln2_g"].reshape(1, C), params["ln2_b"].reshape(1, C),
      params["fc1_w"], params["fc1_b"].reshape(1, Hd),
      params["fc2_w"], params["fc2_b"].reshape(1, C))

    return out.reshape(B, N, C)


block_forward = jax.jit(_block_forward, static_argnames=("image_size", "num_heads"))


# --------------------------- parameter init ----------------------------------
def init_params(key, dim, num_heads, mlp_ratio=4.0):
    hidden = int(dim * mlp_ratio)
    ks = jax.random.split(key, 12)
    f32 = jnp.float32

    def w(k, shape, s):
        return (s * jax.random.normal(k, shape)).astype(f32)

    return {
        # LayerNorms
        "ln1_g": jnp.ones((dim,), f32), "ln1_b": jnp.zeros((dim,), f32),
        "ln2_g": jnp.ones((dim,), f32), "ln2_b": jnp.zeros((dim,), f32),
        # SepConv3d for q: depthwise (3,3,3,dim) + bias, BN(eval), pointwise (dim->dim)
        "q_dw_w": w(ks[0], (3, 3, 3, dim), 0.1),
        "q_dw_b": w(ks[1], (dim,), 0.1),
        "q_bn_g": jnp.ones((dim,), f32),
        "q_bn_b": jnp.zeros((dim,), f32),
        "q_bn_mean": jnp.zeros((dim,), f32),
        "q_bn_var": jnp.ones((dim,), f32),
        "q_pw_w": w(ks[2], (dim, dim), 0.05),        # stored (C_in, C_out)
        "q_pw_b": w(ks[3], (dim,), 0.05),
        # kv Linear (qkv_bias=False -> no bias), proj Linear
        "kv_w": w(ks[4], (dim, 2 * dim), 0.05),
        "proj_w": w(ks[5], (dim, dim), 0.05),
        "proj_b": w(ks[6], (dim,), 0.05),
        # MLP
        "fc1_w": w(ks[7], (dim, hidden), 0.05),
        "fc1_b": w(ks[8], (hidden,), 0.05),
        "fc2_w": w(ks[9], (hidden, dim), 0.05),
        "fc2_b": w(ks[10], (dim,), 0.05),
    }


if __name__ == "__main__":
    B, dim, num_heads = 2, 32, 4
    image_size = (4, 4, 4)                 # (l, w, d) -> N = 64
    N = image_size[0] * image_size[1] * image_size[2]

    key = jax.random.PRNGKey(0)
    kx, kp = jax.random.split(key)
    x = (0.1 * jax.random.normal(kx, (B, N, dim))).astype(jnp.float32)
    params = init_params(kp, dim, num_heads)

    out = block_forward(x, params, image_size=image_size, num_heads=num_heads)
    jax.block_until_ready(out)
    assert out.shape == (B, N, dim) and out.dtype == jnp.float32
    print("KERNEL_OK")
</pallas_src>

<mosaic_0001>
module attributes {stable_mosaic.version = 11 : i64} {
  func.func @_ln_kv_kernel(%arg0: i32, %arg1: memref<128x32xf32, #tpu.memory_space<vmem>>, %arg2: memref<1x32xf32, #tpu.memory_space<vmem>>, %arg3: memref<1x32xf32, #tpu.memory_space<vmem>>, %arg4: memref<32x32xf32, #tpu.memory_space<vmem>>, %arg5: memref<32x32xf32, #tpu.memory_space<vmem>>, %arg6: memref<128x32xf32, #tpu.memory_space<vmem>>, %arg7: memref<128x32xf32, #tpu.memory_space<vmem>>, %arg8: memref<128x32xf32, #tpu.memory_space<vmem>>) attributes {dimension_semantics = [#tpu.dimension_semantics<parallel>], iteration_bounds = array<i64: 1>, scalar_prefetch = 0 : i64, scratch_operands = 0 : i64, tpu.core_type = #tpu.core_type<tc>, window_params = [{transform_indices = @transform_0, window_bounds = array<i64: 128, 32>}, {pipeline_mode = #tpu.pipeline_mode<synchronous>, transform_indices = @transform_1, window_bounds = array<i64: 1, 32>}, {pipeline_mode = #tpu.pipeline_mode<synchronous>, transform_indices = @transform_2, window_bounds = array<i64: 1, 32>}, {pipeline_mode = #tpu.pipeline_mode<synchronous>, transform_indices = @transform_3, window_bounds = array<i64: 32, 32>}, {pipeline_mode = #tpu.pipeline_mode<synchronous>, transform_indices = @transform_4, window_bounds = array<i64: 32, 32>}, {transform_indices = @transform_5, window_bounds = array<i64: 128, 32>}, {transform_indices = @transform_6, window_bounds = array<i64: 128, 32>}, {transform_indices = @transform_7, window_bounds = array<i64: 128, 32>}]} {
    %c0 = arith.constant 0 : index
    %c0_0 = arith.constant 0 : index
    %0 = vector.load %arg1[%c0, %c0_0] : memref<128x32xf32, #tpu.memory_space<vmem>>, vector<128x32xf32>
    %cst = arith.constant dense<0.000000e+00> : vector<128xf32>
    %1 = vector.multi_reduction <add>, %0, %cst [1] : vector<128x32xf32> to vector<128xf32>
    %2 = vector.shape_cast %1 : vector<128xf32> to vector<128x1xf32>
    %cst_1 = arith.constant 3.200000e+01 : f32
    %3 = vector.broadcast %cst_1 : f32 to vector<128x1xf32>
    %4 = arith.divf %2, %3 : vector<128x1xf32>
    %5 = vector.broadcast %4 : vector<128x1xf32> to vector<128x32xf32>
    %6 = arith.subf %0, %5 : vector<128x32xf32>
    %7 = arith.mulf %6, %6 : vector<128x32xf32>
    %cst_2 = arith.constant dense<0.000000e+00> : vector<128xf32>
    %8 = vector.multi_reduction <add>, %7, %cst_2 [1] : vector<128x32xf32> to vector<128xf32>
    %9 = vector.shape_cast %8 : vector<128xf32> to vector<128x1xf32>
    %cst_3 = arith.constant 3.200000e+01 : f32
    %10 = vector.broadcast %cst_3 : f32 to vector<128x1xf32>
    %11 = arith.divf %9, %10 : vector<128x1xf32>
    %12 = vector.broadcast %4 : vector<128x1xf32> to vector<128x32xf32>
    %13 = arith.subf %0, %12 : vector<128x32xf32>
    %cst_4 = arith.constant 9.99999974E-6 : f32
    %14 = vector.broadcast %cst_4 : f32 to vector<128x1xf32>
    %15 = arith.addf %11, %14 : vector<128x1xf32>
    %16 = math.rsqrt %15 : vector<128x1xf32>
    %17 = vector.broadcast %16 : vector<128x1xf32> to vector<128x32xf32>
    %18 = arith.mulf %13, %17 : vector<128x32xf32>
    %c0_5 = arith.constant 0 : index
    %c0_6 = arith.constant 0 : index
    %19 = vector.load %arg2[%c0_5, %c0_6] : memref<1x32xf32, #tpu.memory_space<vmem>>, vector<1x32xf32>
    %20 = vector.broadcast %19 : vector<1x32xf32> to vector<128x32xf32>
    %21 = arith.mulf %18, %20 : vector<128x32xf32>
    %c0_7 = arith.constant 0 : index
    %c0_8 = arith.constant 0 : index
    %22 = vector.load %arg3[%c0_7, %c0_8] : memref<1x32xf32, #tpu.memory_space<vmem>>, vector<1x32xf32>
    %23 = vector.broadcast %22 : vector<1x32xf32> to vector<128x32xf32>
    %24 = arith.addf %21, %23 : vector<128x32xf32>
    %c0_9 = arith.constant 0 : index
    %c0_10 = arith.constant 0 : index
    %25 = vector.load %arg6[%c0_9, %c0_10] : memref<128x32xf32, #tpu.memory_space<vmem>>, vector<128x32xf32>
    tpu.vector_store %arg6[%c0_9, %c0_10], %24 {strides = array<i32>} : memref<128x32xf32, #tpu.memory_space<vmem>>, vector<128x32xf32>,
    %c0_11 = arith.constant 0 : index
    %c0_12 = arith.constant 0 : index
    %26 = vector.load %arg4[%c0_11, %c0_12] : memref<32x32xf32, #tpu.memory_space<vmem>>, vector<32x32xf32>
    %cst_13 = arith.constant dense<0.000000e+00> : vector<128x32xf32>
    %27 = tpu.matmul %24, %26, %cst_13 {dimension_numbers = #tpu.dot_dimension_numbers<[1], [0], [0], [1], [0, 0, 1, 1], [], []>} : vector<128x32xf32>, vector<32x32xf32>, vector<128x32xf32> -> vector<128x32xf32>
    %c0_14 = arith.constant 0 : index
    %c0_15 = arith.constant 0 : index
    %28 = vector.load %arg7[%c0_14, %c0_15] : memref<128x32xf32, #tpu.memory_space<vmem>>, vector<128x32xf32>
    tpu.vector_store %arg7[%c0_14, %c0_15], %27 {strides = array<i32>} : memref<128x32xf32, #tpu.memory_space<vmem>>, vector<128x32xf32>,
    %c0_16 = arith.constant 0 : index
    %c0_17 = arith.constant 0 : index
    %29 = vector.load %arg5[%c0_16, %c0_17] : memref<32x32xf32, #tpu.memory_space<vmem>>, vector<32x32xf32>
    %cst_18 = arith.constant dense<0.000000e+00> : vector<128x32xf32>
    %30 = tpu.matmul %24, %29, %cst_18 {dimension_numbers = #tpu.dot_dimension_numbers<[1], [0], [0], [1], [0, 0, 1, 1], [], []>} : vector<128x32xf32>, vector<32x32xf32>, vector<128x32xf32> -> vector<128x32xf32>
    %c0_19 = arith.constant 0 : index
    %c0_20 = arith.constant 0 : index
    %31 = vector.load %arg8[%c0_19, %c0_20] : memref<128x32xf32, #tpu.memory_space<vmem>>, vector<128x32xf32>
    tpu.vector_store %arg8[%c0_19, %c0_20], %30 {strides = array<i32>} : memref<128x32xf32, #tpu.memory_space<vmem>>, vector<128x32xf32>,
    return
  }
  func.func @transform_0(%arg0: i32) -> (i32, i32) {
    %c0_i32 = arith.constant 0 : i32
    %c0_i32_0 = arith.constant 0 : i32
    return %arg0, %c0_i32 : i32, i32
  }
  func.func @transform_1(%arg0: i32) -> (i32, i32) {
    %c0_i32 = arith.constant 0 : i32
    %c0_i32_0 = arith.constant 0 : i32
    %c0_i32_1 = arith.constant 0 : i32
    return %c0_i32, %c0_i32_0 : i32, i32
  }
  func.func @transform_2(%arg0: i32) -> (i32, i32) {
    %c0_i32 = arith.constant 0 : i32
    %c0_i32_0 = arith.constant 0 : i32
    %c0_i32_1 = arith.constant 0 : i32
    return %c0_i32, %c0_i32_0 : i32, i32
  }
  func.func @transform_3(%arg0: i32) -> (i32, i32) {
    %c0_i32 = arith.constant 0 : i32
    %c0_i32_0 = arith.constant 0 : i32
    %c0_i32_1 = arith.constant 0 : i32
    return %c0_i32, %c0_i32_0 : i32, i32
  }
  func.func @transform_4(%arg0: i32) -> (i32, i32) {
    %c0_i32 = arith.constant 0 : i32
    %c0_i32_0 = arith.constant 0 : i32
    %c0_i32_1 = arith.constant 0 : i32
    return %c0_i32, %c0_i32_0 : i32, i32
  }
  func.func @transform_5(%arg0: i32) -> (i32, i32) {
    %c0_i32 = arith.constant 0 : i32
    %c0_i32_0 = arith.constant 0 : i32
    return %arg0, %c0_i32 : i32, i32
  }
  func.func @transform_6(%arg0: i32) -> (i32, i32) {
    %c0_i32 = arith.constant 0 : i32
    %c0_i32_0 = arith.constant 0 : i32
    return %arg0, %c0_i32 : i32, i32
  }
  func.func @transform_7(%arg0: i32) -> (i32, i32) {
    %c0_i32 = arith.constant 0 : i32
    %c0_i32_0 = arith.constant 0 : i32
    return %arg0, %c0_i32 : i32, i32
  }
}

module attributes {stable_mosaic.version = 11 : i64} {
  func.func @_dwconv_kernel(%arg0: i32, %arg1: memref<1x6x6x6x32xf32, #tpu.memory_space<vmem>>, %arg2: memref<3x3x3x32xf32, #tpu.memory_space<vmem>>, %arg3: memref<1x4x4x4x32xf32, #tpu.memory_space<vmem>>) attributes {dimension_semantics = [#tpu.dimension_semantics<parallel>], iteration_bounds = array<i64: 2>, scalar_prefetch = 0 : i64, scratch_operands = 0 : i64, tpu.core_type = #tpu.core_type<tc>, window_params = [{transform_indices = @transform_0, window_bounds = array<i64: 1, 6, 6, 6, 32>}, {pipeline_mode = #tpu.pipeline_mode<synchronous>, transform_indices = @transform_1, window_bounds = array<i64: 3, 3, 3, 32>}, {transform_indices = @transform_2, window_bounds = array<i64: 1, 4, 4, 4, 32>}]} {
    %c0 = arith.constant 0 : index
    %c0_0 = arith.constant 0 : index
    %c0_1 = arith.constant 0 : index
    %c0_2 = arith.constant 0 : index
    %c0_3 = arith.constant 0 : index
    %0 = vector.load %arg1[%c0, %c0_0, %c0_1, %c0_2, %c0_3] : memref<1x6x6x6x32xf32, #tpu.memory_space<vmem>>, vector<1x6x6x6x32xf32>
    %1 = vector.shape_cast %0 : vector<1x6x6x6x32xf32> to vector<6x6x6x32xf32>
    %c0_4 = arith.constant 0 : index
    %c0_5 = arith.constant 0 : index
    %c0_6 = arith.constant 0 : index
    %c0_7 = arith.constant 0 : index
    %2 = vector.load %arg2[%c0_4, %c0_5, %c0_6, %c0_7] : memref<3x3x3x32xf32, #tpu.memory_space<vmem>>, vector<3x3x3x32xf32>
    %cst = arith.constant 0.000000e+00 : f32
    %3 = vector.broadcast %cst : f32 to vector<4x4x4x32xf32>
    %4 = vector.extract_strided_slice %1 {offsets = [0, 0, 0, 0], sizes = [4, 4, 4, 32], strides = [1, 1, 1, 1]} : vector<6x6x6x32xf32> to vector<4x4x4x32xf32>
    %5 = vector.extract_strided_slice %2 {offsets = [0, 0, 0, 0], sizes = [1, 1, 1, 32], strides = [1, 1, 1, 1]} : vector<3x3x3x32xf32> to vector<1x1x1x32xf32>
    %6 = vector.shape_cast %5 : vector<1x1x1x32xf32> to vector<32xf32>
    %7 = vector.shape_cast %6 : vector<32xf32> to vector<1x1x1x32xf32>
    %8 = vector.broadcast %7 : vector<1x1x1x32xf32> to vector<4x4x4x32xf32>
    %9 = arith.mulf %4, %8 : vector<4x4x4x32xf32>
    %10 = arith.addf %3, %9 : vector<4x4x4x32xf32>
    %11 = vector.extract_strided_slice %1 {offsets = [0, 0, 1, 0], sizes = [4, 4, 4, 32], strides = [1, 1, 1, 1]} : vector<6x6x6x32xf32> to vector<4x4x4x32xf32>
    %12 = vector.extract_strided_slice %2 {offsets = [0, 0, 1, 0], sizes = [1, 1, 1, 32], strides = [1, 1, 1, 1]} : vector<3x3x3x32xf32> to vector<1x1x1x32xf32>
    %13 = vector.shape_cast %12 : vector<1x1x1x32xf32> to vector<32xf32>
    %14 = vector.shape_cast %13 : vector<32xf32> to vector<1x1x1x32xf32>
    %15 = vector.broadcast %14 : vector<1x1x1x32xf32> to vector<4x4x4x32xf32>
    %16 = arith.mulf %11, %15 : vector<4x4x4x32xf32>
    %17 = arith.addf %10, %16 : vector<4x4x4x32xf32>
    %18 = vector.extract_strided_slice %1 {offsets = [0, 0, 2, 0], sizes = [4, 4, 4, 32], strides = [1, 1, 1, 1]} : vector<6x6x6x32xf32> to vector<4x4x4x32xf32>
    %19 = vector.extract_strided_slice %2 {offsets = [0, 0, 2, 0], sizes = [1, 1, 1, 32], strides = [1, 1, 1, 1]} : vector<3x3x3x32xf32> to vector<1x1x1x32xf32>
    %20 = vector.shape_cast %19 : vector<1x1x1x32xf32> to vector<32xf32>
    %21 = vector.shape_cast %20 : vector<32xf32> to vector<1x1x1x32xf32>
    %22 = vector.broadcast %21 : vector<1x1x1x32xf32> to vector<4x4x4x32xf32>
    %23 = arith.mulf %18, %22 : vector<4x4x4x32xf32>
    %24 = arith.addf %17, %23 : vector<4x4x4x32xf32>
    %25 = vector.extract_strided_slice %1 {offsets = [0, 1, 0, 0], sizes = [4, 4, 4, 32], strides = [1, 1, 1, 1]} : vector<6x6x6x32xf32> to vector<4x4x4x32xf32>
    %26 = vector.extract_strided_slice %2 {offsets = [0, 1, 0, 0], sizes = [1, 1, 1, 32], strides = [1, 1, 1, 1]} : vector<3x3x3x32xf32> to vector<1x1x1x32xf32>
    %27 = vector.shape_cast %26 : vector<1x1x1x32xf32> to vector<32xf32>
    %28 = vector.shape_cast %27 : vector<32xf32> to vector<1x1x1x32xf32>
    %29 = vector.broadcast %28 : vector<1x1x1x32xf32> to vector<4x4x4x32xf32>
    %30 = arith.mulf %25, %29 : vector<4x4x4x32xf32>
    %31 = arith.addf %24, %30 : vector<4x4x4x32xf32>
    %32 = vector.extract_strided_slice %1 {offsets = [0, 1, 1, 0], sizes = [4, 4, 4, 32], strides = [1, 1, 1, 1]} : vector<6x6x6x32xf32> to vector<4x4x4x32xf32>
    %33 = vector.extract_strided_slice %2 {offsets = [0, 1, 1, 0], sizes = [1, 1, 1, 32], strides = [1, 1, 1, 1]} : vector<3x3x3x32xf32> to vector<1x1x1x32xf32>
    %34 = vector.shape_cast %33 : vector<1x1x1x32xf32> to vector<32xf32>
    %35 = vector.shape_cast %34 : vector<32xf32> to vector<1x1x1x32xf32>
    %36 = vector.broadcast %35 : vector<1x1x1x32xf32> to vector<4x4x4x32xf32>
    %37 = arith.mulf %32, %36 : vector<4x4x4x32xf32>
    %38 = arith.addf %31, %37 : vector<4x4x4x32xf32>
    %39 = vector.extract_strided_slice %1 {offsets = [0, 1, 2, 0], sizes = [4, 4, 4, 32], strides = [1, 1, 1, 1]} : vector<6x6x6x32xf32> to vector<4x4x4x32xf32>
    %40 = vector.extract_strided_slice %2 {offsets = [0, 1, 2, 0], sizes = [1, 1, 1, 32], strides = [1, 1, 1, 1]} : vector<3x3x3x32xf32> to vector<1x1x1x32xf32>
    %41 = vector.shape_cast %40 : vector<1x1x1x32xf32> to vector<32xf32>
    %42 = vector.shape_cast %41 : vector<32xf32> to vector<1x1x1x32xf32>
    %43 = vector.broadcast %42 : vector<1x1x1x32xf32> to vector<4x4x4x32xf32>
    %44 = arith.mulf %39, %43 : vector<4x4x4x32xf32>
    %45 = arith.addf %38, %44 : vector<4x4x4x32xf32>
    %46 = vector.extract_strided_slice %1 {offsets = [0, 2, 0, 0], sizes = [4, 4, 4, 32], strides = [1, 1, 1, 1]} : vector<6x6x6x32xf32> to vector<4x4x4x32xf32>
    %47 = vector.extract_strided_slice %2 {offsets = [0, 2, 0, 0], sizes = [1, 1, 1, 32], strides = [1, 1, 1, 1]} : vector<3x3x3x32xf32> to vector<1x1x1x32xf32>
    %48 = vector.shape_cast %47 : vector<1x1x1x32xf32> to vector<32xf32>
    %49 = vector.shape_cast %48 : vector<32xf32> to vector<1x1x1x32xf32>
    %50 = vector.broadcast %49 : vector<1x1x1x32xf32> to vector<4x4x4x32xf32>
    %51 = arith.mulf %46, %50 : vector<4x4x4x32xf32>
    %52 = arith.addf %45, %51 : vector<4x4x4x32xf32>
    %53 = vector.extract_strided_slice %1 {offsets = [0, 2, 1, 0], sizes = [4, 4, 4, 32], strides = [1, 1, 1, 1]} : vector<6x6x6x32xf32> to vector<4x4x4x32xf32>
    %54 = vector.extract_strided_slice %2 {offsets = [0, 2, 1, 0], sizes = [1, 1, 1, 32], strides = [1, 1, 1, 1]} : vector<3x3x3x32xf32> to vector<1x1x1x32xf32>
    %55 = vector.shape_cast %54 : vector<1x1x1x32xf32> to vector<32xf32>
    %56 = vector.shape_cast %55 : vector<32xf32> to vector<1x1x1x32xf32>
    %57 = vector.broadcast %56 : vector<1x1x1x32xf32> to vector<4x4x4x32xf32>
    %58 = arith.mulf %53, %57 : vector<4x4x4x32xf32>
    %59 = arith.addf %52, %58 : vector<4x4x4x32xf32>
    %60 = vector.extract_strided_slice %1 {offsets = [0, 2, 2, 0], sizes = [4, 4, 4, 32], strides = [1, 1, 1, 1]} : vector<6x6x6x32xf32> to vector<4x4x4x32xf32>
    %61 = vector.extract_strided_slice %2 {offsets = [0, 2, 2, 0], sizes = [1, 1, 1, 32], strides = [1, 1, 1, 1]} : vector<3x3x3x32xf32> to vector<1x1x1x32xf32>
    %62 = vector.shape_cast %61 : vector<1x1x1x32xf32> to vector<32xf32>
    %63 = vector.shape_cast %62 : vector<32xf32> to vector<1x1x1x32xf32>
    %64 = vector.broadcast %63 : vector<1x1x1x32xf32> to vector<4x4x4x32xf32>
    %65 = arith.mulf %60, %64 : vector<4x4x4x32xf32>
    %66 = arith.addf %59, %65 : vector<4x4x4x32xf32>
    %67 = vector.extract_strided_slice %1 {offsets = [1, 0, 0, 0], sizes = [4, 4, 4, 32], strides = [1, 1, 1, 1]} : vector<6x6x6x32xf32> to vector<4x4x4x32xf32>
    %68 = vector.extract_strided_slice %2 {offsets = [1, 0, 0, 0], sizes = [1, 1, 1, 32], strides = [1, 1, 1, 1]} : vector<3x3x3x32xf32> to vector<1x1x1x32xf32>
    %69 = vector.shape_cast %68 : vector<1x1x1x32xf32> to vector<32xf32>
    %70 = vector.shape_cast %69 : vector<32xf32> to vector<1x1x1x32xf32>
    %71 = vector.broadcast %70 : vector<1x1x1x32xf32> to vector<4x4x4x32xf32>
    %72 = arith.mulf %67, %71 : vector<4x4x4x32xf32>
    %73 = arith.addf %66, %72 : vector<4x4x4x32xf32>
    %74 = vector.extract_strided_slice %1 {offsets = [1, 0, 1, 0], sizes = [4, 4, 4, 32], strides = [1, 1, 1, 1]} : vector<6x6x6x32xf32> to vector<4x4x4x32xf32>
    %75 = vector.extract_strided_slice %2 {offsets = [1, 0, 1, 0], sizes = [1, 1, 1, 32], strides = [1, 1, 1, 1]} : vector<3x3x3x32xf32> to vector<1x1x1x32xf32>
    %76 = vector.shape_cast %75 : vector<1x1x1x32xf32> to vector<32xf32>
    %77 = vector.shape_cast %76 : vector<32xf32> to vector<1x1x1x32xf32>
    %78 = vector.broadcast %77 : vector<1x1x1x32xf32> to vector<4x4x4x32xf32>
    %79 = arith.mulf %74, %78 : vector<4x4x4x32xf32>
    %80 = arith.addf %73, %79 : vector<4x4x4x32xf32>
    %81 = vector.extract_strided_slice %1 {offsets = [1, 0, 2, 0], sizes = [4, 4, 4, 32], strides = [1, 1, 1, 1]} : vector<6x6x6x32xf32> to vector<4x4x4x32xf32>
    %82 = vector.extract_strided_slice %2 {offsets = [1, 0, 2, 0], sizes = [1, 1, 1, 32], strides = [1, 1, 1, 1]} : vector<3x3x3x32xf32> to vector<1x1x1x32xf32>
    %83 = vector.shape_cast %82 : vector<1x1x1x32xf32> to vector<32xf32>
    %84 = vector.shape_cast %83 : vector<32xf32> to vector<1x1x1x32xf32>
    %85 = vector.broadcast %84 : vector<1x1x1x32xf32> to vector<4x4x4x32xf32>
    %86 = arith.mulf %81, %85 : vector<4x4x4x32xf32>
    %87 = arith.addf %80, %86 : vector<4x4x4x32xf32>
    %88 = vector.extract_strided_slice %1 {offsets = [1, 1, 0, 0], sizes = [4, 4, 4, 32], strides = [1, 1, 1, 1]} : vector<6x6x6x32xf32> to vector<4x4x4x32xf32>
    %89 = vector.extract_strided_slice %2 {offsets = [1, 1, 0, 0], sizes = [1, 1, 1, 32], strides = [1, 1, 1, 1]} : vector<3x3x3x32xf32> to vector<1x1x1x32xf32>
    %90 = vector.shape_cast %89 : vector<1x1x1x32xf32> to vector<32xf32>
    %91 = vector.shape_cast %90 : vector<32xf32> to vector<1x1x1x32xf32>
    %92 = vector.broadcast %91 : vector<1x1x1x32xf32> to vector<4x4x4x32xf32>
    %93 = arith.mulf %88, %92 : vector<4x4x4x32xf32>
    %94 = arith.addf %87, %93 : vector<4x4x4x32xf32>
    %95 = vector.extract_strided_slice %1 {offsets = [1, 1, 1, 0], sizes = [4, 4, 4, 32], strides = [1, 1, 1, 1]} : vector<6x6x6x32xf32> to vector<4x4x4x32xf32>
    %96 = vector.extract_strided_slice %2 {offsets = [1, 1, 1, 0], sizes = [1, 1, 1, 32], strides = [1, 1, 1, 1]} : vector<3x3x3x32xf32> to vector<1x1x1x32xf32>
    %97 = vector.shape_cast %96 : vector<1x1x1x32xf32> to vector<32xf32>
    %98 = vector.shape_cast %97 : vector<32xf32> to vector<1x1x1x32xf32>
    %99 = vector.broadcast %98 : vector<1x1x1x32xf32> to vector<4x4x4x32xf32>
    %100 = arith.mulf %95, %99 : vector<4x4x4x32xf32>
    %101 = arith.addf %94, %100 : vector<4x4x4x32xf32>
    %102 = vector.extract_strided_slice %1 {offsets = [1, 1, 2, 0], sizes = [4, 4, 4, 32], strides = [1, 1, 1, 1]} : vector<6x6x6x32xf32> to vector<4x4x4x32xf32>
    %103 = vector.extract_strided_slice %2 {offsets = [1, 1, 2, 0], sizes = [1, 1, 1, 32], strides = [1, 1, 1, 1]} : vector<3x3x3x32xf32> to vector<1x1x1x32xf32>
    %104 = vector.shape_cast %103 : vector<1x1x1x32xf32> to vector<32xf32>
    %105 = vector.shape_cast %104 : vector<32xf32> to vector<1x1x1x32xf32>
    %106 = vector.broadcast %105 : vector<1x1x1x32xf32> to vector<4x4x4x32xf32>
    %107 = arith.mulf %102, %106 : vector<4x4x4x32xf32>
    %108 = arith.addf %101, %107 : vector<4x4x4x32xf32>
    %109 = vector.extract_strided_slice %1 {offsets = [1, 2, 0, 0], sizes = [4, 4, 4, 32], strides = [1, 1, 1, 1]} : vector<6x6x6x32xf32> to vector<4x4x4x32xf32>
    %110 = vector.extract_strided_slice %2 {offsets = [1, 2, 0, 0], sizes = [1, 1, 1, 32], strides = [1, 1, 1, 1]} : vector<3x3x3x32xf32> to vector<1x1x1x32xf32>
    %111 = vector.shape_cast %110 : vector<1x1x1x32xf32> to vector<32xf32>
    %112 = vector.shape_cast %111 : vector<32xf32> to vector<1x1x1x32xf32>
    %113 = vector.broadcast %112 : vector<1x1x1x32xf32> to vector<4x4x4x32xf32>
    %114 = arith.mulf %109, %113 : vector<4x4x4x32xf32>
    %115 = arith.addf %108, %114 : vector<4x4x4x32xf32>
    %116 = vector.extract_strided_slice %1 {offsets = [1, 2, 1, 0], sizes = [4, 4, 4, 32], strides = [1, 1, 1, 1]} : vector<6x6x6x32xf32> to vector<4x4x4x32xf32>
    %117 = vector.extract_strided_slice %2 {offsets = [1, 2, 1, 0], sizes = [1, 1, 1, 32], strides = [1, 1, 1, 1]} : vector<3x3x3x32xf32> to vector<1x1x1x32xf32>
    %118 = vector.shape_cast %117 : vector<1x1x1x32xf32> to vector<32xf32>
    %119 = vector.shape_cast %118 : vector<32xf32> to vector<1x1x1x32xf32>
    %120 = vector.broadcast %119 : vector<1x1x1x32xf32> to vector<4x4x4x32xf32>
    %121 = arith.mulf %116, %120 : vector<4x4x4x32xf32>
    %122 = arith.addf %115, %121 : vector<4x4x4x32xf32>
    %123 = vector.extract_strided_slice %1 {offsets = [1, 2, 2, 0], sizes = [4, 4, 4, 32], strides = [1, 1, 1, 1]} : vector<6x6x6x32xf32> to vector<4x4x4x32xf32>
    %124 = vector.extract_strided_slice %2 {offsets = [1, 2, 2, 0], sizes = [1, 1, 1, 32], strides = [1, 1, 1, 1]} : vector<3x3x3x32xf32> to vector<1x1x1x32xf32>
    %125 = vector.shape_cast %124 : vector<1x1x1x32xf32> to vector<32xf32>
    %126 = vector.shape_cast %125 : vector<32xf32> to vector<1x1x1x32xf32>
    %127 = vector.broadcast %126 : vector<1x1x1x32xf32> to vector<4x4x4x32xf32>
    %128 = arith.mulf %123, %127 : vector<4x4x4x32xf32>
    %129 = arith.addf %122, %128 : vector<4x4x4x32xf32>
    %130 = vector.extract_strided_slice %1 {offsets = [2, 0, 0, 0], sizes = [4, 4, 4, 32], strides = [1, 1, 1, 1]} : vector<6x6x6x32xf32> to vector<4x4x4x32xf32>
    %131 = vector.extract_strided_slice %2 {offsets = [2, 0, 0, 0], sizes = [1, 1, 1, 32], strides = [1, 1, 1, 1]} : vector<3x3x3x32xf32> to vector<1x1x1x32xf32>
    %132 = vector.shape_cast %131 : vector<1x1x1x32xf32> to vector<32xf32>
    %133 = vector.shape_cast %132 : vector<32xf32> to vector<1x1x1x32xf32>
    %134 = vector.broadcast %133 : vector<1x1x1x32xf32> to vector<4x4x4x32xf32>
    %135 = arith.mulf %130, %134 : vector<4x4x4x32xf32>
    %136 = arith.addf %129, %135 : vector<4x4x4x32xf32>
    %137 = vector.extract_strided_slice %1 {offsets = [2, 0, 1, 0], sizes = [4, 4, 4, 32], strides = [1, 1, 1, 1]} : vector<6x6x6x32xf32> to vector<4x4x4x32xf32>
    %138 = vector.extract_strided_slice %2 {offsets = [2, 0, 1, 0], sizes = [1, 1, 1, 32], strides = [1, 1, 1, 1]} : vector<3x3x3x32xf32> to vector<1x1x1x32xf32>
    %139 = vector.shape_cast %138 : vector<1x1x1x32xf32> to vector<32xf32>
    %140 = vector.shape_cast %139 : vector<32xf32> to vector<1x1x1x32xf32>
    %141 = vector.broadcast %140 : vector<1x1x1x32xf32> to vector<4x4x4x32xf32>
    %142 = arith.mulf %137, %141 : vector<4x4x4x32xf32>
    %143 = arith.addf %136, %142 : vector<4x4x4x32xf32>
    %144 = vector.extract_strided_slice %1 {offsets = [2, 0, 2, 0], sizes = [4, 4, 4, 32], strides = [1, 1, 1, 1]} : vector<6x6x6x32xf32> to vector<4x4x4x32xf32>
    %145 = vector.extract_strided_slice %2 {offsets = [2, 0, 2, 0], sizes = [1, 1, 1, 32], strides = [1, 1, 1, 1]} : vector<3x3x3x32xf32> to vector<1x1x1x32xf32>
    %146 = vector.shape_cast %145 : vector<1x1x1x32xf32> to vector<32xf32>
    %147 = vector.shape_cast %146 : vector<32xf32> to vector<1x1x1x32xf32>
    %148 = vector.broadcast %147 : vector<1x1x1x32xf32> to vector<4x4x4x32xf32>
    %149 = arith.mulf %144, %148 : vector<4x4x4x32xf32>
    %150 = arith.addf %143, %149 : vector<4x4x4x32xf32>
    %151 = vector.extract_strided_slice %1 {offsets = [2, 1, 0, 0], sizes = [4, 4, 4, 32], strides = [1, 1, 1, 1]} : vector<6x6x6x32xf32> to vector<4x4x4x32xf32>
    %152 = vector.extract_strided_slice %2 {offsets = [2, 1, 0, 0], sizes = [1, 1, 1, 32], strides = [1, 1, 1, 1]} : vector<3x3x3x32xf32> to vector<1x1x1x32xf32>
    %153 = vector.shape_cast %152 : vector<1x1x1x32xf32> to vector<32xf32>
    %154 = vector.shape_cast %153 : vector<32xf32> to vector<1x1x1x32xf32>
    %155 = vector.broadcast %154 : vector<1x1x1x32xf32> to vector<4x4x4x32xf32>
    %156 = arith.mulf %151, %155 : vector<4x4x4x32xf32>
    %157 = arith.addf %150, %156 : vector<4x4x4x32xf32>
    %158 = vector.extract_strided_slice %1 {offsets = [2, 1, 1, 0], sizes = [4, 4, 4, 32], strides = [1, 1, 1, 1]} : vector<6x6x6x32xf32> to vector<4x4x4x32xf32>
    %159 = vector.extract_strided_slice %2 {offsets = [2, 1, 1, 0], sizes = [1, 1, 1, 32], strides = [1, 1, 1, 1]} : vector<3x3x3x32xf32> to vector<1x1x1x32xf32>
    %160 = vector.shape_cast %159 : vector<1x1x1x32xf32> to vector<32xf32>
    %161 = vector.shape_cast %160 : vector<32xf32> to vector<1x1x1x32xf32>
    %162 = vector.broadcast %161 : vector<1x1x1x32xf32> to vector<4x4x4x32xf32>
    %163 = arith.mulf %158, %162 : vector<4x4x4x32xf32>
    %164 = arith.addf %157, %163 : vector<4x4x4x32xf32>
    %165 = vector.extract_strided_slice %1 {offsets = [2, 1, 2, 0], sizes = [4, 4, 4, 32], strides = [1, 1, 1, 1]} : vector<6x6x6x32xf32> to vector<4x4x4x32xf32>
    %166 = vector.extract_strided_slice %2 {offsets = [2, 1, 2, 0], sizes = [1, 1, 1, 32], strides = [1, 1, 1, 1]} : vector<3x3x3x32xf32> to vector<1x1x1x32xf32>
    %167 = vector.shape_cast %166 : vector<1x1x1x32xf32> to vector<32xf32>
    %168 = vector.shape_cast %167 : vector<32xf32> to vector<1x1x1x32xf32>
    %169 = vector.broadcast %168 : vector<1x1x1x32xf32> to vector<4x4x4x32xf32>
    %170 = arith.mulf %165, %169 : vector<4x4x4x32xf32>
    %171 = arith.addf %164, %170 : vector<4x4x4x32xf32>
    %172 = vector.extract_strided_slice %1 {offsets = [2, 2, 0, 0], sizes = [4, 4, 4, 32], strides = [1, 1, 1, 1]} : vector<6x6x6x32xf32> to vector<4x4x4x32xf32>
    %173 = vector.extract_strided_slice %2 {offsets = [2, 2, 0, 0], sizes = [1, 1, 1, 32], strides = [1, 1, 1, 1]} : vector<3x3x3x32xf32> to vector<1x1x1x32xf32>
    %174 = vector.shape_cast %173 : vector<1x1x1x32xf32> to vector<32xf32>
    %175 = vector.shape_cast %174 : vector<32xf32> to vector<1x1x1x32xf32>
    %176 = vector.broadcast %175 : vector<1x1x1x32xf32> to vector<4x4x4x32xf32>
    %177 = arith.mulf %172, %176 : vector<4x4x4x32xf32>
    %178 = arith.addf %171, %177 : vector<4x4x4x32xf32>
    %179 = vector.extract_strided_slice %1 {offsets = [2, 2, 1, 0], sizes = [4, 4, 4, 32], strides = [1, 1, 1, 1]} : vector<6x6x6x32xf32> to vector<4x4x4x32xf32>
    %180 = vector.extract_strided_slice %2 {offsets = [2, 2, 1, 0], sizes = [1, 1, 1, 32], strides = [1, 1, 1, 1]} : vector<3x3x3x32xf32> to vector<1x1x1x32xf32>
    %181 = vector.shape_cast %180 : vector<1x1x1x32xf32> to vector<32xf32>
    %182 = vector.shape_cast %181 : vector<32xf32> to vector<1x1x1x32xf32>
    %183 = vector.broadcast %182 : vector<1x1x1x32xf32> to vector<4x4x4x32xf32>
    %184 = arith.mulf %179, %183 : vector<4x4x4x32xf32>
    %185 = arith.addf %178, %184 : vector<4x4x4x32xf32>
    %186 = vector.extract_strided_slice %1 {offsets = [2, 2, 2, 0], sizes = [4, 4, 4, 32], strides = [1, 1, 1, 1]} : vector<6x6x6x32xf32> to vector<4x4x4x32xf32>
    %187 = vector.extract_strided_slice %2 {offsets = [2, 2, 2, 0], sizes = [1, 1, 1, 32], strides = [1, 1, 1, 1]} : vector<3x3x3x32xf32> to vector<1x1x1x32xf32>
    %188 = vector.shape_cast %187 : vector<1x1x1x32xf32> to vector<32xf32>
    %189 = vector.shape_cast %188 : vector<32xf32> to vector<1x1x1x32xf32>
    %190 = vector.broadcast %189 : vector<1x1x1x32xf32> to vector<4x4x4x32xf32>
    %191 = arith.mulf %186, %190 : vector<4x4x4x32xf32>
    %192 = arith.addf %185, %191 : vector<4x4x4x32xf32>
    %c0_8 = arith.constant 0 : index
    %c0_9 = arith.constant 0 : index
    %c0_10 = arith.constant 0 : index
    %c0_11 = arith.constant 0 : index
    %c0_12 = arith.constant 0 : index
    %193 = vector.load %arg3[%c0_8, %c0_9, %c0_10, %c0_11, %c0_12] : memref<1x4x4x4x32xf32, #tpu.memory_space<vmem>>, vector<1x4x4x4x32xf32>
    %194 = vector.shape_cast %193 : vector<1x4x4x4x32xf32> to vector<4x4x4x32xf32>
    %195 = vector.shape_cast %192 : vector<4x4x4x32xf32> to vector<1x4x4x4x32xf32>
    tpu.vector_store %arg3[%c0_8, %c0_9, %c0_10, %c0_11, %c0_12], %195 {strides = array<i32>} : memref<1x4x4x4x32xf32, #tpu.memory_space<vmem>>, vector<1x4x4x4x32xf32>,
    return
  }
  func.func @transform_0(%arg0: i32) -> (i32, i32, i32, i32, i32) {
    %c0_i32 = arith.constant 0 : i32
    %c0_i32_0 = arith.constant 0 : i32
    %c0_i32_1 = arith.constant 0 : i32
    %c0_i32_2 = arith.constant 0 : i32
    %c0_i32_3 = arith.constant 0 : i32
    return %arg0, %c0_i32, %c0_i32_0, %c0_i32_1, %c0_i32_2 : i32, i32, i32, i32, i32
  }
  func.func @transform_1(%arg0: i32) -> (i32, i32, i32, i32) {
    %c0_i32 = arith.constant 0 : i32
    %c0_i32_0 = arith.constant 0 : i32
    %c0_i32_1 = arith.constant 0 : i32
    %c0_i32_2 = arith.constant 0 : i32
    %c0_i32_3 = arith.constant 0 : i32
    return %c0_i32, %c0_i32_0, %c0_i32_1, %c0_i32_2 : i32, i32, i32, i32
  }
  func.func @transform_2(%arg0: i32) -> (i32, i32, i32, i32, i32) {
    %c0_i32 = arith.constant 0 : i32
    %c0_i32_0 = arith.constant 0 : i32
    %c0_i32_1 = arith.constant 0 : i32
    %c0_i32_2 = arith.constant 0 : i32
    %c0_i32_3 = arith.constant 0 : i32
    return %arg0, %c0_i32, %c0_i32_0, %c0_i32_1, %c0_i32_2 : i32, i32, i32, i32, i32
  }
}

module attributes {stable_mosaic.version = 11 : i64} {
  func.func @_ln_mlp_kernel(%arg0: i32, %arg1: memref<128x32xf32, #tpu.memory_space<vmem>>, %arg2: memref<1x32xf32, #tpu.memory_space<vmem>>, %arg3: memref<1x32xf32, #tpu.memory_space<vmem>>, %arg4: memref<32x128xf32, #tpu.memory_space<vmem>>, %arg5: memref<1x128xf32, #tpu.memory_space<vmem>>, %arg6: memref<128x32xf32, #tpu.memory_space<vmem>>, %arg7: memref<1x32xf32, #tpu.memory_space<vmem>>, %arg8: memref<128x32xf32, #tpu.memory_space<vmem>>) attributes {dimension_semantics = [#tpu.dimension_semantics<parallel>], iteration_bounds = array<i64: 1>, scalar_prefetch = 0 : i64, scratch_operands = 0 : i64, tpu.core_type = #tpu.core_type<tc>, window_params = [{transform_indices = @transform_0, window_bounds = array<i64: 128, 32>}, {pipeline_mode = #tpu.pipeline_mode<synchronous>, transform_indices = @transform_1, window_bounds = array<i64: 1, 32>}, {pipeline_mode = #tpu.pipeline_mode<synchronous>, transform_indices = @transform_2, window_bounds = array<i64: 1, 32>}, {pipeline_mode = #tpu.pipeline_mode<synchronous>, transform_indices = @transform_3, window_bounds = array<i64: 32, 128>}, {pipeline_mode = #tpu.pipeline_mode<synchronous>, transform_indices = @transform_4, window_bounds = array<i64: 1, 128>}, {pipeline_mode = #tpu.pipeline_mode<synchronous>, transform_indices = @transform_5, window_bounds = array<i64: 128, 32>}, {pipeline_mode = #tpu.pipeline_mode<synchronous>, transform_indices = @transform_6, window_bounds = array<i64: 1, 32>}, {transform_indices = @transform_7, window_bounds = array<i64: 128, 32>}]} {
    %c0 = arith.constant 0 : index
    %c0_0 = arith.constant 0 : index
    %0 = vector.load %arg1[%c0, %c0_0] : memref<128x32xf32, #tpu.memory_space<vmem>>, vector<128x32xf32>
    %cst = arith.constant dense<0.000000e+00> : vector<128xf32>
    %1 = vector.multi_reduction <add>, %0, %cst [1] : vector<128x32xf32> to vector<128xf32>
    %2 = vector.shape_cast %1 : vector<128xf32> to vector<128x1xf32>
    %cst_1 = arith.constant 3.200000e+01 : f32
    %3 = vector.broadcast %cst_1 : f32 to vector<128x1xf32>
    %4 = arith.divf %2, %3 : vector<128x1xf32>
    %5 = vector.broadcast %4 : vector<128x1xf32> to vector<128x32xf32>
    %6 = arith.subf %0, %5 : vector<128x32xf32>
    %7 = arith.mulf %6, %6 : vector<128x32xf32>
    %cst_2 = arith.constant dense<0.000000e+00> : vector<128xf32>
    %8 = vector.multi_reduction <add>, %7, %cst_2 [1] : vector<128x32xf32> to vector<128xf32>
    %9 = vector.shape_cast %8 : vector<128xf32> to vector<128x1xf32>
    %cst_3 = arith.constant 3.200000e+01 : f32
    %10 = vector.broadcast %cst_3 : f32 to vector<128x1xf32>
    %11 = arith.divf %9, %10 : vector<128x1xf32>
    %12 = vector.broadcast %4 : vector<128x1xf32> to vector<128x32xf32>
    %13 = arith.subf %0, %12 : vector<128x32xf32>
    %cst_4 = arith.constant 9.99999974E-6 : f32
    %14 = vector.broadcast %cst_4 : f32 to vector<128x1xf32>
    %15 = arith.addf %11, %14 : vector<128x1xf32>
    %16 = math.rsqrt %15 : vector<128x1xf32>
    %17 = vector.broadcast %16 : vector<128x1xf32> to vector<128x32xf32>
    %18 = arith.mulf %13, %17 : vector<128x32xf32>
    %c0_5 = arith.constant 0 : index
    %c0_6 = arith.constant 0 : index
    %19 = vector.load %arg2[%c0_5, %c0_6] : memref<1x32xf32, #tpu.memory_space<vmem>>, vector<1x32xf32>
    %20 = vector.broadcast %19 : vector<1x32xf32> to vector<128x32xf32>
    %21 = arith.mulf %18, %20 : vector<128x32xf32>
    %c0_7 = arith.constant 0 : index
    %c0_8 = arith.constant 0 : index
    %22 = vector.load %arg3[%c0_7, %c0_8] : memref<1x32xf32, #tpu.memory_space<vmem>>, vector<1x32xf32>
    %23 = vector.broadcast %22 : vector<1x32xf32> to vector<128x32xf32>
    %24 = arith.addf %21, %23 : vector<128x32xf32>
    %c0_9 = arith.constant 0 : index
    %c0_10 = arith.constant 0 : index
    %25 = vector.load %arg4[%c0_9, %c0_10] : memref<32x128xf32, #tpu.memory_space<vmem>>, vector<32x128xf32>
    %cst_11 = arith.constant dense<0.000000e+00> : vector<128x128xf32>
    %26 = tpu.matmul %24, %25, %cst_11 {dimension_numbers = #tpu.dot_dimension_numbers<[1], [0], [0], [1], [0, 0, 1, 1], [], []>} : vector<128x32xf32>, vector<32x128xf32>, vector<128x128xf32> -> vector<128x128xf32>
    %c0_12 = arith.constant 0 : index
    %c0_13 = arith.constant 0 : index
    %27 = vector.load %arg5[%c0_12, %c0_13] : memref<1x128xf32, #tpu.memory_space<vmem>>, vector<1x128xf32>
    %28 = vector.broadcast %27 : vector<1x128xf32> to vector<128x128xf32>
    %29 = arith.addf %26, %28 : vector<128x128xf32>
    %cst_14 = arith.constant 5.000000e-01 : f32
    %30 = vector.broadcast %cst_14 : f32 to vector<128x128xf32>
    %31 = arith.mulf %30, %29 : vector<128x128xf32>
    %cst_15 = arith.constant 0.707106769 : f32
    %32 = vector.broadcast %cst_15 : f32 to vector<128x128xf32>
    %33 = arith.mulf %29, %32 : vector<128x128xf32>
    %34 = math.erf %33 : vector<128x128xf32>
    %cst_16 = arith.constant 1.000000e+00 : f32
    %35 = vector.broadcast %cst_16 : f32 to vector<128x128xf32>
    %36 = arith.addf %35, %34 : vector<128x128xf32>
    %37 = arith.mulf %31, %36 : vector<128x128xf32>
    %c0_17 = arith.constant 0 : index
    %c0_18 = arith.constant 0 : index
    %38 = vector.load %arg6[%c0_17, %c0_18] : memref<128x32xf32, #tpu.memory_space<vmem>>, vector<128x32xf32>
    %cst_19 = arith.constant dense<0.000000e+00> : vector<128x32xf32>
    %39 = tpu.matmul %37, %38, %cst_19 {dimension_numbers = #tpu.dot_dimension_numbers<[1], [0], [0], [1], [0, 0, 1, 1], [], []>} : vector<128x128xf32>, vector<128x32xf32>, vector<128x32xf32> -> vector<128x32xf32>
    %c0_20 = arith.constant 0 : index
    %c0_21 = arith.constant 0 : index
    %40 = vector.load %arg7[%c0_20, %c0_21] : memref<1x32xf32, #tpu.memory_space<vmem>>, vector<1x32xf32>
    %41 = vector.broadcast %40 : vector<1x32xf32> to vector<128x32xf32>
    %42 = arith.addf %39, %41 : vector<128x32xf32>
    %43 = arith.addf %0, %42 : vector<128x32xf32>
    %c0_22 = arith.constant 0 : index
    %c0_23 = arith.constant 0 : index
    %44 = vector.load %arg8[%c0_22, %c0_23] : memref<128x32xf32, #tpu.memory_space<vmem>>, vector<128x32xf32>
    tpu.vector_store %arg8[%c0_22, %c0_23], %43 {strides = array<i32>} : memref<128x32xf32, #tpu.memory_space<vmem>>, vector<128x32xf32>,
    return
  }
  func.func @transform_0(%arg0: i32) -> (i32, i32) {
    %c0_i32 = arith.constant 0 : i32
    %c0_i32_0 = arith.constant 0 : i32
    return %arg0, %c0_i32 : i32, i32
  }
  func.func @transform_1(%arg0: i32) -> (i32, i32) {
    %c0_i32 = arith.constant 0 : i32
    %c0_i32_0 = arith.constant 0 : i32
    %c0_i32_1 = arith.constant 0 : i32
    return %c0_i32, %c0_i32_0 : i32, i32
  }
  func.func @transform_2(%arg0: i32) -> (i32, i32) {
    %c0_i32 = arith.constant 0 : i32
    %c0_i32_0 = arith.constant 0 : i32
    %c0_i32_1 = arith.constant 0 : i32
    return %c0_i32, %c0_i32_0 : i32, i32
  }
  func.func @transform_3(%arg0: i32) -> (i32, i32) {
    %c0_i32 = arith.constant 0 : i32
    %c0_i32_0 = arith.constant 0 : i32
    %c0_i32_1 = arith.constant 0 : i32
    return %c0_i32, %c0_i32_0 : i32, i32
  }
  func.func @transform_4(%arg0: i32) -> (i32, i32) {
    %c0_i32 = arith.constant 0 : i32
    %c0_i32_0 = arith.constant 0 : i32
    %c0_i32_1 = arith.constant 0 : i32
    return %c0_i32, %c0_i32_0 : i32, i32
  }
  func.func @transform_5(%arg0: i32) -> (i32, i32) {
    %c0_i32 = arith.constant 0 : i32
    %c0_i32_0 = arith.constant 0 : i32
    %c0_i32_1 = arith.constant 0 : i32
    return %c0_i32, %c0_i32_0 : i32, i32
  }
  func.func @transform_6(%arg0: i32) -> (i32, i32) {
    %c0_i32 = arith.constant 0 : i32
    %c0_i32_0 = arith.constant 0 : i32
    %c0_i32_1 = arith.constant 0 : i32
    return %c0_i32, %c0_i32_0 : i32, i32
  }
  func.func @transform_7(%arg0: i32) -> (i32, i32) {
    %c0_i32 = arith.constant 0 : i32
    %c0_i32_0 = arith.constant 0 : i32
    return %arg0, %c0_i32 : i32, i32
  }
}

module attributes {stable_mosaic.version = 11 : i64} {
  func.func @_attn_kernel(%arg0: i32, %arg1: i32, %arg2: memref<1x64x32xf32, #tpu.memory_space<vmem>>, %arg3: memref<1x32x32xf32, #tpu.memory_space<vmem>>, %arg4: memref<1x32x32xf32, #tpu.memory_space<vmem>>, %arg5: memref<32x32xf32, #tpu.memory_space<vmem>>, %arg6: memref<1x32xf32, #tpu.memory_space<vmem>>, %arg7: memref<32x32xf32, #tpu.memory_space<vmem>>, %arg8: memref<1x32xf32, #tpu.memory_space<vmem>>, %arg9: memref<1x64x32xf32, #tpu.memory_space<vmem>>, %arg10: memref<1x64x32xf32, #tpu.memory_space<vmem>>, %arg11: memref<64x32xf32, #tpu.memory_space<vmem>>, %arg12: memref<64x4xf32, #tpu.memory_space<vmem>>, %arg13: memref<64x4xf32, #tpu.memory_space<vmem>>, %arg14: memref<64x32xf32, #tpu.memory_space<vmem>>) attributes {dimension_semantics = [#tpu.dimension_semantics<parallel>, #tpu.dimension_semantics<arbitrary>], iteration_bounds = array<i64: 2, 2>, scalar_prefetch = 0 : i64, scratch_operands = 4 : i64, tpu.core_type = #tpu.core_type<tc>, window_params = [{transform_indices = @transform_0, window_bounds = array<i64: 1, 64, 32>}, {transform_indices = @transform_1, window_bounds = array<i64: 1, 32, 32>}, {transform_indices = @transform_2, window_bounds = array<i64: 1, 32, 32>}, {pipeline_mode = #tpu.pipeline_mode<synchronous>, transform_indices = @transform_3, window_bounds = array<i64: 32, 32>}, {pipeline_mode = #tpu.pipeline_mode<synchronous>, transform_indices = @transform_4, window_bounds = array<i64: 1, 32>}, {pipeline_mode = #tpu.pipeline_mode<synchronous>, transform_indices = @transform_5, window_bounds = array<i64: 32, 32>}, {pipeline_mode = #tpu.pipeline_mode<synchronous>, transform_indices = @transform_6, window_bounds = array<i64: 1, 32>}, {transform_indices = @transform_7, window_bounds = array<i64: 1, 64, 32>}, {transform_indices = @transform_8, window_bounds = array<i64: 1, 64, 32>}]} {
    %c0_i32 = arith.constant 0 : i32
    %0 = arith.cmpi eq, %arg1, %c0_i32 : i32
    %1 = arith.extui %0 : i1 to i32
    %c0_i32_0 = arith.constant 0 : i32
    %2 = arith.cmpi ne, %1, %c0_i32_0 : i32
    scf.if %2 {
      %c0_70 = arith.constant 0 : index
      %c0_71 = arith.constant 0 : index
      %c0_72 = arith.constant 0 : index
      %127 = vector.load %arg2[%c0_70, %c0_71, %c0_72] : memref<1x64x32xf32, #tpu.memory_space<vmem>>, vector<1x64x32xf32>
      %128 = vector.shape_cast %127 : vector<1x64x32xf32> to vector<64x32xf32>
      %c0_73 = arith.constant 0 : index
      %c0_74 = arith.constant 0 : index
      %129 = vector.load %arg5[%c0_73, %c0_74] : memref<32x32xf32, #tpu.memory_space<vmem>>, vector<32x32xf32>
      %cst_75 = arith.constant dense<0.000000e+00> : vector<64x32xf32>
      %130 = tpu.matmul %128, %129, %cst_75 {dimension_numbers = #tpu.dot_dimension_numbers<[1], [0], [0], [1], [0, 0, 1, 1], [], []>} : vector<64x32xf32>, vector<32x32xf32>, vector<64x32xf32> -> vector<64x32xf32>
      %c0_76 = arith.constant 0 : index
      %c0_77 = arith.constant 0 : index
      %131 = vector.load %arg6[%c0_76, %c0_77] : memref<1x32xf32, #tpu.memory_space<vmem>>, vector<1x32xf32>
      %132 = vector.broadcast %131 : vector<1x32xf32> to vector<64x32xf32>
      %133 = arith.addf %130, %132 : vector<64x32xf32>
      %c0_78 = arith.constant 0 : index
      %c0_79 = arith.constant 0 : index
      %134 = vector.load %arg11[%c0_78, %c0_79] : memref<64x32xf32, #tpu.memory_space<vmem>>, vector<64x32xf32>
      tpu.vector_store %arg11[%c0_78, %c0_79], %133 {strides = array<i32>} : memref<64x32xf32, #tpu.memory_space<vmem>>, vector<64x32xf32>,
      %cst_80 = arith.constant 0xFF800000 : f32
      %135 = vector.broadcast %cst_80 : f32 to vector<64x4xf32>
      %c0_81 = arith.constant 0 : index
      %c0_82 = arith.constant 0 : index
      %136 = vector.load %arg12[%c0_81, %c0_82] : memref<64x4xf32, #tpu.memory_space<vmem>>, vector<64x4xf32>
      tpu.vector_store %arg12[%c0_81, %c0_82], %135 {strides = array<i32>} : memref<64x4xf32, #tpu.memory_space<vmem>>, vector<64x4xf32>,
      %cst_83 = arith.constant 0.000000e+00 : f32
      %137 = vector.broadcast %cst_83 : f32 to vector<64x4xf32>
      %c0_84 = arith.constant 0 : index
      %c0_85 = arith.constant 0 : index
      %138 = vector.load %arg13[%c0_84, %c0_85] : memref<64x4xf32, #tpu.memory_space<vmem>>, vector<64x4xf32>
      tpu.vector_store %arg13[%c0_84, %c0_85], %137 {strides = array<i32>} : memref<64x4xf32, #tpu.memory_space<vmem>>, vector<64x4xf32>,
      %cst_86 = arith.constant 0.000000e+00 : f32
      %139 = vector.broadcast %cst_86 : f32 to vector<64x32xf32>
      %c0_87 = arith.constant 0 : index
      %c0_88 = arith.constant 0 : index
      %140 = vector.load %arg14[%c0_87, %c0_88] : memref<64x32xf32, #tpu.memory_space<vmem>>, vector<64x32xf32>
      tpu.vector_store %arg14[%c0_87, %c0_88], %139 {strides = array<i32>} : memref<64x32xf32, #tpu.memory_space<vmem>>, vector<64x32xf32>,
    } else {
    }
    %c0 = arith.constant 0 : index
    %c0_1 = arith.constant 0 : index
    %c0_2 = arith.constant 0 : index
    %3 = vector.load %arg3[%c0, %c0_1, %c0_2] : memref<1x32x32xf32, #tpu.memory_space<vmem>>, vector<1x32x32xf32>
    %4 = vector.shape_cast %3 : vector<1x32x32xf32> to vector<32x32xf32>
    %c0_3 = arith.constant 0 : index
    %c0_4 = arith.constant 0 : index
    %c0_5 = arith.constant 0 : index
    %5 = vector.load %arg4[%c0_3, %c0_4, %c0_5] : memref<1x32x32xf32, #tpu.memory_space<vmem>>, vector<1x32x32xf32>
    %6 = vector.shape_cast %5 : vector<1x32x32xf32> to vector<32x32xf32>
    %c0_6 = arith.constant 0 : index
    %c0_7 = arith.constant 0 : index
    %7 = vector.load %arg11[%c0_6, %c0_7] : memref<64x32xf32, #tpu.memory_space<vmem>>, vector<64x32xf32>
    %8 = vector.extract_strided_slice %7 {offsets = [0, 0], sizes = [64, 8], strides = [1, 1]} : vector<64x32xf32> to vector<64x8xf32>
    %9 = vector.extract_strided_slice %4 {offsets = [0, 0], sizes = [32, 8], strides = [1, 1]} : vector<32x32xf32> to vector<32x8xf32>
    %10 = vector.extract_strided_slice %6 {offsets = [0, 0], sizes = [32, 8], strides = [1, 1]} : vector<32x32xf32> to vector<32x8xf32>
    %11 = tpu.transpose %9, [1, 0] : vector<32x8xf32> -> vector<8x32xf32>
    %cst = arith.constant dense<0.000000e+00> : vector<64x32xf32>
    %12 = tpu.matmul %8, %11, %cst {dimension_numbers = #tpu.dot_dimension_numbers<[1], [0], [0], [1], [0, 0, 1, 1], [], []>} : vector<64x8xf32>, vector<8x32xf32>, vector<64x32xf32> -> vector<64x32xf32>
    %cst_8 = arith.constant 0.353553385 : f32
    %13 = vector.broadcast %cst_8 : f32 to vector<64x32xf32>
    %14 = arith.mulf %12, %13 : vector<64x32xf32>
    %c0_9 = arith.constant 0 : index
    %c0_10 = arith.constant 0 : index
    %15 = vector.load %arg12[%c0_9, %c0_10] : memref<64x4xf32, #tpu.memory_space<vmem>>, vector<64x1xf32>
    %cst_11 = arith.constant dense<0xFF800000> : vector<64xf32>
    %16 = vector.multi_reduction <maximumf>, %14, %cst_11 [1] : vector<64x32xf32> to vector<64xf32>
    %17 = vector.shape_cast %16 : vector<64xf32> to vector<64x1xf32>
    %18 = arith.maximumf %15, %17 : vector<64x1xf32>
    %19 = arith.subf %15, %18 : vector<64x1xf32>
    %20 = math.exp %19 : vector<64x1xf32>
    %21 = vector.broadcast %18 : vector<64x1xf32> to vector<64x32xf32>
    %22 = arith.subf %14, %21 : vector<64x32xf32>
    %23 = math.exp %22 : vector<64x32xf32>
    %c0_12 = arith.constant 0 : index
    %c0_13 = arith.constant 0 : index
    %24 = vector.load %arg13[%c0_12, %c0_13] : memref<64x4xf32, #tpu.memory_space<vmem>>, vector<64x1xf32>
    %25 = arith.mulf %20, %24 : vector<64x1xf32>
    %cst_14 = arith.constant dense<0.000000e+00> : vector<64xf32>
    %26 = vector.multi_reduction <add>, %23, %cst_14 [1] : vector<64x32xf32> to vector<64xf32>
    %27 = vector.shape_cast %26 : vector<64xf32> to vector<64x1xf32>
    %28 = arith.addf %25, %27 : vector<64x1xf32>
    %c0_15 = arith.constant 0 : index
    %c0_16 = arith.constant 0 : index
    %29 = vector.load %arg13[%c0_15, %c0_16] : memref<64x4xf32, #tpu.memory_space<vmem>>, vector<64x1xf32>
    tpu.vector_store %arg13[%c0_15, %c0_16], %28 {strides = array<i32>} : memref<64x4xf32, #tpu.memory_space<vmem>>, vector<64x1xf32>,
    %c0_17 = arith.constant 0 : index
    %c0_18 = arith.constant 0 : index
    %30 = vector.load %arg14[%c0_17, %c0_18] : memref<64x32xf32, #tpu.memory_space<vmem>>, vector<64x8xf32>
    %31 = vector.broadcast %20 : vector<64x1xf32> to vector<64x8xf32>
    %32 = arith.mulf %31, %30 : vector<64x8xf32>
    %cst_19 = arith.constant dense<0.000000e+00> : vector<64x8xf32>
    %33 = tpu.matmul %23, %10, %cst_19 {dimension_numbers = #tpu.dot_dimension_numbers<[1], [0], [0], [1], [0, 0, 1, 1], [], []>} : vector<64x32xf32>, vector<32x8xf32>, vector<64x8xf32> -> vector<64x8xf32>
    %34 = arith.addf %32, %33 : vector<64x8xf32>
    %c0_20 = arith.constant 0 : index
    %c0_21 = arith.constant 0 : index
    %35 = vector.load %arg14[%c0_20, %c0_21] : memref<64x32xf32, #tpu.memory_space<vmem>>, vector<64x8xf32>
    tpu.vector_store %arg14[%c0_20, %c0_21], %34 {strides = array<i32>} : memref<64x32xf32, #tpu.memory_space<vmem>>, vector<64x8xf32>,
    %c0_22 = arith.constant 0 : index
    %c0_23 = arith.constant 0 : index
    %36 = vector.load %arg12[%c0_22, %c0_23] : memref<64x4xf32, #tpu.memory_space<vmem>>, vector<64x1xf32>
    tpu.vector_store %arg12[%c0_22, %c0_23], %18 {strides = array<i32>} : memref<64x4xf32, #tpu.memory_space<vmem>>, vector<64x1xf32>,
    %37 = vector.extract_strided_slice %7 {offsets = [0, 8], sizes = [64, 8], strides = [1, 1]} : vector<64x32xf32> to vector<64x8xf32>
    %38 = vector.extract_strided_slice %4 {offsets = [0, 8], sizes = [32, 8], strides = [1, 1]} : vector<32x32xf32> to vector<32x8xf32>
    %39 = vector.extract_strided_slice %6 {offsets = [0, 8], sizes = [32, 8], strides = [1, 1]} : vector<32x32xf32> to vector<32x8xf32>
    %40 = tpu.transpose %38, [1, 0] : vector<32x8xf32> -> vector<8x32xf32>
    %cst_24 = arith.constant dense<0.000000e+00> : vector<64x32xf32>
    %41 = tpu.matmul %37, %40, %cst_24 {dimension_numbers = #tpu.dot_dimension_numbers<[1], [0], [0], [1], [0, 0, 1, 1], [], []>} : vector<64x8xf32>, vector<8x32xf32>, vector<64x32xf32> -> vector<64x32xf32>
    %cst_25 = arith.constant 0.353553385 : f32
    %42 = vector.broadcast %cst_25 : f32 to vector<64x32xf32>
    %43 = arith.mulf %41, %42 : vector<64x32xf32>
    %c0_26 = arith.constant 0 : index
    %c1 = arith.constant 1 : index
    %44 = vector.load %arg12[%c0_26, %c1] : memref<64x4xf32, #tpu.memory_space<vmem>>, vector<64x1xf32>
    %cst_27 = arith.constant dense<0xFF800000> : vector<64xf32>
    %45 = vector.multi_reduction <maximumf>, %43, %cst_27 [1] : vector<64x32xf32> to vector<64xf32>
    %46 = vector.shape_cast %45 : vector<64xf32> to vector<64x1xf32>
    %47 = arith.maximumf %44, %46 : vector<64x1xf32>
    %48 = arith.subf %44, %47 : vector<64x1xf32>
    %49 = math.exp %48 : vector<64x1xf32>
    %50 = vector.broadcast %47 : vector<64x1xf32> to vector<64x32xf32>
    %51 = arith.subf %43, %50 : vector<64x32xf32>
    %52 = math.exp %51 : vector<64x32xf32>
    %c0_28 = arith.constant 0 : index
    %c1_29 = arith.constant 1 : index
    %53 = vector.load %arg13[%c0_28, %c1_29] : memref<64x4xf32, #tpu.memory_space<vmem>>, vector<64x1xf32>
    %54 = arith.mulf %49, %53 : vector<64x1xf32>
    %cst_30 = arith.constant dense<0.000000e+00> : vector<64xf32>
    %55 = vector.multi_reduction <add>, %52, %cst_30 [1] : vector<64x32xf32> to vector<64xf32>
    %56 = vector.shape_cast %55 : vector<64xf32> to vector<64x1xf32>
    %57 = arith.addf %54, %56 : vector<64x1xf32>
    %c0_31 = arith.constant 0 : index
    %c1_32 = arith.constant 1 : index
    %58 = vector.load %arg13[%c0_31, %c1_32] : memref<64x4xf32, #tpu.memory_space<vmem>>, vector<64x1xf32>
    tpu.vector_store %arg13[%c0_31, %c1_32], %57 {strides = array<i32>} : memref<64x4xf32, #tpu.memory_space<vmem>>, vector<64x1xf32>,
    %c0_33 = arith.constant 0 : index
    %c8 = arith.constant 8 : index
    %59 = vector.load %arg14[%c0_33, %c8] : memref<64x32xf32, #tpu.memory_space<vmem>>, vector<64x8xf32>
    %60 = vector.broadcast %49 : vector<64x1xf32> to vector<64x8xf32>
    %61 = arith.mulf %60, %59 : vector<64x8xf32>
    %cst_34 = arith.constant dense<0.000000e+00> : vector<64x8xf32>
    %62 = tpu.matmul %52, %39, %cst_34 {dimension_numbers = #tpu.dot_dimension_numbers<[1], [0], [0], [1], [0, 0, 1, 1], [], []>} : vector<64x32xf32>, vector<32x8xf32>, vector<64x8xf32> -> vector<64x8xf32>
    %63 = arith.addf %61, %62 : vector<64x8xf32>
    %c0_35 = arith.constant 0 : index
    %c8_36 = arith.constant 8 : index
    %64 = vector.load %arg14[%c0_35, %c8_36] : memref<64x32xf32, #tpu.memory_space<vmem>>, vector<64x8xf32>
    tpu.vector_store %arg14[%c0_35, %c8_36], %63 {strides = array<i32>} : memref<64x32xf32, #tpu.memory_space<vmem>>, vector<64x8xf32>,
    %c0_37 = arith.constant 0 : index
    %c1_38 = arith.constant 1 : index
    %65 = vector.load %arg12[%c0_37, %c1_38] : memref<64x4xf32, #tpu.memory_space<vmem>>, vector<64x1xf32>
    tpu.vector_store %arg12[%c0_37, %c1_38], %47 {strides = array<i32>} : memref<64x4xf32, #tpu.memory_space<vmem>>, vector<64x1xf32>,
    %66 = vector.extract_strided_slice %7 {offsets = [0, 16], sizes = [64, 8], strides = [1, 1]} : vector<64x32xf32> to vector<64x8xf32>
    %67 = vector.extract_strided_slice %4 {offsets = [0, 16], sizes = [32, 8], strides = [1, 1]} : vector<32x32xf32> to vector<32x8xf32>
    %68 = vector.extract_strided_slice %6 {offsets = [0, 16], sizes = [32, 8], strides = [1, 1]} : vector<32x32xf32> to vector<32x8xf32>
    %69 = tpu.transpose %67, [1, 0] : vector<32x8xf32> -> vector<8x32xf32>
    %cst_39 = arith.constant dense<0.000000e+00> : vector<64x32xf32>
    %70 = tpu.matmul %66, %69, %cst_39 {dimension_numbers = #tpu.dot_dimension_numbers<[1], [0], [0], [1], [0, 0, 1, 1], [], []>} : vector<64x8xf32>, vector<8x32xf32>, vector<64x32xf32> -> vector<64x32xf32>
    %cst_40 = arith.constant 0.353553385 : f32
    %71 = vector.broadcast %cst_40 : f32 to vector<64x32xf32>
    %72 = arith.mulf %70, %71 : vector<64x32xf32>
    %c0_41 = arith.constant 0 : index
    %c2 = arith.constant 2 : index
    %73 = vector.load %arg12[%c0_41, %c2] : memref<64x4xf32, #tpu.memory_space<vmem>>, vector<64x1xf32>
    %cst_42 = arith.constant dense<0xFF800000> : vector<64xf32>
    %74 = vector.multi_reduction <maximumf>, %72, %cst_42 [1] : vector<64x32xf32> to vector<64xf32>
    %75 = vector.shape_cast %74 : vector<64xf32> to vector<64x1xf32>
    %76 = arith.maximumf %73, %75 : vector<64x1xf32>
    %77 = arith.subf %73, %76 : vector<64x1xf32>
    %78 = math.exp %77 : vector<64x1xf32>
    %79 = vector.broadcast %76 : vector<64x1xf32> to vector<64x32xf32>
    %80 = arith.subf %72, %79 : vector<64x32xf32>
    %81 = math.exp %80 : vector<64x32xf32>
    %c0_43 = arith.constant 0 : index
    %c2_44 = arith.constant 2 : index
    %82 = vector.load %arg13[%c0_43, %c2_44] : memref<64x4xf32, #tpu.memory_space<vmem>>, vector<64x1xf32>
    %83 = arith.mulf %78, %82 : vector<64x1xf32>
    %cst_45 = arith.constant dense<0.000000e+00> : vector<64xf32>
    %84 = vector.multi_reduction <add>, %81, %cst_45 [1] : vector<64x32xf32> to vector<64xf32>
    %85 = vector.shape_cast %84 : vector<64xf32> to vector<64x1xf32>
    %86 = arith.addf %83, %85 : vector<64x1xf32>
    %c0_46 = arith.constant 0 : index
    %c2_47 = arith.constant 2 : index
    %87 = vector.load %arg13[%c0_46, %c2_47] : memref<64x4xf32, #tpu.memory_space<vmem>>, vector<64x1xf32>
    tpu.vector_store %arg13[%c0_46, %c2_47], %86 {strides = array<i32>} : memref<64x4xf32, #tpu.memory_space<vmem>>, vector<64x1xf32>,
    %c0_48 = arith.constant 0 : index
    %c16 = arith.constant 16 : index
    %88 = vector.load %arg14[%c0_48, %c16] : memref<64x32xf32, #tpu.memory_space<vmem>>, vector<64x8xf32>
    %89 = vector.broadcast %78 : vector<64x1xf32> to vector<64x8xf32>
    %90 = arith.mulf %89, %88 : vector<64x8xf32>
    %cst_49 = arith.constant dense<0.000000e+00> : vector<64x8xf32>
    %91 = tpu.matmul %81, %68, %cst_49 {dimension_numbers = #tpu.dot_dimension_numbers<[1], [0], [0], [1], [0, 0, 1, 1], [], []>} : vector<64x32xf32>, vector<32x8xf32>, vector<64x8xf32> -> vector<64x8xf32>
    %92 = arith.addf %90, %91 : vector<64x8xf32>
    %c0_50 = arith.constant 0 : index
    %c16_51 = arith.constant 16 : index
    %93 = vector.load %arg14[%c0_50, %c16_51] : memref<64x32xf32, #tpu.memory_space<vmem>>, vector<64x8xf32>
    tpu.vector_store %arg14[%c0_50, %c16_51], %92 {strides = array<i32>} : memref<64x32xf32, #tpu.memory_space<vmem>>, vector<64x8xf32>,
    %c0_52 = arith.constant 0 : index
    %c2_53 = arith.constant 2 : index
    %94 = vector.load %arg12[%c0_52, %c2_53] : memref<64x4xf32, #tpu.memory_space<vmem>>, vector<64x1xf32>
    tpu.vector_store %arg12[%c0_52, %c2_53], %76 {strides = array<i32>} : memref<64x4xf32, #tpu.memory_space<vmem>>, vector<64x1xf32>,
    %95 = vector.extract_strided_slice %7 {offsets = [0, 24], sizes = [64, 8], strides = [1, 1]} : vector<64x32xf32> to vector<64x8xf32>
    %96 = vector.extract_strided_slice %4 {offsets = [0, 24], sizes = [32, 8], strides = [1, 1]} : vector<32x32xf32> to vector<32x8xf32>
    %97 = vector.extract_strided_slice %6 {offsets = [0, 24], sizes = [32, 8], strides = [1, 1]} : vector<32x32xf32> to vector<32x8xf32>
    %98 = tpu.transpose %96, [1, 0] : vector<32x8xf32> -> vector<8x32xf32>
    %cst_54 = arith.constant dense<0.000000e+00> : vector<64x32xf32>
    %99 = tpu.matmul %95, %98, %cst_54 {dimension_numbers = #tpu.dot_dimension_numbers<[1], [0], [0], [1], [0, 0, 1, 1], [], []>} : vector<64x8xf32>, vector<8x32xf32>, vector<64x32xf32> -> vector<64x32xf32>
    %cst_55 = arith.constant 0.353553385 : f32
    %100 = vector.broadcast %cst_55 : f32 to vector<64x32xf32>
    %101 = arith.mulf %99, %100 : vector<64x32xf32>
    %c0_56 = arith.constant 0 : index
    %c3 = arith.constant 3 : index
    %102 = vector.load %arg12[%c0_56, %c3] : memref<64x4xf32, #tpu.memory_space<vmem>>, vector<64x1xf32>
    %cst_57 = arith.constant dense<0xFF800000> : vector<64xf32>
    %103 = vector.multi_reduction <maximumf>, %101, %cst_57 [1] : vector<64x32xf32> to vector<64xf32>
    %104 = vector.shape_cast %103 : vector<64xf32> to vector<64x1xf32>
    %105 = arith.maximumf %102, %104 : vector<64x1xf32>
    %106 = arith.subf %102, %105 : vector<64x1xf32>
    %107 = math.exp %106 : vector<64x1xf32>
    %108 = vector.broadcast %105 : vector<64x1xf32> to vector<64x32xf32>
    %109 = arith.subf %101, %108 : vector<64x32xf32>
    %110 = math.exp %109 : vector<64x32xf32>
    %c0_58 = arith.constant 0 : index
    %c3_59 = arith.constant 3 : index
    %111 = vector.load %arg13[%c0_58, %c3_59] : memref<64x4xf32, #tpu.memory_space<vmem>>, vector<64x1xf32>
    %112 = arith.mulf %107, %111 : vector<64x1xf32>
    %cst_60 = arith.constant dense<0.000000e+00> : vector<64xf32>
    %113 = vector.multi_reduction <add>, %110, %cst_60 [1] : vector<64x32xf32> to vector<64xf32>
    %114 = vector.shape_cast %113 : vector<64xf32> to vector<64x1xf32>
    %115 = arith.addf %112, %114 : vector<64x1xf32>
    %c0_61 = arith.constant 0 : index
    %c3_62 = arith.constant 3 : index
    %116 = vector.load %arg13[%c0_61, %c3_62] : memref<64x4xf32, #tpu.memory_space<vmem>>, vector<64x1xf32>
    tpu.vector_store %arg13[%c0_61, %c3_62], %115 {strides = array<i32>} : memref<64x4xf32, #tpu.memory_space<vmem>>, vector<64x1xf32>,
    %c0_63 = arith.constant 0 : index
    %c24 = arith.constant 24 : index
    %117 = vector.load %arg14[%c0_63, %c24] : memref<64x32xf32, #tpu.memory_space<vmem>>, vector<64x8xf32>
    %118 = vector.broadcast %107 : vector<64x1xf32> to vector<64x8xf32>
    %119 = arith.mulf %118, %117 : vector<64x8xf32>
    %cst_64 = arith.constant dense<0.000000e+00> : vector<64x8xf32>
    %120 = tpu.matmul %110, %97, %cst_64 {dimension_numbers = #tpu.dot_dimension_numbers<[1], [0], [0], [1], [0, 0, 1, 1], [], []>} : vector<64x32xf32>, vector<32x8xf32>, vector<64x8xf32> -> vector<64x8xf32>
    %121 = arith.addf %119, %120 : vector<64x8xf32>
    %c0_65 = arith.constant 0 : index
    %c24_66 = arith.constant 24 : index
    %122 = vector.load %arg14[%c0_65, %c24_66] : memref<64x32xf32, #tpu.memory_space<vmem>>, vector<64x8xf32>
    tpu.vector_store %arg14[%c0_65, %c24_66], %121 {strides = array<i32>} : memref<64x32xf32, #tpu.memory_space<vmem>>, vector<64x8xf32>,
    %c0_67 = arith.constant 0 : index
    %c3_68 = arith.constant 3 : index
    %123 = vector.load %arg12[%c0_67, %c3_68] : memref<64x4xf32, #tpu.memory_space<vmem>>, vector<64x1xf32>
    tpu.vector_store %arg12[%c0_67, %c3_68], %105 {strides = array<i32>} : memref<64x4xf32, #tpu.memory_space<vmem>>, vector<64x1xf32>,
    %c1_i32 = arith.constant 1 : i32
    %124 = arith.cmpi eq, %arg1, %c1_i32 : i32
    %125 = arith.extui %124 : i1 to i32
    %c0_i32_69 = arith.constant 0 : i32
    %126 = arith.cmpi ne, %125, %c0_i32_69 : i32
    scf.if %126 {
      %c0_70 = arith.constant 0 : index
      %c0_71 = arith.constant 0 : index
      %127 = vector.load %arg13[%c0_70, %c0_71] : memref<64x4xf32, #tpu.memory_space<vmem>>, vector<64x4xf32>
      %128 = tpu.reciprocal %127 : vector<64x4xf32> -> vector<64x4xf32>
      %c0_72 = arith.constant 0 : index
      %c0_73 = arith.constant 0 : index
      %129 = vector.load %arg14[%c0_72, %c0_73] : memref<64x32xf32, #tpu.memory_space<vmem>>, vector<64x8xf32>
      %130 = vector.extract_strided_slice %128 {offsets = [0, 0], sizes = [64, 1], strides = [1, 1]} : vector<64x4xf32> to vector<64x1xf32>
      %131 = vector.broadcast %130 : vector<64x1xf32> to vector<64x8xf32>
      %132 = arith.mulf %129, %131 : vector<64x8xf32>
      %c0_74 = arith.constant 0 : index
      %c0_75 = arith.constant 0 : index
      %133 = vector.load %arg14[%c0_74, %c0_75] : memref<64x32xf32, #tpu.memory_space<vmem>>, vector<64x8xf32>
      tpu.vector_store %arg14[%c0_74, %c0_75], %132 {strides = array<i32>} : memref<64x32xf32, #tpu.memory_space<vmem>>, vector<64x8xf32>,
      %c0_76 = arith.constant 0 : index
      %c8_77 = arith.constant 8 : index
      %134 = vector.load %arg14[%c0_76, %c8_77] : memref<64x32xf32, #tpu.memory_space<vmem>>, vector<64x8xf32>
      %135 = vector.extract_strided_slice %128 {offsets = [0, 1], sizes = [64, 1], strides = [1, 1]} : vector<64x4xf32> to vector<64x1xf32>
      %136 = vector.broadcast %135 : vector<64x1xf32> to vector<64x8xf32>
      %137 = arith.mulf %134, %136 : vector<64x8xf32>
      %c0_78 = arith.constant 0 : index
      %c8_79 = arith.constant 8 : index
      %138 = vector.load %arg14[%c0_78, %c8_79] : memref<64x32xf32, #tpu.memory_space<vmem>>, vector<64x8xf32>
      tpu.vector_store %arg14[%c0_78, %c8_79], %137 {strides = array<i32>} : memref<64x32xf32, #tpu.memory_space<vmem>>, vector<64x8xf32>,
      %c0_80 = arith.constant 0 : index
      %c16_81 = arith.constant 16 : index
      %139 = vector.load %arg14[%c0_80, %c16_81] : memref<64x32xf32, #tpu.memory_space<vmem>>, vector<64x8xf32>
      %140 = vector.extract_strided_slice %128 {offsets = [0, 2], sizes = [64, 1], strides = [1, 1]} : vector<64x4xf32> to vector<64x1xf32>
      %141 = vector.broadcast %140 : vector<64x1xf32> to vector<64x8xf32>
      %142 = arith.mulf %139, %141 : vector<64x8xf32>
      %c0_82 = arith.constant 0 : index
      %c16_83 = arith.constant 16 : index
      %143 = vector.load %arg14[%c0_82, %c16_83] : memref<64x32xf32, #tpu.memory_space<vmem>>, vector<64x8xf32>
      tpu.vector_store %arg14[%c0_82, %c16_83], %142 {strides = array<i32>} : memref<64x32xf32, #tpu.memory_space<vmem>>, vector<64x8xf32>,
      %c0_84 = arith.constant 0 : index
      %c24_85 = arith.constant 24 : index
      %144 = vector.load %arg14[%c0_84, %c24_85] : memref<64x32xf32, #tpu.memory_space<vmem>>, vector<64x8xf32>
      %145 = vector.extract_strided_slice %128 {offsets = [0, 3], sizes = [64, 1], strides = [1, 1]} : vector<64x4xf32> to vector<64x1xf32>
      %146 = vector.broadcast %145 : vector<64x1xf32> to vector<64x8xf32>
      %147 = arith.mulf %144, %146 : vector<64x8xf32>
      %c0_86 = arith.constant 0 : index
      %c24_87 = arith.constant 24 : index
      %148 = vector.load %arg14[%c0_86, %c24_87] : memref<64x32xf32, #tpu.memory_space<vmem>>, vector<64x8xf32>
      tpu.vector_store %arg14[%c0_86, %c24_87], %147 {strides = array<i32>} : memref<64x32xf32, #tpu.memory_space<vmem>>, vector<64x8xf32>,
      %c0_88 = arith.constant 0 : index
      %c0_89 = arith.constant 0 : index
      %149 = vector.load %arg14[%c0_88, %c0_89] : memref<64x32xf32, #tpu.memory_space<vmem>>, vector<64x32xf32>
      %c0_90 = arith.constant 0 : index
      %c0_91 = arith.constant 0 : index
      %150 = vector.load %arg7[%c0_90, %c0_91] : memref<32x32xf32, #tpu.memory_space<vmem>>, vector<32x32xf32>
      %cst_92 = arith.constant dense<0.000000e+00> : vector<64x32xf32>
      %151 = tpu.matmul %149, %150, %cst_92 {dimension_numbers = #tpu.dot_dimension_numbers<[1], [0], [0], [1], [0, 0, 1, 1], [], []>} : vector<64x32xf32>, vector<32x32xf32>, vector<64x32xf32> -> vector<64x32xf32>
      %c0_93 = arith.constant 0 : index
      %c0_94 = arith.constant 0 : index
      %152 = vector.load %arg8[%c0_93, %c0_94] : memref<1x32xf32, #tpu.memory_space<vmem>>, vector<1x32xf32>
      %153 = vector.broadcast %152 : vector<1x32xf32> to vector<64x32xf32>
      %154 = arith.addf %151, %153 : vector<64x32xf32>
      %c0_95 = arith.constant 0 : index
      %c0_96 = arith.constant 0 : index
      %c0_97 = arith.constant 0 : index
      %155 = vector.load %arg9[%c0_95, %c0_96, %c0_97] : memref<1x64x32xf32, #tpu.memory_space<vmem>>, vector<1x64x32xf32>
      %156 = vector.shape_cast %155 : vector<1x64x32xf32> to vector<64x32xf32>
      %157 = arith.addf %156, %154 : vector<64x32xf32>
      %c0_98 = arith.constant 0 : index
      %c0_99 = arith.constant 0 : index
      %c0_100 = arith.constant 0 : index
      %158 = vector.load %arg10[%c0_98, %c0_99, %c0_100] : memref<1x64x32xf32, #tpu.memory_space<vmem>>, vector<1x64x32xf32>
      %159 = vector.shape_cast %158 : vector<1x64x32xf32> to vector<64x32xf32>
      %160 = vector.shape_cast %157 : vector<64x32xf32> to vector<1x64x32xf32>
      tpu.vector_store %arg10[%c0_98, %c0_99, %c0_100], %160 {strides = array<i32>} : memref<1x64x32xf32, #tpu.memory_space<vmem>>, vector<1x64x32xf32>,
    } else {
    }
    return
  }
  func.func @transform_0(%arg0: i32, %arg1: i32) -> (i32, i32, i32) {
    %c0_i32 = arith.constant 0 : i32
    %c0_i32_0 = arith.constant 0 : i32
    %c0_i32_1 = arith.constant 0 : i32
    return %arg0, %c0_i32, %c0_i32_0 : i32, i32, i32
  }
  func.func @transform_1(%arg0: i32, %arg1: i32) -> (i32, i32, i32) {
    %c0_i32 = arith.constant 0 : i32
    %c0_i32_0 = arith.constant 0 : i32
    return %arg0, %arg1, %c0_i32 : i32, i32, i32
  }
  func.func @transform_2(%arg0: i32, %arg1: i32) -> (i32, i32, i32) {
    %c0_i32 = arith.constant 0 : i32
    %c0_i32_0 = arith.constant 0 : i32
    return %arg0, %arg1, %c0_i32 : i32, i32, i32
  }
  func.func @transform_3(%arg0: i32, %arg1: i32) -> (i32, i32) {
    %c0_i32 = arith.constant 0 : i32
    %c0_i32_0 = arith.constant 0 : i32
    %c0_i32_1 = arith.constant 0 : i32
    return %c0_i32, %c0_i32_0 : i32, i32
  }
  func.func @transform_4(%arg0: i32, %arg1: i32) -> (i32, i32) {
    %c0_i32 = arith.constant 0 : i32
    %c0_i32_0 = arith.constant 0 : i32
    %c0_i32_1 = arith.constant 0 : i32
    return %c0_i32, %c0_i32_0 : i32, i32
  }
  func.func @transform_5(%arg0: i32, %arg1: i32) -> (i32, i32) {
    %c0_i32 = arith.constant 0 : i32
    %c0_i32_0 = arith.constant 0 : i32
    %c0_i32_1 = arith.constant 0 : i32
    return %c0_i32, %c0_i32_0 : i32, i32
  }
  func.func @transform_6(%arg0: i32, %arg1: i32) -> (i32, i32) {
    %c0_i32 = arith.constant 0 : i32
    %c0_i32_0 = arith.constant 0 : i32
    %c0_i32_1 = arith.constant 0 : i32
    return %c0_i32, %c0_i32_0 : i32, i32
  }
  func.func @transform_7(%arg0: i32, %arg1: i32) -> (i32, i32, i32) {
    %c0_i32 = arith.constant 0 : i32
    %c0_i32_0 = arith.constant 0 : i32
    %c0_i32_1 = arith.constant 0 : i32
    return %arg0, %c0_i32, %c0_i32_0 : i32, i32, i32
  }
  func.func @transform_8(%arg0: i32, %arg1: i32) -> (i32, i32, i32) {
    %c0_i32 = arith.constant 0 : i32
    %c0_i32_0 = arith.constant 0 : i32
    %c0_i32_1 = arith.constant 0 : i32
    return %arg0, %c0_i32, %c0_i32_0 : i32, i32, i32
  }
}

</mosaic_0001>

<bundles_post_ra>
// kernel: _block_forward.4
= control target key start
LH: loop header
LB: loop body
LE: loop exit
PB: predicated region body
PF: predicated region fallthrough
CT: control target
= control target key end

     0   :  { %vm39_vm0 = vcmask 261120   ;;  %v762_v26 = vmov 32.0   ;;  %s1557_s0 = inlined_call_operand.vmem [shape: f32[128,32], index: 0, kind: input, shape index: {}]   ;;  %s1558_s1 = inlined_call_operand.vmem [shape: f32[1,32], index: 1, kind: input, shape index: {}]   ;;  %s1559_s2 = inlined_call_operand.vmem [shape: f32[1,32], index: 2, kind: input, shape index: {}]   ;;  %s1560_s3 = inlined_call_operand.vmem [shape: f32[32,32], index: 3, kind: input, shape index: {}]   ;;  %s1561_s4 = inlined_call_operand.vmem [shape: f32[32,32], index: 4, kind: input, shape index: {}]   ;;  %s1562_s5 = inlined_call_operand.vmem [shape: f32[128,32], index: 5, kind: output, shape index: {0}]   ;;  %s1563_s6 = inlined_call_operand.vmem [shape: f32[128,32], index: 6, kind: output, shape index: {1}]   ;;  %s1564_s7 = inlined_call_operand.vmem [shape: f32[128,32], index: 7, kind: output, shape index: {2}]  }
   0x1   :  { %v32_v0 = vld [vmem:[%s1557_s0 + $0x48] sm:$0xff]  ;;  %v31_v1 = vld [vmem:[%s1557_s0 + $0x40] sm:$0xff]  ;;  %v814_v4 = vld [vmem:[%s1557_s0 + $0x50] sm:$0xff]  ;;  %728 = vrcp.f32 %v762_v26 }
   0x2   :  { %v67_v2 = vsel %vm39_vm0, %v32_v0, 0.0  ;;  %v64_v3 = vsel %vm39_vm0, %v31_v1, 0.0  ;;  %v70_v5 = vsel %vm39_vm0, %v814_v4, 0.0  ;;  %v24_v6 = vld [vmem:[%s1557_s0 + $0x8] sm:$0xff]  ;;  %v23_v7 = vld [vmem:[%s1557_s0] sm:$0xff]  ;;  %v827_v8 = vld [vmem:[%s1557_s0 + $0x10] sm:$0xff] }
   0x3   :  { %68 = vadd.xlane.f32.xlu1 %v67_v2  ;;  %65 = vadd.xlane.f32.xlu0 %v64_v3  ;;  %v43_v9 = vsel %vm39_vm0, %v24_v6, 0.0  ;;  %v40_v10 = vsel %vm39_vm0, %v23_v7, 0.0  ;;  %v46_v11 = vsel %vm39_vm0, %v827_v8, 0.0  ;;  %v836_v12 = vld [vmem:[%s1557_s0 + $0x18] sm:$0xff]  ;;  %v846_v14 = vld [vmem:[%s1557_s0 + $0x60] sm:$0xff]  ;;  %v857_v18 = vld [vmem:[%s1557_s0 + $0x68] sm:$0xff] }
   0x4   :  { %71 = vadd.xlane.f32.xlu2 %v70_v5  ;;  %v841_v13 = vld [vmem:[%s1557_s0 + $0x58] sm:$0xff]  ;;  %v49_v15 = vsel %vm39_vm0, %v836_v12, 0.0  ;;  %v76_v17 = vsel %vm39_vm0, %v846_v14, 0.0  ;;  %v862_v19 = vld [vmem:[%s1557_s0 + $0x20] sm:$0xff]  ;;  %v867_v20 = vld [vmem:[%s1557_s0 + $0x28] sm:$0xff]  ;;  %v79_v21 = vsel %vm39_vm0, %v857_v18, 0.0 }
   0x5   :  { %v73_v16 = vsel %vm39_vm0, %v841_v13, 0.0  ;;  %v52_v22 = vsel %vm39_vm0, %v862_v19, 0.0  ;;  %v55_v23 = vsel %vm39_vm0, %v867_v20, 0.0  ;;  %v878_v24 = vld [vmem:[%s1557_s0 + $0x70] sm:$0xff]  ;;  %v901_v48 = vld [vmem:[%s1557_s0 + $0x38] sm:$0xff] }
   0x6   :  { %v82_v25 = vsel %vm39_vm0, %v878_v24, 0.0  ;;  %v906_v49 = vld [vmem:[%s1557_s0 + $0x30] sm:$0xff]  ;;  %v61_v53 = vsel %vm39_vm0, %v901_v48, 0.0 }
   0x7   :  { %v729_v27 = vpop.eup %728  ;;  %v58_v54 = vsel %vm39_vm0, %v906_v49, 0.0 }
   0x8   :  { %v89_v28 = vmul.f32 32.0, %v729_v27  ;;  %vm93_vm1 = vweird.f32 %v729_v27 }
   0xa   :  { %v90_v29 = vsub.f32 1.0, %v89_v28 }
   0xb   :  { %44 = vadd.xlane.f32.xlu1 %v43_v9  ;;  %41 = vadd.xlane.f32.xlu0 %v40_v10 }
   0xc   :  { %47 = vadd.xlane.f32.xlu2 %v46_v11  ;;  %v91_v30 = vmul.f32 %v729_v27, %v90_v29 }
   0xe   :  { %v92_v31 = vadd.f32 %v729_v27, %v91_v30 }
  0x10   :  { %v882_v32 = vsel %vm93_vm1, %v729_v27, %v92_v31 }
  0x13   :  { %50 = vadd.xlane.f32.xlu1 %v49_v15  ;;  %74 = vadd.xlane.f32.xlu0 %v73_v16 }
  0x14   :  { %77 = vadd.xlane.f32.xlu2 %v76_v17 }
  0x1b   :  { %80 = vadd.xlane.f32.xlu1 %v79_v21  ;;  %53 = vadd.xlane.f32.xlu0 %v52_v22 }
  0x1c   :  { %56 = vadd.xlane.f32.xlu2 %v55_v23 }
  0x23   :  { %83 = vadd.xlane.f32.xlu1 %v82_v25 }
  0x76   :  { %v69_v33 = vpop.xlane.xlu1 %68  ;;  %v66_v34 = vpop.xlane.xlu0 %65 }
  0x77   :  { %v104_v35 = vmul.f32 %v882_v32, %v69_v33  ;;  %v103_v36 = vmul.f32 %v882_v32, %v66_v34  ;;  %v72_v37 = vpop.xlane.xlu2 %71 }
  0x78   :  { %v105_v62 = vmul.f32 %v882_v32, %v72_v37 }
  0x79   :  { %v886_v38 = vsub.f32 %v32_v0, %v104_v35  ;;  %v888_v39 = vsub.f32 %v31_v1, %v103_v36  ;;  %v930_v0 = vld [vmem:[%s1557_s0 + $0x78] sm:$0xff] }
  0x7b   :  { %v136_v40 = vmul.f32 %v886_v38, %v886_v38  ;;  %v135_v41 = vmul.f32 %v888_v39, %v888_v39 }
  0x7d   :  { %v170_v42 = vsel %vm39_vm0, %v136_v40, 0.0  ;;  %v167_v43 = vsel %vm39_vm0, %v135_v41, 0.0 }
  0x7e   :  { %171 = vadd.xlane.f32.xlu1 %v170_v42  ;;  %v45_v44 = vpop.xlane.xlu1 %44  ;;  %168 = vadd.xlane.f32.xlu0 %v167_v43  ;;  %v42_v45 = vpop.xlane.xlu0 %41 }
  0x7f   :  { %v96_v46 = vmul.f32 %v882_v32, %v45_v44  ;;  %v95_v47 = vmul.f32 %v882_v32, %v42_v45  ;;  %v48_v50 = vpop.xlane.xlu2 %47  ;;  %v591_v44 = vld [vmem:[%s1561_s4 + $0x18] sm:$0xff]  ;;  %v457_v45 = vld [vmem:[%s1560_s3 + $0x10] sm:$0xff] }
  0x80   :  { %v97_v60 = vmul.f32 %v882_v32, %v48_v50  ;;  %721 = vmatpush.msra.mxu3 %v591_v44  ;;  %604 = vmatpush.msra.mxu1 %v591_v44  ;;  %v589_v50 = vld [vmem:[%s1561_s4 + $0x8] sm:$0xff] }
  0x81   :  { %v908_v51 = vsub.f32 %v23_v7, %v95_v47  ;;  %v910_v52 = vsub.f32 %v24_v6, %v96_v46  ;;  %v939_v6 = vsub.f32 %v814_v4, %v105_v62  ;;  %v85_v7 = vsel %vm39_vm0, %v930_v0, 0.0  ;;  %v590_v46 = vld [vmem:[%s1561_s4 + $0x10] sm:$0xff]  ;;  %v456_v47 = vld [vmem:[%s1560_s3 + $0x8] sm:$0xff] }
  0x82   :  { %v933_v2 = vsub.f32 %v827_v8, %v97_v60  ;;  %722 = vmatpush.msra.mxu3 %v590_v46  ;;  %605 = vmatpush.msra.mxu1 %v590_v46  ;;  %v1058_v46 = vld [vmem:[%s1558_s1] ss:$0 sm:$0xff] }
  0x83   :  { %v127_v55 = vmul.f32 %v908_v51, %v908_v51  ;;  %v128_v61 = vmul.f32 %v910_v52, %v910_v52  ;;  %v137_v16 = vmul.f32 %v939_v6, %v939_v6 }
  0x84   :  { %v129_v15 = vmul.f32 %v933_v2, %v933_v2  ;;  %723 = vmatpush.msra.mxu3 %v589_v50  ;;  %606 = vmatpush.msra.mxu1 %v589_v50 }
  0x85   :  { %v143_v56 = vsel %vm39_vm0, %v127_v55, 0.0  ;;  %v146_v3 = vsel %vm39_vm0, %v128_v61, 0.0  ;;  %v173_v26 = vsel %vm39_vm0, %v137_v16, 0.0 }
  0x86   :  { %62 = vadd.xlane.f32.xlu1 %v61_v53  ;;  %v51_v57 = vpop.xlane.xlu1 %50  ;;  %59 = vadd.xlane.f32.xlu0 %v58_v54  ;;  %v75_v58 = vpop.xlane.xlu0 %74  ;;  %v149_v22 = vsel %vm39_vm0, %v129_v15, 0.0  ;;  %v455_v53 = vld [vmem:[%s1560_s3] sm:$0xff] }
  0x87   :  { %144 = vadd.xlane.f32.xlu2 %v143_v56  ;;  %v106_v59 = vmul.f32 %v882_v32, %v75_v58  ;;  %v78_v1 = vpop.xlane.xlu2 %77  ;;  %v98_v4 = vmul.f32 %v882_v32, %v51_v57  ;;  %v588_v54 = vld [vmem:[%s1561_s4] sm:$0xff] }
  0x88   :  { %724 = vmatpush.msra.mxu3 %v588_v54  ;;  %607 = vmatpush.msra.mxu1 %v588_v54 }
  0x89   :  { %v925_v63 = vsub.f32 %v841_v13, %v106_v59  ;;  %v107_v13 = vmul.f32 %v882_v32, %v78_v1  ;;  %v961_v25 = vsub.f32 %v836_v12, %v98_v4 }
  0x8b   :  { %v138_v5 = vmul.f32 %v925_v63, %v925_v63  ;;  %v955_v21 = vsub.f32 %v846_v14, %v107_v13  ;;  %v130_v12 = vmul.f32 %v961_v25, %v961_v25 }
  0x8d   :  { %v176_v9 = vsel %vm39_vm0, %v138_v5, 0.0  ;;  %v139_v30 = vmul.f32 %v955_v21, %v955_v21  ;;  %v152_v40 = vsel %vm39_vm0, %v130_v12, 0.0 }
  0x8e   :  { %v81_v10 = vpop.xlane.xlu1 %80  ;;  %147 = vadd.xlane.f32.xlu0 %v146_v3  ;;  %177 = vadd.xlane.f32.xlu1 %v176_v9  ;;  %v54_v11 = vpop.xlane.xlu0 %53 }
  0x8f   :  { %86 = vadd.xlane.f32.xlu2 %v85_v7  ;;  %v99_v8 = vmul.f32 %v882_v32, %v54_v11  ;;  %v57_v27 = vpop.xlane.xlu2 %56  ;;  %v108_v31 = vmul.f32 %v882_v32, %v81_v10  ;;  %v179_v35 = vsel %vm39_vm0, %v139_v30, 0.0 }
  0x90   :  { %v100_v14 = vmul.f32 %v882_v32, %v57_v27 }
  0x91   :  { %v952_v17 = vsub.f32 %v862_v19, %v99_v8  ;;  %v982_v37 = vsub.f32 %v857_v18, %v108_v31  ;;  %v458_v18 = vld [vmem:[%s1560_s3 + $0x18] sm:$0xff] }
  0x92   :  { %v976_v34 = vsub.f32 %v867_v20, %v100_v14  ;;  %717 = vmatpush.msra.mxu2 %v458_v18  ;;  %519 = vmatpush.msra.mxu0 %v458_v18 }
  0x93   :  { %v131_v23 = vmul.f32 %v952_v17, %v952_v17  ;;  %v140_v20 = vmul.f32 %v982_v37, %v982_v37 }
  0x94   :  { %718 = vmatpush.msra.mxu2 %v457_v45  ;;  %520 = vmatpush.msra.mxu0 %v457_v45 }
  0x95   :  { %v155_v28 = vsel %vm39_vm0, %v131_v23, 0.0  ;;  %v182_v43 = vsel %vm39_vm0, %v140_v20, 0.0 }
  0x96   :  { %v84_v29 = vpop.xlane.xlu1 %83  ;;  %150 = vadd.xlane.f32.xlu0 %v149_v22  ;;  %156 = vadd.xlane.f32.xlu1 %v155_v28 }
  0x97   :  { %v109_v19 = vmul.f32 %v882_v32, %v84_v29  ;;  %174 = vadd.xlane.f32.xlu2 %v173_v26  ;;  %719 = vmatpush.msra.mxu2 %v456_v47 }
  0x98   :  { %521 = vmatpush.msra.mxu0 %v456_v47 }
  0x99   :  { %v973_v33 = vsub.f32 %v878_v24, %v109_v19  ;;  %v132_v24 = vmul.f32 %v976_v34, %v976_v34  ;;  %720 = vmatpush.msra.mxu2 %v455_v53 }
  0x9a   :  { %522 = vmatpush.msra.mxu0 %v455_v53 }
  0x9b   :  { %v141_v36 = vmul.f32 %v973_v33, %v973_v33  ;;  %v158_v42 = vsel %vm39_vm0, %v132_v24, 0.0 }
  0x9d   :  { %v185_v41 = vsel %vm39_vm0, %v141_v36, 0.0 }
  0x9e   :  { %180 = vadd.xlane.f32.xlu0 %v179_v35  ;;  %186 = vadd.xlane.f32.xlu1 %v185_v41 }
  0x9f   :  { %153 = vadd.xlane.f32.xlu2 %v152_v40 }
  0xa6   :  { %159 = vadd.xlane.f32.xlu0 %v158_v42 }
  0xa7   :  { %183 = vadd.xlane.f32.xlu2 %v182_v43 }
  0xf1   :  { %v172_v55 = vpop.xlane.xlu1 %171  ;;  %v169_v56 = vpop.xlane.xlu0 %168 }
  0xf2   :  { %v200_v57 = vmul.f32 %v172_v55, %v882_v32  ;;  %v199_v58 = vmul.f32 %v169_v56, %v882_v32  ;;  %v1066_v56 = vld [vmem:[%s1559_s2] ss:$0 sm:$0xff] }
  0xf4   :  { %v216_v59 = vadd.f32 1e-05, %v200_v57  ;;  %v215_v60 = vadd.f32 1e-05, %v199_v58 }
  0xf6   :  { %730 = vrsqrt.f32 %v216_v59  ;;  %vm319_vm2 = vweird.f32 %v216_v59  ;;  %vm309_vm6 = vweird.f32 %v215_v60 }
  0xf7   :  { %732 = vrsqrt.f32 %v215_v60 }
  0xf9   :  { %v63_v61 = vpop.xlane.xlu1 %62  ;;  %v60_v62 = vpop.xlane.xlu0 %59 }
  0xfa   :  { %v102_v1 = vmul.f32 %v882_v32, %v63_v61  ;;  %v145_v3 = vpop.xlane.xlu2 %144  ;;  %v101_v5 = vmul.f32 %v882_v32, %v60_v62 }
  0xfb   :  { %v191_v7 = vmul.f32 %v145_v3, %v882_v32 }
  0xfc   :  { %v731_v9 = vpop.eup %730  ;;  %v1022_v10 = vsub.f32 %v901_v48, %v102_v1  ;;  %v1025_v11 = vsub.f32 %v906_v49, %v101_v5 }
  0xfd   :  { %v733_v8 = vpop.eup %732  ;;  %v314_v13 = vmul.f32 %v731_v9, %v216_v59  ;;  %v1027_v15 = vadd.f32 1e-05, %v191_v7  ;;  %vm320_vm3 = vweird.f32 %v731_v9 }
  0xfe   :  { %v304_v4 = vmul.f32 %v733_v8, %v215_v60  ;;  %v134_v16 = vmul.f32 %v1022_v10, %v1022_v10  ;;  %v133_v22 = vmul.f32 %v1025_v11, %v1025_v11  ;;  %vm1039_vm4 = vmor %vm319_vm2, %vm320_vm3  ;;  %vm310_vm5 = vweird.f32 %v733_v8 }
  0xff   :  { %v315_v23 = vmul.f32 %v731_v9, %v314_v13  ;;  %734 = vrsqrt.f32 %v1027_v15  ;;  %vm311_vm7 = vmor %vm309_vm6, %vm310_vm5  ;;  %vm229_vm9 = vweird.f32 %v1027_v15 }
 0x100   :  { %v305_v26 = vmul.f32 %v733_v8, %v304_v4  ;;  %v164_v48 = vsel %vm39_vm0, %v134_v16, 0.0  ;;  %v161_v49 = vsel %vm39_vm0, %v133_v22, 0.0 }
 0x101   :  { %v316_v27 = vmul.f32 0.5, %v315_v23  ;;  %v178_v28 = vpop.xlane.xlu1 %177  ;;  %165 = vadd.xlane.f32.xlu1 %v164_v48  ;;  %162 = vadd.xlane.f32.xlu2 %v161_v49  ;;  %v148_v29 = vpop.xlane.xlu0 %147 }
 0x102   :  { %v306_v19 = vmul.f32 0.5, %v305_v26  ;;  %v87_v14 = vpop.xlane.xlu2 %86  ;;  %v202_v30 = vmul.f32 %v178_v28, %v882_v32  ;;  %v192_v31 = vmul.f32 %v148_v29, %v882_v32 }
 0x103   :  { %v317_v12 = vsub.f32 1.5, %v316_v27  ;;  %v110_v35 = vmul.f32 %v882_v32, %v87_v14 }
 0x104   :  { %v307_v40 = vsub.f32 1.5, %v306_v19  ;;  %v1043_v41 = vadd.f32 1e-05, %v202_v30  ;;  %v1045_v24 = vadd.f32 1e-05, %v192_v31 }
 0x105   :  { %v735_v20 = vpop.eup %734  ;;  %v318_v42 = vmul.f32 %v731_v9, %v317_v12  ;;  %v1048_v43 = vsub.f32 %v930_v0, %v110_v35 }
 0x106   :  { %v308_v18 = vmul.f32 %v733_v8, %v307_v40  ;;  %v224_v44 = vmul.f32 %v735_v20, %v1027_v15  ;;  %736 = vrsqrt.f32 %v1043_v41  ;;  %vm230_vm8 = vweird.f32 %v735_v20 }
 0x107   :  { %v322_v45 = vsel %vm1039_vm4, %v731_v9, %v318_v42  ;;  %738 = vrsqrt.f32 %v1045_v24  ;;  %v142_v50 = vmul.f32 %v1048_v43, %v1048_v43  ;;  %vm1092_vm10 = vmor %vm229_vm9, %vm230_vm8  ;;  %vm339_vm11 = vweird.f32 %v1043_v41 }
 0x108   :  { %v312_v47 = vsel %vm311_vm7, %v733_v8, %v308_v18  ;;  %v225_v0 = vmul.f32 %v735_v20, %v224_v44  ;;  %v392_v57 = vmul.f32 %v322_v45, %v886_v38  ;;  %vm239_vm13 = vweird.f32 %v1045_v24 }
 0x109   :  { %v157_v53 = vpop.xlane.xlu1 %156  ;;  %v151_v54 = vpop.xlane.xlu0 %150  ;;  %v391_v55 = vmul.f32 %v312_v47, %v888_v39  ;;  %v188_v59 = vsel %vm39_vm0, %v142_v50, 0.0 }
 0x10a   :  { %v226_v58 = vmul.f32 0.5, %v225_v0  ;;  %v175_v60 = vpop.xlane.xlu2 %174  ;;  %v195_v61 = vmul.f32 %v157_v53, %v882_v32  ;;  %v193_v62 = vmul.f32 %v151_v54, %v882_v32  ;;  %189 = vadd.xlane.f32.xlu0 %v188_v59  ;;  %v412_v16 = vmul.f32 %v1058_v46, %v392_v57 }
 0x10b   :  { %v201_v1 = vmul.f32 %v175_v60, %v882_v32  ;;  %v411_v39 = vmul.f32 %v1058_v46, %v391_v55 }
 0x10c   :  { %v1074_v3 = vpop.eup %736  ;;  %v227_v5 = vsub.f32 1.5, %v226_v58  ;;  %v1076_v7 = vadd.f32 1e-05, %v195_v61  ;;  %v1078_v38 = vadd.f32 1e-05, %v193_v62  ;;  %v432_v19 = vadd.f32 %v1066_v56, %v412_v16 }
 0x10d   :  { %v1080_v9 = vpop.eup %738  ;;  %v334_v8 = vmul.f32 %v1074_v3, %v1043_v41  ;;  %v1084_v13 = vadd.f32 1e-05, %v201_v1  ;;  %v431_v4 = vadd.f32 %v1066_v56, %v411_v39  ;;  %vm340_vm12 = vweird.f32 %v1074_v3 }
 0x10e   :  { %v228_v22 = vmul.f32 %v735_v20, %v227_v5  ;;  %v234_v23 = vmul.f32 %v1080_v9, %v1045_v24  ;;  %740 = vrsqrt.f32 %v1076_v7  ;;  %448 = vst.msk [vmem:[%s1562_s5 + $0x48] sm:$0xff] %vm39_vm0, %v432_v19  ;;  %vm240_vm14 = vweird.f32 %v1080_v9  ;;  %vm1141_vm1 = vmor %vm339_vm11, %vm340_vm12 }
 0x10f   :  { %v335_v48 = vmul.f32 %v1074_v3, %v334_v8  ;;  %742 = vrsqrt.f32 %v1084_v13  ;;  %447 = vst.msk [vmem:[%s1562_s5 + $0x40] sm:$0xff] %vm39_vm0, %v431_v4  ;;  %693 = vmatmul.msk.f32.vlgmr.msra.gmra.mxu2 %vm39_vm0, %v431_v4  ;;  %709 = vmatmul.msk.f32.vlgmr.msra.gmra.mxu3 %vm39_vm0, %v431_v4  ;;  %vm329_vm15 = vweird.f32 %v1084_v13  ;;  %vm269_vm2 = vweird.f32 %v1076_v7  ;;  %vm1161_vm4 = vmor %vm239_vm13, %vm240_vm14 }
 0x110   :  { %v232_v15 = vsel %vm1092_vm10, %v735_v20, %v228_v22  ;;  %v235_v49 = vmul.f32 %v1080_v9, %v234_v23  ;;  %744 = vrsqrt.f32 %v1078_v38  ;;  %vm249_vm3 = vweird.f32 %v1078_v38 }
 0x111   :  { %v336_v27 = vmul.f32 0.5, %v335_v48  ;;  %v187_v28 = vpop.xlane.xlu1 %186  ;;  %v181_v29 = vpop.xlane.xlu0 %180  ;;  %v383_v35 = vmul.f32 %v232_v15, %v908_v51 }
 0x112   :  { %v236_v14 = vmul.f32 0.5, %v235_v49  ;;  %v154_v30 = vpop.xlane.xlu2 %153  ;;  %v205_v31 = vmul.f32 %v187_v28, %v882_v32  ;;  %v203_v12 = vmul.f32 %v181_v29, %v882_v32 }
 0x113   :  { %v337_v36 = vsub.f32 1.5, %v336_v27  ;;  %v194_v40 = vmul.f32 %v154_v30, %v882_v32  ;;  %v403_v55 = vmul.f32 %v1058_v46, %v383_v35 }
 0x114   :  { %v1120_v20 = vpop.eup %740  ;;  %v237_v42 = vsub.f32 1.5, %v236_v14  ;;  %v1124_v51 = vadd.f32 1e-05, %v205_v31  ;;  %v1133_v0 = vadd.f32 1e-05, %v203_v12 }
 0x115   :  { %v1126_v18 = vpop.eup %742  ;;  %v338_v44 = vmul.f32 %v1074_v3, %v337_v36  ;;  %v264_v45 = vmul.f32 %v1120_v20, %v1076_v7  ;;  %v1131_v47 = vadd.f32 1e-05, %v194_v40  ;;  %vm270_vm6 = vweird.f32 %v1120_v20 }
 0x116   :  { %v1135_v50 = vpop.eup %744  ;;  %v324_v54 = vmul.f32 %v1126_v18, %v1084_v13  ;;  %746 = vrsqrt.f32 %v1124_v51  ;;  %v238_v57 = vmul.f32 %v1080_v9, %v237_v42  ;;  %vm330_vm5 = vweird.f32 %v1126_v18  ;;  %vm1187_vm8 = vmor %vm269_vm2, %vm270_vm6 }
 0x117   :  { %v265_v58 = vmul.f32 %v1120_v20, %v264_v45  ;;  %v244_v41 = vmul.f32 %v1135_v50, %v1078_v38  ;;  %694 = vmatmul.msk.f32.gmra.mxu2 %vm39_vm0, %v432_v19  ;;  %710 = vmatmul.msk.f32.gmra.mxu3 %vm39_vm0, %v432_v19  ;;  %748 = vrsqrt.f32 %v1131_v47  ;;  %v342_v61 = vsel %vm1141_vm1, %v1074_v3, %v338_v44  ;;  %vm1205_vm11 = vmor %vm329_vm15, %vm330_vm5 }
 0x118   :  { %v325_v60 = vmul.f32 %v1126_v18, %v324_v54  ;;  %750 = vrsqrt.f32 %v1133_v0  ;;  %vm250_vm7 = vweird.f32 %v1135_v50  ;;  %v423_v5 = vadd.f32 %v1066_v56, %v403_v55 }
 0x119   :  { %v266_v62 = vmul.f32 0.5, %v265_v58  ;;  %v245_v1 = vmul.f32 %v1135_v50, %v244_v41  ;;  %v160_v24 = vpop.xlane.xlu0 %159  ;;  %v242_v16 = vsel %vm1161_vm4, %v1080_v9, %v238_v57  ;;  %vm259_vm9 = vweird.f32 %v1131_v47  ;;  %vm1220_vm13 = vmor %vm249_vm3, %vm250_vm7 }
 0x11a   :  { %v326_v39 = vmul.f32 0.5, %v325_v60  ;;  %v184_v8 = vpop.xlane.xlu2 %183  ;;  %v196_v4 = vmul.f32 %v160_v24, %v882_v32  ;;  %vm369_vm10 = vweird.f32 %v1124_v51  ;;  %439 = vst.msk [vmem:[%s1562_s5] sm:$0xff] %vm39_vm0, %v423_v5  ;;  %685 = vmatmul.msk.f32.vlgmr.msra.gmra.mxu0 %vm39_vm0, %v423_v5  ;;  %701 = vmatmul.msk.f32.vlgmr.msra.gmra.mxu1 %vm39_vm0, %v423_v5  ;;  %vm349_vm12 = vweird.f32 %v1133_v0 }
 0x11b   :  { %v267_v22 = vsub.f32 1.5, %v266_v62  ;;  %v246_v3 = vmul.f32 0.5, %v245_v1  ;;  %v204_v23 = vmul.f32 %v184_v8, %v882_v32  ;;  %v384_v30 = vmul.f32 %v242_v16, %v910_v52 }
 0x11c   :  { %v1181_v26 = vpop.eup %746  ;;  %v327_v48 = vsub.f32 1.5, %v326_v39  ;;  %v1199_v9 = vadd.f32 1e-05, %v196_v4  ;;  %v394_v38 = vmul.f32 %v342_v61, %v925_v63 }
 0x11d   :  { %v268_v49 = vmul.f32 %v1120_v20, %v267_v22  ;;  %v247_v27 = vsub.f32 1.5, %v246_v3  ;;  %v364_v28 = vmul.f32 %v1181_v26, %v1124_v51  ;;  %v1213_v29 = vpop.eup %748  ;;  %v1224_v14 = vadd.f32 1e-05, %v204_v23 }
 0x11e   :  { %v328_v19 = vmul.f32 %v1126_v18, %v327_v48  ;;  %752 = vrsqrt.f32 %v1199_v9  ;;  %v1228_v31 = vpop.eup %750  ;;  %v254_v35 = vmul.f32 %v1213_v29, %v1131_v47  ;;  %vm370_vm14 = vweird.f32 %v1181_v26 }
 0x11f   :  { %v248_v12 = vmul.f32 %v1135_v50, %v247_v27  ;;  %v272_v40 = vsel %vm1187_vm8, %v1120_v20, %v268_v49  ;;  %v365_v52 = vmul.f32 %v1181_v26, %v364_v28  ;;  %v344_v42 = vmul.f32 %v1228_v31, %v1133_v0  ;;  %vm1264_vm2 = vmor %vm369_vm10, %vm370_vm14 }
 0x120   :  { %v332_v36 = vsel %vm1205_vm11, %v1126_v18, %v328_v19  ;;  %v255_v45 = vmul.f32 %v1213_v29, %v254_v35  ;;  %vm260_vm15 = vweird.f32 %v1213_v29  ;;  %754 = vrsqrt.f32 %v1224_v14 }
 0x121   :  { %v252_v44 = vsel %vm1220_vm13, %v1135_v50, %v248_v12  ;;  %v366_v63 = vmul.f32 0.5, %v365_v52  ;;  %v345_v18 = vmul.f32 %v1228_v31, %v344_v42  ;;  %v404_v20 = vmul.f32 %v1058_v46, %v384_v30  ;;  %vm1276_vm3 = vmor %vm259_vm9, %vm260_vm15 }
 0x122   :  { %v385_v53 = vmul.f32 %v252_v44, %v933_v2  ;;  %v256_v54 = vmul.f32 0.5, %v255_v45  ;;  %vm350_vm1 = vweird.f32 %v1228_v31  ;;  %v393_v55 = vmul.f32 %v332_v36, %v939_v6 }
 0x123   :  { %v414_v50 = vmul.f32 %v1058_v46, %v394_v38  ;;  %v367_v58 = vsub.f32 1.5, %v366_v63  ;;  %v346_v41 = vmul.f32 0.5, %v345_v18  ;;  %v424_v59 = vadd.f32 %v1066_v56, %v404_v20  ;;  %vm1293_vm4 = vmor %vm349_vm12, %vm350_vm1 }
 0x124   :  { %v1256_v57 = vpop.eup %752  ;;  %v405_v60 = vmul.f32 %v1058_v46, %v385_v53  ;;  %v257_v61 = vsub.f32 1.5, %v256_v54  ;;  %v413_v62 = vmul.f32 %v1058_v46, %v393_v55  ;;  %v387_v1 = vmul.f32 %v272_v40, %v952_v17 }
 0x125   :  { %v274_v6 = vmul.f32 %v1256_v57, %v1199_v9  ;;  %v368_v51 = vmul.f32 %v1181_v26, %v367_v58  ;;  %v347_v39 = vsub.f32 1.5, %v346_v41  ;;  %440 = vst.msk [vmem:[%s1562_s5 + $0x8] sm:$0xff] %vm39_vm0, %v424_v59  ;;  %686 = vmatmul.msk.f32.gmra.mxu0 %vm39_vm0, %v424_v59  ;;  %702 = vmatmul.msk.f32.gmra.mxu1 %vm39_vm0, %v424_v59  ;;  %vm279_vm5 = vweird.f32 %v1199_v9 }
 0x126   :  { %v425_v17 = vadd.f32 %v1066_v56, %v405_v60  ;;  %v755_v5 = vpop.eup %754  ;;  %v258_v47 = vmul.f32 %v1213_v29, %v257_v61  ;;  %v433_v16 = vadd.f32 %v1066_v56, %v413_v62  ;;  %v434_v22 = vadd.f32 %v1066_v56, %v414_v50 }
 0x127   :  { %v275_v4 = vmul.f32 %v1256_v57, %v274_v6  ;;  %v372_v3 = vsel %vm1264_vm2, %v1181_v26, %v368_v51  ;;  %v348_v23 = vmul.f32 %v1228_v31, %v347_v39  ;;  %v354_v48 = vmul.f32 %v755_v5, %v1224_v14 }
 0x128   :  { %441 = vst.msk [vmem:[%s1562_s5 + $0x10] sm:$0xff] %vm39_vm0, %v425_v17  ;;  %v262_v0 = vsel %vm1276_vm3, %v1213_v29, %v258_v47  ;;  %vm280_vm6 = vweird.f32 %v1256_v57  ;;  %695 = vmatmul.msk.f32.gmra.mxu2 %vm39_vm0, %v433_v16  ;;  %711 = vmatmul.msk.f32.gmra.mxu3 %vm39_vm0, %v433_v16  ;;  %v407_v26 = vmul.f32 %v1058_v46, %v387_v1  ;;  %vm359_vm7 = vweird.f32 %v1224_v14 }
 0x129   :  { %v276_v15 = vmul.f32 0.5, %v275_v4  ;;  %449 = vst.msk [vmem:[%s1562_s5 + $0x50] sm:$0xff] %vm39_vm0, %v433_v16  ;;  %v352_v7 = vsel %vm1293_vm4, %v1228_v31, %v348_v23  ;;  %v355_v49 = vmul.f32 %v755_v5, %v354_v48  ;;  %v386_v27 = vmul.f32 %v262_v0, %v961_v25  ;;  %vm1337_vm9 = vmor %vm279_vm5, %vm280_vm6 }
 0x12a   :  { %450 = vst.msk [vmem:[%s1562_s5 + $0x58] sm:$0xff] %vm39_vm0, %v434_v22  ;;  %v397_v28 = vmul.f32 %v372_v3, %v973_v33  ;;  %v427_v19 = vadd.f32 %v1066_v56, %v407_v26  ;;  %v395_v13 = vmul.f32 %v352_v7, %v955_v21  ;;  %vm360_vm8 = vweird.f32 %v755_v5 }
 0x12b   :  { %v277_v29 = vsub.f32 1.5, %v276_v15  ;;  %v356_v30 = vmul.f32 0.5, %v355_v49  ;;  %v406_v31 = vmul.f32 %v1058_v46, %v386_v27  ;;  %vm361_vm10 = vmor %vm359_vm7, %vm360_vm8 }
 0x12c   :  { %v417_v33 = vmul.f32 %v1058_v46, %v397_v28  ;;  %443 = vst.msk [vmem:[%s1562_s5 + $0x20] sm:$0xff] %vm39_vm0, %v427_v19  ;;  %v415_v21 = vmul.f32 %v1058_v46, %v395_v13 }
 0x12d   :  { %v278_v12 = vmul.f32 %v1256_v57, %v277_v29  ;;  %v357_v35 = vsub.f32 1.5, %v356_v30  ;;  %687 = vmatmul.msk.f32.gmra.mxu0 %vm39_vm0, %v425_v17  ;;  %703 = vmatmul.msk.f32.gmra.mxu1 %vm39_vm0, %v425_v17  ;;  %v426_v9 = vadd.f32 %v1066_v56, %v406_v31 }
 0x12e   :  { %v437_v38 = vadd.f32 %v1066_v56, %v417_v33  ;;  %v435_v40 = vadd.f32 %v1066_v56, %v415_v21 }
 0x12f   :  { %v282_v36 = vsel %vm1337_vm9, %v1256_v57, %v278_v12  ;;  %v358_v52 = vmul.f32 %v755_v5, %v357_v35  ;;  %442 = vst.msk [vmem:[%s1562_s5 + $0x18] sm:$0xff] %vm39_vm0, %v426_v9 }
 0x130   :  { %v388_v42 = vmul.f32 %v282_v36, %v976_v34  ;;  %696 = vmatmul.msk.f32.gmra.mxu2 %vm39_vm0, %v434_v22  ;;  %712 = vmatmul.msk.f32.gmra.mxu3 %vm39_vm0, %v434_v22  ;;  %451 = vst.msk [vmem:[%s1562_s5 + $0x60] sm:$0xff] %vm39_vm0, %v435_v40 }
 0x131   :  { %v362_v14 = vsel %vm361_vm10, %v755_v5, %v358_v52  ;;  %453 = vst.msk [vmem:[%s1562_s5 + $0x70] sm:$0xff] %vm39_vm0, %v437_v38 }
 0x132   :  { %v408_v44 = vmul.f32 %v1058_v46, %v388_v42  ;;  %v396_v45 = vmul.f32 %v362_v14, %v982_v37 }
 0x134   :  { %v428_v34 = vadd.f32 %v1066_v56, %v408_v44  ;;  %v416_v63 = vmul.f32 %v1058_v46, %v396_v45 }
 0x135   :  { %688 = vmatmul.msk.f32.gmra.mxu0 %vm39_vm0, %v426_v9  ;;  %704 = vmatmul.msk.f32.gmra.mxu1 %vm39_vm0, %v426_v9 }
 0x136   :  { %444 = vst.msk [vmem:[%s1562_s5 + $0x28] sm:$0xff] %vm39_vm0, %v428_v34  ;;  %v436_v18 = vadd.f32 %v1066_v56, %v416_v63 }
 0x138   :  { %697 = vmatmul.msk.f32.gmra.mxu2 %vm39_vm0, %v435_v40  ;;  %713 = vmatmul.msk.f32.gmra.mxu3 %vm39_vm0, %v435_v40  ;;  %452 = vst.msk [vmem:[%s1562_s5 + $0x68] sm:$0xff] %vm39_vm0, %v436_v18 }
 0x13d   :  { %689 = vmatmul.msk.f32.gmra.mxu0 %vm39_vm0, %v427_v19  ;;  %705 = vmatmul.msk.f32.gmra.mxu1 %vm39_vm0, %v427_v19 }
 0x140   :  { %698 = vmatmul.msk.f32.gmra.mxu2 %vm39_vm0, %v436_v18  ;;  %714 = vmatmul.msk.f32.gmra.mxu3 %vm39_vm0, %v436_v18 }
 0x145   :  { %690 = vmatmul.msk.f32.gmra.mxu0 %vm39_vm0, %v428_v34  ;;  %706 = vmatmul.msk.f32.gmra.mxu1 %vm39_vm0, %v428_v34 }
 0x148   :  { %699 = vmatmul.msk.f32.gmra.mxu2 %vm39_vm0, %v437_v38  ;;  %715 = vmatmul.msk.f32.gmra.mxu3 %vm39_vm0, %v437_v38 }
 0x174   :  { %v166_v37 = vpop.xlane.xlu1 %165  ;;  %v163_v20 = vpop.xlane.xlu2 %162 }
 0x175   :  { %v198_v53 = vmul.f32 %v166_v37, %v882_v32  ;;  %v197_v54 = vmul.f32 %v163_v20, %v882_v32 }
 0x177   :  { %v214_v55 = vadd.f32 1e-05, %v198_v53  ;;  %v213_v50 = vadd.f32 1e-05, %v197_v54 }
 0x179   :  { %756 = vrsqrt.f32 %v214_v55  ;;  %vm299_vm11 = vweird.f32 %v214_v55  ;;  %vm289_vm14 = vweird.f32 %v213_v50 }
 0x17a   :  { %758 = vrsqrt.f32 %v213_v50 }
 0x17d   :  { %v190_v57 = vpop.xlane.xlu0 %189 }
 0x17e   :  { %v206_v41 = vmul.f32 %v190_v57, %v882_v32 }
 0x17f   :  { %v757_v58 = vpop.eup %756 }
 0x180   :  { %v759_v59 = vpop.eup %758  ;;  %v294_v60 = vmul.f32 %v757_v58, %v214_v55  ;;  %v222_v2 = vadd.f32 1e-05, %v206_v41  ;;  %vm300_vm12 = vweird.f32 %v757_v58 }
 0x181   :  { %v284_v61 = vmul.f32 %v759_v59, %v213_v50  ;;  %vm301_vm13 = vmor %vm299_vm11, %vm300_vm12  ;;  %vm290_vm15 = vweird.f32 %v759_v59 }
 0x182   :  { %v295_v6 = vmul.f32 %v757_v58, %v294_v60  ;;  %760 = vrsqrt.f32 %v222_v2  ;;  %vm291_vm1 = vmor %vm289_vm14, %vm290_vm15  ;;  %vm379_vm3 = vweird.f32 %v222_v2 }
 0x183   :  { %v285_v62 = vmul.f32 %v759_v59, %v284_v61 }
 0x184   :  { %v296_v1 = vmul.f32 0.5, %v295_v6 }
 0x185   :  { %v286_v24 = vmul.f32 0.5, %v285_v62 }
 0x186   :  { %v297_v51 = vsub.f32 1.5, %v296_v1 }
 0x187   :  { %v287_v39 = vsub.f32 1.5, %v286_v24 }
 0x188   :  { %v298_v17 = vmul.f32 %v757_v58, %v297_v51  ;;  %v761_v5 = vpop.eup %760 }
 0x189   :  { %v288_v47 = vmul.f32 %v759_v59, %v287_v39  ;;  %v374_v8 = vmul.f32 %v761_v5, %v222_v2  ;;  %vm380_vm2 = vweird.f32 %v761_v5 }
 0x18a   :  { %v302_v32 = vsel %vm301_vm13, %v757_v58, %v298_v17  ;;  %vm381_vm4 = vmor %vm379_vm3, %vm380_vm2 }
 0x18b   :  { %v292_v4 = vsel %vm291_vm1, %v759_v59, %v288_v47  ;;  %v390_v16 = vmul.f32 %v302_v32, %v1022_v10  ;;  %v375_v22 = vmul.f32 %v761_v5, %v374_v8 }
 0x18c   :  { %v389_v3 = vmul.f32 %v292_v4, %v1025_v11 }
 0x18d   :  { %v410_v23 = vmul.f32 %v1058_v46, %v390_v16  ;;  %v376_v48 = vmul.f32 0.5, %v375_v22 }
 0x18e   :  { %v409_v0 = vmul.f32 %v1058_v46, %v389_v3 }
 0x18f   :  { %v430_v15 = vadd.f32 %v1066_v56, %v410_v23  ;;  %v377_v26 = vsub.f32 1.5, %v376_v48 }
 0x190   :  { %v429_v7 = vadd.f32 %v1066_v56, %v409_v0 }
 0x191   :  { %446 = vst.msk [vmem:[%s1562_s5 + $0x38] sm:$0xff] %vm39_vm0, %v430_v15  ;;  %v378_v10 = vmul.f32 %v761_v5, %v377_v26 }
 0x192   :  { %445 = vst.msk [vmem:[%s1562_s5 + $0x30] sm:$0xff] %vm39_vm0, %v429_v7  ;;  %691 = vmatmul.msk.f32.gmra.mxu0 %vm39_vm0, %v429_v7  ;;  %v548_v11 = vpop.f32.mrf.mxu2  ;;  %707 = vmatmul.msk.f32.gmra.mxu1 %vm39_vm0, %v429_v7  ;;  %v633_v49 = vpop.f32.mrf.mxu3 }
 0x193   :  { %580 = vst.msk [vmem:[%s1563_s6 + $0x40] sm:$0xff] %vm39_vm0, %v548_v11  ;;  %v382_v27 = vsel %vm381_vm4, %v761_v5, %v378_v10 }
 0x194   :  { %665 = vst.msk [vmem:[%s1564_s7 + $0x40] sm:$0xff] %vm39_vm0, %v633_v49  ;;  %v398_v28 = vmul.f32 %v382_v27, %v1048_v43 }
 0x196   :  { %v418_v29 = vmul.f32 %v1058_v46, %v398_v28 }
 0x197   :  { %v524_v19 = vpop.f32.mrf.mxu0  ;;  %v609_v13 = vpop.f32.mrf.mxu1 }
 0x198   :  { %v438_v30 = vadd.f32 %v1066_v56, %v418_v29  ;;  %572 = vst.msk [vmem:[%s1563_s6] sm:$0xff] %vm39_vm0, %v524_v19 }
 0x199   :  { %657 = vst.msk [vmem:[%s1564_s7] sm:$0xff] %vm39_vm0, %v609_v13 }
 0x19a   :  { %692 = vmatmul.msk.f32.gmra.mxu0 %vm39_vm0, %v430_v15  ;;  %v551_v25 = vpop.f32.mrf.mxu2  ;;  %708 = vmatmul.msk.f32.gmra.mxu1 %vm39_vm0, %v430_v15  ;;  %v636_v43 = vpop.f32.mrf.mxu3  ;;  %454 = vst.msk [vmem:[%s1562_s5 + $0x78] sm:$0xff] %vm39_vm0, %v438_v30 }
 0x19b   :  { %700 = vmatmul.msk.f32.gmra.mxu2 %vm39_vm0, %v438_v30  ;;  %716 = vmatmul.msk.f32.gmra.mxu3 %vm39_vm0, %v438_v30  ;;  %581 = vst.msk [vmem:[%s1563_s6 + $0x48] sm:$0xff] %vm39_vm0, %v551_v25 }
 0x19c   :  { %666 = vst.msk [vmem:[%s1564_s7 + $0x48] sm:$0xff] %vm39_vm0, %v636_v43 }
 0x1a2   :  { %v527_v46 = vpop.f32.mrf.mxu0  ;;  %v612_v56 = vpop.f32.mrf.mxu1 }
 0x1a3   :  { %573 = vst.msk [vmem:[%s1563_s6 + $0x8] sm:$0xff] %vm39_vm0, %v527_v46 }
 0x1a4   :  { %658 = vst.msk [vmem:[%s1564_s7 + $0x8] sm:$0xff] %vm39_vm0, %v612_v56 }
 0x1aa   :  { %v530_v31 = vpop.f32.mrf.mxu0  ;;  %v615_v33 = vpop.f32.mrf.mxu1 }
 0x1ab   :  { %574 = vst.msk [vmem:[%s1563_s6 + $0x10] sm:$0xff] %vm39_vm0, %v530_v31  ;;  %v554_v12 = vpop.f32.mrf.mxu2  ;;  %v639_v21 = vpop.f32.mrf.mxu3 }
 0x1ac   :  { %659 = vst.msk [vmem:[%s1564_s7 + $0x10] sm:$0xff] %vm39_vm0, %v615_v33 }
 0x1ad   :  { %582 = vst.msk [vmem:[%s1563_s6 + $0x50] sm:$0xff] %vm39_vm0, %v554_v12 }
 0x1ae   :  { %667 = vst.msk [vmem:[%s1564_s7 + $0x50] sm:$0xff] %vm39_vm0, %v639_v21 }
 0x1b2   :  { %v533_v35 = vpop.f32.mrf.mxu0  ;;  %v618_v9 = vpop.f32.mrf.mxu1 }
 0x1b3   :  { %575 = vst.msk [vmem:[%s1563_s6 + $0x18] sm:$0xff] %vm39_vm0, %v533_v35  ;;  %v557_v38 = vpop.f32.mrf.mxu2  ;;  %v642_v36 = vpop.f32.mrf.mxu3 }
 0x1b4   :  { %660 = vst.msk [vmem:[%s1564_s7 + $0x18] sm:$0xff] %vm39_vm0, %v618_v9 }
 0x1b5   :  { %583 = vst.msk [vmem:[%s1563_s6 + $0x58] sm:$0xff] %vm39_vm0, %v557_v38 }
 0x1b6   :  { %668 = vst.msk [vmem:[%s1564_s7 + $0x58] sm:$0xff] %vm39_vm0, %v642_v36 }
 0x1ba   :  { %v536_v40 = vpop.f32.mrf.mxu0  ;;  %v621_v52 = vpop.f32.mrf.mxu1 }
 0x1bb   :  { %576 = vst.msk [vmem:[%s1563_s6 + $0x20] sm:$0xff] %vm39_vm0, %v536_v40  ;;  %v560_v42 = vpop.f32.mrf.mxu2  ;;  %v645_v14 = vpop.f32.mrf.mxu3 }
 0x1bc   :  { %661 = vst.msk [vmem:[%s1564_s7 + $0x20] sm:$0xff] %vm39_vm0, %v621_v52 }
 0x1bd   :  { %584 = vst.msk [vmem:[%s1563_s6 + $0x60] sm:$0xff] %vm39_vm0, %v560_v42 }
 0x1be   :  { %669 = vst.msk [vmem:[%s1564_s7 + $0x60] sm:$0xff] %vm39_vm0, %v645_v14 }
 0x1c2   :  { %v539_v44 = vpop.f32.mrf.mxu0  ;;  %v624_v45 = vpop.f32.mrf.mxu1 }
 0x1c3   :  { %577 = vst.msk [vmem:[%s1563_s6 + $0x28] sm:$0xff] %vm39_vm0, %v539_v44  ;;  %v563_v34 = vpop.f32.mrf.mxu2  ;;  %v648_v63 = vpop.f32.mrf.mxu3 }
 0x1c4   :  { %662 = vst.msk [vmem:[%s1564_s7 + $0x28] sm:$0xff] %vm39_vm0, %v624_v45 }
 0x1c5   :  { %585 = vst.msk [vmem:[%s1563_s6 + $0x68] sm:$0xff] %vm39_vm0, %v563_v34 }
 0x1c6   :  { %670 = vst.msk [vmem:[%s1564_s7 + $0x68] sm:$0xff] %vm39_vm0, %v648_v63 }
 0x1cb   :  { %v566_v18 = vpop.f32.mrf.mxu2  ;;  %v651_v37 = vpop.f32.mrf.mxu3 }
 0x1cc   :  { %586 = vst.msk [vmem:[%s1563_s6 + $0x70] sm:$0xff] %vm39_vm0, %v566_v18 }
 0x1cd   :  { %671 = vst.msk [vmem:[%s1564_s7 + $0x70] sm:$0xff] %vm39_vm0, %v651_v37 }
 0x20f   :  { %v542_v20 = vpop.f32.mrf.mxu0  ;;  %v627_v53 = vpop.f32.mrf.mxu1 }
 0x210   :  { %578 = vst.msk [vmem:[%s1563_s6 + $0x30] sm:$0xff] %vm39_vm0, %v542_v20 }
 0x211   :  { %663 = vst.msk [vmem:[%s1564_s7 + $0x30] sm:$0xff] %vm39_vm0, %v627_v53 }
 0x217   :  { %v545_v54 = vpop.f32.mrf.mxu0  ;;  %v630_v55 = vpop.f32.mrf.mxu1 }
 0x218   :  { %579 = vst.msk [vmem:[%s1563_s6 + $0x38] sm:$0xff] %vm39_vm0, %v545_v54 }
 0x219   :  { %664 = vst.msk [vmem:[%s1564_s7 + $0x38] sm:$0xff] %vm39_vm0, %v630_v55 }
 0x21e   :  { %v569_v50 = vpop.f32.mrf.mxu2  ;;  %v654_v57 = vpop.f32.mrf.mxu3 }
 0x21f   :  { %587 = vst.msk [vmem:[%s1563_s6 + $0x78] sm:$0xff] %vm39_vm0, %v569_v50 }
 0x220   :  { %672 = vst.msk [vmem:[%s1564_s7 + $0x78] sm:$0xff] %vm39_vm0, %v654_v57 }

// kernel: _block_forward.7
= control target key start
LH: loop header
LB: loop body
LE: loop exit
PB: predicated region body
PF: predicated region fallthrough
CT: control target
= control target key end

     0   :  { %vm42_vm0 = vcmask 261120   ;;  %v1544_v18 = vmov 32.0   ;;  %s2762_s0 = inlined_call_operand.vmem [shape: f32[128,32], index: 0, kind: input, shape index: {}]   ;;  %s2763_s1 = inlined_call_operand.vmem [shape: f32[1,32], index: 1, kind: input, shape index: {}]   ;;  %s2764_s2 = inlined_call_operand.vmem [shape: f32[1,32], index: 2, kind: input, shape index: {}]   ;;  %s2765_s3 = inlined_call_operand.vmem [shape: f32[32,128], index: 3, kind: input, shape index: {}]   ;;  %s2766_s4 = inlined_call_operand.vmem [shape: f32[1,128], index: 4, kind: input, shape index: {}]   ;;  %s2767_s5 = inlined_call_operand.vmem [shape: f32[128,32], index: 5, kind: input, shape index: {}]   ;;  %s2768_s6 = inlined_call_operand.vmem [shape: f32[1,32], index: 6, kind: input, shape index: {}]   ;;  %s2769_s7 = inlined_call_operand.vmem [shape: f32[128,32], index: 7, kind: output, shape index: {}]  }
   0x1   :  { %v1588_v0 = vld [vmem:[%s2762_s0 + $0x20] sm:$0xff]  ;;  %v28_v4 = vld [vmem:[%s2762_s0 + $0x10] sm:$0xff]  ;;  %v31_v6 = vld [vmem:[%s2762_s0 + $0x28] sm:$0xff]  ;;  %1461 = vrcp.f32 %v1544_v18 }
   0x2   :  { %v26_v1 = vld [vmem:[%s2762_s0] sm:$0xff]  ;;  %v55_v2 = vsel %vm42_vm0, %v1588_v0, 0.0  ;;  %v49_v5 = vsel %vm42_vm0, %v28_v4, 0.0  ;;  %v27_v7 = vld [vmem:[%s2762_s0 + $0x8] sm:$0xff]  ;;  %v29_v8 = vld [vmem:[%s2762_s0 + $0x18] sm:$0xff]  ;;  %v58_v9 = vsel %vm42_vm0, %v31_v6, 0.0 }
   0x3   :  { %v43_v3 = vsel %vm42_vm0, %v26_v1, 0.0  ;;  %56 = vadd.xlane.f32.xlu2 %v55_v2  ;;  %50 = vadd.xlane.f32.xlu1 %v49_v5  ;;  %v46_v10 = vsel %vm42_vm0, %v27_v7, 0.0  ;;  %v52_v11 = vsel %vm42_vm0, %v29_v8, 0.0  ;;  %v1615_v12 = vld [vmem:[%s2762_s0 + $0x30] sm:$0xff]  ;;  %v1629_v16 = vld [vmem:[%s2762_s0 + $0x58] sm:$0xff]  ;;  %v1636_v19 = vld [vmem:[%s2762_s0 + $0x60] sm:$0xff] }
   0x4   :  { %44 = vadd.xlane.f32.xlu0 %v43_v3  ;;  %v61_v13 = vsel %vm42_vm0, %v1615_v12, 0.0  ;;  %v1622_v14 = vld [vmem:[%s2762_s0 + $0x50] sm:$0xff]  ;;  %v76_v17 = vsel %vm42_vm0, %v1629_v16, 0.0  ;;  %v79_v20 = vsel %vm42_vm0, %v1636_v19, 0.0  ;;  %v1654_v39 = vld [vmem:[%s2762_s0 + $0x38] sm:$0xff]  ;;  %v1674_v50 = vld [vmem:[%s2762_s0 + $0x40] sm:$0xff] }
   0x5   :  { %v73_v15 = vsel %vm42_vm0, %v1622_v14, 0.0  ;;  %v64_v43 = vsel %vm42_vm0, %v1654_v39, 0.0  ;;  %v1681_v52 = vld [vmem:[%s2762_s0 + $0x78] sm:$0xff]  ;;  %v67_v53 = vsel %vm42_vm0, %v1674_v50, 0.0  ;;  %v1694_v58 = vld [vmem:[%s2762_s0 + $0x48] sm:$0xff] }
   0x6   :  { %v88_v54 = vsel %vm42_vm0, %v1681_v52, 0.0  ;;  %v70_v61 = vsel %vm42_vm0, %v1694_v58, 0.0  ;;  %v1708_v2 = vld [vmem:[%s2762_s0 + $0x68] sm:$0xff] }
   0x7   :  { %v1462_v21 = vpop.eup %1461 }
   0x8   :  { %v92_v22 = vmul.f32 32.0, %v1462_v21  ;;  %vm96_vm1 = vweird.f32 %v1462_v21 }
   0xa   :  { %v93_v23 = vsub.f32 1.0, %v92_v22 }
   0xb   :  { %59 = vadd.xlane.f32.xlu2 %v58_v9  ;;  %53 = vadd.xlane.f32.xlu1 %v52_v11  ;;  %v1724_v9 = vld [vmem:[%s2762_s0 + $0x70] sm:$0xff] }
   0xc   :  { %47 = vadd.xlane.f32.xlu0 %v46_v10  ;;  %v94_v24 = vmul.f32 %v1462_v21, %v93_v23 }
   0xe   :  { %v95_v25 = vadd.f32 %v1462_v21, %v94_v24 }
  0x10   :  { %v1640_v26 = vsel %vm96_vm1, %v1462_v21, %v95_v25  ;;  %v442_v21 = vld [vmem:[%s2765_s3] sm:$0xff] }
  0x13   :  { %62 = vadd.xlane.f32.xlu1 %v61_v13 }
  0x1b   :  { %74 = vadd.xlane.f32.xlu1 %v73_v15 }
  0x23   :  { %77 = vadd.xlane.f32.xlu1 %v76_v17  ;;  %v445_v17 = vld [vmem:[%s2765_s3 + $0x18] sm:$0xff] }
  0x24   :  { %510 = vmatpush.msra.mxu0 %v445_v17  ;;  %1420 = vmatpush.msra.mxu3 %v445_v17 }
  0x2b   :  { %80 = vadd.xlane.f32.xlu1 %v79_v20  ;;  %v443_v20 = vld [vmem:[%s2765_s3 + $0x8] sm:$0xff] }
  0x76   :  { %v57_v27 = vpop.xlane.xlu2 %56  ;;  %v51_v32 = vpop.xlane.xlu1 %50 }
  0x77   :  { %v45_v28 = vpop.xlane.xlu0 %44  ;;  %v100_v38 = vmul.f32 %v1640_v26, %v51_v32  ;;  %v102_v57 = vmul.f32 %v1640_v26, %v57_v27 }
  0x78   :  { %v98_v29 = vmul.f32 %v1640_v26, %v45_v28 }
  0x79   :  { %v1666_v45 = vsub.f32 %v28_v4, %v100_v38  ;;  %v1701_v62 = vsub.f32 %v1588_v0, %v102_v57  ;;  %v82_v0 = vsel %vm42_vm0, %v1708_v2, 0.0 }
  0x7a   :  { %v1643_v30 = vsub.f32 %v26_v1, %v98_v29 }
  0x7b   :  { %v132_v51 = vmul.f32 %v1666_v45, %v1666_v45  ;;  %v134_v3 = vmul.f32 %v1701_v62, %v1701_v62 }
  0x7c   :  { %v130_v31 = vmul.f32 %v1643_v30, %v1643_v30 }
  0x7d   :  { %v152_v56 = vsel %vm42_vm0, %v132_v51, 0.0  ;;  %v158_v5 = vsel %vm42_vm0, %v134_v3, 0.0 }
  0x7e   :  { %v146_v33 = vsel %vm42_vm0, %v130_v31, 0.0  ;;  %v60_v34 = vpop.xlane.xlu2 %59  ;;  %v54_v48 = vpop.xlane.xlu1 %53 }
  0x7f   :  { %147 = vadd.xlane.f32.xlu0 %v146_v33  ;;  %v48_v35 = vpop.xlane.xlu0 %47  ;;  %v103_v36 = vmul.f32 %v1640_v26, %v60_v34  ;;  %v101_v49 = vmul.f32 %v1640_v26, %v54_v48 }
  0x80   :  { %v99_v37 = vmul.f32 %v1640_v26, %v48_v35 }
  0x81   :  { %v1656_v40 = vsub.f32 %v31_v6, %v103_v36  ;;  %v1687_v55 = vsub.f32 %v29_v8, %v101_v49 }
  0x82   :  { %v1658_v41 = vsub.f32 %v27_v7, %v99_v37 }
  0x83   :  { %v135_v42 = vmul.f32 %v1656_v40, %v1656_v40  ;;  %v133_v59 = vmul.f32 %v1687_v55, %v1687_v55 }
  0x84   :  { %v131_v44 = vmul.f32 %v1658_v41, %v1658_v41 }
  0x85   :  { %v161_v46 = vsel %vm42_vm0, %v135_v42, 0.0  ;;  %v155_v63 = vsel %vm42_vm0, %v133_v59, 0.0 }
  0x86   :  { %v149_v47 = vsel %vm42_vm0, %v131_v44, 0.0  ;;  %162 = vadd.xlane.f32.xlu1 %v161_v46  ;;  %v63_v60 = vpop.xlane.xlu1 %62 }
  0x87   :  { %65 = vadd.xlane.f32.xlu0 %v64_v43  ;;  %150 = vadd.xlane.f32.xlu2 %v149_v47  ;;  %v104_v1 = vmul.f32 %v1640_v26, %v63_v60 }
  0x89   :  { %v1713_v4 = vsub.f32 %v1615_v12, %v104_v1  ;;  %v85_v12 = vsel %vm42_vm0, %v1724_v9, 0.0 }
  0x8b   :  { %v136_v8 = vmul.f32 %v1713_v4, %v1713_v4 }
  0x8d   :  { %v164_v11 = vsel %vm42_vm0, %v136_v8, 0.0 }
  0x8e   :  { %89 = vadd.xlane.f32.xlu1 %v88_v54  ;;  %v75_v6 = vpop.xlane.xlu1 %74 }
  0x8f   :  { %68 = vadd.xlane.f32.xlu0 %v67_v53  ;;  %153 = vadd.xlane.f32.xlu2 %v152_v56  ;;  %v108_v7 = vmul.f32 %v1640_v26, %v75_v6 }
  0x91   :  { %v1727_v10 = vsub.f32 %v1622_v14, %v108_v7  ;;  %v444_v14 = vld [vmem:[%s2765_s3 + $0x10] sm:$0xff] }
  0x92   :  { %511 = vmatpush.msra.mxu0 %v444_v14  ;;  %1421 = vmatpush.msra.mxu3 %v444_v14 }
  0x93   :  { %v140_v13 = vmul.f32 %v1727_v10, %v1727_v10 }
  0x94   :  { %512 = vmatpush.msra.mxu0 %v443_v20  ;;  %1422 = vmatpush.msra.mxu3 %v443_v20 }
  0x95   :  { %v176_v15 = vsel %vm42_vm0, %v140_v13, 0.0 }
  0x96   :  { %v78_v18 = vpop.xlane.xlu1 %77  ;;  %513 = vmatpush.msra.mxu0 %v442_v21  ;;  %1423 = vmatpush.msra.mxu3 %v442_v21 }
  0x97   :  { %71 = vadd.xlane.f32.xlu0 %v70_v61  ;;  %156 = vadd.xlane.f32.xlu2 %v155_v63  ;;  %v109_v28 = vmul.f32 %v1640_v26, %v78_v18 }
  0x99   :  { %v1755_v37 = vsub.f32 %v1629_v16, %v109_v28 }
  0x9b   :  { %v141_v16 = vmul.f32 %v1755_v37, %v1755_v37 }
  0x9d   :  { %v179_v1 = vsel %vm42_vm0, %v141_v16, 0.0 }
  0x9e   :  { %v81_v25 = vpop.xlane.xlu1 %80 }
  0x9f   :  { %83 = vadd.xlane.f32.xlu0 %v82_v0  ;;  %159 = vadd.xlane.f32.xlu2 %v158_v5  ;;  %v110_v46 = vmul.f32 %v1640_v26, %v81_v25 }
  0xa1   :  { %v1770_v59 = vsub.f32 %v1636_v19, %v110_v46 }
  0xa3   :  { %v142_v13 = vmul.f32 %v1770_v59, %v1770_v59 }
  0xa7   :  { %165 = vadd.xlane.f32.xlu0 %v164_v11  ;;  %86 = vadd.xlane.f32.xlu2 %v85_v12  ;;  %v1790_v11 = vld [vmem:[%s2764_s2] ss:$0 sm:$0xff] }
  0xaf   :  { %177 = vadd.xlane.f32.xlu0 %v176_v15 }
  0xf2   :  { %v148_v22 = vpop.xlane.xlu0 %147 }
  0xf3   :  { %v194_v23 = vmul.f32 %v148_v22, %v1640_v26 }
  0xf5   :  { %v210_v24 = vadd.f32 1e-05, %v194_v23 }
  0xf7   :  { %1463 = vrsqrt.f32 %v210_v24  ;;  %vm232_vm3 = vweird.f32 %v210_v24 }
  0xf9   :  { %v163_v43 = vpop.xlane.xlu1 %162 }
  0xfa   :  { %v66_v27 = vpop.xlane.xlu0 %65  ;;  %v151_v29 = vpop.xlane.xlu2 %150  ;;  %v199_v53 = vmul.f32 %v163_v43, %v1640_v26 }
  0xfb   :  { %v105_v31 = vmul.f32 %v1640_v26, %v66_v27  ;;  %v195_v32 = vmul.f32 %v151_v29, %v1640_v26  ;;  %v182_v27 = vsel %vm42_vm0, %v142_v13, 0.0 }
  0xfc   :  { %v1782_v5 = vadd.f32 1e-05, %v199_v53 }
  0xfd   :  { %v1464_v33 = vpop.eup %1463  ;;  %v1752_v34 = vsub.f32 %v1654_v39, %v105_v31  ;;  %v211_v36 = vadd.f32 1e-05, %v195_v32 }
  0xfe   :  { %v227_v35 = vmul.f32 %v1464_v33, %v210_v24  ;;  %vm233_vm2 = vweird.f32 %v1464_v33  ;;  %vm282_vm14 = vweird.f32 %v1782_v5 }
  0xff   :  { %v137_v38 = vmul.f32 %v1752_v34, %v1752_v34  ;;  %1465 = vrsqrt.f32 %v211_v36  ;;  %vm234_vm4 = vmor %vm232_vm3, %vm233_vm2  ;;  %vm242_vm6 = vweird.f32 %v211_v36 }
 0x100   :  { %v228_v42 = vmul.f32 %v1464_v33, %v227_v35 }
 0x101   :  { %v167_v44 = vsel %vm42_vm0, %v137_v38, 0.0  ;;  %v90_v19 = vpop.xlane.xlu1 %89 }
 0x102   :  { %v229_v47 = vmul.f32 0.5, %v228_v42  ;;  %168 = vadd.xlane.f32.xlu2 %v167_v44  ;;  %v69_v48 = vpop.xlane.xlu0 %68  ;;  %v154_v39 = vpop.xlane.xlu2 %153  ;;  %v113_v20 = vmul.f32 %v1640_v26, %v90_v19 }
 0x103   :  { %v106_v49 = vmul.f32 %v1640_v26, %v69_v48  ;;  %v196_v54 = vmul.f32 %v154_v39, %v1640_v26 }
 0x104   :  { %v230_v51 = vsub.f32 1.5, %v229_v47  ;;  %v1807_v31 = vsub.f32 %v1681_v52, %v113_v20 }
 0x105   :  { %v1767_v56 = vsub.f32 %v1674_v50, %v106_v49  ;;  %v1466_v57 = vpop.eup %1465  ;;  %v1772_v61 = vadd.f32 1e-05, %v196_v54  ;;  %v1780_v50 = vld [vmem:[%s2763_s1] ss:$0 sm:$0xff] }
 0x106   :  { %v231_v60 = vmul.f32 %v1464_v33, %v230_v51  ;;  %v237_v63 = vmul.f32 %v1466_v57, %v211_v36  ;;  %vm243_vm5 = vweird.f32 %v1466_v57  ;;  %v145_v46 = vmul.f32 %v1807_v31, %v1807_v31 }
 0x107   :  { %v138_v3 = vmul.f32 %v1767_v56, %v1767_v56  ;;  %1467 = vrsqrt.f32 %v1772_v61  ;;  %vm244_vm7 = vmor %vm242_vm6, %vm243_vm5  ;;  %vm252_vm9 = vweird.f32 %v1772_v61 }
 0x108   :  { %v235_v0 = vsel %vm234_vm4, %v1464_v33, %v231_v60  ;;  %v238_v6 = vmul.f32 %v1466_v57, %v237_v63  ;;  %1469 = vrsqrt.f32 %v1782_v5  ;;  %v191_v60 = vsel %vm42_vm0, %v145_v46, 0.0 }
 0x109   :  { %v170_v7 = vsel %vm42_vm0, %v138_v3, 0.0  ;;  %v386_v8 = vmul.f32 %v235_v0, %v1643_v30 }
 0x10a   :  { %180 = vadd.xlane.f32.xlu2 %v179_v1  ;;  %171 = vadd.xlane.f32.xlu1 %v170_v7  ;;  %v72_v12 = vpop.xlane.xlu0 %71  ;;  %v239_v15 = vmul.f32 0.5, %v238_v6  ;;  %v157_v17 = vpop.xlane.xlu2 %156 }
 0x10b   :  { %v107_v14 = vmul.f32 %v1640_v26, %v72_v12  ;;  %v406_v18 = vmul.f32 %v1780_v50, %v386_v8  ;;  %v197_v30 = vmul.f32 %v157_v17, %v1640_v26 }
 0x10c   :  { %v240_v21 = vsub.f32 1.5, %v239_v15 }
 0x10d   :  { %v1800_v22 = vsub.f32 %v1694_v58, %v107_v14  ;;  %v426_v23 = vadd.f32 %v1790_v11, %v406_v18  ;;  %v1468_v24 = vpop.eup %1467  ;;  %v213_v25 = vadd.f32 1e-05, %v197_v30 }
 0x10e   :  { %v241_v28 = vmul.f32 %v1466_v57, %v240_v21  ;;  %v247_v29 = vmul.f32 %v1468_v24, %v1772_v61  ;;  %v1812_v36 = vpop.eup %1469  ;;  %vm253_vm8 = vweird.f32 %v1468_v24 }
 0x10f   :  { %1388 = vmatmul.msk.f32.vlgmr.msra.gmra.mxu0 %vm42_vm0, %v426_v23  ;;  %v139_v32 = vmul.f32 %v1800_v22, %v1800_v22  ;;  %1471 = vrsqrt.f32 %v213_v25  ;;  %vm254_vm10 = vmor %vm252_vm9, %vm253_vm8  ;;  %vm262_vm12 = vweird.f32 %v213_v25  ;;  %vm283_vm15 = vweird.f32 %v1812_v36 }
 0x110   :  { %v245_v58 = vsel %vm244_vm7, %v1466_v57, %v241_v28  ;;  %v248_v33 = vmul.f32 %v1468_v24, %v247_v29  ;;  %vm1852_vm2 = vmor %vm282_vm14, %vm283_vm15 }
 0x111   :  { %v173_v35 = vsel %vm42_vm0, %v139_v32, 0.0  ;;  %v387_v42 = vmul.f32 %v245_v58, %v1658_v41  ;;  %v277_v41 = vmul.f32 %v1812_v36, %v1782_v5 }
 0x112   :  { %183 = vadd.xlane.f32.xlu1 %v182_v27  ;;  %174 = vadd.xlane.f32.xlu0 %v173_v35  ;;  %v84_v38 = vpop.xlane.xlu0 %83  ;;  %v249_v43 = vmul.f32 0.5, %v248_v33  ;;  %v160_v44 = vpop.xlane.xlu2 %159 }
 0x113   :  { %v111_v52 = vmul.f32 %v1640_v26, %v84_v38  ;;  %v198_v47 = vmul.f32 %v160_v44, %v1640_v26  ;;  %v407_v48 = vmul.f32 %v1780_v50, %v387_v42  ;;  %v278_v61 = vmul.f32 %v1812_v36, %v277_v41 }
 0x114   :  { %v250_v39 = vsub.f32 1.5, %v249_v43 }
 0x115   :  { %v1821_v49 = vsub.f32 %v1708_v2, %v111_v52  ;;  %v1472_v16 = vpop.eup %1471  ;;  %v214_v51 = vadd.f32 1e-05, %v198_v47  ;;  %v427_v53 = vadd.f32 %v1790_v11, %v407_v48  ;;  %v279_v18 = vmul.f32 0.5, %v278_v61  ;;  %v1903_v52 = vld [vmem:[%s2766_s4] ss:$0 sm:$0xff] }
 0x116   :  { %v251_v54 = vmul.f32 %v1468_v24, %v250_v39  ;;  %v257_v57 = vmul.f32 %v1472_v16, %v213_v25  ;;  %vm263_vm11 = vweird.f32 %v1472_v16 }
 0x117   :  { %v143_v63 = vmul.f32 %v1821_v49, %v1821_v49  ;;  %1473 = vrsqrt.f32 %v214_v51  ;;  %1389 = vmatmul.msk.f32.gmra.mxu0 %vm42_vm0, %v427_v53  ;;  %vm264_vm13 = vmor %vm262_vm12, %vm263_vm11  ;;  %v280_v32 = vsub.f32 1.5, %v279_v18  ;;  %vm272_vm3 = vweird.f32 %v214_v51 }
 0x118   :  { %v255_v2 = vsel %vm254_vm10, %v1468_v24, %v251_v54  ;;  %v258_v1 = vmul.f32 %v1472_v16, %v257_v57 }
 0x119   :  { %v185_v3 = vsel %vm42_vm0, %v143_v63, 0.0  ;;  %v388_v19 = vmul.f32 %v255_v2, %v1666_v45 }
 0x11a   :  { %192 = vadd.xlane.f32.xlu1 %v191_v60  ;;  %186 = vadd.xlane.f32.xlu2 %v185_v3  ;;  %v166_v0 = vpop.xlane.xlu0 %165  ;;  %v259_v6 = vmul.f32 0.5, %v258_v1  ;;  %v87_v7 = vpop.xlane.xlu2 %86 }
 0x11b   :  { %v200_v8 = vmul.f32 %v166_v0, %v1640_v26  ;;  %v112_v12 = vmul.f32 %v1640_v26, %v87_v7  ;;  %v408_v13 = vmul.f32 %v1780_v50, %v388_v19 }
 0x11c   :  { %v260_v15 = vsub.f32 1.5, %v259_v6 }
 0x11d   :  { %v216_v17 = vadd.f32 1e-05, %v200_v8  ;;  %v1474_v14 = vpop.eup %1473  ;;  %v1838_v20 = vsub.f32 %v1724_v9, %v112_v12  ;;  %v428_v30 = vadd.f32 %v1790_v11, %v408_v13 }
 0x11e   :  { %v261_v21 = vmul.f32 %v1472_v16, %v260_v15  ;;  %v267_v45 = vmul.f32 %v1474_v14, %v214_v51  ;;  %vm273_vm1 = vweird.f32 %v1474_v14 }
 0x11f   :  { %1475 = vrsqrt.f32 %v216_v17  ;;  %1390 = vmatmul.msk.f32.gmra.mxu0 %vm42_vm0, %v428_v30  ;;  %v144_v23 = vmul.f32 %v1838_v20, %v1838_v20  ;;  %vm274_vm4 = vmor %vm272_vm3, %vm273_vm1  ;;  %vm292_vm5 = vweird.f32 %v216_v17 }
 0x120   :  { %v265_v24 = vsel %vm264_vm13, %v1472_v16, %v261_v21  ;;  %v268_v27 = vmul.f32 %v1474_v14, %v267_v45 }
 0x121   :  { %v188_v28 = vsel %vm42_vm0, %v144_v23, 0.0  ;;  %v389_v9 = vmul.f32 %v265_v24, %v1687_v55  ;;  %v281_v55 = vmul.f32 %v1812_v36, %v280_v32 }
 0x122   :  { %v178_v29 = vpop.xlane.xlu0 %177  ;;  %v269_v58 = vmul.f32 0.5, %v268_v27  ;;  %189 = vadd.xlane.f32.xlu0 %v188_v28 }
 0x123   :  { %v204_v25 = vmul.f32 %v178_v29, %v1640_v26  ;;  %v409_v33 = vmul.f32 %v1780_v50, %v389_v9  ;;  %v285_v16 = vsel %vm1852_vm2, %v1812_v36, %v281_v55 }
 0x124   :  { %v270_v38 = vsub.f32 1.5, %v269_v58  ;;  %v391_v60 = vmul.f32 %v285_v16, %v1656_v40 }
 0x125   :  { %v1476_v35 = vpop.eup %1475  ;;  %v220_v42 = vadd.f32 1e-05, %v204_v25  ;;  %v429_v44 = vadd.f32 %v1790_v11, %v409_v33 }
 0x126   :  { %v287_v43 = vmul.f32 %v1476_v35, %v216_v17  ;;  %v271_v46 = vmul.f32 %v1474_v14, %v270_v38  ;;  %vm293_vm6 = vweird.f32 %v1476_v35  ;;  %v411_v36 = vmul.f32 %v1780_v50, %v391_v60 }
 0x127   :  { %1477 = vrsqrt.f32 %v220_v42  ;;  %1391 = vmatmul.msk.f32.gmra.mxu0 %vm42_vm0, %v429_v44  ;;  %vm294_vm7 = vmor %vm292_vm5, %vm293_vm6  ;;  %vm332_vm8 = vweird.f32 %v220_v42 }
 0x128   :  { %v288_v5 = vmul.f32 %v1476_v35, %v287_v43  ;;  %v275_v47 = vsel %vm274_vm4, %v1474_v14, %v271_v46  ;;  %v431_v0 = vadd.f32 %v1790_v11, %v411_v36  ;;  %v1279_v36 = vld [vmem:[%s2767_s5 + $0x60] sm:$0xff] }
 0x129   :  { %v390_v39 = vmul.f32 %v275_v47, %v1701_v62 }
 0x12a   :  { %v289_v48 = vmul.f32 0.5, %v288_v5  ;;  %v1281_v5 = vld [vmem:[%s2767_s5 + $0x70] sm:$0xff] }
 0x12b   :  { %v410_v53 = vmul.f32 %v1780_v50, %v390_v39 }
 0x12c   :  { %v290_v41 = vsub.f32 1.5, %v289_v48 }
 0x12d   :  { %v1478_v54 = vpop.eup %1477  ;;  %v430_v57 = vadd.f32 %v1790_v11, %v410_v53  ;;  %v1280_v53 = vld [vmem:[%s2767_s5 + $0x68] sm:$0xff] }
 0x12e   :  { %v327_v51 = vmul.f32 %v1478_v54, %v220_v42  ;;  %v291_v63 = vmul.f32 %v1476_v35, %v290_v41  ;;  %vm333_vm9 = vweird.f32 %v1478_v54  ;;  %v1282_v42 = vld [vmem:[%s2767_s5 + $0x78] sm:$0xff] }
 0x12f   :  { %1392 = vmatmul.msk.f32.gmra.mxu0 %vm42_vm0, %v430_v57  ;;  %vm334_vm10 = vmor %vm332_vm8, %vm333_vm9  ;;  %1287 = vmatpush.msra.mxu1 %v1282_v42 }
 0x130   :  { %v328_v2 = vmul.f32 %v1478_v54, %v327_v51  ;;  %v295_v1 = vsel %vm294_vm7, %v1476_v35, %v291_v63  ;;  %1424 = vmatpush.msra.mxu2 %v1282_v42  ;;  %1425 = vmatpush.msrb.mxu3 %v1282_v42 }
 0x131   :  { %v392_v19 = vmul.f32 %v295_v1, %v1713_v4  ;;  %1288 = vmatpush.msra.mxu1 %v1281_v5 }
 0x132   :  { %v329_v62 = vmul.f32 0.5, %v328_v2  ;;  %1426 = vmatpush.msra.mxu2 %v1281_v5  ;;  %1427 = vmatpush.msrb.mxu3 %v1281_v5 }
 0x133   :  { %v412_v7 = vmul.f32 %v1780_v50, %v392_v19  ;;  %1289 = vmatpush.msra.mxu1 %v1280_v53 }
 0x134   :  { %v330_v3 = vsub.f32 1.5, %v329_v62  ;;  %1428 = vmatpush.msra.mxu2 %v1280_v53  ;;  %1429 = vmatpush.msrb.mxu3 %v1280_v53 }
 0x135   :  { %v432_v13 = vadd.f32 %v1790_v11, %v412_v7  ;;  %1290 = vmatpush.msra.mxu1 %v1279_v36 }
 0x136   :  { %v331_v61 = vmul.f32 %v1478_v54, %v330_v3  ;;  %1430 = vmatpush.msra.mxu2 %v1279_v36  ;;  %1431 = vmatpush.msrb.mxu3 %v1279_v36 }
 0x137   :  { %1393 = vmatmul.msk.f32.gmra.mxu0 %vm42_vm0, %v431_v0 }
 0x138   :  { %v335_v6 = vsel %vm334_vm10, %v1478_v54, %v331_v61 }
 0x139   :  { %v396_v40 = vmul.f32 %v335_v6, %v1727_v10  ;;  %v1278_v6 = vld [vmem:[%s2767_s5 + $0x58] sm:$0xff] }
 0x13a   :  { %1291 = vmatpush.msra.mxu1 %v1278_v6  ;;  %1432 = vmatpush.msra.mxu2 %v1278_v6 }
 0x13b   :  { %v416_v8 = vmul.f32 %v1780_v50, %v396_v40  ;;  %1433 = vmatpush.msrb.mxu3 %v1278_v6 }
 0x13d   :  { %v436_v12 = vadd.f32 %v1790_v11, %v416_v8 }
 0x13f   :  { %1398 = vmatmul.msk.f32.vlgmr.msra.gmra.mxu3 %vm42_vm0, %v436_v12  ;;  %1394 = vmatmul.msk.f32.gmra.mxu0 %vm42_vm0, %v432_v13 }
 0x175   :  { %v169_v15 = vpop.xlane.xlu2 %168 }
 0x176   :  { %v201_v4 = vmul.f32 %v169_v15, %v1640_v26 }
 0x178   :  { %v217_v17 = vadd.f32 1e-05, %v201_v4 }
 0x17a   :  { %1479 = vrsqrt.f32 %v217_v17  ;;  %vm302_vm12 = vweird.f32 %v217_v17 }
 0x17d   :  { %v181_v14 = vpop.xlane.xlu2 %180  ;;  %v172_v18 = vpop.xlane.xlu1 %171 }
 0x17e   :  { %v205_v10 = vmul.f32 %v181_v14, %v1640_v26  ;;  %v202_v30 = vmul.f32 %v172_v18, %v1640_v26  ;;  %v1277_v14 = vld [vmem:[%s2767_s5 + $0x50] sm:$0xff] }
 0x17f   :  { %1292 = vmatpush.msra.mxu1 %v1277_v14  ;;  %1434 = vmatpush.msra.mxu2 %v1277_v14 }
 0x180   :  { %v1480_v21 = vpop.eup %1479  ;;  %v1879_v45 = vadd.f32 1e-05, %v205_v10  ;;  %v1881_v23 = vadd.f32 1e-05, %v202_v30  ;;  %1435 = vmatpush.msrb.mxu3 %v1277_v14 }
 0x181   :  { %v297_v24 = vmul.f32 %v1480_v21, %v217_v17  ;;  %vm303_vm11 = vweird.f32 %v1480_v21 }
 0x182   :  { %1481 = vrsqrt.f32 %v1879_v45  ;;  %vm304_vm13 = vmor %vm302_vm12, %vm303_vm11  ;;  %vm342_vm1 = vweird.f32 %v1879_v45  ;;  %vm312_vm3 = vweird.f32 %v1881_v23 }
 0x183   :  { %v298_v27 = vmul.f32 %v1480_v21, %v297_v24  ;;  %1483 = vrsqrt.f32 %v1881_v23 }
 0x185   :  { %v299_v28 = vmul.f32 0.5, %v298_v27  ;;  %v184_v29 = vpop.xlane.xlu1 %183  ;;  %v175_v9 = vpop.xlane.xlu0 %174 }
 0x186   :  { %v206_v32 = vmul.f32 %v184_v29, %v1640_v26  ;;  %v203_v58 = vmul.f32 %v175_v9, %v1640_v26 }
 0x187   :  { %v300_v25 = vsub.f32 1.5, %v299_v28 }
 0x188   :  { %v1887_v33 = vpop.eup %1481  ;;  %v1889_v35 = vadd.f32 1e-05, %v206_v32  ;;  %v1891_v38 = vadd.f32 1e-05, %v203_v58 }
 0x189   :  { %v1896_v43 = vpop.eup %1483  ;;  %v301_v44 = vmul.f32 %v1480_v21, %v300_v25  ;;  %v337_v55 = vmul.f32 %v1887_v33, %v1879_v45  ;;  %vm343_vm14 = vweird.f32 %v1887_v33  ;;  %v1276_v45 = vld [vmem:[%s2767_s5 + $0x48] sm:$0xff]  ;;  %v1275_v25 = vld [vmem:[%s2767_s5 + $0x40] sm:$0xff] }
 0x18a   :  { %v307_v46 = vmul.f32 %v1896_v43, %v1881_v23  ;;  %1485 = vrsqrt.f32 %v1889_v35  ;;  %vm313_vm15 = vweird.f32 %v1896_v43  ;;  %vm1948_vm2 = vmor %vm342_vm1, %vm343_vm14  ;;  %1293 = vmatpush.msra.mxu1 %v1276_v45  ;;  %1436 = vmatpush.msra.mxu2 %v1276_v45  ;;  %vm352_vm6 = vweird.f32 %v1889_v35 }
 0x18b   :  { %v305_v47 = vsel %vm304_vm13, %v1480_v21, %v301_v44  ;;  %v338_v48 = vmul.f32 %v1887_v33, %v337_v55  ;;  %1487 = vrsqrt.f32 %v1891_v38  ;;  %vm314_vm4 = vmor %vm312_vm3, %vm313_vm15  ;;  %1437 = vmatpush.msrb.mxu3 %v1276_v45  ;;  %v1274_v44 = vld [vmem:[%s2767_s5 + $0x38] sm:$0xff]  ;;  %vm322_vm8 = vweird.f32 %v1891_v38  ;;  %v1269_v45 = vld [vmem:[%s2767_s5 + $0x10] sm:$0xff] }
 0x18c   :  { %v308_v39 = vmul.f32 %v1896_v43, %v307_v46  ;;  %v515_v16 = vpop.f32.mrf.mxu0  ;;  %v393_v41 = vmul.f32 %v305_v47, %v1752_v34  ;;  %1294 = vmatpush.msra.mxu1 %v1275_v25  ;;  %1438 = vmatpush.msra.mxu2 %v1275_v25 }
 0x18d   :  { %v339_v54 = vmul.f32 0.5, %v338_v48  ;;  %v1919_v51 = vadd.f32 %v1903_v52, %v515_v16  ;;  %v193_v57 = vpop.xlane.xlu1 %192  ;;  %v187_v60 = vpop.xlane.xlu2 %186  ;;  %1439 = vmatpush.msrb.mxu3 %v1275_v25  ;;  %v1273_v16 = vld [vmem:[%s2767_s5 + $0x30] sm:$0xff] }
 0x18e   :  { %v309_v63 = vmul.f32 0.5, %v308_v39  ;;  %v209_v2 = vmul.f32 %v193_v57, %v1640_v26  ;;  %v207_v62 = vmul.f32 %v187_v60, %v1640_v26  ;;  %v413_v34 = vmul.f32 %v1780_v50, %v393_v41  ;;  %1295 = vmatpush.msra.mxu1 %v1274_v44  ;;  %1440 = vmatpush.msra.mxu2 %v1274_v44 }
 0x18f   :  { %v340_v1 = vsub.f32 1.5, %v339_v54  ;;  %v1944_v12 = vmul.f32 0.70710677, %v1919_v51  ;;  %1441 = vmatpush.msrb.mxu3 %v1274_v44 }
 0x190   :  { %v1928_v3 = vpop.eup %1485  ;;  %v310_v61 = vsub.f32 1.5, %v309_v63  ;;  %v1931_v0 = vadd.f32 1e-05, %v207_v62  ;;  %v433_v19 = vadd.f32 %v1790_v11, %v413_v34  ;;  %v1956_v17 = vadd.f32 1e-05, %v209_v2  ;;  %1296 = vmatpush.msra.mxu1 %v1273_v16  ;;  %1442 = vmatpush.msra.mxu2 %v1273_v16  ;;  %v1272_v63 = vld [vmem:[%s2767_s5 + $0x28] sm:$0xff] }
 0x191   :  { %v1937_v40 = vpop.eup %1487  ;;  %v341_v7 = vmul.f32 %v1887_v33, %v340_v1  ;;  %v347_v8 = vmul.f32 %v1928_v3, %v1889_v35  ;;  %v595_v24 = vmul.f32 %v1944_v12, %v1944_v12  ;;  %vm353_vm5 = vweird.f32 %v1928_v3  ;;  %1443 = vmatpush.msrb.mxu3 %v1273_v16 }
 0x192   :  { %v311_v15 = vmul.f32 %v1896_v43, %v310_v61  ;;  %v317_v4 = vmul.f32 %v1937_v40, %v1891_v38  ;;  %1395 = vmatmul.msk.f32.gmra.mxu0 %vm42_vm0, %v433_v19  ;;  %1489 = vrsqrt.f32 %v1931_v0  ;;  %vm323_vm7 = vweird.f32 %v1937_v40  ;;  %vm2005_vm9 = vmor %vm352_vm6, %vm353_vm5  ;;  %1297 = vmatpush.msra.mxu1 %v1272_v63  ;;  %v1271_v19 = vld [vmem:[%s2767_s5 + $0x20] sm:$0xff] }
 0x193   :  { %v345_v18 = vsel %vm1948_vm2, %v1887_v33, %v341_v7  ;;  %v348_v10 = vmul.f32 %v1928_v3, %v347_v8  ;;  %1491 = vrsqrt.f32 %v1956_v17  ;;  %vm2020_vm10 = vmor %vm322_vm8, %vm323_vm7  ;;  %1444 = vmatpush.msra.mxu2 %v1272_v63  ;;  %1445 = vmatpush.msrb.mxu3 %v1272_v63  ;;  %vm362_vm12 = vweird.f32 %v1931_v0 }
 0x194   :  { %v315_v30 = vsel %vm314_vm4, %v1896_v43, %v311_v15  ;;  %v318_v21 = vmul.f32 %v1937_v40, %v317_v4  ;;  %v518_v27 = vpop.f32.mrf.mxu0  ;;  %v397_v29 = vmul.f32 %v345_v18, %v1755_v37  ;;  %1298 = vmatpush.msra.mxu1 %v1271_v19  ;;  %v1270_v15 = vld [vmem:[%s2767_s5 + $0x18] sm:$0xff]  ;;  %vm382_vm14 = vweird.f32 %v1956_v17 }
 0x195   :  { %v349_v23 = vmul.f32 0.5, %v348_v10  ;;  %v394_v28 = vmul.f32 %v315_v30, %v1767_v56  ;;  %v1980_v32 = vadd.f32 %v1903_v52, %v518_v27  ;;  %v190_v58 = vpop.xlane.xlu0 %189  ;;  %1446 = vmatpush.msra.mxu2 %v1271_v19  ;;  %1447 = vmatpush.msrb.mxu3 %v1271_v19 }
 0x196   :  { %v319_v9 = vmul.f32 0.5, %v318_v21  ;;  %v208_v56 = vmul.f32 %v190_v58, %v1640_v26  ;;  %v1998_v26 = vmin.f32 %v595_v24, 16.0  ;;  %v417_v46 = vmul.f32 %v1780_v50, %v397_v29  ;;  %1299 = vmatpush.msra.mxu1 %v1270_v15 }
 0x197   :  { %v350_v33 = vsub.f32 1.5, %v349_v23  ;;  %v414_v37 = vmul.f32 %v1780_v50, %v394_v28  ;;  %v1991_v43 = vmul.f32 0.70710677, %v1980_v32  ;;  %1448 = vmatpush.msra.mxu2 %v1270_v15  ;;  %1449 = vmatpush.msrb.mxu3 %v1270_v15 }
 0x198   :  { %v320_v42 = vsub.f32 1.5, %v319_v9  ;;  %v2001_v35 = vpop.eup %1489  ;;  %v2012_v38 = vadd.f32 1e-05, %v208_v56  ;;  %v597_v2 = vmul.f32 2.1237322e-06, %v1998_v26  ;;  %v437_v1 = vadd.f32 %v1790_v11, %v417_v46  ;;  %1300 = vmatpush.msra.mxu1 %v1269_v45  ;;  %v1268_v9 = vld [vmem:[%s2767_s5 + $0x8] sm:$0xff] }
 0x199   :  { %v351_v55 = vmul.f32 %v1928_v3, %v350_v33  ;;  %v635_v48 = vmul.f32 %v1991_v43, %v1991_v43  ;;  %v434_v39 = vadd.f32 %v1790_v11, %v414_v37  ;;  %v357_v53 = vmul.f32 %v2001_v35, %v1931_v0  ;;  %v2026_v54 = vpop.eup %1491  ;;  %1450 = vmatpush.msra.mxu2 %v1269_v45  ;;  %v1267_v46 = vld [vmem:[%s2767_s5] sm:$0xff] }
 0x19a   :  { %v321_v47 = vmul.f32 %v1937_v40, %v320_v42  ;;  %1493 = vrsqrt.f32 %v2012_v38  ;;  %v377_v6 = vmul.f32 %v2026_v54, %v1956_v17  ;;  %v608_v8 = vmul.f32 3.8918573e-05, %v1998_v26  ;;  %1399 = vmatmul.msk.f32.gmra.mxu3 %vm42_vm0, %v437_v1  ;;  %1301 = vmatpush.msra.mxu1 %v1268_v9 }
 0x19b   :  { %v355_v57 = vsel %vm2005_vm9, %v1928_v3, %v351_v55  ;;  %1396 = vmatmul.msk.f32.gmra.mxu0 %vm42_vm0, %v434_v39  ;;  %v358_v62 = vmul.f32 %v2001_v35, %v357_v53  ;;  %v2041_v36 = vmin.f32 %v635_v48, 16.0  ;;  %v598_v4 = vadd.f32 0.00028619796, %v597_v2  ;;  %1452 = vmatpush.msra.mxu2 %v1268_v9 }
 0x19c   :  { %v325_v60 = vsel %vm2020_vm10, %v1937_v40, %v321_v47  ;;  %v521_v34 = vpop.f32.mrf.mxu0  ;;  %v398_v7 = vmul.f32 %v355_v57, %v1770_v59  ;;  %vm363_vm11 = vweird.f32 %v2001_v35  ;;  %v378_v23 = vmul.f32 %v2026_v54, %v377_v6  ;;  %1451 = vmatpush.msrb.mxu3 %v1269_v45  ;;  %1302 = vmatpush.msra.mxu1 %v1267_v46 }
 0x19d   :  { %v2045_v3 = vadd.f32 %v1903_v52, %v521_v34  ;;  %v395_v61 = vmul.f32 %v325_v60, %v1800_v22  ;;  %v359_v40 = vmul.f32 0.5, %v358_v62  ;;  %v637_v10 = vmul.f32 2.1237322e-06, %v2041_v36  ;;  %vm364_vm13 = vmor %vm362_vm12, %vm363_vm11  ;;  %1454 = vmatpush.msra.mxu2 %v1267_v46 }
 0x19e   :  { %v418_v59 = vmul.f32 %v1780_v50, %v398_v7  ;;  %v609_v0 = vadd.f32 0.001143296, %v608_v8  ;;  %v599_v58 = vmul.f32 %v598_v4, %v1998_v26  ;;  %v379_v5 = vmul.f32 0.5, %v378_v23  ;;  %1453 = vmatpush.msrb.mxu3 %v1268_v9 }
 0x19f   :  { %v2057_v13 = vmul.f32 0.70710677, %v2045_v3  ;;  %v415_v22 = vmul.f32 %v1780_v50, %v395_v61  ;;  %v360_v14 = vsub.f32 1.5, %v359_v40  ;;  %v638_v37 = vadd.f32 0.00028619796, %v637_v10 }
 0x1a0   :  { %v2065_v18 = vpop.eup %1493  ;;  %v438_v29 = vadd.f32 %v1790_v11, %v418_v59  ;;  %v610_v47 = vmul.f32 %v609_v0, %v1998_v26  ;;  %v600_v41 = vadd.f32 0.0036580483, %v599_v58  ;;  %vm372_vm1 = vweird.f32 %v2012_v38  ;;  %1455 = vmatpush.msrb.mxu3 %v1267_v46 }
 0x1a1   :  { %v675_v30 = vmul.f32 %v2057_v13, %v2057_v13  ;;  %v435_v21 = vadd.f32 %v1790_v11, %v415_v22  ;;  %v361_v24 = vmul.f32 %v2001_v35, %v360_v14  ;;  %v367_v27 = vmul.f32 %v2065_v18, %v2012_v38 }
 0x1a2   :  { %1400 = vmatmul.msk.f32.gmra.mxu3 %vm42_vm0, %v438_v29  ;;  %vm373_vm15 = vweird.f32 %v2065_v18  ;;  %v639_v53 = vmul.f32 %v638_v37, %v2041_v36  ;;  %v611_v57 = vadd.f32 0.014752088, %v610_v47  ;;  %v380_v60 = vsub.f32 1.5, %v379_v5 }
 0x1a3   :  { %v2081_v28 = vmin.f32 %v675_v30, 16.0  ;;  %1397 = vmatmul.msk.f32.gmra.mxu0 %vm42_vm0, %v435_v21  ;;  %v365_v25 = vsel %vm364_vm13, %v2001_v35, %v361_v24  ;;  %v368_v33 = vmul.f32 %v2065_v18, %v367_v27  ;;  %v648_v2 = vmul.f32 3.8918573e-05, %v2041_v36  ;;  %vm374_vm3 = vmor %vm372_vm1, %vm373_vm15 }
 0x1a4   :  { %v524_v56 = vpop.f32.mrf.mxu0  ;;  %v399_v55 = vmul.f32 %v365_v25, %v1821_v49  ;;  %vm383_vm2 = vweird.f32 %v2026_v54  ;;  %v612_v61 = vmul.f32 %v611_v57, %v1998_v26  ;;  %v601_v8 = vmul.f32 %v600_v41, %v1998_v26 }
 0x1a5   :  { %v677_v42 = vmul.f32 2.1237322e-06, %v2081_v28  ;;  %v2093_v44 = vadd.f32 %v1903_v52, %v524_v56  ;;  %v369_v35 = vmul.f32 0.5, %v368_v33  ;;  %v688_v62 = vmul.f32 3.8918573e-05, %v2081_v28  ;;  %vm2128_vm4 = vmor %vm382_vm14, %vm383_vm2 }
 0x1a6   :  { %v419_v39 = vmul.f32 %v1780_v50, %v399_v55  ;;  %v649_v40 = vadd.f32 0.001143296, %v648_v2  ;;  %v640_v22 = vadd.f32 0.0036580483, %v639_v53  ;;  %v381_v4 = vmul.f32 %v2026_v54, %v380_v60 }
 0x1a7   :  { %v678_v48 = vadd.f32 0.00028619796, %v677_v42  ;;  %v370_v49 = vsub.f32 1.5, %v369_v35  ;;  %v2105_v16 = vmul.f32 0.70710677, %v2093_v44 }
 0x1a8   :  { %v439_v1 = vadd.f32 %v1790_v11, %v419_v39  ;;  %v689_v7 = vadd.f32 0.001143296, %v688_v62  ;;  %v613_v14 = vadd.f32 0.112945676, %v612_v61  ;;  %v650_v59 = vmul.f32 %v649_v40, %v2041_v36 }
 0x1a9   :  { %v371_v63 = vmul.f32 %v2065_v18, %v370_v49  ;;  %v679_v34 = vmul.f32 %v678_v48, %v2081_v28  ;;  %v715_v19 = vmul.f32 %v2105_v16, %v2105_v16  ;;  %v602_v24 = vadd.f32 0.05243302, %v601_v8 }
 0x1aa   :  { %v690_v10 = vmul.f32 %v689_v7, %v2081_v28  ;;  %1401 = vmatmul.msk.f32.gmra.mxu3 %vm42_vm0, %v439_v1  ;;  %v614_v45 = vmul.f32 %v613_v14, %v1998_v26  ;;  %v651_v23 = vadd.f32 0.014752088, %v650_v59  ;;  %v641_v27 = vmul.f32 %v640_v22, %v2041_v36 }
 0x1ab   :  { %v375_v38 = vsel %vm374_vm3, %v2065_v18, %v371_v63  ;;  %v680_v30 = vadd.f32 0.0036580483, %v679_v34  ;;  %v2134_v21 = vmin.f32 %v715_v19, 16.0  ;;  %v385_v17 = vsel %vm2128_vm4, %v2026_v54, %v381_v4 }
 0x1ac   :  { %v527_v6 = vpop.f32.mrf.mxu0  ;;  %v400_v15 = vmul.f32 %v375_v38, %v1838_v20  ;;  %v691_v0 = vadd.f32 0.014752088, %v690_v10  ;;  %v615_v9 = vadd.f32 0.4994258, %v614_v45  ;;  %v652_v58 = vmul.f32 %v651_v23, %v2041_v36 }
 0x1ad   :  { %v2142_v29 = vadd.f32 %v1903_v52, %v527_v6  ;;  %v681_v25 = vmul.f32 %v680_v30, %v2081_v28  ;;  %v717_v37 = vmul.f32 2.1237322e-06, %v2134_v21  ;;  %v603_v54 = vmul.f32 %v602_v24, %v1998_v26 }
 0x1ae   :  { %v420_v20 = vmul.f32 %v1780_v50, %v400_v15  ;;  %v692_v56 = vmul.f32 %v691_v0, %v2081_v28  ;;  %v616_v55 = vmul.f32 %v615_v9, %v1998_v26  ;;  %v653_v46 = vadd.f32 0.112945676, %v652_v58 }
 0x1af   :  { %v642_v5 = vadd.f32 0.05243302, %v641_v27  ;;  %v401_v35 = vmul.f32 %v385_v17, %v1807_v31  ;;  %v2153_v48 = vmul.f32 0.70710677, %v2142_v29  ;;  %v682_v53 = vadd.f32 0.05243302, %v681_v25 }
 0x1b0   :  { %v440_v33 = vadd.f32 %v1790_v11, %v420_v20  ;;  %v693_v47 = vadd.f32 0.112945676, %v692_v56  ;;  %v617_v49 = vadd.f32 1.0, %v616_v55  ;;  %v654_v41 = vmul.f32 %v653_v46, %v2041_v36 }
 0x1b1   :  { %v718_v60 = vadd.f32 0.00028619796, %v717_v37  ;;  %v604_v63 = vadd.f32 0.18741608, %v603_v54  ;;  %v643_v31 = vmul.f32 %v642_v5, %v2041_v36  ;;  %v421_v2 = vmul.f32 %v1780_v50, %v401_v35 }
 0x1b2   :  { %1402 = vmatmul.msk.f32.gmra.mxu3 %vm42_vm0, %v440_v33  ;;  %v694_v57 = vmul.f32 %v693_v47, %v2081_v28  ;;  %1495 = vrcp.f32 %v617_v49  ;;  %v755_v62 = vmul.f32 %v2153_v48, %v2153_v48  ;;  %v655_v1 = vadd.f32 0.4994258, %v654_v41 }
 0x1b3   :  { %v683_v38 = vmul.f32 %v682_v53, %v2081_v28  ;;  %v719_v19 = vmul.f32 %v718_v60, %v2134_v21  ;;  %v728_v40 = vmul.f32 3.8918573e-05, %v2134_v21  ;;  %v605_v7 = vmul.f32 %v604_v63, %v1998_v26 }
 0x1b4   :  { %v530_v42 = vpop.f32.mrf.mxu0  ;;  %v695_v61 = vadd.f32 0.4994258, %v694_v57  ;;  %v656_v6 = vmul.f32 %v655_v1, %v2041_v36  ;;  %v644_v8 = vadd.f32 0.18741608, %v643_v31  ;;  %v441_v50 = vadd.f32 %v1790_v11, %v421_v2 }
 0x1b5   :  { %v2156_v39 = vadd.f32 %v1903_v52, %v530_v42  ;;  %v2174_v4 = vmin.f32 %v755_v62, 16.0  ;;  %v684_v18 = vadd.f32 0.18741608, %v683_v38  ;;  %v720_v20 = vadd.f32 0.0036580483, %v719_v19 }
 0x1b6   :  { %v2178_v59 = vadd.f32 1.0, %v656_v6  ;;  %v696_v10 = vmul.f32 %v695_v61, %v2081_v28  ;;  %v729_v11 = vadd.f32 0.001143296, %v728_v40  ;;  %v606_v45 = vadd.f32 1.1283791, %v605_v7 }
 0x1b7   :  { %v2166_v34 = vmul.f32 0.70710677, %v2156_v39  ;;  %v645_v23 = vmul.f32 %v644_v8, %v2041_v36  ;;  %v757_v27 = vmul.f32 2.1237322e-06, %v2174_v4  ;;  %v629_v17 = vand.u32 2147483648, %v617_v49 }
 0x1b8   :  { %v1496_v15 = vpop.eup %1495  ;;  %1497 = vrcp.f32 %v2178_v59  ;;  %v2190_v9 = vadd.f32 1.0, %v696_v10  ;;  %v685_v58 = vmul.f32 %v684_v18, %v2081_v28  ;;  %v627_v33 = vand.u32 2147483647, %v617_v49 }
 0x1b9   :  { %v795_v14 = vmul.f32 %v2166_v34, %v2166_v34  ;;  %v619_v30 = vmul.f32 %v1496_v15, %v617_v49  ;;  %vm624_vm5 = vweird.f32 %v1496_v15  ;;  %v721_v56 = vmul.f32 %v720_v20, %v2134_v21 }
 0x1ba   :  { %1403 = vmatmul.msk.f32.gmra.mxu3 %vm42_vm0, %v441_v50  ;;  %v730_v36 = vmul.f32 %v729_v11, %v2134_v21  ;;  %v607_v42 = vmul.f32 %v606_v45, %v1944_v12  ;;  %v646_v55 = vadd.f32 1.1283791, %v645_v23  ;;  %vm623_vm6 = vweird.f32 %v617_v49 }
 0x1bb   :  { %v620_v24 = vsub.f32 1.0, %v619_v30  ;;  %v2188_v0 = vmin.f32 %v795_v14, 16.0  ;;  %v758_v5 = vadd.f32 0.00028619796, %v757_v27  ;;  %vm625_vm7 = vmor %vm623_vm6, %vm624_vm5  ;;  %v630_v28 = vor.u32 1.1754944e-38, %v629_v17 }
 0x1bc   :  { %v533_v22 = vpop.f32.mrf.mxu0  ;;  %1499 = vrcp.f32 %v2190_v9  ;;  %v686_v47 = vadd.f32 1.1283791, %v685_v58  ;;  %vm628_vm8 = vcmp.eq.f32.partialorder %v627_v33, 8.507059e+37  ;;  %v722_v57 = vadd.f32 0.05243302, %v721_v56 }
 0x1bd   :  { %v2183_v26 = vadd.f32 %v1903_v52, %v533_v22  ;;  %v621_v25 = vmul.f32 %v1496_v15, %v620_v24  ;;  %v797_v35 = vmul.f32 2.1237322e-06, %v2188_v0  ;;  %v731_v63 = vadd.f32 0.014752088, %v730_v36 }
 0x1be   :  { %v1498_v54 = vpop.eup %1497  ;;  %v563_v49 = vmul.f32 0.5, %v1919_v51  ;;  %v564_v31 = vmul.f32 0.5, %v1980_v32  ;;  %v647_v1 = vmul.f32 %v646_v55, %v1991_v43  ;;  %v759_v61 = vmul.f32 %v758_v5, %v2174_v4 }
 0x1bf   :  { %v2195_v37 = vmul.f32 0.70710677, %v2183_v26  ;;  %v622_v46 = vadd.f32 %v1496_v15, %v621_v25  ;;  %v659_v53 = vmul.f32 %v1498_v54, %v2178_v59  ;;  %v798_v38 = vadd.f32 0.00028619796, %v797_v35 }
 0x1c0   :  { %v669_v19 = vand.u32 2147483648, %v2178_v59  ;;  %vm664_vm9 = vweird.f32 %v1498_v54  ;;  %v667_v7 = vand.u32 2147483647, %v2178_v59  ;;  %v687_v50 = vmul.f32 %v686_v47, %v2057_v13 }
 0x1c1   :  { %v626_v41 = vsel %vm625_vm7, %v1496_v15, %v622_v46  ;;  %v835_v12 = vmul.f32 %v2195_v37, %v2195_v37  ;;  %v660_v62 = vsub.f32 1.0, %v659_v53  ;;  %v723_v51 = vmul.f32 %v722_v57, %v2134_v21 }
 0x1c2   :  { %v631_v60 = vsel %vm628_vm8, %v630_v28, %v626_v41  ;;  %v1500_v8 = vpop.eup %1499  ;;  %v732_v22 = vmul.f32 %v731_v63, %v2134_v21  ;;  %vm663_vm10 = vweird.f32 %v2178_v59  ;;  %v768_v14 = vmul.f32 3.8918573e-05, %v2174_v4 }
 0x1c3   :  { %v632_v2 = vmul.f32 %v631_v60, %v607_v42  ;;  %v661_v40 = vmul.f32 %v1498_v54, %v660_v62  ;;  %v2212_v32 = vmin.f32 %v835_v12, 16.0  ;;  %v760_v10 = vadd.f32 0.0036580483, %v759_v61  ;;  %vm665_vm11 = vmor %vm663_vm10, %vm664_vm9 }
 0x1c4   :  { %v670_v18 = vor.u32 1.1754944e-38, %v669_v19  ;;  %v699_v30 = vmul.f32 %v1500_v8, %v2190_v9  ;;  %v733_v20 = vadd.f32 0.112945676, %v732_v22  ;;  %v799_v13 = vmul.f32 %v798_v38, %v2188_v0 }
 0x1c5   :  { %v1404_v6 = vclamps-f32 %v632_v2, 1.0  ;;  %v662_v15 = vadd.f32 %v1498_v54, %v661_v40  ;;  %vm668_vm12 = vcmp.eq.f32.partialorder %v667_v7, 8.507059e+37  ;;  %v837_v23 = vmul.f32 2.1237322e-06, %v2212_v32 }
 0x1c6   :  { %v700_v27 = vsub.f32 1.0, %v699_v30  ;;  %v734_v17 = vmul.f32 %v733_v20, %v2134_v21  ;;  %v707_v58 = vand.u32 2147483647, %v2190_v9  ;;  %v709_v25 = vand.u32 2147483648, %v2190_v9 }
 0x1c7   :  { %v1235_v43 = vadd.f32 1.0, %v1404_v6  ;;  %v666_v45 = vsel %vm665_vm11, %v1498_v54, %v662_v15  ;;  %v769_v33 = vadd.f32 0.001143296, %v768_v14  ;;  %vm704_vm13 = vweird.f32 %v1500_v8 }
 0x1c8   :  { %v671_v24 = vsel %vm668_vm12, %v670_v18, %v666_v45  ;;  %v701_v56 = vmul.f32 %v1500_v8, %v700_v27  ;;  %v735_v36 = vadd.f32 0.4994258, %v734_v17  ;;  %v808_v42 = vmul.f32 3.8918573e-05, %v2188_v0 }
 0x1c9   :  { %v1251_v11 = vmul.f32 %v1235_v43, %v563_v49  ;;  %v672_v59 = vmul.f32 %v671_v24, %v647_v1  ;;  %vm703_vm14 = vweird.f32 %v2190_v9  ;;  %v770_v46 = vmul.f32 %v769_v33, %v2174_v4 }
 0x1ca   :  { %v848_v54 = vmul.f32 3.8918573e-05, %v2212_v32  ;;  %v838_v5 = vadd.f32 0.00028619796, %v837_v23  ;;  %v702_v35 = vadd.f32 %v1500_v8, %v701_v56  ;;  %v736_v28 = vmul.f32 %v735_v36, %v2134_v21  ;;  %vm705_vm15 = vmor %vm703_vm14, %vm704_vm13 }
 0x1cb   :  { %1303 = vmatmul.f32.vlgmr.msra.gmra.mxu1 %v1251_v11  ;;  %v1405_v55 = vclamps-f32 %v672_v59, 1.0  ;;  %v809_v47 = vadd.f32 0.001143296, %v808_v42  ;;  %vm708_vm1 = vcmp.eq.f32.partialorder %v707_v58, 8.507059e+37  ;;  %v710_v53 = vor.u32 1.1754944e-38, %v709_v25 }
 0x1cc   :  { %v771_v57 = vadd.f32 0.014752088, %v770_v46  ;;  %v706_v12 = vsel %vm705_vm15, %v1500_v8, %v702_v35  ;;  %v2228_v60 = vadd.f32 1.0, %v736_v28  ;;  %v849_v9 = vadd.f32 0.001143296, %v848_v54 }
 0x1cd   :  { %v1236_v41 = vadd.f32 1.0, %v1405_v55  ;;  %v810_v63 = vmul.f32 %v809_v47, %v2188_v0  ;;  %v711_v2 = vsel %vm708_vm1, %v710_v53, %v706_v12  ;;  %v839_v1 = vmul.f32 %v838_v5, %v2212_v32 }
 0x1ce   :  { %v772_v62 = vmul.f32 %v771_v57, %v2174_v4  ;;  %v712_v61 = vmul.f32 %v711_v2, %v687_v50  ;;  %1501 = vrcp.f32 %v2228_v60  ;;  %v724_v38 = vadd.f32 0.18741608, %v723_v51 }
 0x1cf   :  { %v1252_v49 = vmul.f32 %v1236_v41, %v564_v31  ;;  %v761_v19 = vmul.f32 %v760_v10, %v2174_v4  ;;  %v800_v6 = vadd.f32 0.0036580483, %v799_v13  ;;  %v811_v8 = vadd.f32 0.014752088, %v810_v63  ;;  %v545_v41 = vpop.f32.mrf.mxu3 }
 0x1d0   :  { %v773_v40 = vadd.f32 0.112945676, %v772_v62  ;;  %v1406_v7 = vclamps-f32 %v712_v61, 1.0  ;;  %v850_v22 = vmul.f32 %v849_v9, %v2212_v32  ;;  %v565_v31 = vmul.f32 0.5, %v2045_v3 }
 0x1d1   :  { %v840_v15 = vadd.f32 0.0036580483, %v839_v1  ;;  %v812_v50 = vmul.f32 %v811_v8, %v2188_v0  ;;  %v725_v51 = vmul.f32 %v724_v38, %v2134_v21  ;;  %v762_v30 = vadd.f32 0.05243302, %v761_v19 }
 0x1d2   :  { %v774_v43 = vmul.f32 %v773_v40, %v2174_v4  ;;  %v1237_v14 = vadd.f32 1.0, %v1406_v7  ;;  %v851_v18 = vadd.f32 0.014752088, %v850_v22  ;;  %v801_v13 = vmul.f32 %v800_v6, %v2188_v0 }
 0x1d3   :  { %1306 = vmatmul.f32.gmra.mxu1 %v1252_v49  ;;  %v813_v45 = vadd.f32 0.112945676, %v812_v50  ;;  %v841_v27 = vmul.f32 %v840_v15, %v2212_v32  ;;  %v726_v58 = vadd.f32 1.1283791, %v725_v51  ;;  %v763_v21 = vmul.f32 %v762_v30, %v2174_v4 }
 0x1d4   :  { %v775_v10 = vadd.f32 0.4994258, %v774_v43  ;;  %v1502_v20 = vpop.eup %1501  ;;  %v1253_v11 = vmul.f32 %v1237_v14, %v565_v31  ;;  %v852_v23 = vmul.f32 %v851_v18, %v2212_v32  ;;  %v802_v56 = vadd.f32 0.05243302, %v801_v13 }
 0x1d5   :  { %v739_v3 = vmul.f32 %v1502_v20, %v2228_v60  ;;  %v814_v17 = vmul.f32 %v813_v45, %v2188_v0  ;;  %v749_v36 = vand.u32 2147483648, %v2228_v60  ;;  %vm744_vm2 = vweird.f32 %v1502_v20 }
 0x1d6   :  { %v776_v24 = vmul.f32 %v775_v10, %v2174_v4  ;;  %v853_v59 = vadd.f32 0.112945676, %v852_v23  ;;  %v747_v54 = vand.u32 2147483647, %v2228_v60  ;;  %v842_v5 = vadd.f32 0.05243302, %v841_v27 }
 0x1d7   :  { %v740_v25 = vsub.f32 1.0, %v739_v3  ;;  %v815_v42 = vadd.f32 0.4994258, %v814_v17  ;;  %v764_v47 = vadd.f32 0.18741608, %v763_v21  ;;  %vm743_vm3 = vweird.f32 %v2228_v60 }
 0x1d8   :  { %v2247_v33 = vadd.f32 1.0, %v776_v24  ;;  %v854_v55 = vmul.f32 %v853_v59, %v2212_v32  ;;  %v803_v57 = vmul.f32 %v802_v56, %v2188_v0  ;;  %vm745_vm4 = vmor %vm743_vm3, %vm744_vm2  ;;  %v750_v12 = vor.u32 1.1754944e-38, %v749_v36 }
 0x1d9   :  { %v741_v46 = vmul.f32 %v1502_v20, %v740_v25  ;;  %v816_v35 = vmul.f32 %v815_v42, %v2188_v0  ;;  %v727_v49 = vmul.f32 %v726_v58, %v2105_v16  ;;  %vm748_vm5 = vcmp.eq.f32.partialorder %v747_v54, 8.507059e+37 }
 0x1da   :  { %1503 = vrcp.f32 %v2247_v33  ;;  %v855_v28 = vadd.f32 0.4994258, %v854_v55  ;;  %v843_v62 = vmul.f32 %v842_v5, %v2212_v32  ;;  %v2262_v1 = vadd.f32 %v1903_v52, %v545_v41 }
 0x1db   :  { %1309 = vmatmul.f32.gmra.mxu1 %v1253_v11  ;;  %v742_v53 = vadd.f32 %v1502_v20, %v741_v46  ;;  %v2256_v63 = vadd.f32 1.0, %v816_v35  ;;  %v765_v38 = vmul.f32 %v764_v47, %v2174_v4  ;;  %v804_v40 = vadd.f32 0.18741608, %v803_v57 }
 0x1dc   :  { %v856_v9 = vmul.f32 %v855_v28, %v2212_v32  ;;  %v844_v8 = vadd.f32 0.18741608, %v843_v62  ;;  %v2271_v22 = vmul.f32 0.70710677, %v2262_v1  ;;  %v566_v31 = vmul.f32 0.5, %v2093_v44 }
 0x1dd   :  { %v746_v2 = vsel %vm745_vm4, %v1502_v20, %v742_v53  ;;  %1505 = vrcp.f32 %v2256_v63  ;;  %v766_v43 = vadd.f32 1.1283791, %v765_v38  ;;  %v789_v4 = vand.u32 2147483648, %v2247_v33 }
 0x1de   :  { %v751_v61 = vsel %vm748_vm5, %v750_v12, %v746_v2  ;;  %v2266_v6 = vadd.f32 1.0, %v856_v9  ;;  %v805_v50 = vmul.f32 %v804_v40, %v2188_v0  ;;  %v787_v51 = vand.u32 2147483647, %v2247_v33 }
 0x1df   :  { %v752_v19 = vmul.f32 %v751_v61, %v727_v49  ;;  %v845_v20 = vmul.f32 %v844_v8, %v2212_v32  ;;  %v995_v13 = vmul.f32 %v2271_v22, %v2271_v22  ;;  %vm783_vm7 = vweird.f32 %v2247_v33 }
 0x1e0   :  { %v1504_v60 = vpop.eup %1503  ;;  %1507 = vrcp.f32 %v2266_v6  ;;  %v767_v45 = vmul.f32 %v766_v43, %v2153_v48  ;;  %v790_v0 = vor.u32 1.1754944e-38, %v789_v4  ;;  %v829_v3 = vand.u32 2147483648, %v2256_v63 }
 0x1e1   :  { %v779_v7 = vmul.f32 %v1504_v60, %v2247_v33  ;;  %v1407_v16 = vclamps-f32 %v752_v19, 1.0  ;;  %vm784_vm6 = vweird.f32 %v1504_v60  ;;  %v806_v24 = vadd.f32 1.1283791, %v805_v50 }
 0x1e2   :  { %vm785_vm8 = vmor %vm783_vm7, %vm784_vm6  ;;  %vm788_vm9 = vcmp.eq.f32.partialorder %v787_v51, 8.507059e+37  ;;  %v827_v58 = vand.u32 2147483647, %v2256_v63  ;;  %v567_v21 = vmul.f32 0.5, %v2142_v29  ;;  %v846_v25 = vadd.f32 1.1283791, %v845_v20 }
 0x1e3   :  { %v780_v52 = vsub.f32 1.0, %v779_v7  ;;  %v1238_v15 = vadd.f32 1.0, %v1407_v16  ;;  %v1506_v14 = vpop.eup %1505  ;;  %vm823_vm11 = vweird.f32 %v2256_v63  ;;  %v830_v36 = vor.u32 1.1754944e-38, %v829_v3 }
 0x1e4   :  { %v819_v10 = vmul.f32 %v1506_v14, %v2256_v63  ;;  %vm824_vm10 = vweird.f32 %v1506_v14  ;;  %v869_v42 = vand.u32 2147483648, %v2266_v6  ;;  %v867_v54 = vand.u32 2147483647, %v2266_v6 }
 0x1e5   :  { %v781_v18 = vmul.f32 %v1504_v60, %v780_v52  ;;  %v1254_v30 = vmul.f32 %v1238_v15, %v566_v31  ;;  %vm825_vm12 = vmor %vm823_vm11, %vm824_vm10  ;;  %v807_v5 = vmul.f32 %v806_v24, %v2166_v34  ;;  %v2291_v35 = vmin.f32 %v995_v13, 16.0 }
 0x1e6   :  { %v1508_v11 = vpop.eup %1507  ;;  %v820_v23 = vsub.f32 1.0, %v819_v10  ;;  %vm828_vm14 = vcmp.eq.f32.partialorder %v827_v58, 8.507059e+37  ;;  %vm863_vm15 = vweird.f32 %v2266_v6  ;;  %v870_v57 = vor.u32 1.1754944e-38, %v869_v42 }
 0x1e7   :  { %v782_v44 = vadd.f32 %v1504_v60, %v781_v18  ;;  %1312 = vmatmul.f32.gmra.mxu1 %v1254_v30  ;;  %v859_v32 = vmul.f32 %v1508_v11, %v2266_v6  ;;  %vm864_vm13 = vweird.f32 %v1508_v11  ;;  %v847_v12 = vmul.f32 %v846_v25, %v2195_v37 }
 0x1e8   :  { %v821_v59 = vmul.f32 %v1506_v14, %v820_v23  ;;  %vm865_vm1 = vmor %vm863_vm15, %vm864_vm13  ;;  %vm868_vm2 = vcmp.eq.f32.partialorder %v867_v54, 8.507059e+37  ;;  %v1008_v34 = vmul.f32 3.8918573e-05, %v2291_v35  ;;  %v569_v37 = vmul.f32 0.5, %v2183_v26 }
 0x1e9   :  { %v786_v27 = vsel %vm785_vm8, %v1504_v60, %v782_v44  ;;  %v860_v33 = vsub.f32 1.0, %v859_v32  ;;  %v568_v60 = vmul.f32 0.5, %v2156_v39  ;;  %v997_v31 = vmul.f32 2.1237322e-06, %v2291_v35  ;;  %v2304_v39 = vld [vmem:[%s2766_s4] ss:$0 sm:$0xff] }
 0x1ea   :  { %v791_v17 = vsel %vm788_vm9, %v790_v0, %v786_v27  ;;  %v822_v56 = vadd.f32 %v1506_v14, %v821_v59  ;;  %v1009_v38 = vadd.f32 0.001143296, %v1008_v34 }
 0x1eb   :  { %v792_v48 = vmul.f32 %v791_v17, %v767_v45  ;;  %v861_v46 = vmul.f32 %v1508_v11, %v860_v33  ;;  %v998_v26 = vadd.f32 0.00028619796, %v997_v31 }
 0x1ec   :  { %v826_v29 = vsel %vm825_vm12, %v1506_v14, %v822_v56  ;;  %v1010_v40 = vmul.f32 %v1009_v38, %v2291_v35 }
 0x1ed   :  { %v1408_v55 = vclamps-f32 %v792_v48, 1.0  ;;  %v831_v47 = vsel %vm828_vm14, %v830_v36, %v826_v29  ;;  %v862_v41 = vadd.f32 %v1508_v11, %v861_v46  ;;  %v999_v30 = vmul.f32 %v998_v26, %v2291_v35 }
 0x1ee   :  { %v832_v53 = vmul.f32 %v831_v47, %v807_v5  ;;  %v1011_v16 = vadd.f32 0.014752088, %v1010_v40 }
 0x1ef   :  { %v1239_v28 = vadd.f32 1.0, %v1408_v55  ;;  %v866_v9 = vsel %vm865_vm1, %v1508_v11, %v862_v41  ;;  %v1000_v23 = vadd.f32 0.0036580483, %v999_v30 }
 0x1f0   :  { %v1409_v49 = vclamps-f32 %v832_v53, 1.0  ;;  %v871_v2 = vsel %vm868_vm2, %v870_v57, %v866_v9  ;;  %v1012_v52 = vmul.f32 %v1011_v16, %v2291_v35 }
 0x1f1   :  { %v1255_v63 = vmul.f32 %v1239_v28, %v567_v21  ;;  %v872_v62 = vmul.f32 %v871_v2, %v847_v12  ;;  %v1001_v21 = vmul.f32 %v1000_v23, %v2291_v35 }
 0x1f2   :  { %v1240_v61 = vadd.f32 1.0, %v1409_v49  ;;  %v1013_v4 = vadd.f32 0.112945676, %v1012_v52 }
 0x1f3   :  { %1315 = vmatmul.f32.gmra.mxu1 %v1255_v63  ;;  %v1410_v6 = vclamps-f32 %v872_v62, 1.0  ;;  %v1002_v54 = vadd.f32 0.05243302, %v1001_v21 }
 0x1f4   :  { %v1256_v19 = vmul.f32 %v1240_v61, %v568_v60  ;;  %v1014_v18 = vmul.f32 %v1013_v4, %v2291_v35 }
 0x1f5   :  { %v1241_v7 = vadd.f32 1.0, %v1410_v6  ;;  %v1003_v49 = vmul.f32 %v1002_v54, %v2291_v35 }
 0x1f6   :  { %v1015_v13 = vadd.f32 0.4994258, %v1014_v18 }
 0x1f7   :  { %v1257_v8 = vmul.f32 %v1241_v7, %v569_v37 }
 0x1f8   :  { %v1016_v32 = vmul.f32 %v1015_v13, %v2291_v35 }
 0x1fa   :  { %v2335_v33 = vadd.f32 1.0, %v1016_v32 }
 0x1fb   :  { %1318 = vmatmul.f32.gmra.mxu1 %v1256_v19 }
 0x1fc   :  { %1509 = vrcp.f32 %v2335_v33  ;;  %vm1023_vm3 = vweird.f32 %v2335_v33 }
 0x202   :  { %v2365_v7 = vpop.eup %1509 }
 0x203   :  { %1321 = vmatmul.f32.gmra.mxu1 %v1257_v8  ;;  %v1004_v8 = vadd.f32 0.18741608, %v1003_v49  ;;  %vm1024_vm5 = vweird.f32 %v2365_v7 }
 0x204   :  { %vm2436_vm9 = vmor %vm1023_vm3, %vm1024_vm5 }
 0x20f   :  { %v536_v43 = vpop.f32.mrf.mxu0 }
 0x210   :  { %v2307_v15 = vadd.f32 %v2304_v39, %v536_v43 }
 0x212   :  { %v2310_v14 = vmul.f32 0.70710677, %v2307_v15 }
 0x214   :  { %v875_v50 = vmul.f32 %v2310_v14, %v2310_v14 }
 0x216   :  { %v2315_v51 = vmin.f32 %v875_v50, 16.0 }
 0x218   :  { %v877_v10 = vmul.f32 2.1237322e-06, %v2315_v51  ;;  %v888_v20 = vmul.f32 3.8918573e-05, %v2315_v51  ;;  %v539_v44 = vpop.f32.mrf.mxu0 }
 0x219   :  { %v2321_v45 = vadd.f32 %v2304_v39, %v539_v44 }
 0x21a   :  { %v878_v11 = vadd.f32 0.00028619796, %v877_v10  ;;  %v889_v0 = vadd.f32 0.001143296, %v888_v20 }
 0x21b   :  { %v2325_v24 = vmul.f32 0.70710677, %v2321_v45 }
 0x21c   :  { %v879_v3 = vmul.f32 %v878_v11, %v2315_v51  ;;  %v890_v27 = vmul.f32 %v889_v0, %v2315_v51  ;;  %v1019_v11 = vmul.f32 %v2365_v7, %v2335_v33  ;;  %v1005_v0 = vmul.f32 %v1004_v8, %v2291_v35 }
 0x21d   :  { %v915_v59 = vmul.f32 %v2325_v24, %v2325_v24  ;;  %v548_v5 = vpop.f32.mrf.mxu3 }
 0x21e   :  { %v880_v17 = vadd.f32 0.0036580483, %v879_v3  ;;  %v891_v58 = vadd.f32 0.014752088, %v890_v27  ;;  %v2344_v47 = vadd.f32 %v2304_v39, %v548_v5 }
 0x21f   :  { %v2332_v25 = vmin.f32 %v915_v59, 16.0 }
 0x220   :  { %v892_v48 = vmul.f32 %v891_v58, %v2315_v51  ;;  %v881_v56 = vmul.f32 %v880_v17, %v2315_v51  ;;  %v542_v36 = vpop.f32.mrf.mxu0  ;;  %v2353_v9 = vmul.f32 0.70710677, %v2344_v47  ;;  %v1029_v58 = vand.u32 2147483648, %v2335_v33 }
 0x221   :  { %v917_v42 = vmul.f32 2.1237322e-06, %v2332_v25  ;;  %v2340_v55 = vadd.f32 %v2304_v39, %v542_v36  ;;  %v928_v29 = vmul.f32 3.8918573e-05, %v2332_v25  ;;  %v1020_v36 = vsub.f32 1.0, %v1019_v11 }
 0x222   :  { %v893_v46 = vadd.f32 0.112945676, %v892_v48  ;;  %v882_v41 = vadd.f32 0.05243302, %v881_v56  ;;  %v1035_v60 = vmul.f32 %v2353_v9, %v2353_v9 }
 0x223   :  { %v918_v28 = vadd.f32 0.00028619796, %v917_v42  ;;  %v2348_v53 = vmul.f32 0.70710677, %v2340_v55  ;;  %v929_v12 = vadd.f32 0.001143296, %v928_v29 }
 0x224   :  { %v894_v57 = vmul.f32 %v893_v46, %v2315_v51  ;;  %v883_v38 = vmul.f32 %v882_v41, %v2315_v51  ;;  %v2368_v16 = vmin.f32 %v1035_v60, 16.0  ;;  %v2394_v42 = vadd.f32 1.1283791, %v1005_v0 }
 0x225   :  { %v919_v63 = vmul.f32 %v918_v28, %v2332_v25  ;;  %v955_v2 = vmul.f32 %v2348_v53, %v2348_v53  ;;  %v930_v62 = vmul.f32 %v929_v12, %v2332_v25  ;;  %v551_v31 = vpop.f32.mrf.mxu3  ;;  %v1027_v28 = vand.u32 2147483647, %v2335_v33 }
 0x226   :  { %v895_v34 = vadd.f32 0.4994258, %v894_v57  ;;  %v1037_v50 = vmul.f32 2.1237322e-06, %v2368_v16  ;;  %v2376_v18 = vadd.f32 %v2304_v39, %v551_v31  ;;  %v884_v30 = vadd.f32 0.18741608, %v883_v38 }
 0x227   :  { %v920_v61 = vadd.f32 0.0036580483, %v919_v63  ;;  %v2362_v19 = vmin.f32 %v955_v2, 16.0  ;;  %v931_v40 = vadd.f32 0.014752088, %v930_v62  ;;  %v2401_v12 = vor.u32 1.1754944e-38, %v1029_v58 }
 0x228   :  { %v896_v6 = vmul.f32 %v895_v34, %v2315_v51  ;;  %v1038_v20 = vadd.f32 0.00028619796, %v1037_v50  ;;  %v2380_v13 = vmul.f32 0.70710677, %v2376_v18  ;;  %v885_v21 = vmul.f32 %v884_v30, %v2315_v51 }
 0x229   :  { %v921_v37 = vmul.f32 %v920_v61, %v2332_v25  ;;  %v957_v52 = vmul.f32 2.1237322e-06, %v2362_v19  ;;  %v932_v4 = vmul.f32 %v931_v40, %v2332_v25  ;;  %v968_v44 = vmul.f32 3.8918573e-05, %v2362_v19 }
 0x22a   :  { %v2371_v43 = vadd.f32 1.0, %v896_v6  ;;  %v1039_v32 = vmul.f32 %v1038_v20, %v2368_v16  ;;  %v1075_v48 = vmul.f32 %v2380_v13, %v2380_v13  ;;  %v886_v63 = vadd.f32 1.1283791, %v885_v21 }
 0x22b   :  { %v922_v26 = vadd.f32 0.05243302, %v921_v37  ;;  %v958_v10 = vadd.f32 0.00028619796, %v957_v52  ;;  %v933_v3 = vadd.f32 0.112945676, %v932_v4  ;;  %v1021_v34 = vmul.f32 %v2365_v7, %v1020_v36 }
 0x22c   :  { %1511 = vrcp.f32 %v2371_v43  ;;  %v969_v56 = vadd.f32 0.001143296, %v968_v44  ;;  %v1040_v29 = vadd.f32 0.0036580483, %v1039_v32  ;;  %v2403_v49 = vmin.f32 %v1075_v48, 16.0 }
 0x22d   :  { %v959_v23 = vmul.f32 %v958_v10, %v2362_v19  ;;  %v923_v27 = vmul.f32 %v922_v26, %v2332_v25  ;;  %v934_v59 = vmul.f32 %v933_v3, %v2332_v25  ;;  %v554_v46 = vpop.f32.mrf.mxu3  ;;  %v907_v61 = vand.u32 2147483647, %v2371_v43 }
 0x22e   :  { %v970_v2 = vmul.f32 %v969_v56, %v2362_v19  ;;  %v1048_v38 = vmul.f32 3.8918573e-05, %v2368_v16  ;;  %v1041_v40 = vmul.f32 %v1040_v29, %v2368_v16  ;;  %v2414_v37 = vadd.f32 %v2304_v39, %v554_v46 }
 0x22f   :  { %v960_v17 = vadd.f32 0.0036580483, %v959_v23  ;;  %v935_v54 = vadd.f32 0.4994258, %v934_v59  ;;  %v924_v5 = vadd.f32 0.18741608, %v923_v27  ;;  %v2420_v50 = vadd.f32 %v2365_v7, %v1021_v34 }
 0x230   :  { %v909_v8 = vand.u32 2147483648, %v2371_v43  ;;  %v1077_v4 = vmul.f32 2.1237322e-06, %v2403_v49  ;;  %v971_v26 = vadd.f32 0.014752088, %v970_v2  ;;  %vm903_vm6 = vweird.f32 %v2371_v43 }
 0x231   :  { %v961_v41 = vmul.f32 %v960_v17, %v2362_v19  ;;  %v936_v57 = vmul.f32 %v935_v54, %v2332_v25  ;;  %v925_v6 = vmul.f32 %v924_v5, %v2332_v25  ;;  %v887_v25 = vmul.f32 %v886_v63, %v2310_v14 }
 0x232   :  { %v1512_v35 = vpop.eup %1511  ;;  %v1049_v20 = vadd.f32 0.001143296, %v1048_v38  ;;  %v1042_v11 = vadd.f32 0.05243302, %v1041_v40  ;;  %v910_v23 = vor.u32 1.1754944e-38, %v909_v8  ;;  %vm908_vm8 = vcmp.eq.f32.partialorder %v907_v61, 8.507059e+37 }
 0x233   :  { %v899_v51 = vmul.f32 %v1512_v35, %v2371_v43  ;;  %v2408_v60 = vadd.f32 1.0, %v936_v57  ;;  %v962_v52 = vadd.f32 0.05243302, %v961_v41  ;;  %vm904_vm4 = vweird.f32 %v1512_v35 }
 0x234   :  { %v926_v44 = vadd.f32 1.1283791, %v925_v6  ;;  %vm905_vm7 = vmor %vm903_vm6, %vm904_vm4  ;;  %v2430_v27 = vmul.f32 0.70710677, %v2414_v37  ;;  %v1078_v43 = vadd.f32 0.00028619796, %v1077_v4  ;;  %v972_v59 = vmul.f32 %v971_v26, %v2362_v19 }
 0x235   :  { %v900_v62 = vsub.f32 1.0, %v899_v51  ;;  %1513 = vrcp.f32 %v2408_v60  ;;  %v557_v30 = vpop.f32.mrf.mxu3  ;;  %v963_v3 = vmul.f32 %v962_v52, %v2362_v19  ;;  %v1026_v58 = vsel %vm2436_vm9, %v2365_v7, %v2420_v50 }
 0x236   :  { %v2426_v0 = vadd.f32 %v2304_v39, %v557_v30  ;;  %v570_v48 = vmul.f32 0.5, %v2307_v15  ;;  %v2451_v46 = vmul.f32 0.5, %v2321_v45  ;;  %v927_v54 = vmul.f32 %v926_v44, %v2325_v24 }
 0x237   :  { %v901_v31 = vmul.f32 %v1512_v35, %v900_v62  ;;  %v1043_v5 = vmul.f32 %v1042_v11, %v2368_v16  ;;  %v964_v41 = vadd.f32 0.18741608, %v963_v3  ;;  %v1115_v51 = vmul.f32 %v2430_v27, %v2430_v27 }
 0x238   :  { %v2447_v56 = vmul.f32 0.70710677, %v2426_v0  ;;  %v1079_v63 = vmul.f32 %v1078_v43, %v2403_v49  ;;  %v947_v45 = vand.u32 2147483647, %v2408_v60  ;;  %v973_v34 = vadd.f32 0.112945676, %v972_v59 }
 0x239   :  { %v902_v10 = vadd.f32 %v1512_v35, %v901_v31  ;;  %v949_v38 = vand.u32 2147483648, %v2408_v60  ;;  %vm2467_vm10 = vcmp.eq.f32.partialorder %v1027_v28, 8.507059e+37  ;;  %v2475_v4 = vmin.f32 %v1115_v51, 16.0 }
 0x23a   :  { %v1155_v15 = vmul.f32 %v2447_v56, %v2447_v56  ;;  %v974_v31 = vmul.f32 %v973_v34, %v2362_v19  ;;  %v1044_v33 = vadd.f32 0.18741608, %v1043_v5  ;;  %vm943_vm12 = vweird.f32 %v2408_v60 }
 0x23b   :  { %v906_v32 = vsel %vm905_vm7, %v1512_v35, %v902_v10  ;;  %v1514_v21 = vpop.eup %1513  ;;  %v1050_v35 = vmul.f32 %v1049_v20, %v2368_v16  ;;  %v950_v44 = vor.u32 1.1754944e-38, %v949_v38  ;;  %vm948_vm14 = vcmp.eq.f32.partialorder %v947_v45, 8.507059e+37 }
 0x23c   :  { %v911_v17 = vsel %vm908_vm8, %v910_v23, %v906_v32  ;;  %v939_v29 = vmul.f32 %v1514_v21, %v2408_v60  ;;  %v2462_v62 = vmin.f32 %v1155_v15, 16.0  ;;  %vm944_vm11 = vweird.f32 %v1514_v21 }
 0x23d   :  { %v912_v36 = vmul.f32 %v911_v17, %v887_v25  ;;  %v560_v24 = vpop.f32.mrf.mxu3  ;;  %v1051_v40 = vadd.f32 0.014752088, %v1050_v35  ;;  %vm945_vm13 = vmor %vm943_vm12, %vm944_vm11  ;;  %v975_v32 = vadd.f32 0.4994258, %v974_v31  ;;  %v1117_v43 = vmul.f32 2.1237322e-06, %v2475_v4 }
 0x23e   :  { %v940_v2 = vsub.f32 1.0, %v939_v29  ;;  %v2472_v8 = vadd.f32 %v2304_v39, %v560_v24  ;;  %v1157_v26 = vmul.f32 2.1237322e-06, %v2462_v62  ;;  %v1168_v25 = vmul.f32 3.8918573e-05, %v2462_v62 }
 0x23f   :  { %v1411_v57 = vclamps-f32 %v912_v36, 1.0  ;;  %v1052_v11 = vmul.f32 %v1051_v40, %v2368_v16  ;;  %v976_v35 = vmul.f32 %v975_v32, %v2362_v19  ;;  %v1007_v29 = vmul.f32 %v2394_v42, %v2271_v22 }
 0x240   :  { %v941_v52 = vmul.f32 %v1514_v21, %v940_v2  ;;  %v2480_v28 = vmul.f32 0.70710677, %v2472_v8  ;;  %v1158_v39 = vadd.f32 0.00028619796, %v1157_v26  ;;  %v1169_v20 = vadd.f32 0.001143296, %v1168_v25 }
 0x241   :  { %v1242_v61 = vadd.f32 1.0, %v1411_v57  ;;  %v1053_v5 = vadd.f32 0.112945676, %v1052_v11  ;;  %v1080_v51 = vadd.f32 0.0036580483, %v1079_v63  ;;  %v2500_v34 = vadd.f32 1.0, %v976_v35 }
 0x242   :  { %v942_v10 = vadd.f32 %v1514_v21, %v941_v52  ;;  %v1195_v23 = vmul.f32 %v2480_v28, %v2480_v28  ;;  %v1159_v17 = vmul.f32 %v1158_v39, %v2462_v62  ;;  %v1170_v59 = vmul.f32 %v1169_v20, %v2462_v62  ;;  %v2498_v2 = vld [vmem:[%s2768_s6] ss:$0 sm:$0xff] }
 0x243   :  { %v1258_v30 = vmul.f32 %v1242_v61, %v570_v48  ;;  %v1031_v22 = vsel %vm2467_vm10, %v2401_v12, %v1026_v58  ;;  %v965_v42 = vmul.f32 %v964_v41, %v2362_v19  ;;  %1515 = vrcp.f32 %v2500_v34 }
 0x244   :  { %v946_v3 = vsel %vm945_vm13, %v1514_v21, %v942_v10  ;;  %v2489_v48 = vmin.f32 %v1195_v23, 16.0  ;;  %v1160_v21 = vadd.f32 0.0036580483, %v1159_v17  ;;  %v1171_v15 = vadd.f32 0.014752088, %v1170_v59  ;;  %v1528_v10 = vld [vmem:[%s2762_s0] sm:$0xff] }
 0x245   :  { %1324 = vmatmul.f32.vlgmr.msra.gmra.mxu2 %v1258_v30  ;;  %v951_v60 = vsel %vm948_vm14, %v950_v44, %v946_v3  ;;  %v1054_v14 = vmul.f32 %v1053_v5, %v2368_v16  ;;  %v1045_v40 = vmul.f32 %v1044_v33, %v2368_v16  ;;  %v2518_v58 = vmul.f32 %v1031_v22, %v1007_v29 }
 0x246   :  { %v952_v36 = vmul.f32 %v951_v60, %v927_v54  ;;  %v1197_v57 = vmul.f32 2.1237322e-06, %v2489_v48  ;;  %v1118_v54 = vadd.f32 0.00028619796, %v1117_v43  ;;  %v1161_v63 = vmul.f32 %v1160_v21, %v2462_v62 }
 0x247   :  { %v1172_v24 = vmul.f32 %v1171_v15, %v2462_v62  ;;  %v1088_v41 = vmul.f32 3.8918573e-05, %v2403_v49  ;;  %v1081_v6 = vmul.f32 %v1080_v51, %v2403_v49  ;;  %v966_v30 = vadd.f32 1.1283791, %v965_v42 }
 0x248   :  { %v1412_v45 = vclamps-f32 %v952_v36, 1.0  ;;  %v1198_v61 = vadd.f32 0.00028619796, %v1197_v57  ;;  %v1162_v7 = vadd.f32 0.05243302, %v1161_v63  ;;  %v1304_v52 = vpop.f32.mrf.mxu1  ;;  %v1119_v33 = vmul.f32 %v1118_v54, %v2475_v4 }
 0x249   :  { %v1173_v50 = vadd.f32 0.112945676, %v1172_v24  ;;  %v1305_v12 = vadd.f32 %v2498_v2, %v1304_v52  ;;  %v1055_v39 = vadd.f32 0.4994258, %v1054_v14  ;;  %v2529_v20 = vadd.f32 1.1283791, %v1045_v40  ;;  %v1516_v23 = vpop.eup %1515 }
 0x24a   :  { %v1243_v38 = vadd.f32 1.0, %v1412_v45  ;;  %v1163_v31 = vmul.f32 %v1162_v7, %v2462_v62  ;;  %v1199_v25 = vmul.f32 %v1198_v61, %v2489_v48  ;;  %v1414_v3 = vclamps-f32 %v2518_v58, 1.0  ;;  %v1529_v61 = vld [vmem:[%s2762_s0 + $0x8] sm:$0xff] }
 0x24b   :  { %v1174_v26 = vmul.f32 %v1173_v50, %v2462_v62  ;;  %v1056_v32 = vmul.f32 %v1055_v39, %v2368_v16  ;;  %v1089_v43 = vadd.f32 0.001143296, %v1088_v41  ;;  %v1208_v17 = vmul.f32 3.8918573e-05, %v2489_v48 }
 0x24c   :  { %v1259_v19 = vmul.f32 %v1243_v38, %v2451_v46  ;;  %v1352_v46 = vadd.f32 %v1528_v10, %v1305_v12  ;;  %v1164_v44 = vadd.f32 0.18741608, %v1163_v31  ;;  %v1200_v36 = vadd.f32 0.0036580483, %v1199_v25 }
 0x24d   :  { %v1175_v11 = vadd.f32 0.4994258, %v1174_v26  ;;  %v979_v35 = vmul.f32 %v1516_v23, %v2500_v34  ;;  %v2542_v5 = vmul.f32 0.5, %v2340_v55  ;;  %v1082_v29 = vadd.f32 0.05243302, %v1081_v6 }
 0x24e   :  { %1327 = vmatmul.f32.gmra.mxu2 %v1259_v19  ;;  %1368 = vst.msk [vmem:[%s2769_s7] sm:$0xff] %vm42_vm0, %v1352_v46  ;;  %v1165_v59 = vmul.f32 %v1164_v44, %v2462_v62  ;;  %v1120_v51 = vadd.f32 0.0036580483, %v1119_v33  ;;  %v2544_v21 = vadd.f32 1.0, %v1056_v32  ;;  %v987_v45 = vand.u32 2147483647, %v2500_v34 }
 0x24f   :  { %v1176_v60 = vmul.f32 %v1175_v11, %v2462_v62  ;;  %v980_v57 = vsub.f32 1.0, %v979_v35  ;;  %v1090_v22 = vmul.f32 %v1089_v43, %v2403_v49  ;;  %v989_v42 = vand.u32 2147483648, %v2500_v34 }
 0x250   :  { %v1307_v16 = vpop.f32.mrf.mxu1  ;;  %1517 = vrcp.f32 %v2544_v21  ;;  %v1209_v55 = vadd.f32 0.001143296, %v1208_v17  ;;  %v967_v54 = vmul.f32 %v966_v30, %v2348_v53  ;;  %v1166_v63 = vadd.f32 1.1283791, %v1165_v59 }
 0x251   :  { %v2546_v15 = vadd.f32 1.0, %v1176_v60  ;;  %v1308_v62 = vadd.f32 %v2498_v2, %v1307_v16  ;;  %v1201_v24 = vmul.f32 %v1200_v36, %v2489_v48  ;;  %v981_v14 = vmul.f32 %v1516_v23, %v980_v57  ;;  %v1530_v16 = vld [vmem:[%s2762_s0 + $0x10] sm:$0xff] }
 0x252   :  { %vm984_vm15 = vweird.f32 %v1516_v23  ;;  %v1128_v40 = vmul.f32 3.8918573e-05, %v2475_v4  ;;  %v2561_v7 = vmul.f32 %v1082_v29, %v2403_v49  ;;  %v2564_v50 = vmul.f32 %v1120_v51, %v2475_v4 }
 0x253   :  { %1519 = vrcp.f32 %v2546_v15  ;;  %v1353_v38 = vadd.f32 %v1529_v61, %v1308_v62  ;;  %vm983_vm1 = vweird.f32 %v2500_v34  ;;  %v1091_v53 = vadd.f32 0.014752088, %v1090_v22 }
 0x254   :  { %v982_v52 = vadd.f32 %v1516_v23, %v981_v14  ;;  %vm2571_vm2 = vcmp.eq.f32.partialorder %v987_v45, 8.507059e+37  ;;  %v990_v19 = vor.u32 1.1754944e-38, %v989_v42  ;;  %v1210_v41 = vmul.f32 %v1209_v55, %v2489_v48  ;;  %vm985_vm3 = vmor %vm983_vm1, %vm984_vm15 }
 0x255   :  { %1369 = vst.msk [vmem:[%s2769_s7 + $0x8] sm:$0xff] %vm42_vm0, %v1353_v38  ;;  %v2577_v6 = vmul.f32 %v1166_v63, %v2447_v56  ;;  %v2579_v31 = vadd.f32 0.05243302, %v1201_v24  ;;  %vm1063_vm4 = vweird.f32 %v2544_v21  ;;  %v1092_v34 = vmul.f32 %v1091_v53, %v2403_v49 }
 0x256   :  { %v1518_v26 = vpop.eup %1517  ;;  %vm1183_vm5 = vweird.f32 %v2546_v15  ;;  %v1187_v25 = vand.u32 2147483647, %v2546_v15  ;;  %v986_v30 = vsel %vm985_vm3, %v1516_v23, %v982_v52  ;;  %v1211_v33 = vadd.f32 0.014752088, %v1210_v41 }
 0x257   :  { %v1129_v10 = vadd.f32 0.001143296, %v1128_v40  ;;  %v1189_v39 = vand.u32 2147483648, %v2546_v15  ;;  %v991_v44 = vsel %vm2571_vm2, %v990_v19, %v986_v30  ;;  %v1059_v11 = vmul.f32 %v1518_v26, %v2544_v21 }
 0x258   :  { %v1310_v56 = vpop.f32.mrf.mxu1  ;;  %v1093_v32 = vadd.f32 0.112945676, %v1092_v34  ;;  %v1067_v59 = vand.u32 2147483647, %v2544_v21  ;;  %v1069_v23 = vand.u32 2147483648, %v2544_v21  ;;  %v992_v60 = vmul.f32 %v991_v44, %v967_v54 }
 0x259   :  { %v1520_v46 = vpop.eup %1519  ;;  %v1311_v17 = vadd.f32 %v2498_v2, %v1310_v56  ;;  %v1060_v36 = vsub.f32 1.0, %v1059_v11  ;;  %v1212_v29 = vmul.f32 %v1211_v33, %v2489_v48  ;;  %vm1064_vm6 = vweird.f32 %v1518_v26 }
 0x25a   :  { %v1179_v43 = vmul.f32 %v1520_v46, %v2546_v15  ;;  %v1094_v35 = vmul.f32 %v1093_v32, %v2403_v49  ;;  %v1130_v45 = vmul.f32 %v1129_v10, %v2475_v4  ;;  %v1413_v22 = vclamps-f32 %v992_v60, 1.0  ;;  %vm1065_vm8 = vmor %vm1063_vm4, %vm1064_vm6 }
 0x25b   :  { %v1354_v57 = vadd.f32 %v1530_v16, %v1311_v17  ;;  %v1061_v62 = vmul.f32 %v1518_v26, %v1060_v36  ;;  %v1213_v55 = vadd.f32 0.112945676, %v1212_v29  ;;  %vm1184_vm7 = vweird.f32 %v1520_v46  ;;  %v1531_v16 = vld [vmem:[%s2762_s0 + $0x18] sm:$0xff] }
 0x25c   :  { %v1180_v51 = vsub.f32 1.0, %v1179_v43  ;;  %v1095_v42 = vadd.f32 0.4994258, %v1094_v35  ;;  %v1190_v54 = vor.u32 1.1754944e-38, %v1189_v39  ;;  %v1131_v24 = vadd.f32 0.014752088, %v1130_v45  ;;  %vm1185_vm10 = vmor %vm1183_vm5, %vm1184_vm7 }
 0x25d   :  { %1370 = vst.msk [vmem:[%s2769_s7 + $0x10] sm:$0xff] %vm42_vm0, %v1354_v57  ;;  %v1244_v61 = vadd.f32 1.0, %v1413_v22  ;;  %v1062_v38 = vadd.f32 %v1518_v26, %v1061_v62  ;;  %v1214_v40 = vmul.f32 %v1213_v55, %v2489_v48  ;;  %vm1068_vm9 = vcmp.eq.f32.partialorder %v1067_v59, 8.507059e+37 }
 0x25e   :  { %v1181_v63 = vmul.f32 %v1520_v46, %v1180_v51  ;;  %v1096_v14 = vmul.f32 %v1095_v42, %v2403_v49  ;;  %v1070_v52 = vor.u32 1.1754944e-38, %v1069_v23  ;;  %v1132_v12 = vmul.f32 %v1131_v24, %v2475_v4 }
 0x25f   :  { %v1260_v19 = vmul.f32 %v1244_v61, %v2542_v5  ;;  %v1066_v41 = vsel %vm1065_vm8, %v1518_v26, %v1062_v38  ;;  %v1215_v30 = vadd.f32 0.4994258, %v1214_v40  ;;  %vm1188_vm11 = vcmp.eq.f32.partialorder %v1187_v25, 8.507059e+37 }
 0x260   :  { %v1182_v53 = vadd.f32 %v1520_v46, %v1181_v63  ;;  %v2612_v34 = vadd.f32 1.0, %v1096_v14  ;;  %v1071_v10 = vsel %vm1068_vm9, %v1070_v52, %v1066_v41  ;;  %v1133_v39 = vadd.f32 0.112945676, %v1132_v12 }
 0x261   :  { %v1047_v21 = vmul.f32 %v2529_v20, %v2353_v9  ;;  %1330 = vmatmul.f32.gmra.mxu2 %v1260_v19  ;;  %v1084_v15 = vadd.f32 0.18741608, %v2561_v7  ;;  %v1122_v44 = vadd.f32 0.05243302, %v2564_v50  ;;  %v1216_v26 = vmul.f32 %v1215_v30, %v2489_v48 }
 0x262   :  { %v1186_v33 = vsel %vm1185_vm10, %v1520_v46, %v1182_v53  ;;  %1521 = vrcp.f32 %v2612_v34  ;;  %v1203_v25 = vmul.f32 %v2579_v31, %v2489_v48  ;;  %v1245_v46 = vadd.f32 1.0, %v1414_v3 }
 0x263   :  { %v1191_v56 = vsel %vm1188_vm11, %v1190_v54, %v1186_v33  ;;  %v1072_v11 = vmul.f32 %v1071_v10, %v1047_v21  ;;  %v1134_v9 = vmul.f32 %v1133_v39, %v2475_v4  ;;  %v2626_v32 = vadd.f32 1.0, %v1216_v26 }
 0x264   :  { %v1192_v5 = vmul.f32 %v1191_v56, %v2577_v6  ;;  %v573_v7 = vmul.f32 0.5, %v2262_v1  ;;  %v577_v50 = vmul.f32 0.5, %v2426_v0  ;;  %v1085_v6 = vmul.f32 %v1084_v15, %v2403_v49  ;;  %v1313_v31 = vpop.f32.mrf.mxu1 }
 0x265   :  { %v1135_v43 = vadd.f32 0.4994258, %v1134_v9  ;;  %v1123_v17 = vmul.f32 %v1122_v44, %v2475_v4  ;;  %1523 = vrcp.f32 %v2626_v32  ;;  %v1204_v3 = vadd.f32 0.18741608, %v1203_v25 }
 0x266   :  { %v1418_v20 = vclamps-f32 %v1192_v5, 1.0  ;;  %v1261_v23 = vmul.f32 %v1245_v46, %v573_v7  ;;  %v1415_v60 = vclamps-f32 %v1072_v11, 1.0  ;;  %v1314_v35 = vadd.f32 %v2498_v2, %v1313_v31 }
 0x267   :  { %v1136_v36 = vmul.f32 %v1135_v43, %v2475_v4  ;;  %v1086_v49 = vadd.f32 1.1283791, %v1085_v6  ;;  %v1124_v51 = vadd.f32 0.18741608, %v1123_v17  ;;  %v1205_v22 = vmul.f32 %v1204_v3, %v2489_v48 }
 0x268   :  { %v1249_v59 = vadd.f32 1.0, %v1418_v20  ;;  %v1522_v58 = vpop.eup %1521  ;;  %v1355_v57 = vadd.f32 %v1531_v16, %v1314_v35  ;;  %v1246_v62 = vadd.f32 1.0, %v1415_v60  ;;  %v1109_v42 = vand.u32 2147483648, %v2612_v34 }
 0x269   :  { %v1099_v0 = vmul.f32 %v1522_v58, %v2612_v34  ;;  %1333 = vmatmul.f32.gmra.mxu2 %v1261_v23  ;;  %v2636_v29 = vadd.f32 1.0, %v1136_v36  ;;  %vm1104_vm12 = vweird.f32 %v1522_v58  ;;  %v1107_v54 = vand.u32 2147483647, %v2612_v34 }
 0x26a   :  { %v1265_v1 = vmul.f32 %v1249_v59, %v577_v50  ;;  %1371 = vst.msk [vmem:[%s2769_s7 + $0x18] sm:$0xff] %vm42_vm0, %v1355_v57  ;;  %v574_v24 = vmul.f32 0.5, %v2344_v47  ;;  %v1087_v48 = vmul.f32 %v1086_v49, %v2380_v13  ;;  %v1125_v38 = vmul.f32 %v1124_v51, %v2475_v4 }
 0x26b   :  { %v1100_v45 = vsub.f32 1.0, %v1099_v0  ;;  %1525 = vrcp.f32 %v2636_v29  ;;  %v1524_v55 = vpop.eup %1523  ;;  %vm1103_vm13 = vweird.f32 %v2612_v34  ;;  %v1206_v40 = vadd.f32 1.1283791, %v1205_v22  ;;  %v1533_v0 = vld [vmem:[%s2762_s0 + $0x28] sm:$0xff]  ;;  %v1534_v22 = vld [vmem:[%s2762_s0 + $0x30] sm:$0xff] }
 0x26c   :  { %1345 = vmatmul.f32.vlgmr.msrb.gmra.mxu3 %v1265_v1  ;;  %v1219_v61 = vmul.f32 %v1524_v55, %v2626_v32  ;;  %v1262_v53 = vmul.f32 %v1246_v62, %v574_v24  ;;  %vm1105_vm14 = vmor %vm1103_vm13, %vm1104_vm12  ;;  %v1110_v52 = vor.u32 1.1754944e-38, %v1109_v42  ;;  %vm1108_vm15 = vcmp.eq.f32.partialorder %v1107_v54, 8.507059e+37 }
 0x26d   :  { %v1101_v63 = vmul.f32 %v1522_v58, %v1100_v45  ;;  %v1227_v41 = vand.u32 2147483647, %v2626_v32  ;;  %v1229_v47 = vand.u32 2147483648, %v2626_v32  ;;  %vm1224_vm1 = vweird.f32 %v1524_v55 }
 0x26e   :  { %v1220_v12 = vsub.f32 1.0, %v1219_v61  ;;  %v575_v4 = vmul.f32 0.5, %v2376_v18  ;;  %v1126_v10 = vadd.f32 1.1283791, %v1125_v38  ;;  %v1207_v56 = vmul.f32 %v1206_v40, %v2480_v28  ;;  %v1532_v18 = vld [vmem:[%s2762_s0 + $0x20] sm:$0xff]  ;;  %v1537_v40 = vld [vmem:[%s2762_s0 + $0x48] sm:$0xff] }
 0x26f   :  { %v1102_v14 = vadd.f32 %v1522_v58, %v1101_v63  ;;  %vm1223_vm2 = vweird.f32 %v2626_v32  ;;  %vm1228_vm4 = vcmp.eq.f32.partialorder %v1227_v41, 8.507059e+37  ;;  %v1230_v26 = vor.u32 1.1754944e-38, %v1229_v47  ;;  %v1536_v61 = vld [vmem:[%s2762_s0 + $0x40] sm:$0xff]  ;;  %v1538_v47 = vld [vmem:[%s2762_s0 + $0x50] sm:$0xff] }
 0x270   :  { %v1221_v13 = vmul.f32 %v1524_v55, %v1220_v12  ;;  %v1316_v34 = vpop.f32.mrf.mxu1  ;;  %vm1225_vm3 = vmor %vm1223_vm2, %vm1224_vm1  ;;  %v1147_v9 = vand.u32 2147483647, %v2636_v29  ;;  %v1149_v28 = vand.u32 2147483648, %v2636_v29  ;;  %vm1143_vm6 = vweird.f32 %v2636_v29 }
 0x271   :  { %v1106_v19 = vsel %vm1105_vm14, %v1522_v58, %v1102_v14  ;;  %v1526_v30 = vpop.eup %1525  ;;  %1336 = vmatmul.f32.gmra.mxu2 %v1262_v53  ;;  %v1317_v15 = vadd.f32 %v2498_v2, %v1316_v34  ;;  %v1127_v58 = vmul.f32 %v1126_v10, %v2430_v27  ;;  %v578_v23 = vmul.f32 0.5, %v2472_v8  ;;  %v1540_v34 = vld [vmem:[%s2762_s0 + $0x58] sm:$0xff] }
 0x272   :  { %v1111_v33 = vsel %vm1108_vm15, %v1110_v52, %v1106_v19  ;;  %v1139_v21 = vmul.f32 %v1526_v30, %v2636_v29  ;;  %v1222_v44 = vadd.f32 %v1524_v55, %v1221_v13  ;;  %vm1144_vm5 = vweird.f32 %v1526_v30 }
 0x273   :  { %v1112_v39 = vmul.f32 %v1111_v33, %v1087_v48  ;;  %v1356_v46 = vadd.f32 %v1532_v18, %v1317_v15  ;;  %vm1145_vm7 = vmor %vm1143_vm6, %vm1144_vm5  ;;  %v1150_v59 = vor.u32 1.1754944e-38, %v1149_v28  ;;  %vm1148_vm8 = vcmp.eq.f32.partialorder %v1147_v9, 8.507059e+37  ;;  %v1539_v33 = vld [vmem:[%s2762_s0 + $0x70] sm:$0xff]  ;;  %v1541_v15 = vld [vmem:[%s2762_s0 + $0x60] sm:$0xff] }
 0x274   :  { %v1140_v25 = vsub.f32 1.0, %v1139_v21  ;;  %v1226_v11 = vsel %vm1225_vm3, %v1524_v55, %v1222_v44  ;;  %v576_v27 = vmul.f32 0.5, %v2414_v37  ;;  %v1535_v37 = vld [vmem:[%s2762_s0 + $0x38] sm:$0xff]  ;;  %v1543_v9 = vld [vmem:[%s2762_s0 + $0x68] sm:$0xff] }
 0x275   :  { %v1416_v5 = vclamps-f32 %v1112_v39, 1.0  ;;  %v1231_v7 = vsel %vm1228_vm4, %v1230_v26, %v1226_v11  ;;  %1372 = vst.msk [vmem:[%s2769_s7 + $0x20] sm:$0xff] %vm42_vm0, %v1356_v46 }
 0x276   :  { %v1141_v50 = vmul.f32 %v1526_v30, %v1140_v25  ;;  %v1232_v32 = vmul.f32 %v1231_v7, %v1207_v56  ;;  %v1542_v25 = vld [vmem:[%s2762_s0 + $0x78] sm:$0xff] }
 0x277   :  { %v1247_v20 = vadd.f32 1.0, %v1416_v5 }
 0x278   :  { %v1142_v6 = vadd.f32 %v1526_v30, %v1141_v50  ;;  %v1419_v17 = vclamps-f32 %v1232_v32, 1.0  ;;  %v1319_v3 = vpop.f32.mrf.mxu1 }
 0x279   :  { %v1263_v43 = vmul.f32 %v1247_v20, %v575_v4  ;;  %v1320_v60 = vadd.f32 %v2498_v2, %v1319_v3 }
 0x27a   :  { %v1146_v31 = vsel %vm1145_vm7, %v1526_v30, %v1142_v6  ;;  %v1250_v36 = vadd.f32 1.0, %v1419_v17 }
 0x27b   :  { %1339 = vmatmul.f32.gmra.mxu2 %v1263_v43  ;;  %v1151_v35 = vsel %vm1148_vm8, %v1150_v59, %v1146_v31  ;;  %v1357_v29 = vadd.f32 %v1533_v0, %v1320_v60 }
 0x27c   :  { %v1152_v1 = vmul.f32 %v1151_v35, %v1127_v58  ;;  %v1266_v49 = vmul.f32 %v1250_v36, %v578_v23 }
 0x27d   :  { %1373 = vst.msk [vmem:[%s2769_s7 + $0x28] sm:$0xff] %vm42_vm0, %v1357_v29 }
 0x27e   :  { %v1417_v51 = vclamps-f32 %v1152_v1, 1.0  ;;  %1348 = vmatmul.f32.gmra.mxu3 %v1266_v49 }
 0x280   :  { %v1248_v8 = vadd.f32 1.0, %v1417_v51  ;;  %v1322_v16 = vpop.f32.mrf.mxu1 }
 0x281   :  { %v1323_v45 = vadd.f32 %v2498_v2, %v1322_v16 }
 0x282   :  { %v1264_v57 = vmul.f32 %v1248_v8, %v576_v27 }
 0x283   :  { %v1358_v62 = vadd.f32 %v1534_v22, %v1323_v45 }
 0x284   :  { %1342 = vmatmul.f32.gmra.mxu2 %v1264_v57 }
 0x285   :  { %1374 = vst.msk [vmem:[%s2769_s7 + $0x30] sm:$0xff] %vm42_vm0, %v1358_v62 }
 0x2c8   :  { %v1325_v42 = vpop.f32.mrf.mxu2 }
 0x2c9   :  { %v1326_v55 = vadd.f32 %v2498_v2, %v1325_v42 }
 0x2cb   :  { %v1359_v63 = vadd.f32 %v1535_v37, %v1326_v55 }
 0x2cd   :  { %1375 = vst.msk [vmem:[%s2769_s7 + $0x38] sm:$0xff] %vm42_vm0, %v1359_v63 }
 0x2d1   :  { %v1328_v54 = vpop.f32.mrf.mxu2 }
 0x2d2   :  { %v1329_v24 = vadd.f32 %v2498_v2, %v1328_v54 }
 0x2d4   :  { %v1360_v48 = vadd.f32 %v1536_v61, %v1329_v24 }
 0x2d6   :  { %1376 = vst.msk [vmem:[%s2769_s7 + $0x40] sm:$0xff] %vm42_vm0, %v1360_v48 }
 0x2e4   :  { %v1331_v38 = vpop.f32.mrf.mxu2 }
 0x2e5   :  { %v1332_v14 = vadd.f32 %v2498_v2, %v1331_v38 }
 0x2e7   :  { %v1361_v53 = vadd.f32 %v1537_v40, %v1332_v14 }
 0x2e9   :  { %1377 = vst.msk [vmem:[%s2769_s7 + $0x48] sm:$0xff] %vm42_vm0, %v1361_v53 }
 0x2ec   :  { %v1334_v52 = vpop.f32.mrf.mxu2 }
 0x2ed   :  { %v1335_v12 = vadd.f32 %v2498_v2, %v1334_v52 }
 0x2ef   :  { %v1346_v19 = vpop.f32.mrf.mxu3  ;;  %v1362_v30 = vadd.f32 %v1538_v47, %v1335_v12 }
 0x2f0   :  { %v1347_v41 = vadd.f32 %v2498_v2, %v1346_v19 }
 0x2f1   :  { %1378 = vst.msk [vmem:[%s2769_s7 + $0x50] sm:$0xff] %vm42_vm0, %v1362_v30 }
 0x2f2   :  { %v1366_v13 = vadd.f32 %v1539_v33, %v1347_v41 }
 0x2f4   :  { %1382 = vst.msk [vmem:[%s2769_s7 + $0x70] sm:$0xff] %vm42_vm0, %v1366_v13  ;;  %v1337_v4 = vpop.f32.mrf.mxu2 }
 0x2f5   :  { %v1338_v10 = vadd.f32 %v2498_v2, %v1337_v4 }
 0x2f7   :  { %v1363_v39 = vadd.f32 %v1540_v34, %v1338_v10 }
 0x2f9   :  { %1379 = vst.msk [vmem:[%s2769_s7 + $0x58] sm:$0xff] %vm42_vm0, %v1363_v39 }
 0x2fe   :  { %v1340_v21 = vpop.f32.mrf.mxu2 }
 0x2ff   :  { %v1341_v56 = vadd.f32 %v2498_v2, %v1340_v21 }
 0x301   :  { %v1364_v44 = vadd.f32 %v1541_v15, %v1341_v56  ;;  %v1349_v5 = vpop.f32.mrf.mxu3 }
 0x302   :  { %v1350_v26 = vadd.f32 %v2498_v2, %v1349_v5 }
 0x303   :  { %1380 = vst.msk [vmem:[%s2769_s7 + $0x60] sm:$0xff] %vm42_vm0, %v1364_v44 }
 0x304   :  { %v1367_v18 = vadd.f32 %v1542_v25, %v1350_v26 }
 0x306   :  { %1383 = vst.msk [vmem:[%s2769_s7 + $0x78] sm:$0xff] %vm42_vm0, %v1367_v18 }
 0x307   :  { %v1343_v46 = vpop.f32.mrf.mxu2 }
 0x308   :  { %v1344_v11 = vadd.f32 %v2498_v2, %v1343_v46 }
 0x30a   :  { %v1365_v28 = vadd.f32 %v1543_v9, %v1344_v11 }
 0x30c   :  { %1381 = vst.msk [vmem:[%s2769_s7 + $0x68] sm:$0xff] %vm42_vm0, %v1365_v28 }

// kernel: _block_forward.5
= control target key start
LH: loop header
LB: loop body
LE: loop exit
PB: predicated region body
PF: predicated region fallthrough
CT: control target
= control target key end

     0   :  { %s2083_s9 = smov 0   ;;  %s3208_s0 = inlined_call_operand.vmem [shape: f32[2,6,6,6,32], index: 0, kind: input, shape index: {}]   ;;  %s3209_s1 = inlined_call_operand.vmem [shape: f32[3,3,3,32], index: 1, kind: input, shape index: {}]   ;;  %s3210_s2 = inlined_call_operand.vmem [shape: f32[2,4,4,4,32], index: 2, kind: output, shape index: {}]  }
   0x1 LB: > { %s2016_s10 = sadd.s32 4294967295, %s2066_s9   ;;  %p2020_p0 = scmp.ge.s32.totalorder %s2066_s9, 1  ;;  %s2066_s9 = sphi %s2083_s9, %s12_s9  }
   0x2   : > { %p112_p1 = scmp.lt.s32.totalorder %s2066_s9, 3 }
   0x4   : > { %p113_p2 = pnand %p2020_p0, %p112_p1 }
   0x6   : > { %116 = sbr.rel (%p113_p2) target bundleno = 316 (0x13c), region = 28 }
   0xb   : > { %p134_p3 = scmp.lt.s32.totalorder %s2016_s10, 1  ;;  %v180_v0 = vld [vmem:[%s3209_s1] sm:$0x7]  ;;  %v2105_v1 = vld [vmem:[%s3209_s1 + $0x4] sm:$0x7]  ;;  %vm1944_vm0 = vcmask 257024  }
   0xc   : > { %3313 = vst [vmem:[#allocation2_spill] sm:$0xff] %v2105_v1  ;;  %v189_v2 = vperm.slane %v180_v0, 0  ;;  %v222_v3 = vperm.slane %v180_v0, 1  ;;  %v2117_v8 = vperm.slane %v180_v0, 2  ;;  %v2120_v9 = vperm.slane %v2105_v1, 0 }
   0xd   : > { %s3451_s10 = smov (!%p134_p3, %s2016_s10), 1 }
   0xe   : > { %s2027_s11 = smul.u32 288, %s3451_s10  ;;  %3317 = vst [vmem:[#allocation6_spill] sm:$0xff] %v2120_v9  ;;  %s2026_s5 = sshll.u32 %s3451_s10, 6 }
   0xf   : > { %s3147_s8 = scalar_lea.vmem %s3210_s2, %s2026_s5 }
  0x10   : > { %s2100_s16 = scalar_lea.vmem %s3208_s0, %s2027_s11 }
  0x11   : > { %v144_v4 = vld [vmem:[%s2100_s16] sm:$0x3f]  ;;  %v2109_v5 = vld [vmem:[%s2100_s16 + $0x8] sm:$0x3f]  ;;  %v2112_v6 = vld [vmem:[%s2100_s16 + $0x10] sm:$0x3f] }
  0x12   : > { %3314 = vst [vmem:[#allocation3_spill] sm:$0xff] %v2109_v5  ;;  %v2115_v7 = vld [vmem:[%s2100_s16 + $0x18] sm:$0x3f]  ;;  %v2123_v10 = vld [vmem:[%s2100_s16 + $0x30] sm:$0x3f]  ;;  %v2131_v13 = vmul.f32 %v189_v2, %v144_v4  ;;  %v2134_v14 = vmul.f32 %v189_v2, %v2109_v5  ;;  %v2137_v15 = vmul.f32 %v189_v2, %v2112_v6  ;;  %v2145_v18 = vmul.f32 %v222_v3, %v144_v4 }
  0x13   : > { %3315 = vst [vmem:[#allocation4_spill] sm:$0xff] %v2112_v6  ;;  %v2126_v11 = vld [vmem:[%s2100_s16 + $0x38] sm:$0x3f]  ;;  %v2129_v12 = vld [vmem:[%s2100_s16 + $0x40] sm:$0x3f]  ;;  %v2143_v17 = vmul.f32 %v189_v2, %v2115_v7  ;;  %v2148_v19 = vmul.f32 %v222_v3, %v2109_v5  ;;  %v2151_v20 = vmul.f32 %v222_v3, %v2112_v6  ;;  %v194_v24 = vmul.f32 %v189_v2, %v2123_v10 }
  0x14   : > { %3316 = vst [vmem:[#allocation5_spill] sm:$0xff] %v2115_v7  ;;  %v2140_v16 = vld [vmem:[%s2100_s16 + $0x48] sm:$0x3f]  ;;  %v2154_v21 = vld [vmem:[%s2100_s16 + $0x60] sm:$0x3f]  ;;  %v195_v25 = vmul.f32 %v189_v2, %v2126_v11  ;;  %v196_v26 = vmul.f32 %v189_v2, %v2129_v12  ;;  %v226_v27 = vmul.f32 %v222_v3, %v2115_v7  ;;  %v227_v30 = vmul.f32 %v222_v3, %v2123_v10 }
  0x15   : > { %3318 = vst [vmem:[#allocation7_spill] sm:$0xff] %v2123_v10  ;;  %v2157_v22 = vld [vmem:[%s2100_s16 + $0x68] sm:$0x3f]  ;;  %v2160_v23 = vld [vmem:[%s2100_s16 + $0x70] sm:$0x3f]  ;;  %v197_v29 = vmul.f32 %v189_v2, %v2140_v16  ;;  %v228_v31 = vmul.f32 %v222_v3, %v2126_v11  ;;  %v229_v32 = vmul.f32 %v222_v3, %v2129_v12  ;;  %v198_v36 = vmul.f32 %v189_v2, %v2154_v21 }
  0x16   : > { %3319 = vst [vmem:[#allocation8_spill] sm:$0xff] %v2126_v11  ;;  %v2167_v28 = vld [vmem:[%s2100_s16 + $0x78] sm:$0x3f]  ;;  %v2174_v33 = vld [vmem:[%s2100_s16 + $0x90] sm:$0x3f]  ;;  %v199_v37 = vmul.f32 %v189_v2, %v2157_v22  ;;  %v200_v38 = vmul.f32 %v189_v2, %v2160_v23  ;;  %v230_v39 = vmul.f32 %v222_v3, %v2140_v16  ;;  %v231_v42 = vmul.f32 %v222_v3, %v2154_v21 }
  0x17   : > { %3320 = vst [vmem:[#allocation9_spill] sm:$0xff] %v2129_v12  ;;  %v2177_v34 = vld [vmem:[%s2100_s16 + $0x98] sm:$0x3f]  ;;  %v2180_v35 = vld [vmem:[%s2100_s16 + $0xa0] sm:$0x3f]  ;;  %v201_v41 = vmul.f32 %v189_v2, %v2167_v28  ;;  %v232_v43 = vmul.f32 %v222_v3, %v2157_v22  ;;  %v233_v44 = vmul.f32 %v222_v3, %v2160_v23  ;;  %v202_v45 = vmul.f32 %v189_v2, %v2174_v33 }
  0x18   : > { %3321 = vst [vmem:[#allocation10_spill] sm:$0xff] %v2140_v16  ;;  %v2187_v40 = vld [vmem:[%s2100_s16 + $0xa8] sm:$0x3f]  ;;  %v203_v46 = vmul.f32 %v189_v2, %v2177_v34  ;;  %v204_v47 = vmul.f32 %v189_v2, %v2180_v35  ;;  %v234_v48 = vmul.f32 %v222_v3, %v2167_v28  ;;  %v235_v50 = vmul.f32 %v222_v3, %v2174_v33 }
  0x19   : > { %3322 = vst [vmem:[#allocation11_spill] sm:$0xff] %v2154_v21  ;;  %v205_v49 = vmul.f32 %v189_v2, %v2187_v40  ;;  %v236_v51 = vmul.f32 %v222_v3, %v2177_v34  ;;  %v237_v52 = vmul.f32 %v222_v3, %v2180_v35  ;;  %v238_v53 = vmul.f32 %v222_v3, %v2187_v40 }
  0x1a   : > { %3323 = vst [vmem:[#allocation12_spill] sm:$0xff] %v2157_v22  ;;  %v2203_v54 = vmul.f32 %v2117_v8, %v144_v4  ;;  %v2207_v55 = vmul.f32 %v2117_v8, %v2109_v5  ;;  %v2211_v56 = vmul.f32 %v2117_v8, %v2112_v6  ;;  %v2215_v57 = vmul.f32 %v2117_v8, %v2115_v7 }
  0x1b   : > { %3324 = vst [vmem:[#allocation13_spill] sm:$0xff] %v2160_v23  ;;  %v2219_v58 = vmul.f32 %v2117_v8, %v2123_v10  ;;  %v2223_v59 = vmul.f32 %v2117_v8, %v2126_v11  ;;  %v2227_v60 = vmul.f32 %v2117_v8, %v2129_v12  ;;  %v2231_v61 = vmul.f32 %v2117_v8, %v2140_v16 }
  0x1c   : > { %3325 = vst [vmem:[#allocation14_spill] sm:$0xff] %v2167_v28  ;;  %v2235_v62 = vmul.f32 %v2117_v8, %v2154_v21  ;;  %v2239_v63 = vmul.f32 %v2117_v8, %v2157_v22  ;;  %v2243_v0 = vmul.f32 %v2117_v8, %v2160_v23  ;;  %v255_v2 = vrot.slane %v2145_v18, 1 }
  0x1d   : > { %3326 = vst [vmem:[#allocation15_spill] sm:$0xff] %v2174_v33  ;;  %v256_v3 = vrot.slane %v2148_v19, 1  ;;  %v257_v4 = vrot.slane %v2151_v20, 1  ;;  %v2250_v10 = vmul.f32 %v2117_v8, %v2167_v28  ;;  %v258_v21 = vrot.slane %v226_v27, 1 }
  0x1e   : > { %3327 = vst [vmem:[#allocation16_spill] sm:$0xff] %v2177_v34  ;;  %v259_v1 = vrot.slane %v227_v30, 1  ;;  %v260_v16 = vrot.slane %v228_v31, 1  ;;  %v261_v12 = vrot.slane %v229_v32, 1  ;;  %v262_v22 = vrot.slane %v230_v39, 1 }
  0x1f   : > { %3328 = vst [vmem:[#allocation17_spill] sm:$0xff] %v2180_v35  ;;  %v263_v11 = vrot.slane %v231_v42, 1  ;;  %v264_v7 = vrot.slane %v232_v43, 1  ;;  %v265_v6 = vrot.slane %v233_v44, 1  ;;  %v266_v23 = vrot.slane %v234_v48, 1 }
  0x20   : > { %3329 = vst [vmem:[#allocation18_spill] sm:$0xff] %v2187_v40  ;;  %v267_v9 = vrot.slane %v235_v50, 1  ;;  %v268_v5 = vrot.slane %v236_v51, 1  ;;  %v269_v18 = vrot.slane %v237_v52, 1  ;;  %v287_v19 = vadd.f32 %v255_v2, %v2131_v13  ;;  %v3335_v2 = vld [vmem:[#allocation6_spill] sm:$0xff] }
  0x21   : > { %3330 = vst [vmem:[#allocation19_spill] sm:$0xff] %v2243_v0  ;;  %v270_v0 = vrot.slane %v238_v53, 1  ;;  %v288_v20 = vadd.f32 %v256_v3, %v2134_v14  ;;  %v289_v28 = vadd.f32 %v257_v4, %v2137_v15  ;;  %v290_v27 = vadd.f32 %v258_v21, %v2143_v17  ;;  %v3336_v4 = vld [vmem:[#allocation4_spill] sm:$0xff] }
  0x22   : > { %v291_v30 = vadd.f32 %v259_v1, %v194_v24  ;;  %v292_v31 = vadd.f32 %v260_v16, %v195_v25  ;;  %v293_v32 = vadd.f32 %v261_v12, %v196_v26  ;;  %v294_v39 = vadd.f32 %v262_v22, %v197_v29 }
  0x23   : > { %v295_v42 = vadd.f32 %v263_v11, %v198_v36  ;;  %v296_v43 = vadd.f32 %v264_v7, %v199_v37  ;;  %v297_v44 = vadd.f32 %v265_v6, %v200_v38  ;;  %v298_v48 = vadd.f32 %v266_v23, %v201_v41 }
  0x24   : > { %v299_v50 = vadd.f32 %v267_v9, %v202_v45  ;;  %v300_v51 = vadd.f32 %v268_v5, %v203_v46  ;;  %v301_v52 = vadd.f32 %v269_v18, %v204_v47  ;;  %v302_v53 = vadd.f32 %v270_v0, %v205_v49  ;;  %v3334_v0 = vld [vmem:[#allocation3_spill] sm:$0xff] }
  0x25   : > { %v316_v13 = vmul.f32 %v2117_v8, %v2174_v33  ;;  %v317_v14 = vmul.f32 %v2117_v8, %v2177_v34  ;;  %v318_v1 = vmul.f32 %v2117_v8, %v2180_v35  ;;  %v319_v12 = vmul.f32 %v2117_v8, %v2187_v40 }
  0x26   : > { %v336_v7 = vrot.slane %v2203_v54, 2  ;;  %v337_v6 = vrot.slane %v2207_v55, 2  ;;  %v338_v5 = vrot.slane %v2211_v56, 2  ;;  %v339_v9 = vrot.slane %v2215_v57, 2  ;;  %v2277_v54 = vld [vmem:[%s2100_s16 + $0x20] sm:$0x3f] }
  0x27   : > { %v340_v11 = vrot.slane %v2219_v58, 2  ;;  %v341_v15 = vrot.slane %v2223_v59, 2  ;;  %v342_v16 = vrot.slane %v2227_v60, 2  ;;  %v343_v17 = vrot.slane %v2231_v61, 2  ;;  %v2280_v58 = vld [vmem:[%s2100_s16 + $0x50] sm:$0x3f] }
  0x28   : > { %v344_v21 = vrot.slane %v2235_v62, 2  ;;  %v345_v8 = vrot.slane %v2239_v63, 2  ;;  %v3331_v22 = vld [vmem:[#allocation19_spill] sm:$0xff]  ;;  %v347_v24 = vrot.slane %v2250_v10, 2  ;;  %v348_v25 = vrot.slane %v316_v13, 2  ;;  %v3344_v13 = vld [vmem:[#allocation14_spill] sm:$0xff] }
  0x29   : > { %v346_v23 = vrot.slane %v3331_v22, 2  ;;  %v349_v26 = vrot.slane %v317_v14, 2  ;;  %v350_v29 = vrot.slane %v318_v1, 2  ;;  %v351_v36 = vrot.slane %v319_v12, 2  ;;  %3332 = vst [vmem:[#allocation19_spill] sm:$0xff] %v2280_v58  ;;  %v3346_v22 = vld [vmem:[#allocation2_spill] sm:$0xff] }
  0x2a   : > { %v368_v37 = vadd.f32 %v336_v7, %v287_v19  ;;  %v369_v38 = vadd.f32 %v337_v6, %v288_v20  ;;  %v370_v41 = vadd.f32 %v338_v5, %v289_v28  ;;  %v371_v45 = vadd.f32 %v339_v9, %v290_v27  ;;  %v2283_v63 = vld [vmem:[%s2100_s16 + $0x80] sm:$0x3f]  ;;  %v3337_v19 = vld [vmem:[#allocation5_spill] sm:$0xff]  ;;  %v2292_v27 = vld [vmem:[%s2100_s16 + $0xb0] sm:$0x3f] }
  0x2b   : > { %v372_v46 = vadd.f32 %v340_v11, %v291_v30  ;;  %v373_v47 = vadd.f32 %v341_v15, %v292_v31  ;;  %v374_v49 = vadd.f32 %v342_v16, %v293_v32  ;;  %v375_v55 = vadd.f32 %v343_v17, %v294_v39  ;;  %3333 = vst [vmem:[#allocation20_spill] sm:$0xff] %v2283_v63  ;;  %v3339_v31 = vld [vmem:[#allocation8_spill] sm:$0xff]  ;;  %v3340_v39 = vld [vmem:[#allocation9_spill] sm:$0xff]  ;;  %v2323_v16 = vld [vmem:[%s3209_s1 + $0x8] sm:$0x7] }
  0x2c   : > { %v376_v56 = vadd.f32 %v344_v21, %v295_v42  ;;  %v377_v57 = vadd.f32 %v345_v8, %v296_v43  ;;  %v378_v10 = vadd.f32 %v346_v23, %v297_v44  ;;  %v379_v59 = vadd.f32 %v347_v24, %v298_v48  ;;  %3338 = vst [vmem:[#allocation3_spill] sm:$0xff] %v2292_v27  ;;  %v3341_v43 = vld [vmem:[#allocation10_spill] sm:$0xff] }
  0x2d   : > { %v380_v60 = vadd.f32 %v348_v25, %v299_v50  ;;  %v381_v61 = vadd.f32 %v349_v26, %v300_v51  ;;  %v382_v62 = vadd.f32 %v350_v29, %v301_v52  ;;  %v383_v28 = vadd.f32 %v351_v36, %v302_v53  ;;  %v3342_v50 = vld [vmem:[#allocation12_spill] sm:$0xff]  ;;  %v3343_v52 = vld [vmem:[#allocation13_spill] sm:$0xff]  ;;  %3345 = vst [vmem:[#allocation6_spill] sm:$0xff] %v2323_v16 }
  0x2e   : > { %v385_v3 = vmul.f32 %v3335_v2, %v3334_v0  ;;  %v386_v18 = vmul.f32 %v3335_v2, %v3336_v4  ;;  %v387_v20 = vmul.f32 %v3335_v2, %v3337_v19  ;;  %v388_v30 = vmul.f32 %v3335_v2, %v2277_v54 }
  0x2f   : > { %v389_v32 = vmul.f32 %v3335_v2, %v3339_v31  ;;  %v390_v42 = vmul.f32 %v3335_v2, %v3340_v39  ;;  %v391_v44 = vmul.f32 %v3335_v2, %v3341_v43  ;;  %v392_v48 = vmul.f32 %v3335_v2, %v2280_v58 }
  0x30   : > { %v393_v51 = vmul.f32 %v3335_v2, %v3342_v50  ;;  %v394_v53 = vmul.f32 %v3335_v2, %v3343_v52  ;;  %v395_v14 = vmul.f32 %v3335_v2, %v3344_v13  ;;  %v396_v1 = vmul.f32 %v3335_v2, %v2283_v63 }
  0x31   : > { %v397_v12 = vmul.f32 %v3335_v2, %v2177_v34  ;;  %v398_v7 = vmul.f32 %v3335_v2, %v2180_v35  ;;  %v399_v6 = vmul.f32 %v3335_v2, %v2187_v40  ;;  %v400_v5 = vmul.f32 %v3335_v2, %v2292_v27 }
  0x32   : > { %v401_v9 = vadd.f32 %v385_v3, %v368_v37  ;;  %v402_v11 = vadd.f32 %v386_v18, %v369_v38  ;;  %v403_v15 = vadd.f32 %v387_v20, %v370_v41  ;;  %v404_v17 = vadd.f32 %v388_v30, %v371_v45 }
  0x33   : > { %v405_v21 = vadd.f32 %v389_v32, %v372_v46  ;;  %v406_v8 = vadd.f32 %v390_v42, %v373_v47  ;;  %v417_v23 = vperm.slane %v3346_v22, 1  ;;  %v407_v24 = vadd.f32 %v391_v44, %v374_v49 }
  0x34   : > { %v408_v25 = vadd.f32 %v392_v48, %v375_v55  ;;  %v409_v26 = vadd.f32 %v393_v51, %v376_v56  ;;  %v410_v29 = vadd.f32 %v394_v53, %v377_v57  ;;  %v411_v36 = vadd.f32 %v395_v14, %v378_v10 }
  0x35   : > { %v412_v33 = vadd.f32 %v396_v1, %v379_v59  ;;  %v413_v2 = vadd.f32 %v397_v12, %v380_v60  ;;  %v414_v37 = vadd.f32 %v398_v7, %v381_v61  ;;  %v415_v38 = vadd.f32 %v399_v6, %v382_v62 }
  0x36   : > { %v416_v41 = vadd.f32 %v400_v5, %v383_v28  ;;  %v2327_v3 = vperm.slane %v3346_v22, 2  ;;  %v2330_v18 = vperm.slane %v2323_v16, 0  ;;  %v418_v45 = vmul.f32 %v417_v23, %v3334_v0 }
  0x37   : > { %v419_v46 = vmul.f32 %v417_v23, %v3336_v4  ;;  %v420_v47 = vmul.f32 %v417_v23, %v3337_v19  ;;  %v2336_v49 = vperm.slane %v2323_v16, 1  ;;  %v421_v55 = vmul.f32 %v417_v23, %v2277_v54 }
  0x38   : > { %3347 = vst [vmem:[#allocation4_spill] sm:$0xff] %v2330_v18  ;;  %v422_v56 = vmul.f32 %v417_v23, %v3339_v31  ;;  %v423_v57 = vmul.f32 %v417_v23, %v3340_v39  ;;  %v424_v10 = vmul.f32 %v417_v23, %v3341_v43  ;;  %v425_v59 = vmul.f32 %v417_v23, %v2280_v58 }
  0x39   : > { %3348 = vst [vmem:[#allocation5_spill] sm:$0xff] %v2336_v49  ;;  %v426_v60 = vmul.f32 %v417_v23, %v3342_v50  ;;  %v427_v61 = vmul.f32 %v417_v23, %v3343_v52  ;;  %v428_v62 = vmul.f32 %v417_v23, %v3344_v13  ;;  %v429_v28 = vmul.f32 %v417_v23, %v2283_v63 }
  0x3a   : > { %v430_v20 = vmul.f32 %v417_v23, %v2177_v34  ;;  %v431_v30 = vmul.f32 %v417_v23, %v2180_v35  ;;  %v432_v32 = vmul.f32 %v417_v23, %v2187_v40  ;;  %v433_v42 = vmul.f32 %v417_v23, %v2292_v27 }
  0x3b   : > { %v450_v44 = vrot.slane %v418_v45, 1  ;;  %v451_v48 = vrot.slane %v419_v46, 1  ;;  %v452_v51 = vrot.slane %v420_v47, 1  ;;  %v453_v53 = vrot.slane %v421_v55, 1 }
  0x3c   : > { %v454_v14 = vrot.slane %v422_v56, 1  ;;  %v455_v1 = vrot.slane %v423_v57, 1  ;;  %v456_v12 = vrot.slane %v424_v10, 1  ;;  %v457_v7 = vrot.slane %v425_v59, 1 }
  0x3d   : > { %v458_v6 = vrot.slane %v426_v60, 1  ;;  %v459_v5 = vrot.slane %v427_v61, 1  ;;  %v460_v22 = vrot.slane %v428_v62, 1  ;;  %v461_v16 = vrot.slane %v429_v28, 1 }
  0x3e   : > { %v462_v49 = vrot.slane %v430_v20, 1  ;;  %v463_v18 = vrot.slane %v431_v30, 1  ;;  %v464_v34 = vrot.slane %v432_v32, 1  ;;  %v465_v35 = vrot.slane %v433_v42, 1 }
  0x3f   : > { %v482_v63 = vadd.f32 %v450_v44, %v401_v9  ;;  %v483_v40 = vadd.f32 %v451_v48, %v402_v11  ;;  %v484_v13 = vadd.f32 %v452_v51, %v403_v15  ;;  %v485_v23 = vadd.f32 %v453_v53, %v404_v17 }
  0x40   : > { %v486_v45 = vadd.f32 %v454_v14, %v405_v21  ;;  %v487_v46 = vadd.f32 %v455_v1, %v406_v8  ;;  %v488_v47 = vadd.f32 %v456_v12, %v407_v24  ;;  %v489_v55 = vadd.f32 %v457_v7, %v408_v25  ;;  %v3349_v21 = vld [vmem:[#allocation14_spill] sm:$0xff]  ;;  %v3350_v24 = vld [vmem:[#allocation20_spill] sm:$0xff] }
  0x41   : > { %v490_v56 = vadd.f32 %v458_v6, %v409_v26  ;;  %v491_v57 = vadd.f32 %v459_v5, %v410_v29  ;;  %v492_v10 = vadd.f32 %v460_v22, %v411_v36  ;;  %v493_v59 = vadd.f32 %v461_v16, %v412_v33  ;;  %v3351_v26 = vld [vmem:[#allocation16_spill] sm:$0xff]  ;;  %v3352_v36 = vld [vmem:[#allocation17_spill] sm:$0xff] }
  0x42   : > { %v494_v60 = vadd.f32 %v462_v49, %v413_v2  ;;  %v495_v61 = vadd.f32 %v463_v18, %v414_v37  ;;  %v496_v62 = vadd.f32 %v464_v34, %v415_v38  ;;  %v497_v28 = vadd.f32 %v465_v35, %v416_v41  ;;  %v3353_v37 = vld [vmem:[#allocation18_spill] sm:$0xff] }
  0x43   : > { %v499_v20 = vmul.f32 %v2327_v3, %v3334_v0  ;;  %v500_v9 = vmul.f32 %v2327_v3, %v3336_v4  ;;  %v501_v11 = vmul.f32 %v2327_v3, %v3337_v19  ;;  %v502_v15 = vmul.f32 %v2327_v3, %v2277_v54 }
  0x44   : > { %v503_v17 = vmul.f32 %v2327_v3, %v3339_v31  ;;  %v504_v33 = vmul.f32 %v2327_v3, %v3340_v39  ;;  %v505_v34 = vmul.f32 %v2327_v3, %v3341_v43  ;;  %v506_v35 = vmul.f32 %v2327_v3, %v2280_v58 }
  0x45   : > { %v507_v0 = vmul.f32 %v2327_v3, %v3342_v50  ;;  %v508_v16 = vmul.f32 %v2327_v3, %v3343_v52  ;;  %v509_v8 = vmul.f32 %v2327_v3, %v3349_v21  ;;  %v510_v25 = vmul.f32 %v2327_v3, %v3350_v24 }
  0x46   : > { %v511_v29 = vmul.f32 %v2327_v3, %v3351_v26  ;;  %v512_v2 = vmul.f32 %v2327_v3, %v3352_v36  ;;  %v513_v38 = vmul.f32 %v2327_v3, %v3353_v37  ;;  %v514_v41 = vmul.f32 %v2327_v3, %v2292_v27 }
  0x47   : > { %v531_v18 = vrot.slane %v499_v20, 2  ;;  %v532_v49 = vrot.slane %v500_v9, 2  ;;  %v533_v30 = vrot.slane %v501_v11, 2  ;;  %v534_v32 = vrot.slane %v502_v15, 2 }
  0x48   : > { %v535_v42 = vrot.slane %v503_v17, 2  ;;  %v536_v44 = vrot.slane %v504_v33, 2  ;;  %v537_v48 = vrot.slane %v505_v34, 2  ;;  %v538_v51 = vrot.slane %v506_v35, 2  ;;  %v2384_v33 = vld [vmem:[%s2100_s16 + $0x28] sm:$0x3f] }
  0x49   : > { %v539_v53 = vrot.slane %v507_v0, 2  ;;  %v540_v14 = vrot.slane %v508_v16, 2  ;;  %v541_v1 = vrot.slane %v509_v8, 2  ;;  %v542_v12 = vrot.slane %v510_v25, 2  ;;  %v2387_v8 = vld [vmem:[%s2100_s16 + $0x58] sm:$0x3f] }
  0x4a   : > { %v543_v7 = vrot.slane %v511_v29, 2  ;;  %v544_v6 = vrot.slane %v512_v2, 2  ;;  %v545_v5 = vrot.slane %v513_v38, 2  ;;  %v546_v22 = vrot.slane %v514_v41, 2  ;;  %3354 = vst [vmem:[#allocation9_spill] sm:$0xff] %v2387_v8 }
  0x4b   : > { %v563_v26 = vadd.f32 %v531_v18, %v482_v63  ;;  %v564_v3 = vadd.f32 %v532_v49, %v483_v40  ;;  %v565_v20 = vadd.f32 %v533_v30, %v484_v13  ;;  %v566_v9 = vadd.f32 %v534_v32, %v485_v23  ;;  %v2390_v40 = vld [vmem:[%s2100_s16 + $0x88] sm:$0x3f]  ;;  %v3356_v23 = vld [vmem:[#allocation4_spill] sm:$0xff] }
  0x4c   : > { %v567_v11 = vadd.f32 %v535_v42, %v486_v45  ;;  %v568_v15 = vadd.f32 %v536_v44, %v487_v46  ;;  %v569_v17 = vadd.f32 %v537_v48, %v488_v47  ;;  %v570_v34 = vadd.f32 %v538_v51, %v489_v55  ;;  %3355 = vst [vmem:[#allocation10_spill] sm:$0xff] %v2390_v40  ;;  %v2399_v55 = vld [vmem:[%s2100_s16 + $0xb8] sm:$0x3f] }
  0x4d   : > { %v571_v35 = vadd.f32 %v539_v53, %v490_v56  ;;  %v572_v0 = vadd.f32 %v540_v14, %v491_v57  ;;  %v573_v16 = vadd.f32 %v541_v1, %v492_v10  ;;  %v574_v25 = vadd.f32 %v542_v12, %v493_v59  ;;  %3357 = vst [vmem:[#allocation13_spill] sm:$0xff] %v2399_v55 }
  0x4e   : > { %v575_v29 = vadd.f32 %v543_v7, %v494_v60  ;;  %v576_v2 = vadd.f32 %v544_v6, %v495_v61  ;;  %v577_v63 = vadd.f32 %v545_v5, %v496_v62  ;;  %v578_v13 = vadd.f32 %v546_v22, %v497_v28 }
  0x4f   : > { %v580_v45 = vmul.f32 %v3356_v23, %v3336_v4  ;;  %v581_v46 = vmul.f32 %v3356_v23, %v3337_v19  ;;  %v582_v47 = vmul.f32 %v3356_v23, %v2277_v54  ;;  %v583_v56 = vmul.f32 %v3356_v23, %v2384_v33 }
  0x50   : > { %v584_v57 = vmul.f32 %v3356_v23, %v3340_v39  ;;  %v585_v10 = vmul.f32 %v3356_v23, %v3341_v43  ;;  %v586_v59 = vmul.f32 %v3356_v23, %v2280_v58  ;;  %v587_v60 = vmul.f32 %v3356_v23, %v2387_v8 }
  0x51   : > { %v588_v61 = vmul.f32 %v3356_v23, %v3343_v52  ;;  %v589_v62 = vmul.f32 %v3356_v23, %v3349_v21  ;;  %v590_v28 = vmul.f32 %v3356_v23, %v3350_v24  ;;  %v591_v38 = vmul.f32 %v3356_v23, %v2390_v40 }
  0x52   : > { %v592_v41 = vmul.f32 %v3356_v23, %v3352_v36  ;;  %v593_v18 = vmul.f32 %v3356_v23, %v3353_v37  ;;  %v594_v49 = vmul.f32 %v3356_v23, %v2292_v27  ;;  %v595_v30 = vmul.f32 %v3356_v23, %v2399_v55  ;;  %v3358_v27 = vld [vmem:[#allocation5_spill] sm:$0xff] }
  0x53   : > { %v596_v32 = vadd.f32 %v580_v45, %v563_v26  ;;  %v597_v42 = vadd.f32 %v581_v46, %v564_v3  ;;  %v598_v44 = vadd.f32 %v582_v47, %v565_v20  ;;  %v599_v48 = vadd.f32 %v583_v56, %v566_v9 }
  0x54   : > { %v600_v51 = vadd.f32 %v584_v57, %v567_v11  ;;  %v601_v53 = vadd.f32 %v585_v10, %v568_v15  ;;  %v602_v14 = vadd.f32 %v586_v59, %v569_v17  ;;  %v603_v1 = vadd.f32 %v587_v60, %v570_v34 }
  0x55   : > { %v604_v12 = vadd.f32 %v588_v61, %v571_v35  ;;  %v605_v7 = vadd.f32 %v589_v62, %v572_v0  ;;  %v606_v6 = vadd.f32 %v590_v28, %v573_v16  ;;  %v607_v5 = vadd.f32 %v591_v38, %v574_v25  ;;  %v3359_v25 = vld [vmem:[#allocation17_spill] sm:$0xff] }
  0x56   : > { %v608_v22 = vadd.f32 %v592_v41, %v575_v29  ;;  %v609_v50 = vadd.f32 %v593_v18, %v576_v2  ;;  %v610_v31 = vadd.f32 %v594_v49, %v577_v63  ;;  %v611_v37 = vadd.f32 %v595_v30, %v578_v13  ;;  %v3360_v2 = vld [vmem:[#allocation18_spill] sm:$0xff]  ;;  %v3361_v13 = vld [vmem:[#allocation3_spill] sm:$0xff] }
  0x57   : > { %v613_v36 = vmul.f32 %v3358_v27, %v3336_v4  ;;  %v614_v26 = vmul.f32 %v3358_v27, %v3337_v19  ;;  %v615_v3 = vmul.f32 %v3358_v27, %v2277_v54  ;;  %v616_v20 = vmul.f32 %v3358_v27, %v2384_v33 }
  0x58   : > { %v617_v9 = vmul.f32 %v3358_v27, %v3340_v39  ;;  %v618_v11 = vmul.f32 %v3358_v27, %v3341_v43  ;;  %v619_v15 = vmul.f32 %v3358_v27, %v2280_v58  ;;  %v620_v17 = vmul.f32 %v3358_v27, %v2387_v8 }
  0x59   : > { %v621_v34 = vmul.f32 %v3358_v27, %v3343_v52  ;;  %v622_v35 = vmul.f32 %v3358_v27, %v3349_v21  ;;  %v623_v0 = vmul.f32 %v3358_v27, %v3350_v24  ;;  %v624_v16 = vmul.f32 %v3358_v27, %v2390_v40 }
  0x5a   : > { %v625_v29 = vmul.f32 %v3358_v27, %v3359_v25  ;;  %v626_v63 = vmul.f32 %v3358_v27, %v3360_v2  ;;  %v627_v23 = vmul.f32 %v3358_v27, %v3361_v13  ;;  %v628_v45 = vmul.f32 %v3358_v27, %v2399_v55  ;;  %v183_v27 = vld [vmem:[%s3209_s1 + $0xc] sm:$0x7] }
  0x5b   : > { %v645_v46 = vrot.slane %v613_v36, 1  ;;  %v646_v47 = vrot.slane %v614_v26, 1  ;;  %v647_v56 = vrot.slane %v615_v3, 1  ;;  %v648_v57 = vrot.slane %v616_v20, 1  ;;  %v3362_v20 = vld [vmem:[#allocation6_spill] sm:$0xff] }
  0x5c   : > { %v649_v10 = vrot.slane %v617_v9, 1  ;;  %v650_v59 = vrot.slane %v618_v11, 1  ;;  %v651_v60 = vrot.slane %v619_v15, 1  ;;  %v652_v61 = vrot.slane %v620_v17, 1 }
  0x5d   : > { %v653_v62 = vrot.slane %v621_v34, 1  ;;  %v654_v28 = vrot.slane %v622_v35, 1  ;;  %v655_v38 = vrot.slane %v623_v0, 1  ;;  %v656_v41 = vrot.slane %v624_v16, 1 }
  0x5e   : > { %v657_v18 = vrot.slane %v625_v29, 1  ;;  %v658_v49 = vrot.slane %v626_v63, 1  ;;  %v659_v30 = vrot.slane %v627_v23, 1  ;;  %v660_v2 = vrot.slane %v628_v45, 1  ;;  %v3367_v23 = vld [vmem:[#allocation3_spill] sm:$0xff] }
  0x5f   : > { %v677_v13 = vadd.f32 %v645_v46, %v596_v32  ;;  %v678_v25 = vadd.f32 %v646_v47, %v597_v42  ;;  %v679_v40 = vadd.f32 %v647_v56, %v598_v44  ;;  %v680_v36 = vadd.f32 %v648_v57, %v599_v48 }
  0x60   : > { %v681_v26 = vadd.f32 %v649_v10, %v600_v51  ;;  %v682_v3 = vadd.f32 %v650_v59, %v601_v53  ;;  %v693_v9 = vperm.slane %v3362_v20, 2  ;;  %v683_v11 = vadd.f32 %v651_v60, %v602_v14 }
  0x61   : > { %v684_v15 = vadd.f32 %v652_v61, %v603_v1  ;;  %v685_v17 = vadd.f32 %v653_v62, %v604_v12  ;;  %v686_v34 = vadd.f32 %v654_v28, %v605_v7  ;;  %v687_v35 = vadd.f32 %v655_v38, %v606_v6  ;;  %v3364_v6 = vld [vmem:[#allocation10_spill] sm:$0xff] }
  0x62   : > { %v688_v0 = vadd.f32 %v656_v41, %v607_v5  ;;  %v689_v16 = vadd.f32 %v657_v18, %v608_v22  ;;  %v690_v29 = vadd.f32 %v658_v49, %v609_v50  ;;  %v691_v32 = vadd.f32 %v659_v30, %v610_v31  ;;  %v3365_v5 = vld [vmem:[#allocation17_spill] sm:$0xff] }
  0x63   : > { %v692_v42 = vadd.f32 %v660_v2, %v611_v37  ;;  %v2463_v44 = vperm.slane %v183_v27, 0  ;;  %v2465_v63 = vperm.slane %v183_v27, 1  ;;  %v694_v48 = vmul.f32 %v693_v9, %v3336_v4  ;;  %v3366_v2 = vld [vmem:[#allocation18_spill] sm:$0xff] }
  0x64   : > { %v695_v51 = vmul.f32 %v693_v9, %v3337_v19  ;;  %v696_v53 = vmul.f32 %v693_v9, %v2277_v54  ;;  %v2470_v14 = vperm.slane %v183_v27, 2  ;;  %v697_v1 = vmul.f32 %v693_v9, %v2384_v33 }
  0x65   : > { %v698_v12 = vmul.f32 %v693_v9, %v3340_v39  ;;  %v699_v50 = vmul.f32 %v693_v9, %v3341_v43  ;;  %v700_v31 = vmul.f32 %v693_v9, %v2280_v58  ;;  %v701_v37 = vmul.f32 %v693_v9, %v2387_v8 }
  0x66   : > { %3363 = vst [vmem:[#allocation2_spill] sm:$0xff] %v2470_v14  ;;  %v702_v7 = vmul.f32 %v693_v9, %v3343_v52  ;;  %v703_v4 = vmul.f32 %v693_v9, %v3349_v21  ;;  %v704_v19 = vmul.f32 %v693_v9, %v3350_v24  ;;  %v705_v54 = vmul.f32 %v693_v9, %v3364_v6 }
  0x67   : > { %v706_v22 = vmul.f32 %v693_v9, %v3365_v5  ;;  %v707_v33 = vmul.f32 %v693_v9, %v3366_v2  ;;  %v708_v45 = vmul.f32 %v693_v9, %v3367_v23  ;;  %v709_v46 = vmul.f32 %v693_v9, %v2399_v55 }
  0x68   : > { %v726_v47 = vrot.slane %v694_v48, 2  ;;  %v727_v56 = vrot.slane %v695_v51, 2  ;;  %v728_v57 = vrot.slane %v696_v53, 2  ;;  %v729_v10 = vrot.slane %v697_v1, 2 }
  0x69   : > { %v730_v59 = vrot.slane %v698_v12, 2  ;;  %v731_v60 = vrot.slane %v699_v50, 2  ;;  %v732_v61 = vrot.slane %v700_v31, 2  ;;  %v733_v62 = vrot.slane %v701_v37, 2 }
  0x6a   : > { %v734_v28 = vrot.slane %v702_v7, 2  ;;  %v735_v38 = vrot.slane %v703_v4, 2  ;;  %v736_v41 = vrot.slane %v704_v19, 2  ;;  %v737_v18 = vrot.slane %v705_v54, 2 }
  0x6b   : > { %v738_v49 = vrot.slane %v706_v22, 2  ;;  %v739_v30 = vrot.slane %v707_v33, 2  ;;  %v740_v27 = vrot.slane %v708_v45, 2  ;;  %v741_v20 = vrot.slane %v709_v46, 2  ;;  %v2486_v33 = vld [vmem:[%s2100_s16 + $0xc0] sm:$0x3f] }
  0x6c   : > { %v758_v6 = vadd.f32 %v726_v47, %v677_v13  ;;  %v759_v9 = vadd.f32 %v727_v56, %v678_v25  ;;  %v760_v48 = vadd.f32 %v728_v57, %v679_v40  ;;  %v761_v51 = vadd.f32 %v729_v10, %v680_v36  ;;  %3368 = vst [vmem:[#allocation14_spill] sm:$0xff] %v2486_v33  ;;  %v2489_v13 = vld [vmem:[%s2100_s16 + $0xc8] sm:$0x3f]  ;;  %v2492_v25 = vld [vmem:[%s2100_s16 + $0xd0] sm:$0x3f] }
  0x6d   : > { %v762_v53 = vadd.f32 %v730_v59, %v681_v26  ;;  %v763_v1 = vadd.f32 %v731_v60, %v682_v3  ;;  %v764_v12 = vadd.f32 %v732_v61, %v683_v11  ;;  %v765_v50 = vadd.f32 %v733_v62, %v684_v15  ;;  %3369 = vst [vmem:[#allocation4_spill] sm:$0xff] %v2489_v13  ;;  %v3371_v36 = vld [vmem:[#allocation7_spill] sm:$0xff]  ;;  %v3372_v3 = vld [vmem:[#allocation8_spill] sm:$0xff] }
  0x6e   : > { %v766_v31 = vadd.f32 %v734_v28, %v685_v17  ;;  %v767_v37 = vadd.f32 %v735_v38, %v686_v34  ;;  %v768_v7 = vadd.f32 %v736_v41, %v687_v35  ;;  %v769_v4 = vadd.f32 %v737_v18, %v688_v0  ;;  %3370 = vst [vmem:[#allocation5_spill] sm:$0xff] %v2492_v25  ;;  %v2501_v17 = vld [vmem:[%s2100_s16 + $0xd8] sm:$0x3f]  ;;  %v3374_v35 = vld [vmem:[#allocation11_spill] sm:$0xff]  ;;  %v3377_v47 = vld [vmem:[#allocation16_spill] sm:$0xff] }
  0x6f   : > { %v770_v19 = vadd.f32 %v738_v49, %v689_v16  ;;  %v771_v54 = vadd.f32 %v739_v30, %v690_v29  ;;  %v772_v22 = vadd.f32 %v740_v27, %v691_v32  ;;  %v773_v40 = vadd.f32 %v741_v20, %v692_v42  ;;  %3373 = vst [vmem:[#allocation6_spill] sm:$0xff] %v2501_v17  ;;  %v3375_v16 = vld [vmem:[#allocation12_spill] sm:$0xff]  ;;  %v3376_v45 = vld [vmem:[#allocation15_spill] sm:$0xff] }
  0x70   : > { %v775_v26 = vmul.f32 %v2463_v44, %v3371_v36  ;;  %v776_v11 = vmul.f32 %v2463_v44, %v3372_v3  ;;  %v777_v15 = vmul.f32 %v2463_v44, %v3340_v39  ;;  %v778_v34 = vmul.f32 %v2463_v44, %v3341_v43 }
  0x71   : > { %v779_v0 = vmul.f32 %v2463_v44, %v3374_v35  ;;  %v780_v29 = vmul.f32 %v2463_v44, %v3375_v16  ;;  %v781_v32 = vmul.f32 %v2463_v44, %v3343_v52  ;;  %v782_v42 = vmul.f32 %v2463_v44, %v3349_v21 }
  0x72   : > { %v783_v46 = vmul.f32 %v2463_v44, %v3376_v45  ;;  %v784_v56 = vmul.f32 %v2463_v44, %v3377_v47  ;;  %v785_v57 = vmul.f32 %v2463_v44, %v3365_v5  ;;  %v786_v10 = vmul.f32 %v2463_v44, %v3366_v2 }
  0x73   : > { %v787_v59 = vmul.f32 %v2463_v44, %v2486_v33  ;;  %v788_v60 = vmul.f32 %v2463_v44, %v2489_v13  ;;  %v789_v61 = vmul.f32 %v2463_v44, %v2492_v25  ;;  %v790_v62 = vmul.f32 %v2463_v44, %v2501_v17 }
  0x74   : > { %v791_v28 = vadd.f32 %v775_v26, %v758_v6  ;;  %v792_v38 = vadd.f32 %v776_v11, %v759_v9  ;;  %v793_v41 = vadd.f32 %v777_v15, %v760_v48  ;;  %v794_v18 = vadd.f32 %v778_v34, %v761_v51 }
  0x75   : > { %v795_v49 = vadd.f32 %v779_v0, %v762_v53  ;;  %v796_v30 = vadd.f32 %v780_v29, %v763_v1  ;;  %v797_v27 = vadd.f32 %v781_v32, %v764_v12  ;;  %v798_v20 = vadd.f32 %v782_v42, %v765_v50 }
  0x76   : > { %v799_v55 = vadd.f32 %v783_v46, %v766_v31  ;;  %v800_v8 = vadd.f32 %v784_v56, %v767_v37  ;;  %v801_v23 = vadd.f32 %v785_v57, %v768_v7  ;;  %v802_v24 = vadd.f32 %v786_v10, %v769_v4  ;;  %v3378_v7 = vld [vmem:[#allocation14_spill] sm:$0xff] }
  0x77   : > { %v803_v58 = vadd.f32 %v787_v59, %v770_v19  ;;  %v804_v14 = vadd.f32 %v788_v60, %v771_v54  ;;  %v805_v13 = vadd.f32 %v789_v61, %v772_v22  ;;  %v806_v33 = vadd.f32 %v790_v62, %v773_v40  ;;  %v3379_v19 = vld [vmem:[#allocation4_spill] sm:$0xff]  ;;  %v3380_v22 = vld [vmem:[#allocation5_spill] sm:$0xff] }
  0x78   : > { %v808_v25 = vmul.f32 %v2465_v63, %v3371_v36  ;;  %v809_v44 = vmul.f32 %v2465_v63, %v3372_v3  ;;  %v810_v6 = vmul.f32 %v2465_v63, %v3340_v39  ;;  %v811_v9 = vmul.f32 %v2465_v63, %v3341_v43 }
  0x79   : > { %v812_v48 = vmul.f32 %v2465_v63, %v3374_v35  ;;  %v813_v51 = vmul.f32 %v2465_v63, %v3375_v16  ;;  %v814_v53 = vmul.f32 %v2465_v63, %v3343_v52  ;;  %v815_v1 = vmul.f32 %v2465_v63, %v3349_v21 }
  0x7a   : > { %v816_v12 = vmul.f32 %v2465_v63, %v3376_v45  ;;  %v817_v50 = vmul.f32 %v2465_v63, %v3377_v47  ;;  %v818_v31 = vmul.f32 %v2465_v63, %v3365_v5  ;;  %v819_v37 = vmul.f32 %v2465_v63, %v3366_v2 }
  0x7b   : > { %v820_v4 = vmul.f32 %v2465_v63, %v3378_v7  ;;  %v821_v54 = vmul.f32 %v2465_v63, %v3379_v19  ;;  %v822_v40 = vmul.f32 %v2465_v63, %v3380_v22  ;;  %v823_v26 = vmul.f32 %v2465_v63, %v2501_v17 }
  0x7c   : > { %v840_v11 = vrot.slane %v808_v25, 1  ;;  %v841_v15 = vrot.slane %v809_v44, 1  ;;  %v842_v34 = vrot.slane %v810_v6, 1  ;;  %v843_v0 = vrot.slane %v811_v9, 1 }
  0x7d   : > { %v844_v29 = vrot.slane %v812_v48, 1  ;;  %v845_v32 = vrot.slane %v813_v51, 1  ;;  %v846_v42 = vrot.slane %v814_v53, 1  ;;  %v847_v46 = vrot.slane %v815_v1, 1 }
  0x7e   : > { %v848_v56 = vrot.slane %v816_v12, 1  ;;  %v849_v57 = vrot.slane %v817_v50, 1  ;;  %v850_v10 = vrot.slane %v818_v31, 1  ;;  %v851_v59 = vrot.slane %v819_v37, 1 }
  0x7f   : > { %v852_v60 = vrot.slane %v820_v4, 1  ;;  %v853_v61 = vrot.slane %v821_v54, 1  ;;  %v854_v62 = vrot.slane %v822_v40, 1  ;;  %v855_v19 = vrot.slane %v823_v26, 1  ;;  %v3381_v4 = vld [vmem:[#allocation2_spill] sm:$0xff] }
  0x80   : > { %v872_v22 = vadd.f32 %v840_v11, %v791_v28  ;;  %v873_v7 = vadd.f32 %v841_v15, %v792_v38  ;;  %v874_v2 = vadd.f32 %v842_v34, %v793_v41  ;;  %v875_v63 = vadd.f32 %v843_v0, %v794_v18 }
  0x81   : > { %v876_v25 = vadd.f32 %v844_v29, %v795_v49  ;;  %v877_v44 = vadd.f32 %v845_v32, %v796_v30  ;;  %v878_v6 = vadd.f32 %v846_v42, %v797_v27  ;;  %v879_v9 = vadd.f32 %v847_v46, %v798_v20  ;;  %v184_v20 = vld [vmem:[%s3209_s1 + $0x10] sm:$0x7] }
  0x82   : > { %v880_v48 = vadd.f32 %v848_v56, %v799_v55  ;;  %v881_v51 = vadd.f32 %v849_v57, %v800_v8  ;;  %v882_v53 = vadd.f32 %v850_v10, %v801_v23  ;;  %v883_v1 = vadd.f32 %v851_v59, %v802_v24  ;;  %v3382_v23 = vld [vmem:[#allocation18_spill] sm:$0xff] }
  0x83   : > { %v884_v12 = vadd.f32 %v852_v60, %v803_v58  ;;  %v885_v50 = vadd.f32 %v853_v61, %v804_v14  ;;  %v886_v31 = vadd.f32 %v854_v62, %v805_v13  ;;  %v887_v37 = vadd.f32 %v855_v19, %v806_v33  ;;  %v3383_v13 = vld [vmem:[#allocation14_spill] sm:$0xff]  ;;  %v2599_v61 = vld [vmem:[%s3209_s1 + $0x14] sm:$0x7] }
  0x84   : > { %v889_v54 = vmul.f32 %v3381_v4, %v3371_v36  ;;  %v890_v28 = vmul.f32 %v3381_v4, %v3372_v3  ;;  %v891_v38 = vmul.f32 %v3381_v4, %v3340_v39  ;;  %v892_v41 = vmul.f32 %v3381_v4, %v3341_v43  ;;  %v3384_v3 = vld [vmem:[#allocation4_spill] sm:$0xff]  ;;  %3386 = vst [vmem:[#allocation17_spill] sm:$0xff] %v2599_v61 }
  0x85   : > { %v893_v8 = vmul.f32 %v3381_v4, %v3374_v35  ;;  %v894_v58 = vmul.f32 %v3381_v4, %v3375_v16  ;;  %v895_v24 = vmul.f32 %v3381_v4, %v3343_v52  ;;  %v896_v55 = vmul.f32 %v3381_v4, %v3349_v21  ;;  %v3385_v35 = vld [vmem:[#allocation5_spill] sm:$0xff] }
  0x86   : > { %v897_v14 = vmul.f32 %v3381_v4, %v3376_v45  ;;  %v898_v39 = vmul.f32 %v3381_v4, %v3377_v47  ;;  %v899_v43 = vmul.f32 %v3381_v4, %v3365_v5  ;;  %v900_v33 = vmul.f32 %v3381_v4, %v3382_v23 }
  0x87   : > { %v901_v36 = vmul.f32 %v3381_v4, %v3383_v13  ;;  %v902_v52 = vmul.f32 %v3381_v4, %v3384_v3  ;;  %v903_v21 = vmul.f32 %v3381_v4, %v3385_v35  ;;  %v904_v16 = vmul.f32 %v3381_v4, %v2501_v17 }
  0x88   : > { %v921_v45 = vrot.slane %v889_v54, 2  ;;  %v922_v47 = vrot.slane %v890_v28, 2  ;;  %v923_v18 = vrot.slane %v891_v38, 2  ;;  %v924_v49 = vrot.slane %v892_v41, 2 }
  0x89   : > { %v925_v5 = vrot.slane %v893_v8, 2  ;;  %v926_v30 = vrot.slane %v894_v58, 2  ;;  %v927_v27 = vrot.slane %v895_v24, 2  ;;  %v928_v19 = vrot.slane %v896_v55, 2  ;;  %v2604_v8 = vld [vmem:[%s2100_s16 + $0x38] sm:$0x3f] }
  0x8a   : > { %v929_v40 = vrot.slane %v897_v14, 2  ;;  %v930_v26 = vrot.slane %v898_v39, 2  ;;  %v931_v11 = vrot.slane %v899_v43, 2  ;;  %v932_v15 = vrot.slane %v900_v33, 2  ;;  %v2627_v24 = vld [vmem:[%s2100_s16 + $0x70] sm:$0x3f] }
  0x8b   : > { %v933_v34 = vrot.slane %v901_v36, 2  ;;  %v934_v0 = vrot.slane %v902_v52, 2  ;;  %v935_v29 = vrot.slane %v903_v21, 2  ;;  %v936_v32 = vrot.slane %v904_v16, 2  ;;  %v2631_v14 = vld [vmem:[%s2100_s16 + $0x78] sm:$0x3f] }
  0x8c   : > { %v953_v42 = vadd.f32 %v921_v45, %v872_v22  ;;  %v954_v46 = vadd.f32 %v922_v47, %v873_v7  ;;  %v955_v56 = vadd.f32 %v923_v18, %v874_v2  ;;  %v956_v57 = vadd.f32 %v924_v49, %v875_v63  ;;  %v3392_v43 = vld [vmem:[#allocation20_spill] sm:$0xff]  ;;  %v2636_v33 = vld [vmem:[%s2100_s16 + $0x98] sm:$0x3f]  ;;  %v2640_v52 = vld [vmem:[%s2100_s16 + $0xa0] sm:$0x3f] }
  0x8d   : > { %v957_v10 = vadd.f32 %v925_v5, %v876_v25  ;;  %v958_v59 = vadd.f32 %v926_v30, %v877_v44  ;;  %v969_v60 = vperm.slane %v184_v20, 0  ;;  %v959_v62 = vadd.f32 %v927_v27, %v878_v6  ;;  %3393 = vst [vmem:[#allocation15_spill] sm:$0xff] %v2636_v33  ;;  %v2644_v16 = vld [vmem:[%s2100_s16 + $0xa8] sm:$0x3f] }
  0x8e   : > { %v960_v4 = vadd.f32 %v928_v19, %v879_v9  ;;  %v961_v54 = vadd.f32 %v929_v40, %v880_v48  ;;  %v962_v28 = vadd.f32 %v930_v26, %v881_v51  ;;  %v963_v22 = vadd.f32 %v931_v11, %v882_v53  ;;  %v2608_v9 = vld [vmem:[%s2100_s16 + $0x40] sm:$0x3f]  ;;  %v2612_v51 = vld [vmem:[%s2100_s16 + $0x48] sm:$0x3f] }
  0x8f   : > { %v964_v7 = vadd.f32 %v932_v15, %v883_v1  ;;  %v965_v2 = vadd.f32 %v933_v34, %v884_v12  ;;  %v966_v63 = vadd.f32 %v934_v0, %v885_v50  ;;  %v967_v25 = vadd.f32 %v935_v29, %v886_v31  ;;  %v2619_v12 = vld [vmem:[%s2100_s16 + $0xe0] sm:$0x3f]  ;;  %v3390_v50 = vld [vmem:[#allocation19_spill] sm:$0xff] }
  0x90   : > { %v968_v44 = vadd.f32 %v936_v32, %v887_v37  ;;  %v1002_v38 = vperm.slane %v184_v20, 1  ;;  %v2601_v41 = vperm.slane %v184_v20, 2  ;;  %v970_v6 = vmul.f32 %v2604_v8, %v969_v60  ;;  %3389 = vst [vmem:[#allocation11_spill] sm:$0xff] %v2619_v12  ;;  %v2623_v37 = vld [vmem:[%s2100_s16 + $0x68] sm:$0x3f] }
  0x91   : > { %v971_v48 = vmul.f32 %v2608_v9, %v969_v60  ;;  %v972_v53 = vmul.f32 %v2612_v51, %v969_v60  ;;  %v2616_v1 = vperm.slane %v2599_v61, 0  ;;  %v973_v31 = vmul.f32 %v969_v60, %v3390_v50  ;;  %3391 = vst [vmem:[#allocation12_spill] sm:$0xff] %v2623_v37  ;;  %v3394_v47 = vld [vmem:[#allocation3_spill] sm:$0xff] }
  0x92   : > { %3387 = vst [vmem:[#allocation7_spill] sm:$0xff] %v2601_v41  ;;  %v974_v58 = vmul.f32 %v2623_v37, %v969_v60  ;;  %v975_v55 = vmul.f32 %v2627_v24, %v969_v60  ;;  %v976_v39 = vmul.f32 %v2631_v14, %v969_v60  ;;  %v977_v23 = vmul.f32 %v969_v60, %v3392_v43 }
  0x93   : > { %3388 = vst [vmem:[#allocation8_spill] sm:$0xff] %v2616_v1  ;;  %v978_v36 = vmul.f32 %v2636_v33, %v969_v60  ;;  %v979_v21 = vmul.f32 %v2640_v52, %v969_v60  ;;  %v980_v45 = vmul.f32 %v2644_v16, %v969_v60  ;;  %v981_v18 = vmul.f32 %v969_v60, %v3394_v47 }
  0x94   : > { %v982_v49 = vmul.f32 %v969_v60, %v3384_v3  ;;  %v983_v5 = vmul.f32 %v969_v60, %v3385_v35  ;;  %v984_v30 = vmul.f32 %v969_v60, %v2501_v17  ;;  %v985_v27 = vmul.f32 %v969_v60, %v2619_v12 }
  0x95   : > { %v986_v20 = vadd.f32 %v970_v6, %v953_v42  ;;  %v987_v19 = vadd.f32 %v971_v48, %v954_v46  ;;  %v988_v40 = vadd.f32 %v972_v53, %v955_v56  ;;  %v989_v26 = vadd.f32 %v973_v31, %v956_v57 }
  0x96   : > { %v990_v11 = vadd.f32 %v974_v58, %v957_v10  ;;  %v991_v15 = vadd.f32 %v975_v55, %v958_v59  ;;  %v992_v34 = vadd.f32 %v976_v39, %v959_v62  ;;  %v993_v0 = vadd.f32 %v977_v23, %v960_v4 }
  0x97   : > { %v994_v29 = vadd.f32 %v978_v36, %v961_v54  ;;  %v995_v32 = vadd.f32 %v979_v21, %v962_v28  ;;  %v996_v13 = vadd.f32 %v980_v45, %v963_v22  ;;  %v997_v61 = vadd.f32 %v981_v18, %v964_v7  ;;  %v3395_v22 = vld [vmem:[#allocation4_spill] sm:$0xff] }
  0x98   : > { %v998_v1 = vadd.f32 %v982_v49, %v965_v2  ;;  %v999_v41 = vadd.f32 %v983_v5, %v966_v63  ;;  %v1000_v3 = vadd.f32 %v984_v30, %v967_v25  ;;  %v1001_v35 = vadd.f32 %v985_v27, %v968_v44  ;;  %v3396_v2 = vld [vmem:[#allocation5_spill] sm:$0xff]  ;;  %v3397_v25 = vld [vmem:[#allocation6_spill] sm:$0xff] }
  0x99   : > { %v1003_v17 = vmul.f32 %v2604_v8, %v1002_v38  ;;  %v1004_v60 = vmul.f32 %v2608_v9, %v1002_v38  ;;  %v1005_v42 = vmul.f32 %v2612_v51, %v1002_v38  ;;  %v1006_v46 = vmul.f32 %v1002_v38, %v3390_v50 }
  0x9a   : > { %v1007_v56 = vmul.f32 %v2623_v37, %v1002_v38  ;;  %v1008_v57 = vmul.f32 %v2627_v24, %v1002_v38  ;;  %v1009_v10 = vmul.f32 %v2631_v14, %v1002_v38  ;;  %v1010_v59 = vmul.f32 %v1002_v38, %v3392_v43 }
  0x9b   : > { %v1011_v62 = vmul.f32 %v2636_v33, %v1002_v38  ;;  %v1012_v4 = vmul.f32 %v2640_v52, %v1002_v38  ;;  %v1013_v54 = vmul.f32 %v2644_v16, %v1002_v38  ;;  %v1014_v28 = vmul.f32 %v1002_v38, %v3394_v47 }
  0x9c   : > { %v1015_v7 = vmul.f32 %v1002_v38, %v3395_v22  ;;  %v1016_v63 = vmul.f32 %v1002_v38, %v3396_v2  ;;  %v1017_v44 = vmul.f32 %v1002_v38, %v3397_v25  ;;  %v1018_v6 = vmul.f32 %v1002_v38, %v2619_v12 }
  0x9d   : > { %v1035_v48 = vrot.slane %v1003_v17, 1  ;;  %v1036_v53 = vrot.slane %v1004_v60, 1  ;;  %v1037_v31 = vrot.slane %v1005_v42, 1  ;;  %v1038_v58 = vrot.slane %v1006_v46, 1 }
  0x9e   : > { %v1039_v55 = vrot.slane %v1007_v56, 1  ;;  %v1040_v39 = vrot.slane %v1008_v57, 1  ;;  %v1041_v23 = vrot.slane %v1009_v10, 1  ;;  %v1042_v36 = vrot.slane %v1010_v59, 1 }
  0x9f   : > { %v1043_v21 = vrot.slane %v1011_v62, 1  ;;  %v1044_v45 = vrot.slane %v1012_v4, 1  ;;  %v1045_v18 = vrot.slane %v1013_v54, 1  ;;  %v1046_v49 = vrot.slane %v1014_v28, 1 }
  0xa0   : > { %v1047_v5 = vrot.slane %v1015_v7, 1  ;;  %v1048_v30 = vrot.slane %v1016_v63, 1  ;;  %v1049_v27 = vrot.slane %v1017_v44, 1  ;;  %v1050_v2 = vrot.slane %v1018_v6, 1  ;;  %v3398_v7 = vld [vmem:[#allocation7_spill] sm:$0xff] }
  0xa1   : > { %v1067_v22 = vadd.f32 %v1035_v48, %v986_v20  ;;  %v1068_v25 = vadd.f32 %v1036_v53, %v987_v19  ;;  %v1069_v47 = vadd.f32 %v1037_v31, %v988_v40  ;;  %v1070_v38 = vadd.f32 %v1038_v58, %v989_v26 }
  0xa2   : > { %v1071_v17 = vadd.f32 %v1039_v55, %v990_v11  ;;  %v1072_v60 = vadd.f32 %v1040_v39, %v991_v15  ;;  %v1073_v42 = vadd.f32 %v1041_v23, %v992_v34  ;;  %v1074_v46 = vadd.f32 %v1042_v36, %v993_v0  ;;  %v3400_v11 = vld [vmem:[#allocation4_spill] sm:$0xff]  ;;  %v3401_v34 = vld [vmem:[#allocation5_spill] sm:$0xff] }
  0xa3   : > { %v1075_v56 = vadd.f32 %v1043_v21, %v994_v29  ;;  %v1076_v57 = vadd.f32 %v1044_v45, %v995_v32  ;;  %v1077_v10 = vadd.f32 %v1045_v18, %v996_v13  ;;  %v1078_v59 = vadd.f32 %v1046_v49, %v997_v61  ;;  %v3402_v29 = vld [vmem:[#allocation6_spill] sm:$0xff] }
  0xa4   : > { %v1079_v62 = vadd.f32 %v1047_v5, %v998_v1  ;;  %v1080_v4 = vadd.f32 %v1048_v30, %v999_v41  ;;  %v1081_v54 = vadd.f32 %v1049_v27, %v1000_v3  ;;  %v1082_v28 = vadd.f32 %v1050_v2, %v1001_v35 }
  0xa5   : > { %v1084_v63 = vmul.f32 %v2604_v8, %v3398_v7  ;;  %v1085_v20 = vmul.f32 %v2608_v9, %v3398_v7  ;;  %v1086_v19 = vmul.f32 %v2612_v51, %v3398_v7  ;;  %v1087_v40 = vmul.f32 %v3398_v7, %v3390_v50  ;;  %v3399_v50 = vld [vmem:[#allocation3_spill] sm:$0xff] }
  0xa6   : > { %v1088_v13 = vmul.f32 %v2623_v37, %v3398_v7  ;;  %v1089_v61 = vmul.f32 %v2627_v24, %v3398_v7  ;;  %v1090_v3 = vmul.f32 %v2631_v14, %v3398_v7  ;;  %v1091_v35 = vmul.f32 %v3398_v7, %v3392_v43 }
  0xa7   : > { %v1092_v41 = vmul.f32 %v2636_v33, %v3398_v7  ;;  %v1093_v8 = vmul.f32 %v2640_v52, %v3398_v7  ;;  %v1094_v1 = vmul.f32 %v2644_v16, %v3398_v7  ;;  %v1095_v26 = vmul.f32 %v3398_v7, %v3399_v50 }
  0xa8   : > { %v1096_v15 = vmul.f32 %v3398_v7, %v3400_v11  ;;  %v1097_v0 = vmul.f32 %v3398_v7, %v3401_v34  ;;  %v1098_v43 = vmul.f32 %v3398_v7, %v3402_v29  ;;  %v1099_v32 = vmul.f32 %v3398_v7, %v2619_v12 }
  0xa9   : > { %v1116_v2 = vrot.slane %v1084_v63, 2  ;;  %v1117_v44 = vrot.slane %v1085_v20, 2  ;;  %v1118_v6 = vrot.slane %v1086_v19, 2  ;;  %v1119_v48 = vrot.slane %v1087_v40, 2 }
  0xaa   : > { %v1120_v53 = vrot.slane %v1088_v13, 2  ;;  %v1121_v31 = vrot.slane %v1089_v61, 2  ;;  %v1122_v58 = vrot.slane %v1090_v3, 2  ;;  %v1123_v55 = vrot.slane %v1091_v35, 2 }
  0xab   : > { %v1124_v39 = vrot.slane %v1092_v41, 2  ;;  %v1125_v23 = vrot.slane %v1093_v8, 2  ;;  %v1126_v36 = vrot.slane %v1094_v1, 2  ;;  %v1127_v21 = vrot.slane %v1095_v26, 2 }
  0xac   : > { %v1128_v45 = vrot.slane %v1096_v15, 2  ;;  %v1129_v18 = vrot.slane %v1097_v0, 2  ;;  %v1130_v49 = vrot.slane %v1098_v43, 2  ;;  %v1131_v5 = vrot.slane %v1099_v32, 2  ;;  %v2730_v15 = vld [vmem:[%s2100_s16 + $0xb0] sm:$0x3f] }
  0xad   : > { %v1148_v30 = vadd.f32 %v1116_v2, %v1067_v22  ;;  %v1149_v27 = vadd.f32 %v1117_v44, %v1068_v25  ;;  %v1150_v50 = vadd.f32 %v1118_v6, %v1069_v47  ;;  %v1151_v7 = vadd.f32 %v1119_v48, %v1070_v38  ;;  %v3403_v22 = vld [vmem:[#allocation8_spill] sm:$0xff]  ;;  %3408 = vst [vmem:[#allocation18_spill] sm:$0xff] %v2730_v15  ;;  %v3409_v43 = vld [vmem:[#allocation13_spill] sm:$0xff] }
  0xae   : > { %v1152_v63 = vadd.f32 %v1120_v53, %v1071_v17  ;;  %v1153_v20 = vadd.f32 %v1121_v31, %v1072_v60  ;;  %v1154_v19 = vadd.f32 %v1122_v58, %v1073_v42  ;;  %v1155_v40 = vadd.f32 %v1123_v55, %v1074_v46  ;;  %v2705_v38 = vld [vmem:[%s2100_s16 + $0x50] sm:$0x3f]  ;;  %v2710_v60 = vld [vmem:[%s2100_s16 + $0xe8] sm:$0x3f]  ;;  %v3405_v42 = vld [vmem:[#allocation9_spill] sm:$0xff] }
  0xaf   : > { %v1156_v13 = vadd.f32 %v1124_v39, %v1075_v56  ;;  %v1157_v61 = vadd.f32 %v1125_v23, %v1076_v57  ;;  %v1158_v3 = vadd.f32 %v1126_v36, %v1077_v10  ;;  %v1159_v35 = vadd.f32 %v1127_v21, %v1078_v59  ;;  %3404 = vst [vmem:[#allocation16_spill] sm:$0xff] %v2710_v60  ;;  %v2719_v10 = vld [vmem:[%s2100_s16 + $0x80] sm:$0x3f]  ;;  %v2747_v55 = vld [vmem:[%s3209_s1 + $0x18] sm:$0x7] }
  0xb0   : > { %v1160_v41 = vadd.f32 %v1128_v45, %v1079_v62  ;;  %v1161_v8 = vadd.f32 %v1129_v18, %v1080_v4  ;;  %v1162_v1 = vadd.f32 %v1130_v49, %v1081_v54  ;;  %v1163_v26 = vadd.f32 %v1131_v5, %v1082_v28  ;;  %3406 = vst [vmem:[#allocation2_spill] sm:$0xff] %v2719_v10  ;;  %v3407_v62 = vld [vmem:[#allocation10_spill] sm:$0xff]  ;;  %v3411_v21 = vld [vmem:[#allocation17_spill] sm:$0xff] }
  0xb1   : > { %v1165_v47 = vmul.f32 %v2608_v9, %v3403_v22  ;;  %v1166_v25 = vmul.f32 %v2612_v51, %v3403_v22  ;;  %v1167_v17 = vmul.f32 %v2705_v38, %v3403_v22  ;;  %v1168_v46 = vmul.f32 %v3403_v22, %v3405_v42  ;;  %3410 = vst [vmem:[#allocation19_spill] sm:$0xff] %v2747_v55 }
  0xb2   : > { %v1169_v56 = vmul.f32 %v2627_v24, %v3403_v22  ;;  %v1170_v57 = vmul.f32 %v2631_v14, %v3403_v22  ;;  %v1171_v59 = vmul.f32 %v2719_v10, %v3403_v22  ;;  %v1172_v4 = vmul.f32 %v3403_v22, %v3407_v62 }
  0xb3   : > { %v1173_v54 = vmul.f32 %v2640_v52, %v3403_v22  ;;  %v1174_v28 = vmul.f32 %v2644_v16, %v3403_v22  ;;  %v1175_v0 = vmul.f32 %v2730_v15, %v3403_v22  ;;  %v1176_v32 = vmul.f32 %v3403_v22, %v3409_v43 }
  0xb4   : > { %v1177_v2 = vmul.f32 %v3403_v22, %v3401_v34  ;;  %v1178_v44 = vmul.f32 %v3403_v22, %v3402_v29  ;;  %v1179_v6 = vmul.f32 %v3403_v22, %v2619_v12  ;;  %v1180_v48 = vmul.f32 %v3403_v22, %v2710_v60 }
  0xb5   : > { %v1181_v53 = vadd.f32 %v1165_v47, %v1148_v30  ;;  %v1182_v31 = vadd.f32 %v1166_v25, %v1149_v27  ;;  %v1183_v58 = vadd.f32 %v1167_v17, %v1150_v50  ;;  %v1184_v39 = vadd.f32 %v1168_v46, %v1151_v7 }
  0xb6   : > { %v1185_v23 = vadd.f32 %v1169_v56, %v1152_v63  ;;  %v1186_v36 = vadd.f32 %v1170_v57, %v1153_v20  ;;  %v1197_v45 = vperm.slane %v3411_v21, 1  ;;  %v1187_v18 = vadd.f32 %v1171_v59, %v1154_v19 }
  0xb7   : > { %v1188_v49 = vadd.f32 %v1172_v4, %v1155_v40  ;;  %v1189_v5 = vadd.f32 %v1173_v54, %v1156_v13  ;;  %v1190_v11 = vadd.f32 %v1174_v28, %v1157_v61  ;;  %v1191_v33 = vadd.f32 %v1175_v0, %v1158_v3 }
  0xb8   : > { %v1192_v37 = vadd.f32 %v1176_v32, %v1159_v35  ;;  %v1193_v22 = vadd.f32 %v1177_v2, %v1160_v41  ;;  %v1194_v30 = vadd.f32 %v1178_v44, %v1161_v8  ;;  %v1195_v27 = vadd.f32 %v1179_v6, %v1162_v1 }
  0xb9   : > { %v1196_v50 = vadd.f32 %v1180_v48, %v1163_v26  ;;  %v2751_v47 = vperm.slane %v3411_v21, 2  ;;  %v2754_v25 = vperm.slane %v2747_v55, 0  ;;  %v1198_v7 = vmul.f32 %v2608_v9, %v1197_v45 }
  0xba   : > { %v1199_v63 = vmul.f32 %v2612_v51, %v1197_v45  ;;  %v1200_v20 = vmul.f32 %v2705_v38, %v1197_v45  ;;  %v2760_v19 = vperm.slane %v2747_v55, 1  ;;  %v1201_v40 = vmul.f32 %v1197_v45, %v3405_v42 }
  0xbb   : > { %3412 = vst [vmem:[#allocation20_spill] sm:$0xff] %v2754_v25  ;;  %v1202_v13 = vmul.f32 %v2627_v24, %v1197_v45  ;;  %v1203_v61 = vmul.f32 %v2631_v14, %v1197_v45  ;;  %v1204_v3 = vmul.f32 %v2719_v10, %v1197_v45  ;;  %v1205_v35 = vmul.f32 %v1197_v45, %v3407_v62 }
  0xbc   : > { %3413 = vst [vmem:[#allocation7_spill] sm:$0xff] %v2760_v19  ;;  %v1206_v41 = vmul.f32 %v2640_v52, %v1197_v45  ;;  %v1207_v8 = vmul.f32 %v2644_v16, %v1197_v45  ;;  %v1208_v1 = vmul.f32 %v2730_v15, %v1197_v45  ;;  %v1209_v26 = vmul.f32 %v1197_v45, %v3409_v43 }
  0xbd   : > { %v1210_v17 = vmul.f32 %v1197_v45, %v3401_v34  ;;  %v1211_v46 = vmul.f32 %v1197_v45, %v3402_v29  ;;  %v1212_v56 = vmul.f32 %v1197_v45, %v2619_v12  ;;  %v1213_v57 = vmul.f32 %v1197_v45, %v2710_v60 }
  0xbe   : > { %v1230_v59 = vrot.slane %v1198_v7, 1  ;;  %v1231_v4 = vrot.slane %v1199_v63, 1  ;;  %v1232_v54 = vrot.slane %v1200_v20, 1  ;;  %v1233_v28 = vrot.slane %v1201_v40, 1 }
  0xbf   : > { %v1234_v0 = vrot.slane %v1202_v13, 1  ;;  %v1235_v32 = vrot.slane %v1203_v61, 1  ;;  %v1236_v2 = vrot.slane %v1204_v3, 1  ;;  %v1237_v44 = vrot.slane %v1205_v35, 1 }
  0xc0   : > { %v1238_v6 = vrot.slane %v1206_v41, 1  ;;  %v1239_v48 = vrot.slane %v1207_v8, 1  ;;  %v1240_v21 = vrot.slane %v1208_v1, 1  ;;  %v1241_v55 = vrot.slane %v1209_v26, 1 }
  0xc1   : > { %v1242_v19 = vrot.slane %v1210_v17, 1  ;;  %v1243_v25 = vrot.slane %v1211_v46, 1  ;;  %v1244_v34 = vrot.slane %v1212_v56, 1  ;;  %v1245_v29 = vrot.slane %v1213_v57, 1 }
  0xc2   : > { %v1262_v43 = vadd.f32 %v1230_v59, %v1181_v53  ;;  %v1263_v12 = vadd.f32 %v1231_v4, %v1182_v31  ;;  %v1264_v15 = vadd.f32 %v1232_v54, %v1183_v58  ;;  %v1265_v45 = vadd.f32 %v1233_v28, %v1184_v39  ;;  %v3416_v39 = vld [vmem:[#allocation5_spill] sm:$0xff] }
  0xc3   : > { %v1266_v7 = vadd.f32 %v1234_v0, %v1185_v23  ;;  %v1267_v63 = vadd.f32 %v1235_v32, %v1186_v36  ;;  %v1268_v20 = vadd.f32 %v1236_v2, %v1187_v18  ;;  %v1269_v40 = vadd.f32 %v1237_v44, %v1188_v49  ;;  %v3417_v36 = vld [vmem:[#allocation6_spill] sm:$0xff]  ;;  %v3418_v49 = vld [vmem:[#allocation11_spill] sm:$0xff] }
  0xc4   : > { %v1270_v13 = vadd.f32 %v1238_v6, %v1189_v5  ;;  %v1271_v61 = vadd.f32 %v1239_v48, %v1190_v11  ;;  %v1272_v3 = vadd.f32 %v1240_v21, %v1191_v33  ;;  %v1273_v35 = vadd.f32 %v1241_v55, %v1192_v37 }
  0xc5   : > { %v1274_v41 = vadd.f32 %v1242_v19, %v1193_v22  ;;  %v1275_v8 = vadd.f32 %v1243_v25, %v1194_v30  ;;  %v1276_v1 = vadd.f32 %v1244_v34, %v1195_v27  ;;  %v1277_v26 = vadd.f32 %v1245_v29, %v1196_v50  ;;  %v3414_v29 = vld [vmem:[#allocation18_spill] sm:$0xff] }
  0xc6   : > { %v1279_v17 = vmul.f32 %v2608_v9, %v2751_v47  ;;  %v1280_v53 = vmul.f32 %v2612_v51, %v2751_v47  ;;  %v1281_v31 = vmul.f32 %v2705_v38, %v2751_v47  ;;  %v1282_v58 = vmul.f32 %v2751_v47, %v3405_v42  ;;  %v3415_v42 = vld [vmem:[#allocation13_spill] sm:$0xff] }
  0xc7   : > { %v1283_v33 = vmul.f32 %v2627_v24, %v2751_v47  ;;  %v1284_v37 = vmul.f32 %v2631_v14, %v2751_v47  ;;  %v1285_v11 = vmul.f32 %v2719_v10, %v2751_v47  ;;  %v1286_v9 = vmul.f32 %v2751_v47, %v3407_v62 }
  0xc8   : > { %v1287_v51 = vmul.f32 %v2640_v52, %v2751_v47  ;;  %v1288_v34 = vmul.f32 %v2644_v16, %v2751_v47  ;;  %v1289_v38 = vmul.f32 %v3414_v29, %v2751_v47  ;;  %v1290_v55 = vmul.f32 %v2751_v47, %v3415_v42 }
  0xc9   : > { %v1291_v23 = vmul.f32 %v2751_v47, %v3416_v39  ;;  %v1292_v18 = vmul.f32 %v2751_v47, %v3417_v36  ;;  %v1293_v62 = vmul.f32 %v2751_v47, %v3418_v49  ;;  %v1294_v5 = vmul.f32 %v2751_v47, %v2710_v60 }
  0xca   : > { %v1311_v22 = vrot.slane %v1279_v17, 2  ;;  %v1312_v30 = vrot.slane %v1280_v53, 2  ;;  %v1313_v27 = vrot.slane %v1281_v31, 2  ;;  %v1314_v50 = vrot.slane %v1282_v58, 2 }
  0xcb   : > { %v1315_v25 = vrot.slane %v1283_v33, 2  ;;  %v1316_v19 = vrot.slane %v1284_v37, 2  ;;  %v1317_v46 = vrot.slane %v1285_v11, 2  ;;  %v1318_v56 = vrot.slane %v1286_v9, 2 }
  0xcc   : > { %v1319_v57 = vrot.slane %v1287_v51, 2  ;;  %v1320_v59 = vrot.slane %v1288_v34, 2  ;;  %v1321_v4 = vrot.slane %v1289_v38, 2  ;;  %v1322_v54 = vrot.slane %v1290_v55, 2  ;;  %v3426_v55 = vld [vmem:[#allocation14_spill] sm:$0xff] }
  0xcd   : > { %v1323_v28 = vrot.slane %v1291_v23, 2  ;;  %v1324_v0 = vrot.slane %v1292_v18, 2  ;;  %v1325_v32 = vrot.slane %v1293_v62, 2  ;;  %v1326_v2 = vrot.slane %v1294_v5, 2  ;;  %v3427_v18 = vld [vmem:[#allocation4_spill] sm:$0xff] }
  0xce   : > { %v1343_v44 = vadd.f32 %v1311_v22, %v1262_v43  ;;  %v1344_v47 = vadd.f32 %v1312_v30, %v1263_v12  ;;  %v1345_v6 = vadd.f32 %v1313_v27, %v1264_v15  ;;  %v1346_v48 = vadd.f32 %v1314_v50, %v1265_v45  ;;  %v2808_v43 = vld [vmem:[%s2100_s16 + $0xf0] sm:$0x3f]  ;;  %v2811_v12 = vld [vmem:[%s2100_s16 + $0xf8] sm:$0x3f]  ;;  %v2814_v15 = vld [vmem:[%s2100_s16 + $0x100] sm:$0x3f] }
  0xcf   : > { %v1347_v21 = vadd.f32 %v1315_v25, %v1266_v7  ;;  %v1348_v17 = vadd.f32 %v1316_v19, %v1267_v63  ;;  %v1349_v53 = vadd.f32 %v1317_v46, %v1268_v20  ;;  %v1350_v31 = vadd.f32 %v1318_v56, %v1269_v40  ;;  %3419 = vst [vmem:[#allocation3_spill] sm:$0xff] %v2808_v43  ;;  %v2817_v7 = vld [vmem:[%s2100_s16 + $0x60] sm:$0x3f]  ;;  %v3422_v63 = vld [vmem:[#allocation20_spill] sm:$0xff] }
  0xd0   : > { %v1351_v58 = vadd.f32 %v1319_v57, %v1270_v13  ;;  %v1352_v33 = vadd.f32 %v1320_v59, %v1271_v61  ;;  %v1353_v37 = vadd.f32 %v1321_v4, %v1272_v3  ;;  %v1354_v11 = vadd.f32 %v1322_v54, %v1273_v35  ;;  %3420 = vst [vmem:[#allocation8_spill] sm:$0xff] %v2811_v12  ;;  %v3423_v40 = vld [vmem:[#allocation12_spill] sm:$0xff]  ;;  %v2826_v3 = vld [vmem:[%s2100_s16 + $0x108] sm:$0x3f] }
  0xd1   : > { %v1355_v9 = vadd.f32 %v1323_v28, %v1274_v41  ;;  %v1356_v51 = vadd.f32 %v1324_v0, %v1275_v8  ;;  %v1357_v34 = vadd.f32 %v1325_v32, %v1276_v1  ;;  %3421 = vst [vmem:[#allocation9_spill] sm:$0xff] %v2814_v15  ;;  %v1358_v45 = vadd.f32 %v1326_v2, %v1277_v26  ;;  %v2831_v41 = vld [vmem:[%s2100_s16 + $0x90] sm:$0x3f]  ;;  %v3425_v1 = vld [vmem:[#allocation15_spill] sm:$0xff] }
  0xd2   : > { %v1360_v20 = vmul.f32 %v2817_v7, %v3422_v63  ;;  %v1361_v13 = vmul.f32 %v3423_v40, %v3422_v63  ;;  %v1362_v61 = vmul.f32 %v2627_v24, %v3422_v63  ;;  %3424 = vst [vmem:[#allocation10_spill] sm:$0xff] %v2826_v3  ;;  %v1363_v35 = vmul.f32 %v2631_v14, %v3422_v63 }
  0xd3   : > { %v1364_v8 = vmul.f32 %v2831_v41, %v3422_v63  ;;  %v1365_v26 = vmul.f32 %v3425_v1, %v3422_v63  ;;  %v1366_v38 = vmul.f32 %v2640_v52, %v3422_v63  ;;  %v1367_v42 = vmul.f32 %v2644_v16, %v3422_v63 }
  0xd4   : > { %v1368_v23 = vmul.f32 %v3422_v63, %v3426_v55  ;;  %v1369_v62 = vmul.f32 %v3422_v63, %v3427_v18  ;;  %v1370_v5 = vmul.f32 %v3422_v63, %v3416_v39  ;;  %v1371_v22 = vmul.f32 %v3422_v63, %v3417_v36 }
  0xd5   : > { %v1372_v30 = vmul.f32 %v3422_v63, %v2808_v43  ;;  %v1373_v27 = vmul.f32 %v3422_v63, %v2811_v12  ;;  %v1374_v50 = vmul.f32 %v3422_v63, %v2814_v15  ;;  %v1375_v25 = vmul.f32 %v3422_v63, %v2826_v3  ;;  %v3428_v15 = vld [vmem:[#allocation7_spill] sm:$0xff] }
  0xd6   : > { %v1376_v19 = vadd.f32 %v1360_v20, %v1343_v44  ;;  %v1377_v46 = vadd.f32 %v1361_v13, %v1344_v47  ;;  %v1378_v56 = vadd.f32 %v1362_v61, %v1345_v6  ;;  %v1379_v57 = vadd.f32 %v1363_v35, %v1346_v48 }
  0xd7   : > { %v1380_v59 = vadd.f32 %v1364_v8, %v1347_v21  ;;  %v1381_v4 = vadd.f32 %v1365_v26, %v1348_v17  ;;  %v1382_v54 = vadd.f32 %v1366_v38, %v1349_v53  ;;  %v1383_v28 = vadd.f32 %v1367_v42, %v1350_v31 }
  0xd8   : > { %v1384_v0 = vadd.f32 %v1368_v23, %v1351_v58  ;;  %v1385_v32 = vadd.f32 %v1369_v62, %v1352_v33  ;;  %v1386_v2 = vadd.f32 %v1370_v5, %v1353_v37  ;;  %v1387_v60 = vadd.f32 %v1371_v22, %v1354_v11  ;;  %v3429_v11 = vld [vmem:[#allocation3_spill] sm:$0xff] }
  0xd9   : > { %v1388_v49 = vadd.f32 %v1372_v30, %v1355_v9  ;;  %v1389_v29 = vadd.f32 %v1373_v27, %v1356_v51  ;;  %v1390_v10 = vadd.f32 %v1374_v50, %v1357_v34  ;;  %v1391_v12 = vadd.f32 %v1375_v25, %v1358_v45  ;;  %v3430_v51 = vld [vmem:[#allocation8_spill] sm:$0xff]  ;;  %v3431_v45 = vld [vmem:[#allocation9_spill] sm:$0xff] }
  0xda   : > { %v1393_v43 = vmul.f32 %v2817_v7, %v3428_v15  ;;  %v1394_v44 = vmul.f32 %v3423_v40, %v3428_v15  ;;  %v1395_v47 = vmul.f32 %v2627_v24, %v3428_v15  ;;  %v1396_v6 = vmul.f32 %v2631_v14, %v3428_v15 }
  0xdb   : > { %v1397_v48 = vmul.f32 %v2831_v41, %v3428_v15  ;;  %v1398_v21 = vmul.f32 %v3425_v1, %v3428_v15  ;;  %v1399_v17 = vmul.f32 %v2640_v52, %v3428_v15  ;;  %v1400_v53 = vmul.f32 %v2644_v16, %v3428_v15 }
  0xdc   : > { %v1401_v31 = vmul.f32 %v3428_v15, %v3426_v55  ;;  %v1402_v58 = vmul.f32 %v3428_v15, %v3427_v18  ;;  %v1403_v33 = vmul.f32 %v3428_v15, %v3416_v39  ;;  %v1404_v37 = vmul.f32 %v3428_v15, %v3417_v36 }
  0xdd   : > { %v1405_v9 = vmul.f32 %v3428_v15, %v3429_v11  ;;  %v1406_v34 = vmul.f32 %v3428_v15, %v3430_v51  ;;  %v1407_v63 = vmul.f32 %v3428_v15, %v3431_v45  ;;  %v1408_v20 = vmul.f32 %v3428_v15, %v2826_v3 }
  0xde   : > { %v1425_v13 = vrot.slane %v1393_v43, 1  ;;  %v1426_v61 = vrot.slane %v1394_v44, 1  ;;  %v1427_v35 = vrot.slane %v1395_v47, 1  ;;  %v1428_v8 = vrot.slane %v1396_v6, 1  ;;  %v187_v43 = vld [vmem:[%s3209_s1 + $0x1c] sm:$0x7] }
  0xdf   : > { %v1429_v26 = vrot.slane %v1397_v48, 1  ;;  %v1430_v38 = vrot.slane %v1398_v21, 1  ;;  %v1431_v42 = vrot.slane %v1399_v17, 1  ;;  %v1432_v23 = vrot.slane %v1400_v53, 1  ;;  %v3432_v6 = vld [vmem:[#allocation19_spill] sm:$0xff] }
  0xe0   : > { %v1433_v62 = vrot.slane %v1401_v31, 1  ;;  %v1434_v5 = vrot.slane %v1402_v58, 1  ;;  %v1435_v22 = vrot.slane %v1403_v33, 1  ;;  %v1436_v30 = vrot.slane %v1404_v37, 1 }
  0xe1   : > { %v1437_v27 = vrot.slane %v1405_v9, 1  ;;  %v1438_v50 = vrot.slane %v1406_v34, 1  ;;  %v1439_v25 = vrot.slane %v1407_v63, 1  ;;  %v1440_v51 = vrot.slane %v1408_v20, 1  ;;  %v3436_v20 = vld [vmem:[#allocation8_spill] sm:$0xff] }
  0xe2   : > { %v1457_v45 = vadd.f32 %v1425_v13, %v1376_v19  ;;  %v1458_v11 = vadd.f32 %v1426_v61, %v1377_v46  ;;  %v1459_v36 = vadd.f32 %v1427_v35, %v1378_v56  ;;  %v1460_v15 = vadd.f32 %v1428_v8, %v1379_v57  ;;  %v3437_v61 = vld [vmem:[#allocation9_spill] sm:$0xff] }
  0xe3   : > { %v1461_v44 = vadd.f32 %v1429_v26, %v1380_v59  ;;  %v1462_v47 = vadd.f32 %v1430_v38, %v1381_v4  ;;  %v1473_v48 = vperm.slane %v3432_v6, 2  ;;  %v1463_v21 = vadd.f32 %v1431_v42, %v1382_v54 }
  0xe4   : > { %v1464_v17 = vadd.f32 %v1432_v23, %v1383_v28  ;;  %v1465_v53 = vadd.f32 %v1433_v62, %v1384_v0  ;;  %v1466_v31 = vadd.f32 %v1434_v5, %v1385_v32  ;;  %v1467_v58 = vadd.f32 %v1435_v22, %v1386_v2  ;;  %v3434_v32 = vld [vmem:[#allocation6_spill] sm:$0xff] }
  0xe5   : > { %v1468_v33 = vadd.f32 %v1436_v30, %v1387_v60  ;;  %v1469_v37 = vadd.f32 %v1437_v27, %v1388_v49  ;;  %v1470_v9 = vadd.f32 %v1438_v50, %v1389_v29  ;;  %v1471_v19 = vadd.f32 %v1439_v25, %v1390_v10 }
  0xe6   : > { %v1472_v46 = vadd.f32 %v1440_v51, %v1391_v12  ;;  %v2893_v56 = vperm.slane %v187_v43, 0  ;;  %v2895_v34 = vperm.slane %v187_v43, 1  ;;  %v1474_v57 = vmul.f32 %v2817_v7, %v1473_v48  ;;  %v3435_v51 = vld [vmem:[#allocation3_spill] sm:$0xff] }
  0xe7   : > { %v1475_v59 = vmul.f32 %v3423_v40, %v1473_v48  ;;  %v1476_v4 = vmul.f32 %v2627_v24, %v1473_v48  ;;  %v2900_v54 = vperm.slane %v187_v43, 2  ;;  %v1477_v28 = vmul.f32 %v2631_v14, %v1473_v48 }
  0xe8   : > { %v1478_v60 = vmul.f32 %v2831_v41, %v1473_v48  ;;  %v1479_v29 = vmul.f32 %v3425_v1, %v1473_v48  ;;  %v1480_v10 = vmul.f32 %v2640_v52, %v1473_v48  ;;  %v1481_v49 = vmul.f32 %v2644_v16, %v1473_v48 }
  0xe9   : > { %3433 = vst [vmem:[#allocation17_spill] sm:$0xff] %v2900_v54  ;;  %v1482_v12 = vmul.f32 %v1473_v48, %v3426_v55  ;;  %v1483_v7 = vmul.f32 %v1473_v48, %v3427_v18  ;;  %v1484_v0 = vmul.f32 %v1473_v48, %v3416_v39  ;;  %v1485_v2 = vmul.f32 %v1473_v48, %v3434_v32 }
  0xea   : > { %v1486_v63 = vmul.f32 %v1473_v48, %v3435_v51  ;;  %v1487_v13 = vmul.f32 %v1473_v48, %v3436_v20  ;;  %v1488_v41 = vmul.f32 %v1473_v48, %v3437_v61  ;;  %v1489_v35 = vmul.f32 %v1473_v48, %v2826_v3 }
  0xeb   : > { %v1506_v8 = vrot.slane %v1474_v57, 2  ;;  %v1507_v26 = vrot.slane %v1475_v59, 2  ;;  %v1508_v38 = vrot.slane %v1476_v4, 2  ;;  %v1509_v42 = vrot.slane %v1477_v28, 2 }
  0xec   : > { %v1510_v23 = vrot.slane %v1478_v60, 2  ;;  %v1511_v55 = vrot.slane %v1479_v29, 2  ;;  %v1512_v62 = vrot.slane %v1480_v10, 2  ;;  %v1513_v18 = vrot.slane %v1481_v49, 2 }
  0xed   : > { %v1514_v5 = vrot.slane %v1482_v12, 2  ;;  %v1515_v39 = vrot.slane %v1483_v7, 2  ;;  %v1516_v22 = vrot.slane %v1484_v0, 2  ;;  %v1517_v30 = vrot.slane %v1485_v2, 2 }
  0xee   : > { %v1518_v27 = vrot.slane %v1486_v63, 2  ;;  %v1519_v50 = vrot.slane %v1487_v13, 2  ;;  %v1520_v25 = vrot.slane %v1488_v41, 2  ;;  %v1521_v43 = vrot.slane %v1489_v35, 2  ;;  %v3440_v13 = vld [vmem:[#allocation11_spill] sm:$0xff] }
  0xef   : > { %v1538_v6 = vadd.f32 %v1506_v8, %v1457_v45  ;;  %v1539_v32 = vadd.f32 %v1507_v26, %v1458_v11  ;;  %v1540_v51 = vadd.f32 %v1508_v38, %v1459_v36  ;;  %v1541_v48 = vadd.f32 %v1509_v42, %v1460_v15  ;;  %v2922_v15 = vld [vmem:[%s2100_s16 + $0x110] sm:$0x3f] }
  0xf0   : > { %v1542_v57 = vadd.f32 %v1510_v23, %v1461_v44  ;;  %v1543_v59 = vadd.f32 %v1511_v55, %v1462_v47  ;;  %v1544_v4 = vadd.f32 %v1512_v62, %v1463_v21  ;;  %v1545_v28 = vadd.f32 %v1513_v18, %v1464_v17  ;;  %v3438_v44 = vld [vmem:[#allocation2_spill] sm:$0xff] }
  0xf1   : > { %v1546_v60 = vadd.f32 %v1514_v5, %v1465_v53  ;;  %v1547_v29 = vadd.f32 %v1515_v39, %v1466_v31  ;;  %v1548_v10 = vadd.f32 %v1516_v22, %v1467_v58  ;;  %v1549_v49 = vadd.f32 %v1517_v30, %v1468_v33  ;;  %v3439_v31 = vld [vmem:[#allocation18_spill] sm:$0xff]  ;;  %v2935_v33 = vld [vmem:[%s2100_s16 + $0xc8] sm:$0x3f] }
  0xf2   : > { %v1550_v12 = vadd.f32 %v1518_v27, %v1469_v37  ;;  %v1551_v7 = vadd.f32 %v1519_v50, %v1470_v9  ;;  %v1552_v0 = vadd.f32 %v1520_v25, %v1471_v19  ;;  %v1553_v2 = vadd.f32 %v1521_v43, %v1472_v46  ;;  %v2940_v9 = vld [vmem:[%s2100_s16 + $0xd0] sm:$0x3f]  ;;  %v2945_v46 = vld [vmem:[%s2100_s16 + $0xd8] sm:$0x3f] }
  0xf3   : > { %v1555_v36 = vmul.f32 %v3423_v40, %v2893_v56  ;;  %v1556_v11 = vmul.f32 %v2627_v24, %v2893_v56  ;;  %v1557_v45 = vmul.f32 %v2631_v14, %v2893_v56  ;;  %v1558_v47 = vmul.f32 %v3438_v44, %v2893_v56 }
  0xf4   : > { %v1559_v21 = vmul.f32 %v3425_v1, %v2893_v56  ;;  %v1560_v17 = vmul.f32 %v2640_v52, %v2893_v56  ;;  %v1561_v53 = vmul.f32 %v2644_v16, %v2893_v56  ;;  %v1562_v58 = vmul.f32 %v3439_v31, %v2893_v56 }
  0xf5   : > { %v1563_v37 = vmul.f32 %v2935_v33, %v2893_v56  ;;  %v1564_v19 = vmul.f32 %v2940_v9, %v2893_v56  ;;  %v1565_v63 = vmul.f32 %v2945_v46, %v2893_v56  ;;  %v1566_v41 = vmul.f32 %v2893_v56, %v3440_v13 }
  0xf6   : > { %v1567_v35 = vmul.f32 %v2893_v56, %v3436_v20  ;;  %v1568_v8 = vmul.f32 %v2893_v56, %v3437_v61  ;;  %v1569_v26 = vmul.f32 %v2893_v56, %v2826_v3  ;;  %v1570_v38 = vmul.f32 %v2893_v56, %v2922_v15 }
  0xf7   : > { %v1571_v42 = vadd.f32 %v1555_v36, %v1538_v6  ;;  %v1572_v23 = vadd.f32 %v1556_v11, %v1539_v32  ;;  %v1573_v55 = vadd.f32 %v1557_v45, %v1540_v51  ;;  %v1574_v62 = vadd.f32 %v1558_v47, %v1541_v48 }
  0xf8   : > { %v1575_v18 = vadd.f32 %v1559_v21, %v1542_v57  ;;  %v1576_v5 = vadd.f32 %v1560_v17, %v1543_v59  ;;  %v1577_v39 = vadd.f32 %v1561_v53, %v1544_v4  ;;  %v1578_v22 = vadd.f32 %v1562_v58, %v1545_v28 }
  0xf9   : > { %v1579_v30 = vadd.f32 %v1563_v37, %v1546_v60  ;;  %v1580_v27 = vadd.f32 %v1564_v19, %v1547_v29  ;;  %v1581_v50 = vadd.f32 %v1565_v63, %v1548_v10  ;;  %v1582_v25 = vadd.f32 %v1566_v41, %v1549_v49  ;;  %v3441_v10 = vld [vmem:[#allocation8_spill] sm:$0xff] }
  0xfa   : > { %v1583_v43 = vadd.f32 %v1567_v35, %v1550_v12  ;;  %v1584_v54 = vadd.f32 %v1568_v8, %v1551_v7  ;;  %v1585_v61 = vadd.f32 %v1569_v26, %v1552_v0  ;;  %v1586_v20 = vadd.f32 %v1570_v38, %v1553_v2  ;;  %v3442_v12 = vld [vmem:[#allocation9_spill] sm:$0xff]  ;;  %v3443_v0 = vld [vmem:[#allocation10_spill] sm:$0xff] }
  0xfb   : > { %v1588_v3 = vmul.f32 %v3423_v40, %v2895_v34  ;;  %v1589_v56 = vmul.f32 %v2627_v24, %v2895_v34  ;;  %v1590_v6 = vmul.f32 %v2631_v14, %v2895_v34  ;;  %v1591_v32 = vmul.f32 %v3438_v44, %v2895_v34 }
  0xfc   : > { %v1592_v51 = vmul.f32 %v3425_v1, %v2895_v34  ;;  %v1593_v48 = vmul.f32 %v2640_v52, %v2895_v34  ;;  %v1594_v57 = vmul.f32 %v2644_v16, %v2895_v34  ;;  %v1595_v59 = vmul.f32 %v3439_v31, %v2895_v34 }
  0xfd   : > { %v1596_v4 = vmul.f32 %v2935_v33, %v2895_v34  ;;  %v1597_v28 = vmul.f32 %v2940_v9, %v2895_v34  ;;  %v1598_v60 = vmul.f32 %v2945_v46, %v2895_v34  ;;  %v1599_v29 = vmul.f32 %v2895_v34, %v3440_v13 }
  0xfe   : > { %v1600_v49 = vmul.f32 %v2895_v34, %v3441_v10  ;;  %v1601_v7 = vmul.f32 %v2895_v34, %v3442_v12  ;;  %v1602_v2 = vmul.f32 %v2895_v34, %v3443_v0  ;;  %v1603_v36 = vmul.f32 %v2895_v34, %v2922_v15 }
  0xff   : > { %v1620_v11 = vrot.slane %v1588_v3, 1  ;;  %v1621_v45 = vrot.slane %v1589_v56, 1  ;;  %v1622_v47 = vrot.slane %v1590_v6, 1  ;;  %v1623_v21 = vrot.slane %v1591_v32, 1 }
 0x100   : > { %v1624_v17 = vrot.slane %v1592_v51, 1  ;;  %v1625_v53 = vrot.slane %v1593_v48, 1  ;;  %v1626_v58 = vrot.slane %v1594_v57, 1  ;;  %v1627_v37 = vrot.slane %v1595_v59, 1 }
 0x101   : > { %v1628_v19 = vrot.slane %v1596_v4, 1  ;;  %v1629_v63 = vrot.slane %v1597_v28, 1  ;;  %v1630_v41 = vrot.slane %v1598_v60, 1  ;;  %v1631_v35 = vrot.slane %v1599_v29, 1 }
 0x102   : > { %v1632_v8 = vrot.slane %v1600_v49, 1  ;;  %v1633_v26 = vrot.slane %v1601_v7, 1  ;;  %v1634_v38 = vrot.slane %v1602_v2, 1  ;;  %v1635_v12 = vrot.slane %v1603_v36, 1  ;;  %v3444_v49 = vld [vmem:[#allocation17_spill] sm:$0xff] }
 0x103   : > { %v1652_v0 = vadd.f32 %v1620_v11, %v1571_v42  ;;  %v1653_v10 = vadd.f32 %v1621_v45, %v1572_v23  ;;  %v1654_v13 = vadd.f32 %v1622_v47, %v1573_v55  ;;  %v1655_v34 = vadd.f32 %v1623_v21, %v1574_v62  ;;  %v188_v11 = vld [vmem:[%s3209_s1 + $0x20] sm:$0x7] }
 0x104   : > { %v1656_v3 = vadd.f32 %v1624_v17, %v1575_v18  ;;  %v1657_v56 = vadd.f32 %v1625_v53, %v1576_v5  ;;  %v1658_v6 = vadd.f32 %v1626_v58, %v1577_v39  ;;  %v1659_v32 = vadd.f32 %v1627_v37, %v1578_v22  ;;  %v3445_v18 = vld [vmem:[#allocation11_spill] sm:$0xff]  ;;  %v3446_v5 = vld [vmem:[#allocation8_spill] sm:$0xff]  ;;  %v3447_v39 = vld [vmem:[#allocation9_spill] sm:$0xff] }
 0x105   : > { %v1660_v51 = vadd.f32 %v1628_v19, %v1579_v30  ;;  %v1661_v48 = vadd.f32 %v1629_v63, %v1580_v27  ;;  %v1662_v57 = vadd.f32 %v1630_v41, %v1581_v50  ;;  %v1663_v59 = vadd.f32 %v1631_v35, %v1582_v25  ;;  %v3448_v22 = vld [vmem:[#allocation10_spill] sm:$0xff] }
 0x106   : > { %v1664_v4 = vadd.f32 %v1632_v8, %v1583_v43  ;;  %v1665_v28 = vadd.f32 %v1633_v26, %v1584_v54  ;;  %v1666_v60 = vadd.f32 %v1634_v38, %v1585_v61  ;;  %v1667_v29 = vadd.f32 %v1635_v12, %v1586_v20 }
 0x107   : > { %v1669_v7 = vmul.f32 %v3423_v40, %v3444_v49  ;;  %v1670_v42 = vmul.f32 %v2627_v24, %v3444_v49  ;;  %v1671_v23 = vmul.f32 %v2631_v14, %v3444_v49  ;;  %v1672_v55 = vmul.f32 %v3438_v44, %v3444_v49 }
 0x108   : > { %v1673_v62 = vmul.f32 %v3425_v1, %v3444_v49  ;;  %v1674_v54 = vmul.f32 %v2640_v52, %v3444_v49  ;;  %v1675_v20 = vmul.f32 %v2644_v16, %v3444_v49  ;;  %v1676_v40 = vmul.f32 %v3439_v31, %v3444_v49 }
 0x109   : > { %v1677_v24 = vmul.f32 %v2935_v33, %v3444_v49  ;;  %v1678_v14 = vmul.f32 %v2940_v9, %v3444_v49  ;;  %v1679_v61 = vmul.f32 %v2945_v46, %v3444_v49  ;;  %v1680_v1 = vmul.f32 %v3444_v49, %v3445_v18 }
 0x10a   : > { %v1681_v52 = vmul.f32 %v3444_v49, %v3446_v5  ;;  %v1682_v16 = vmul.f32 %v3444_v49, %v3447_v39  ;;  %v1683_v30 = vmul.f32 %v3444_v49, %v3448_v22  ;;  %v1684_v33 = vmul.f32 %v3444_v49, %v2922_v15 }
 0x10b   : > { %v1701_v27 = vrot.slane %v1669_v7, 2  ;;  %v1702_v50 = vrot.slane %v1670_v42, 2  ;;  %v1703_v25 = vrot.slane %v1671_v23, 2  ;;  %v1704_v43 = vrot.slane %v1672_v55, 2 }
 0x10c   : > { %v1705_v12 = vrot.slane %v1673_v62, 2  ;;  %v1706_v2 = vrot.slane %v1674_v54, 2  ;;  %v1707_v36 = vrot.slane %v1675_v20, 2  ;;  %v1708_v45 = vrot.slane %v1676_v40, 2 }
 0x10d   : > { %v1709_v47 = vrot.slane %v1677_v24, 2  ;;  %v1710_v21 = vrot.slane %v1678_v14, 2  ;;  %v1711_v17 = vrot.slane %v1679_v61, 2  ;;  %v1712_v53 = vrot.slane %v1680_v1, 2  ;;  %v3032_v24 = vld [vmem:[%s2100_s16 + $0x70] sm:$0x3f] }
 0x10e   : > { %v1713_v58 = vrot.slane %v1681_v52, 2  ;;  %v1714_v37 = vrot.slane %v1682_v16, 2  ;;  %v1715_v19 = vrot.slane %v1683_v30, 2  ;;  %v1716_v63 = vrot.slane %v1684_v33, 2  ;;  %v3054_v61 = vld [vmem:[%s2100_s16 + $0xb8] sm:$0x3f] }
 0x10f   : > { %v1733_v41 = vadd.f32 %v1701_v27, %v1652_v0  ;;  %v1734_v35 = vadd.f32 %v1702_v50, %v1653_v10  ;;  %v1735_v8 = vadd.f32 %v1703_v25, %v1654_v13  ;;  %v1736_v26 = vadd.f32 %v1704_v43, %v1655_v34  ;;  %v3060_v52 = vld [vmem:[%s2100_s16 + $0xe0] sm:$0x3f]  ;;  %v3449_v30 = vld [vmem:[#allocation16_spill] sm:$0xff] }
 0x110   : > { %v1737_v38 = vadd.f32 %v1705_v12, %v1656_v3  ;;  %v1738_v49 = vadd.f32 %v1706_v2, %v1657_v56  ;;  %v1749_v7 = vperm.slane %v188_v11, 0  ;;  %v1739_v42 = vadd.f32 %v1707_v36, %v1658_v6  ;;  %v3029_v56 = vld [vmem:[%s2100_s16 + $0x118] sm:$0x3f] }
 0x111   : > { %v1740_v23 = vadd.f32 %v1708_v45, %v1659_v32  ;;  %v1741_v55 = vadd.f32 %v1709_v47, %v1660_v51  ;;  %v1742_v62 = vadd.f32 %v1710_v21, %v1661_v48  ;;  %v1743_v54 = vadd.f32 %v1711_v17, %v1662_v57  ;;  %v3036_v32 = vld [vmem:[%s2100_s16 + $0x78] sm:$0x3f]  ;;  %v3041_v57 = vld [vmem:[%s2100_s16 + $0x88] sm:$0x3f] }
 0x112   : > { %v1744_v20 = vadd.f32 %v1712_v53, %v1663_v59  ;;  %v1745_v40 = vadd.f32 %v1713_v58, %v1664_v4  ;;  %v1746_v0 = vadd.f32 %v1714_v37, %v1665_v28  ;;  %v1747_v10 = vadd.f32 %v1715_v19, %v1666_v60  ;;  %v3045_v4 = vld [vmem:[%s2100_s16 + $0xa0] sm:$0x3f]  ;;  %v3049_v60 = vld [vmem:[%s2100_s16 + $0xa8] sm:$0x3f] }
 0x113   : > { %v1748_v13 = vadd.f32 %v1716_v63, %v1667_v29  ;;  %v1782_v34 = vperm.slane %v188_v11, 1  ;;  %v3026_v3 = vperm.slane %v188_v11, 2  ;;  %v1750_v6 = vmul.f32 %v3032_v24, %v1749_v7 }
 0x114   : > { %v1751_v51 = vmul.f32 %v3036_v32, %v1749_v7  ;;  %v1752_v48 = vmul.f32 %v3438_v44, %v1749_v7  ;;  %v1753_v59 = vmul.f32 %v3041_v57, %v1749_v7  ;;  %v1754_v28 = vmul.f32 %v3045_v4, %v1749_v7 }
 0x115   : > { %v1755_v29 = vmul.f32 %v3049_v60, %v1749_v7  ;;  %v1756_v14 = vmul.f32 %v3439_v31, %v1749_v7  ;;  %v1757_v18 = vmul.f32 %v3054_v61, %v1749_v7  ;;  %v1758_v1 = vmul.f32 %v2940_v9, %v1749_v7 }
 0x116   : > { %v1759_v5 = vmul.f32 %v2945_v46, %v1749_v7  ;;  %v1760_v16 = vmul.f32 %v3060_v52, %v1749_v7  ;;  %v1761_v33 = vmul.f32 %v1749_v7, %v3449_v30  ;;  %v1762_v27 = vmul.f32 %v1749_v7, %v3447_v39 }
 0x117   : > { %v1763_v50 = vmul.f32 %v1749_v7, %v3448_v22  ;;  %v1764_v25 = vmul.f32 %v1749_v7, %v2922_v15  ;;  %v1765_v43 = vmul.f32 %v1749_v7, %v3029_v56  ;;  %v1766_v12 = vadd.f32 %v1750_v6, %v1733_v41 }
 0x118   : > { %v1767_v2 = vadd.f32 %v1751_v51, %v1734_v35  ;;  %v1768_v36 = vadd.f32 %v1752_v48, %v1735_v8  ;;  %v1769_v11 = vadd.f32 %v1753_v59, %v1736_v26  ;;  %v1770_v45 = vadd.f32 %v1754_v28, %v1737_v38 }
 0x119   : > { %v1771_v47 = vadd.f32 %v1755_v29, %v1738_v49  ;;  %v3068_v21 = vadd.f32 %v1756_v14, %v1739_v42  ;;  %v3070_v17 = vadd.f32 %v1757_v18, %v1740_v23  ;;  %v3072_v53 = vadd.f32 %v1758_v1, %v1741_v55 }
 0x11a   : > { %v3074_v58 = vadd.f32 %v1759_v5, %v1742_v62  ;;  %v3076_v37 = vadd.f32 %v1760_v16, %v1743_v54  ;;  %v3078_v19 = vadd.f32 %v1761_v33, %v1744_v20  ;;  %v3080_v63 = vadd.f32 %v1762_v27, %v1745_v40 }
 0x11b   : > { %v3082_v41 = vadd.f32 %v1763_v50, %v1746_v0  ;;  %v3084_v35 = vadd.f32 %v1764_v25, %v1747_v10  ;;  %v3086_v8 = vadd.f32 %v1765_v43, %v1748_v13  ;;  %v1783_v26 = vmul.f32 %v3032_v24, %v1782_v34 }
 0x11c   : > { %v1784_v38 = vmul.f32 %v3036_v32, %v1782_v34  ;;  %v1785_v49 = vmul.f32 %v3438_v44, %v1782_v34  ;;  %v1786_v7 = vmul.f32 %v3041_v57, %v1782_v34  ;;  %v1787_v42 = vmul.f32 %v3045_v4, %v1782_v34 }
 0x11d   : > { %v1788_v23 = vmul.f32 %v3049_v60, %v1782_v34  ;;  %v1789_v55 = vmul.f32 %v3439_v31, %v1782_v34  ;;  %v1790_v62 = vmul.f32 %v3054_v61, %v1782_v34  ;;  %v1791_v54 = vmul.f32 %v2940_v9, %v1782_v34 }
 0x11e   : > { %v3098_v20 = vmul.f32 %v2945_v46, %v1782_v34  ;;  %v3101_v40 = vmul.f32 %v3060_v52, %v1782_v34  ;;  %v3104_v0 = vmul.f32 %v1782_v34, %v3449_v30  ;;  %v3107_v10 = vmul.f32 %v1782_v34, %v3447_v39 }
 0x11f   : > { %v3110_v13 = vmul.f32 %v1782_v34, %v3448_v22  ;;  %v3113_v6 = vmul.f32 %v1782_v34, %v2922_v15  ;;  %v3116_v51 = vmul.f32 %v1782_v34, %v3029_v56  ;;  %v1815_v48 = vrot.slane %v1783_v26, 1 }
 0x120   : > { %v1816_v59 = vrot.slane %v1784_v38, 1  ;;  %v1817_v28 = vrot.slane %v1785_v49, 1  ;;  %v1818_v29 = vrot.slane %v1786_v7, 1  ;;  %v1819_v14 = vrot.slane %v1787_v42, 1 }
 0x121   : > { %v1820_v18 = vrot.slane %v1788_v23, 1  ;;  %v1821_v1 = vrot.slane %v1789_v55, 1  ;;  %v1822_v5 = vrot.slane %v1790_v62, 1  ;;  %v1823_v16 = vrot.slane %v1791_v54, 1 }
 0x122   : > { %v1864_v33 = vmul.f32 %v3032_v24, %v3026_v3  ;;  %v1865_v27 = vmul.f32 %v3036_v32, %v3026_v3  ;;  %v1866_v34 = vmul.f32 %v3438_v44, %v3026_v3  ;;  %v1824_v50 = vrot.slane %v3098_v20, 1 }
 0x123   : > { %v1825_v25 = vrot.slane %v3101_v40, 1  ;;  %v1826_v43 = vrot.slane %v3104_v0, 1  ;;  %v1867_v26 = vmul.f32 %v3041_v57, %v3026_v3  ;;  %v1827_v38 = vrot.slane %v3107_v10, 1 }
 0x124   : > { %v1828_v49 = vrot.slane %v3110_v13, 1  ;;  %v1829_v24 = vrot.slane %v3113_v6, 1  ;;  %v1868_v32 = vmul.f32 %v3045_v4, %v3026_v3  ;;  %v1847_v7 = vadd.f32 %v1815_v48, %v1766_v12 }
 0x125   : > { %v1848_v44 = vadd.f32 %v1816_v59, %v1767_v2  ;;  %v1849_v42 = vadd.f32 %v1817_v28, %v1768_v36  ;;  %v1869_v23 = vmul.f32 %v3049_v60, %v3026_v3  ;;  %v1870_v55 = vmul.f32 %v3439_v31, %v3026_v3 }
 0x126   : > { %v1896_v57 = vrot.slane %v1864_v33, 2  ;;  %v1897_v62 = vrot.slane %v1865_v27, 2  ;;  %v1898_v54 = vrot.slane %v1866_v34, 2  ;;  %v1830_v20 = vrot.slane %v3116_v51, 1 }
 0x127   : > { %v1850_v40 = vadd.f32 %v1818_v29, %v1769_v11  ;;  %v1871_v0 = vmul.f32 %v3054_v61, %v3026_v3  ;;  %v1899_v4 = vrot.slane %v1867_v26, 2  ;;  %v1851_v12 = vadd.f32 %v1819_v14, %v1770_v45 }
 0x128   : > { %v1852_v2 = vadd.f32 %v1820_v18, %v1771_v47  ;;  %v1872_v36 = vmul.f32 %v2940_v9, %v3026_v3  ;;  %v1900_v60 = vrot.slane %v1868_v32, 2  ;;  %v1853_v31 = vadd.f32 %v1821_v1, %v3068_v21 }
 0x129   : > { %v1873_v11 = vmul.f32 %v2945_v46, %v3026_v3  ;;  %v1874_v61 = vmul.f32 %v3060_v52, %v3026_v3  ;;  %v1901_v45 = vrot.slane %v1869_v23, 2  ;;  %v1902_v47 = vrot.slane %v1870_v55, 2 }
 0x12a   : > { %v1928_v10 = vadd.f32 %v1896_v57, %v1847_v7  ;;  %v1929_v9 = vadd.f32 %v1897_v62, %v1848_v44  ;;  %v1930_v13 = vadd.f32 %v1898_v54, %v1849_v42  ;;  %v1854_v6 = vadd.f32 %v1822_v5, %v3070_v17 }
 0x12b   : > { %v1875_v51 = vmul.f32 %v3026_v3, %v3449_v30  ;;  %v1903_v48 = vrot.slane %v1871_v0, 2  ;;  %v1931_v21 = vadd.f32 %v1899_v4, %v1850_v40  ;;  %v1855_v59 = vadd.f32 %v1823_v16, %v3072_v53 }
 0x12c   : > { %v1876_v46 = vmul.f32 %v3026_v3, %v3447_v39  ;;  %v1904_v52 = vrot.slane %v1872_v36, 2  ;;  %v1932_v28 = vadd.f32 %v1900_v60, %v1851_v12  ;;  %1945 = vst.msk [vmem:[%s3147_s8] sm:$0xf] %vm1944_vm0, %v1928_v10  ;;  %v1856_v29 = vadd.f32 %v1824_v50, %v3074_v58 }
 0x12d   : > { %v1877_v17 = vmul.f32 %v3026_v3, %v3448_v22  ;;  %v1905_v14 = vrot.slane %v1873_v11, 2  ;;  %v1933_v30 = vadd.f32 %v1901_v45, %v1852_v2  ;;  %1946 = vst.msk [vmem:[%s3147_s8 + $0x4] sm:$0xf] %vm1944_vm0, %v1929_v9  ;;  %v1857_v53 = vadd.f32 %v1825_v25, %v3076_v37 }
 0x12e   : > { %v1878_v39 = vmul.f32 %v3026_v3, %v2922_v15  ;;  %v1906_v18 = vrot.slane %v1874_v61, 2  ;;  %v1934_v1 = vadd.f32 %v1902_v47, %v1853_v31  ;;  %1947 = vst.msk [vmem:[%s3147_s8 + $0x8] sm:$0xf] %vm1944_vm0, %v1930_v13  ;;  %v1858_v58 = vadd.f32 %v1826_v43, %v3078_v19 }
 0x12f   : > { %v1879_v22 = vmul.f32 %v3026_v3, %v3029_v56  ;;  %v1907_v5 = vrot.slane %v1875_v51, 2  ;;  %v1935_v16 = vadd.f32 %v1903_v48, %v1854_v6  ;;  %1948 = vst.msk [vmem:[%s3147_s8 + $0xc] sm:$0xf] %vm1944_vm0, %v1931_v21  ;;  %v1859_v37 = vadd.f32 %v1827_v38, %v3080_v63 }
 0x130   : > { %v1908_v33 = vrot.slane %v1876_v46, 2  ;;  %v1936_v15 = vadd.f32 %v1904_v52, %v1855_v59  ;;  %1949 = vst.msk [vmem:[%s3147_s8 + $0x10] sm:$0xf] %vm1944_vm0, %v1932_v28  ;;  %v1860_v27 = vadd.f32 %v1828_v49, %v3082_v41  ;;  %v1909_v19 = vrot.slane %v1877_v17, 2 }
 0x131   : > { %v1937_v34 = vadd.f32 %v1905_v14, %v1856_v29  ;;  %1950 = vst.msk [vmem:[%s3147_s8 + $0x14] sm:$0xf] %vm1944_vm0, %v1933_v30  ;;  %v1861_v3 = vadd.f32 %v1829_v24, %v3084_v35  ;;  %v1910_v56 = vrot.slane %v1878_v39, 2  ;;  %v1938_v63 = vadd.f32 %v1906_v18, %v1857_v53 }
 0x132   : > { %1951 = vst.msk [vmem:[%s3147_s8 + $0x18] sm:$0xf] %vm1944_vm0, %v1934_v1  ;;  %v1862_v50 = vadd.f32 %v1830_v20, %v3086_v8  ;;  %v1911_v25 = vrot.slane %v1879_v22, 2  ;;  %v1939_v41 = vadd.f32 %v1907_v5, %v1858_v58  ;;  %v1940_v43 = vadd.f32 %v1908_v33, %v1859_v37 }
 0x133   : > { %1952 = vst.msk [vmem:[%s3147_s8 + $0x1c] sm:$0xf] %vm1944_vm0, %v1935_v16  ;;  %v1941_v26 = vadd.f32 %v1909_v19, %v1860_v27  ;;  %v1942_v35 = vadd.f32 %v1910_v56, %v1861_v3 }
 0x134   : > { %1953 = vst.msk [vmem:[%s3147_s8 + $0x20] sm:$0xf] %vm1944_vm0, %v1936_v15  ;;  %v1943_v38 = vadd.f32 %v1911_v25, %v1862_v50 }
 0x135   : > { %1954 = vst.msk [vmem:[%s3147_s8 + $0x24] sm:$0xf] %vm1944_vm0, %v1937_v34 }
 0x136   : > { %1955 = vst.msk [vmem:[%s3147_s8 + $0x28] sm:$0xf] %vm1944_vm0, %v1938_v63 }
 0x137   : > { %1956 = vst.msk [vmem:[%s3147_s8 + $0x2c] sm:$0xf] %vm1944_vm0, %v1939_v41 }
 0x138   : > { %1957 = vst.msk [vmem:[%s3147_s8 + $0x30] sm:$0xf] %vm1944_vm0, %v1940_v43 }
 0x139   : > { %1958 = vst.msk [vmem:[%s3147_s8 + $0x34] sm:$0xf] %vm1944_vm0, %v1941_v26 }
 0x13a   : > { %1959 = vst.msk [vmem:[%s3147_s8 + $0x38] sm:$0xf] %vm1944_vm0, %v1942_v35 }
 0x13b   : > { %1960 = vst.msk [vmem:[%s3147_s8 + $0x3c] sm:$0xf] %vm1944_vm0, %v1943_v38 }
 0x13c PF: > { %s12_s9 = sadd.s32 1, %s2066_s9  }
 0x13d   : > { %p9_p4 = scmp.ge.s32.totalorder %s12_s9, 4  }
 0x13f   :  { %11 = sbr.rel (!%p9_p4) target bundleno = 1 (0x1), region = 58 }

// kernel: _block_forward.6
= control target key start
LH: loop header
LB: loop body
LE: loop exit
PB: predicated region body
PF: predicated region fallthrough
CT: control target
= control target key end

     0   :  { %s3477_s27 = smov 0   ;;  %s3479_s28 = smov 0   ;;  %s4942_s0 = inlined_call_operand.vmem [shape: f32[2,64,32], index: 0, kind: input, shape index: {}]   ;;  %s4943_s1 = inlined_call_operand.vmem [shape: f32[2,64,32], index: 1, kind: input, shape index: {}]   ;;  %s4944_s2 = inlined_call_operand.vmem [shape: f32[2,64,32], index: 2, kind: input, shape index: {}]   ;;  %s4945_s3 = inlined_call_operand.vmem [shape: f32[32,32], index: 3, kind: input, shape index: {}]   ;;  %s4946_s4 = inlined_call_operand.vmem [shape: f32[1,32], index: 4, kind: input, shape index: {}]   ;;  %s4947_s5 = inlined_call_operand.vmem [shape: f32[32,32], index: 5, kind: input, shape index: {}]   ;;  %s4948_s6 = inlined_call_operand.vmem [shape: f32[1,32], index: 6, kind: input, shape index: {}]   ;;  %s4949_s7 = inlined_call_operand.vmem [shape: f32[2,64,32], index: 7, kind: input, shape index: {}]   ;;  %s4950_s8 = inlined_call_operand.vmem [shape: f32[2,64,32], index: 8, kind: output, shape index: {}]  }
   0x1   :  { %s3481_s29 = smov 0   ;;  %s3483_s30 = smov 0  }
   0x2   :  { %s3485_s9 = smov 0  }
   0x3 LB: > { %s27_s10 = sadd.s32 1, %s3406_s29  ;;  %s30_s11 = sadd.s32 1, %s3410_s30  ;;  %s3414_s9 = sphi %s3485_s9, %s18_s9   ;;  %s3410_s30 = sphi %s3483_s30, %s5046_s30   ;;  %s3406_s29 = sphi %s3481_s29, %s5045_s29   ;;  %s3402_s28 = sphi %s3479_s28, %s5044_s28   ;;  %s3398_s27 = sphi %s3477_s27, %s5043_s27  }
   0x4   : > { %p28_p0 = scmp.ge.s32.totalorder %s27_s10, 2  ;;  %p2961_p1 = scmp.ge.s32.totalorder %s3414_s9, 1 }
   0x5   : > { %p318_p2 = scmp.lt.s32.totalorder %s3414_s9, 5 }
   0x6   : > { %s5048_s10 = smov (%p28_p0, %s27_s10), 0  ;;  %s5050_s11 = smov (!%p28_p0, %s30_s11), %s3410_s30 }
   0x7   : > { %p319_p3 = pnand %p2961_p1, %p318_p2  ;;  %p32_p4 = scmp.ge.s32.totalorder %s5050_s11, 2 }
   0x9   : > { %s5052_s11 = smov (%p32_p4, %s5050_s11), 0  ;;  %322 = sbr.rel (%p319_p3) target bundleno = 2069 (0x815), region = 52 }
   0xa   : > { %4959 = sst [smem:[#allocation6_spill]] %s5052_s11 }
   0xe   : > { %p375_p5 = scmp.lt.s32.totalorder %s3402_s28, 1  ;;  %s2964_s12 = sshll.u32 %s3398_s27, 2 }
   0xf   : > { %p383_p6 = scmp.lt.s32.totalorder %s2964_s12, 7  ;;  %p2974_p7 = scmp.ne.s32.totalorder %s3398_s27, 0 }
  0x10   : > { %s5054_s28 = smov (!%p375_p5, %s3402_s28), 1 }
  0x11   : > { %s5056_s12 = smov (!%p383_p6, %s2964_s12), 7  ;;  %s3074_s13 = sshll.u32 %s5054_s28, 6 }
  0x12   : > { %s2965_s14 = sshll.u32 %s5054_s28, 3  ;;  %s3513_s17 = scalar_lea.vmem %s4942_s0, %s3074_s13 }
  0x13   : > { %s386_s18 = sadd.s32 %s2965_s14, %s5056_s12  ;;  %s3518_s22 = scalar_lea.vmem %s4949_s7, %s3074_s13 }
  0x14   : > { %s2966_s19 = sshll.u32 %s386_s18, 3  ;;  %s3533_s12 = scalar_lea.vmem %s4950_s8, %s3074_s13 }
  0x15   : > { %s3523_s25 = scalar_lea.vmem %s4943_s1, %s2966_s19  ;;  %s3528_s28 = scalar_lea.vmem %s4944_s2, %s2966_s19 }
  0x16   : > { %413 = sbr.rel (%p2974_p7) target bundleno = 179 (0xb3), region = 56 }
  0x1b   : > { %v425_v0 = vld [vmem:[%s4945_s3 + $0x18] sm:$0xff]  ;;  %v424_v1 = vld [vmem:[%s4945_s3 + $0x10] sm:$0xff]  ;;  %vm504_vm0 = vcmask 31744   ;;  %v3416_v2 = vmov -inf   ;;  %v423_v3 = vld [vmem:[%s4945_s3 + $0x8] sm:$0xff]  ;;  %vm430_vm1 = vcmask 261120  }
  0x1c   : > { %3078 = vmatpush.msra.mxu2 %v425_v0  ;;  %3079 = vmatpush.msra.mxu3 %v425_v0  ;;  %505 = vst.msk [vmem:[#allocation3] sm:$0xff] %vm504_vm0, %v3416_v2  ;;  %v422_v4 = vld [vmem:[%s4945_s3] sm:$0xff]  ;;  %v420_v6 = vld [vmem:[%s3513_s17 + $0x30] sm:$0xff]  ;;  %v3417_v9 = vmov 0.0   ;;  %v419_v10 = vld [vmem:[%s3513_s17 + $0x28] sm:$0xff] }
  0x1d   : > { %467 = vmatpush.msra.mxu0 %v425_v0  ;;  %3077 = vmatpush.msra.mxu1 %v425_v0  ;;  %506 = vst.msk [vmem:[#allocation3 + $0x8] sm:$0xff] %vm504_vm0, %v3416_v2  ;;  %v418_v5 = vld [vmem:[%s3513_s17 + $0x20] sm:$0xff]  ;;  %v416_v8 = vld [vmem:[%s3513_s17 + $0x10] sm:$0xff]  ;;  %v421_v11 = vld [vmem:[%s3513_s17 + $0x38] sm:$0xff] }
  0x1e   : > { %3081 = vmatpush.msra.mxu2 %v424_v1  ;;  %3082 = vmatpush.msra.mxu3 %v424_v1  ;;  %507 = vst.msk [vmem:[#allocation3 + $0x10] sm:$0xff] %vm504_vm0, %v3416_v2  ;;  %v414_v7 = vld [vmem:[%s3513_s17] sm:$0xff]  ;;  %v415_v12 = vld [vmem:[%s3513_s17 + $0x8] sm:$0xff]  ;;  %v417_v13 = vld [vmem:[%s3513_s17 + $0x18] sm:$0xff] }
  0x1f   : > { %508 = vst.msk [vmem:[#allocation3 + $0x18] sm:$0xff] %vm504_vm0, %v3416_v2  ;;  %468 = vmatpush.msra.mxu0 %v424_v1  ;;  %3080 = vmatpush.msra.mxu1 %v424_v1  ;;  %v3157_v14 = vld [vmem:[%s4946_s4] ss:$0 sm:$0xff] }
  0x20   : > { %3084 = vmatpush.msra.mxu2 %v423_v3  ;;  %3085 = vmatpush.msra.mxu3 %v423_v3  ;;  %509 = vst.msk [vmem:[#allocation3 + $0x20] sm:$0xff] %vm504_vm0, %v3416_v2 }
  0x21   : > { %510 = vst.msk [vmem:[#allocation3 + $0x28] sm:$0xff] %vm504_vm0, %v3416_v2  ;;  %469 = vmatpush.msra.mxu0 %v423_v3  ;;  %3083 = vmatpush.msra.mxu1 %v423_v3 }
  0x22   : > { %3087 = vmatpush.msra.mxu2 %v422_v4  ;;  %3088 = vmatpush.msra.mxu3 %v422_v4  ;;  %511 = vst.msk [vmem:[#allocation3 + $0x30] sm:$0xff] %vm504_vm0, %v3416_v2 }
  0x23   : > { %2979 = vmatmul.msk.f32.vlgmr.msra.gmra.mxu2 %vm430_vm1, %v418_v5  ;;  %512 = vst.msk [vmem:[#allocation3 + $0x38] sm:$0xff] %vm504_vm0, %v3416_v2  ;;  %2981 = vmatmul.msk.f32.vlgmr.msra.gmra.mxu3 %vm430_vm1, %v420_v6 }
  0x24   : > { %513 = vst.msk [vmem:[#allocation4] sm:$0xff] %vm504_vm0, %v3417_v9  ;;  %470 = vmatpush.msra.mxu0 %v422_v4  ;;  %3086 = vmatpush.msra.mxu1 %v422_v4 }
  0x25   : > { %514 = vst.msk [vmem:[#allocation4 + $0x8] sm:$0xff] %vm504_vm0, %v3417_v9  ;;  %2975 = vmatmul.msk.f32.vlgmr.msra.gmra.mxu0 %vm430_vm1, %v414_v7  ;;  %2977 = vmatmul.msk.f32.vlgmr.msra.gmra.mxu1 %vm430_vm1, %v416_v8 }
  0x26   : > { %515 = vst.msk [vmem:[#allocation4 + $0x10] sm:$0xff] %vm504_vm0, %v3417_v9 }
  0x27   : > { %516 = vst.msk [vmem:[#allocation4 + $0x18] sm:$0xff] %vm504_vm0, %v3417_v9 }
  0x28   : > { %517 = vst.msk [vmem:[#allocation4 + $0x20] sm:$0xff] %vm504_vm0, %v3417_v9 }
  0x29   : > { %518 = vst.msk [vmem:[#allocation4 + $0x28] sm:$0xff] %vm504_vm0, %v3417_v9 }
  0x2a   : > { %519 = vst.msk [vmem:[#allocation4 + $0x30] sm:$0xff] %vm504_vm0, %v3417_v9 }
  0x2b   : > { %520 = vst.msk [vmem:[#allocation4 + $0x38] sm:$0xff] %vm504_vm0, %v3417_v9  ;;  %2980 = vmatmul.msk.f32.gmra.mxu2 %vm430_vm1, %v419_v10  ;;  %2982 = vmatmul.msk.f32.gmra.mxu3 %vm430_vm1, %v421_v11 }
  0x2c   : > { %521 = vst.msk [vmem:[#allocation5] sm:$0xff] %vm430_vm1, %v3417_v9 }
  0x2d   : > { %522 = vst.msk [vmem:[#allocation5 + $0x8] sm:$0xff] %vm430_vm1, %v3417_v9  ;;  %2976 = vmatmul.msk.f32.gmra.mxu0 %vm430_vm1, %v415_v12  ;;  %2978 = vmatmul.msk.f32.gmra.mxu1 %vm430_vm1, %v417_v13 }
  0x2e   : > { %523 = vst.msk [vmem:[#allocation5 + $0x10] sm:$0xff] %vm430_vm1, %v3417_v9 }
  0x2f   : > { %524 = vst.msk [vmem:[#allocation5 + $0x18] sm:$0xff] %vm430_vm1, %v3417_v9 }
  0x30   : > { %525 = vst.msk [vmem:[#allocation5 + $0x20] sm:$0xff] %vm430_vm1, %v3417_v9 }
  0x31   : > { %526 = vst.msk [vmem:[#allocation5 + $0x28] sm:$0xff] %vm430_vm1, %v3417_v9 }
  0x32   : > { %527 = vst.msk [vmem:[#allocation5 + $0x30] sm:$0xff] %vm430_vm1, %v3417_v9 }
  0x33   : > { %528 = vst.msk [vmem:[#allocation5 + $0x38] sm:$0xff] %vm430_vm1, %v3417_v9 }
  0xa2   : > { %v472_v15 = vpop.f32.mrf.mxu0  ;;  %v478_v16 = vpop.f32.mrf.mxu1 }
  0xa3   : > { %v473_v17 = vadd.f32 %v3157_v14, %v472_v15  ;;  %v479_v18 = vadd.f32 %v3157_v14, %v478_v16 }
  0xa5   : > { %496 = vst.msk [vmem:[#allocation2] sm:$0xff] %vm430_vm1, %v473_v17 }
  0xa6   : > { %498 = vst.msk [vmem:[#allocation2 + $0x10] sm:$0xff] %vm430_vm1, %v479_v18  ;;  %v484_v19 = vpop.f32.mrf.mxu2  ;;  %v490_v20 = vpop.f32.mrf.mxu3 }
  0xa7   : > { %v485_v21 = vadd.f32 %v3157_v14, %v484_v19  ;;  %v491_v22 = vadd.f32 %v3157_v14, %v490_v20 }
  0xa9   : > { %500 = vst.msk [vmem:[#allocation2 + $0x20] sm:$0xff] %vm430_vm1, %v485_v21 }
  0xaa   : > { %502 = vst.msk [vmem:[#allocation2 + $0x30] sm:$0xff] %vm430_vm1, %v491_v22  ;;  %v475_v23 = vpop.f32.mrf.mxu0  ;;  %v481_v24 = vpop.f32.mrf.mxu1 }
  0xab   : > { %v476_v25 = vadd.f32 %v3157_v14, %v475_v23  ;;  %v482_v26 = vadd.f32 %v3157_v14, %v481_v24 }
  0xad   : > { %497 = vst.msk [vmem:[#allocation2 + $0x8] sm:$0xff] %vm430_vm1, %v476_v25 }
  0xae   : > { %499 = vst.msk [vmem:[#allocation2 + $0x18] sm:$0xff] %vm430_vm1, %v482_v26  ;;  %v487_v27 = vpop.f32.mrf.mxu2  ;;  %v493_v28 = vpop.f32.mrf.mxu3 }
  0xaf   : > { %v488_v29 = vadd.f32 %v3157_v14, %v487_v27  ;;  %v494_v30 = vadd.f32 %v3157_v14, %v493_v28 }
  0xb1   : > { %501 = vst.msk [vmem:[#allocation2 + $0x28] sm:$0xff] %vm430_vm1, %v488_v29 }
  0xb2   : > { %503 = vst.msk [vmem:[#allocation2 + $0x38] sm:$0xff] %vm430_vm1, %v494_v30 }
  0xb3 PF: > { %v3599_v31 = vld [vmem:[#allocation2 + $0x10] sm:$0xff]  ;;  %v532_v33 = vld [vmem:[%s3523_s25 + $0x18] sm:$0xff]  ;;  %vm4958_vm2 = vcmask 64512   ;;  %s3418_s26 = smov 120   ;;  %v537_v35 = vld [vmem:[#allocation2] sm:$0xff]  ;;  %s3420_s15 = smov 104  }
  0xb4   : > { %v538_v32 = vld [vmem:[#allocation2 + $0x8] sm:$0xff]  ;;  %966 = vrot.lane.b32.xlu0 %v3599_v31, %s3418_s26  ;;  %2983 = vmatpush.xpose.msk.msra.mxu0 %vm4958_vm2, %v532_v33  ;;  %v531_v34 = vld [vmem:[%s3523_s25 + $0x10] sm:$0xff]  ;;  %v536_v36 = vld [vmem:[%s3528_s28 + $0x18] sm:$0xff]  ;;  %vm4954_vm3 = vcmask 261120   ;;  %vm808_vm4 = vcmask 7168   ;;  %vm1235_vm5 = vcmask 15368  }
  0xb5   : > { %964 = vrot.lane.b32.xlu1 %v538_v32, %s3418_s26  ;;  %962 = vrot.lane.b32.xlu2 %v537_v35, %s3418_s26  ;;  %v535_v37 = vld [vmem:[%s3528_s28 + $0x10] sm:$0xff]  ;;  %v541_v39 = vld [vmem:[#allocation2 + $0x20] sm:$0xff]  ;;  %v530_v40 = vld [vmem:[%s3523_s25 + $0x8] sm:$0xff]  ;;  %vm1711_vm6 = vcmask 23568   ;;  %vm2183_vm7 = vcmask 31768   ;;  %vm4957_vm8 = vcmask 130112  }
  0xb6   : > { %909 = vmatpush.msra.mxu1 %v536_v36  ;;  %v3613_v41 = vld [vmem:[%s3528_s28 + $0x8] sm:$0xff]  ;;  %v3619_v42 = vld [vmem:[%s3528_s28] sm:$0xff]  ;;  %v540_v43 = vld [vmem:[#allocation2 + $0x18] sm:$0xff]  ;;  %v3163_v47 = vpack.i.bf16 %v536_v36, %v535_v37  ;;  %s3426_s16 = smov 16   ;;  %s3427_s14 = smov 24   ;;  %vm4956_vm9 = vcmask 195712  }
  0xb7   : > { %v529_v44 = vld [vmem:[%s3523_s25] sm:$0xff]  ;;  %v543_v46 = vld [vmem:[#allocation2 + $0x30] sm:$0xff]  ;;  %v3158_v48 = vpack.i.bf16 %v3613_v41, %v3619_v42  ;;  %s3419_s25 = smov 112   ;;  %vm4955_vm10 = vcmask 261312   ;;  %p3063_p8 = scmp.ne.s32.totalorder %s3398_s27, 1 }
  0xb8   : > { %2984 = vmatpush.xpose.msk.msra.mxu0 %vm4958_vm2, %v531_v34  ;;  %v542_v38 = vld [vmem:[#allocation2 + $0x28] sm:$0xff]  ;;  %910 = vmatpush.msra.mxu1 %v535_v37 }
  0xb9   : > { %v544_v45 = vld [vmem:[#allocation2 + $0x38] sm:$0xff] }
  0xba   : > { %911 = vmatpush.msra.mxu1 %v3613_v41 }
  0xbc   : > { %972 = vrot.lane.b32.xlu0 %v542_v38, %s3418_s26  ;;  %2985 = vmatpush.xpose.msk.msra.mxu0 %vm4958_vm2, %v530_v40 }
  0xbd   : > { %970 = vrot.lane.b32.xlu1 %v541_v39, %s3418_s26  ;;  %912 = vmatpush.msra.mxu1 %v3619_v42 }
  0xbe   : > { %968 = vrot.lane.b32.xlu2 %v540_v43, %s3418_s26 }
  0xc0   : > { %2986 = vmatpush.xpose.msk.msra.mxu0 %vm4958_vm2, %v529_v44 }
  0xc3   : > { %2987 = vmatmul.msk.f32.vlgmr.msra.gmra.mxu0 %vm4958_vm2, %v537_v35 }
  0xc4   : > { %978 = vrot.lane.b32.xlu0 %v529_v44, %s3418_s26 }
  0xc5   : > { %976 = vrot.lane.b32.xlu1 %v544_v45, %s3418_s26 }
  0xc6   : > { %974 = vrot.lane.b32.xlu2 %v543_v46, %s3418_s26 }
  0xcb   : > { %2988 = vmatmul.msk.f32.gmra.mxu0 %vm4958_vm2, %v538_v32 }
  0xcc   : > { %984 = vrot.lane.b32.xlu0 %v532_v33, %s3418_s26 }
  0xcd   : > { %982 = vrot.lane.b32.xlu1 %v531_v34, %s3418_s26 }
  0xce   : > { %980 = vrot.lane.b32.xlu2 %v530_v40, %s3418_s26 }
  0xd3   : > { %2989 = vmatmul.msk.f32.gmra.mxu0 %vm4958_vm2, %v3599_v31 }
  0xd4   : > { %3159 = vrot.lane.b32.xlu0 %v3158_v48, %s3418_s26 }
  0xd5   : > { %3164 = vrot.lane.b32.xlu1 %v3163_v47, %s3418_s26  ;;  %v631_v47 = vld [vmem:[#allocation3] sm:$0xff] }
  0xd6   : > { %1460 = vrot.lane.b32.xlu2 %v532_v33, %s3419_s25 }
  0xdb   : > { %2990 = vmatmul.msk.f32.gmra.mxu0 %vm4958_vm2, %v540_v43 }
  0xdc   : > { %1458 = vrot.lane.b32.xlu0 %v531_v34, %s3419_s25 }
  0xdd   : > { %1456 = vrot.lane.b32.xlu1 %v530_v40, %s3419_s25 }
  0xde   : > { %1438 = vrot.lane.b32.xlu2 %v537_v35, %s3419_s25 }
  0xe3   : > { %2991 = vmatmul.msk.f32.gmra.mxu0 %vm4958_vm2, %v541_v39 }
  0xe4   : > { %1454 = vrot.lane.b32.xlu0 %v529_v44, %s3419_s25 }
  0xe5   : > { %1932 = vrot.lane.b32.xlu1 %v532_v33, %s3420_s15 }
  0xe6   : > { %1440 = vrot.lane.b32.xlu2 %v538_v32, %s3419_s25 }
  0xeb   : > { %2992 = vmatmul.msk.f32.gmra.mxu0 %vm4958_vm2, %v542_v38 }
  0xec   : > { %1930 = vrot.lane.b32.xlu0 %v531_v34, %s3420_s15 }
  0xed   : > { %1928 = vrot.lane.b32.xlu1 %v530_v40, %s3420_s15 }
  0xee   : > { %1442 = vrot.lane.b32.xlu2 %v3599_v31, %s3419_s25 }
  0xf3   : > { %2993 = vmatmul.msk.f32.gmra.mxu0 %vm4958_vm2, %v543_v46 }
  0xf4   : > { %1926 = vrot.lane.b32.xlu0 %v529_v44, %s3420_s15 }
  0xf5   : > { %1910 = vrot.lane.b32.xlu1 %v537_v35, %s3420_s15 }
  0xf6   : > { %1914 = vrot.lane.b32.xlu2 %v3599_v31, %s3420_s15 }
  0xfb   : > { %2994 = vmatmul.msk.f32.gmra.mxu0 %vm4958_vm2, %v544_v45 }
  0xfc   : > { %1912 = vrot.lane.b32.xlu0 %v538_v32, %s3420_s15 }
  0xfd   : > { %1444 = vrot.lane.b32.xlu1 %v540_v43, %s3419_s25 }
  0xfe   : > { %1448 = vrot.lane.b32.xlu2 %v542_v38, %s3419_s25 }
 0x104   : > { %1446 = vrot.lane.b32.xlu0 %v541_v39, %s3419_s25 }
 0x105   : > { %1916 = vrot.lane.b32.xlu1 %v540_v43, %s3420_s15 }
 0x106   : > { %1450 = vrot.lane.b32.xlu2 %v543_v46, %s3419_s25 }
 0x10c   : > { %1918 = vrot.lane.b32.xlu0 %v541_v39, %s3420_s15  ;;  %v3421_v39 = vmov 0  }
 0x10d   : > { %1452 = vrot.lane.b32.xlu1 %v544_v45, %s3419_s25  ;;  %3168 = vset.pattern.permute.xlu2 %v3421_v39 }
 0x10e   : > { %3170 = vset.pattern.permute.xlu1 %v3421_v39  ;;  %3169 = vset.pattern.permute.xlu0 %v3421_v39 }
 0x10f   : > { %v963_v49 = vpop.permute.xlu2 %962 }
 0x114   : > { %1920 = vrot.lane.b32.xlu0 %v542_v38, %s3420_s15 }
 0x115   : > { %1924 = vrot.lane.b32.xlu1 %v544_v45, %s3420_s15 }
 0x118   : > { %v969_v50 = vpop.permute.xlu2 %968 }
 0x11c   : > { %1922 = vrot.lane.b32.xlu0 %v543_v46, %s3420_s15 }
 0x120   : > { %v3671_v51 = vpop.permute.xlu2 %974 }
 0x126   : > { %v967_v52 = vpop.permute.xlu0 %966 }
 0x127   : > { %v965_v53 = vpop.permute.xlu1 %964 }
 0x128   : > { %v981_v54 = vpop.permute.xlu2 %980 }
 0x12e   : > { %v3673_v55 = vpop.permute.xlu0 %972 }
 0x12f   : > { %v971_v56 = vpop.permute.xlu1 %970 }
 0x130   : > { %v1461_v57 = vpop.permute.xlu2 %1460 }
 0x131   : > { %3023 = vmatpush.xpose.msk.msrb.mxu1 %vm4958_vm2, %v1461_v57 }
 0x136   : > { %v979_v59 = vpop.permute.xlu0 %978 }
 0x137   : > { %v3676_v58 = vpop.permute.xlu1 %976 }
 0x138   : > { %v3705_v22 = vpop.permute.xlu2 %1438 }
 0x13e   : > { %v985_v61 = vpop.permute.xlu0 %984 }
 0x13f   : > { %v983_v60 = vpop.permute.xlu1 %982  ;;  %3003 = vmatpush.xpose.msk.msra.mxu2 %vm4958_vm2, %v985_v61 }
 0x140   : > { %v599_v62 = vpop.f32.mrf.mxu0  ;;  %v3713_v27 = vpop.permute.xlu2 %1440 }
 0x141   : > { %v3679_v63 = vmul.f32 0.35355338, %v599_v62 }
 0x143   : > { %3004 = vmatpush.xpose.msk.msra.mxu2 %vm4958_vm2, %v983_v60  ;;  %v640_v0 = vsel %vm4954_vm3, %v3679_v63, -inf }
 0x146   : > { %v3160_v2 = vpop.permute.xlu0 %3159  ;;  %641 = vmax.xlane.f32.xlu0 %v640_v0 }
 0x147   : > { %v3165_v1 = vpop.permute.xlu1 %3164  ;;  %3005 = vmatpush.xpose.msk.msra.mxu2 %vm4958_vm2, %v981_v54  ;;  %v3162_v5 = vunpack.i.h.bf16 %v3160_v2  ;;  %v3161_v6 = vunpack.i.l.bf16 %v3160_v2  ;;  %v632_v54 = vld [vmem:[#allocation3 + $0x8] sm:$0xff] }
 0x148   : > { %v3167_v3 = vunpack.i.h.bf16 %v3165_v1  ;;  %v3166_v4 = vunpack.i.l.bf16 %v3165_v1  ;;  %v602_v11 = vpop.f32.mrf.mxu0  ;;  %v3722_v31 = vpop.permute.xlu2 %1442 }
 0x149   : > { %v3692_v12 = vmul.f32 0.35355338, %v602_v11 }
 0x14a   : > { %1352 = vmatpush.msra.mxu3 %v3167_v3  ;;  %v3769_v3 = vld [vmem:[#allocation3 + $0x18] sm:$0xff] }
 0x14b   : > { %3006 = vmatpush.xpose.msk.msra.mxu2 %vm4958_vm2, %v979_v59  ;;  %v643_v13 = vsel %vm4954_vm3, %v3692_v12, -inf  ;;  %v3756_v59 = vld [vmem:[#allocation3 + $0x10] sm:$0xff] }
 0x14c   : > { %1353 = vmatpush.msra.mxu3 %v3166_v4 }
 0x14e   : > { %1354 = vmatpush.msra.mxu3 %v3162_v5  ;;  %3007 = vmatmul.msk.f32.vlgmr.msra.gmra.mxu2 %vm4958_vm2, %v963_v49  ;;  %v1459_v8 = vpop.permute.xlu0 %1458 }
 0x14f   : > { %v1457_v7 = vpop.permute.xlu1 %1456  ;;  %3024 = vmatpush.xpose.msk.msrb.mxu1 %vm4958_vm2, %v1459_v8  ;;  %644 = vmax.xlane.f32.xlu0 %v643_v13 }
 0x150   : > { %1355 = vmatpush.msra.mxu3 %v3161_v6  ;;  %v605_v16 = vpop.f32.mrf.mxu0  ;;  %v1915_v34 = vpop.permute.xlu2 %1914 }
 0x151   : > { %v3698_v17 = vmul.f32 0.35355338, %v605_v16 }
 0x153   : > { %3025 = vmatpush.xpose.msk.msrb.mxu1 %vm4958_vm2, %v1457_v7  ;;  %v646_v20 = vsel %vm4954_vm3, %v3698_v17, -inf  ;;  %v3778_v7 = vld [vmem:[#allocation3 + $0x20] sm:$0xff] }
 0x154   : > { %647 = vmax.xlane.f32.xlu1 %v646_v20 }
 0x156   : > { %3008 = vmatmul.msk.f32.gmra.mxu2 %vm4958_vm2, %v965_v53  ;;  %v1455_v10 = vpop.permute.xlu0 %1454 }
 0x157   : > { %v1933_v9 = vpop.permute.xlu1 %1932  ;;  %3026 = vmatpush.xpose.msk.msrb.mxu1 %vm4958_vm2, %v1455_v10 }
 0x158   : > { %3043 = vmatpush.xpose.msk.msrb.mxu0 %vm4958_vm2, %v1933_v9  ;;  %v608_v21 = vpop.f32.mrf.mxu0 }
 0x159   : > { %v3707_v23 = vmul.f32 0.35355338, %v608_v21 }
 0x15b   : > { %v649_v24 = vsel %vm4954_vm3, %v3707_v23, -inf }
 0x15c   : > { %650 = vmax.xlane.f32.xlu1 %v649_v24 }
 0x15e   : > { %3009 = vmatmul.msk.f32.gmra.mxu2 %vm4958_vm2, %v967_v52  ;;  %v1931_v14 = vpop.permute.xlu0 %1930 }
 0x15f   : > { %v1929_v15 = vpop.permute.xlu1 %1928  ;;  %3044 = vmatpush.xpose.msk.msrb.mxu0 %vm4958_vm2, %v1931_v14 }
 0x160   : > { %v611_v26 = vpop.f32.mrf.mxu0 }
 0x161   : > { %v3715_v28 = vmul.f32 0.35355338, %v611_v26 }
 0x163   : > { %3045 = vmatpush.xpose.msk.msrb.mxu0 %vm4958_vm2, %v1929_v15  ;;  %v652_v29 = vsel %vm4954_vm3, %v3715_v28, -inf  ;;  %v636_v15 = vld [vmem:[#allocation3 + $0x28] sm:$0xff] }
 0x164   : > { %653 = vmax.xlane.f32.xlu2 %v652_v29 }
 0x166   : > { %3010 = vmatmul.msk.f32.gmra.mxu2 %vm4958_vm2, %v969_v50  ;;  %v1927_v18 = vpop.permute.xlu0 %1926 }
 0x167   : > { %v1911_v19 = vpop.permute.xlu1 %1910  ;;  %3046 = vmatpush.xpose.msk.msrb.mxu0 %vm4958_vm2, %v1927_v18 }
 0x168   : > { %v614_v30 = vpop.f32.mrf.mxu0 }
 0x169   : > { %v3724_v32 = vmul.f32 0.35355338, %v614_v30 }
 0x16a   : > { %3047 = vmatmul.msk.f32.vlgmr.msrb.gmra.mxu0 %vm4958_vm2, %v1911_v19 }
 0x16b   : > { %v655_v33 = vsel %vm4954_vm3, %v3724_v32, -inf }
 0x16c   : > { %656 = vmax.xlane.f32.xlu2 %v655_v33 }
 0x16e   : > { %3011 = vmatmul.msk.f32.gmra.mxu2 %vm4958_vm2, %v971_v56  ;;  %v1913_v25 = vpop.permute.xlu0 %1912 }
 0x16f   : > { %v3733_v35 = vpop.permute.xlu1 %1444 }
 0x170   : > { %v617_v44 = vpop.f32.mrf.mxu0 }
 0x171   : > { %v3741_v45 = vmul.f32 0.35355338, %v617_v44 }
 0x172   : > { %3048 = vmatmul.msk.f32.gmra.mxu0 %vm4958_vm2, %v1913_v25 }
 0x173   : > { %v658_v46 = vsel %vm4954_vm3, %v3741_v45, -inf }
 0x174   : > { %659 = vmax.xlane.f32.xlu0 %v658_v46 }
 0x176   : > { %3012 = vmatmul.msk.f32.gmra.mxu2 %vm4958_vm2, %v3673_v55  ;;  %v3735_v36 = vpop.permute.xlu0 %1446 }
 0x177   : > { %v1917_v37 = vpop.permute.xlu1 %1916 }
 0x178   : > { %v620_v50 = vpop.f32.mrf.mxu0 }
 0x17a   : > { %3049 = vmatmul.msk.f32.gmra.mxu0 %vm4958_vm2, %v1915_v34 }
 0x17e   : > { %3013 = vmatmul.msk.f32.gmra.mxu2 %vm4958_vm2, %v3671_v51  ;;  %v1919_v38 = vpop.permute.xlu0 %1918  ;;  %v3746_v51 = vmul.f32 0.35355338, %v620_v50 }
 0x17f   : > { %v3750_v53 = vpop.permute.xlu1 %1452 }
 0x180   : > { %v661_v52 = vsel %vm4954_vm3, %v3746_v51, -inf }
 0x181   : > { %662 = vmax.xlane.f32.xlu1 %v661_v52 }
 0x182   : > { %3050 = vmatmul.msk.f32.gmra.mxu0 %vm4958_vm2, %v1917_v37 }
 0x186   : > { %3014 = vmatmul.msk.f32.gmra.mxu2 %vm4958_vm2, %v3676_v58  ;;  %v1921_v40 = vpop.permute.xlu0 %1920  ;;  %v3753_v58 = vpop.permute.xlu2 %1448 }
 0x187   : > { %v1925_v57 = vpop.permute.xlu1 %1924 }
 0x18a   : > { %3051 = vmatmul.msk.f32.gmra.mxu0 %vm4958_vm2, %v1919_v38 }
 0x18e   : > { %v1923_v43 = vpop.permute.xlu0 %1922  ;;  %v3763_v0 = vpop.permute.xlu2 %1450 }
 0x192   : > { %3052 = vmatmul.msk.f32.gmra.mxu0 %vm4958_vm2, %v1921_v40 }
 0x19a   : > { %3053 = vmatmul.msk.f32.gmra.mxu0 %vm4958_vm2, %v1923_v43  ;;  %v3809_v43 = vld [vmem:[#allocation3 + $0x30] sm:$0xff] }
 0x1a2   : > { %3054 = vmatmul.msk.f32.gmra.mxu0 %vm4958_vm2, %v1925_v57 }
 0x1b9   : > { %v642_v48 = vpop.xlane.xlu0 %641 }
 0x1ba   : > { %v664_v49 = vmax.f32 %v631_v47, %v642_v48 }
 0x1bc   : > { %954 = vst.msk [vmem:[#allocation3] sm:$0xff] %vm808_vm4, %v664_v49  ;;  %698 = vperm.xlu2 %3168, %v664_v49   ;;  %v672_v25 = vsub.f32 %v631_v47, %v664_v49 }
 0x1be   : > { %v680_v26 = vmul.f32 1.442695, %v672_v25 }
 0x1c2   : > { %v645_v55 = vpop.xlane.xlu0 %644 }
 0x1c3   : > { %v665_v56 = vmax.f32 %v632_v54, %v645_v55 }
 0x1c5   : > { %955 = vst.msk [vmem:[#allocation3 + $0x8] sm:$0xff] %vm808_vm4, %v665_v56  ;;  %v673_v14 = vsub.f32 %v632_v54, %v665_v56 }
 0x1c7   : > { %v648_v60 = vpop.xlane.xlu1 %647  ;;  %v682_v20 = vmul.f32 1.442695, %v673_v14 }
 0x1c8   : > { %v3759_v61 = vmax.f32 %v3756_v59, %v648_v60  ;;  %v638_v60 = vld [vmem:[#allocation3 + $0x38] sm:$0xff] }
 0x1c9   : > { %3209 = vpow2.f32 %v682_v20 }
 0x1ca   : > { %956 = vst.msk [vmem:[#allocation3 + $0x10] sm:$0xff] %vm808_vm4, %v3759_v61  ;;  %3211 = vpow2.f32 %v680_v26 }
 0x1cf   : > { %v651_v4 = vpop.xlane.xlu1 %650  ;;  %v3797_v29 = vpop.eup %3209 }
 0x1d0   : > { %v3772_v5 = vmax.f32 %v3769_v3, %v651_v4  ;;  %v3800_v30 = vpop.eup %3211  ;;  %v674_v4 = vsub.f32 %v3756_v59, %v3759_v61 }
 0x1d1   : > { %v1027_v62 = vpop.f32.mrf.mxu2 }
 0x1d2   : > { %v3765_v1 = vmul.f32 0.35355338, %v1027_v62  ;;  %v675_v6 = vsub.f32 %v3769_v3, %v3772_v5  ;;  %957 = vst.msk [vmem:[#allocation3 + $0x18] sm:$0xff] %vm808_vm4, %v3772_v5 }
 0x1d4   : > { %v1067_v2 = vsel %vm4954_vm3, %v3765_v1, -inf }
 0x1d7   : > { %v654_v8 = vpop.xlane.xlu2 %653 }
 0x1d8   : > { %v3781_v10 = vmax.f32 %v3778_v7, %v654_v8  ;;  %v686_v8 = vmul.f32 1.442695, %v675_v6 }
 0x1d9   : > { %v1030_v33 = vpop.f32.mrf.mxu2 }
 0x1da   : > { %958 = vst.msk [vmem:[#allocation3 + $0x20] sm:$0xff] %vm808_vm4, %v3781_v10  ;;  %v3811_v46 = vmul.f32 0.35355338, %v1030_v33 }
 0x1dc   : > { %v1070_v55 = vsel %vm4954_vm3, %v3811_v46, -inf }
 0x1df   : > { %v657_v16 = vpop.xlane.xlu2 %656 }
 0x1e0   : > { %v3789_v19 = vmax.f32 %v636_v15, %v657_v16 }
 0x1e1   : > { %v1033_v39 = vpop.f32.mrf.mxu2 }
 0x1e2   : > { %959 = vst.msk [vmem:[#allocation3 + $0x28] sm:$0xff] %vm808_vm4, %v3789_v19  ;;  %v3830_v57 = vmul.f32 0.35355338, %v1033_v39 }
 0x1e4   : > { %v1073_v3 = vsel %vm4954_vm3, %v3830_v57, -inf }
 0x1e5   : > { %1068 = vmax.xlane.f32.xlu2 %v1067_v2 }
 0x1e7   : > { %v1975_v9 = vpop.f32.mrf.mxu0  ;;  %v660_v49 = vpop.xlane.xlu0 %659 }
 0x1e8   : > { %v3783_v11 = vmul.f32 0.35355338, %v1975_v9  ;;  %v676_v9 = vsub.f32 %v3778_v7, %v3781_v10 }
 0x1e9   : > { %v1036_v44 = vpop.f32.mrf.mxu2 }
 0x1ea   : > { %4960 = vst [vmem:[#allocation7_spill] sm:$0xff] %v3783_v11  ;;  %v2015_v13 = vsel %vm4954_vm3, %v3783_v11, -inf  ;;  %v3813_v47 = vmul.f32 0.35355338, %v1036_v44  ;;  %v688_v14 = vmul.f32 1.442695, %v676_v9 }
 0x1eb   : > { %2016 = vmax.xlane.f32.xlu1 %v2015_v13  ;;  %v677_v13 = vsub.f32 %v636_v15, %v3789_v19 }
 0x1ec   : > { %v1076_v54 = vsel %vm4954_vm3, %v3813_v47, -inf }
 0x1ed   : > { %v690_v16 = vmul.f32 1.442695, %v677_v13 }
 0x1ef   : > { %v1978_v18 = vpop.f32.mrf.mxu0 }
 0x1f0   : > { %v3791_v21 = vmul.f32 0.35355338, %v1978_v18 }
 0x1f1   : > { %v1039_v20 = vpop.f32.mrf.mxu2 }
 0x1f2   : > { %4961 = vst [vmem:[#allocation8_spill] sm:$0xff] %v3791_v21  ;;  %v2018_v24 = vsel %vm4954_vm3, %v3791_v21, -inf  ;;  %v3869_v33 = vmul.f32 0.35355338, %v1039_v20  ;;  %v817_v20 = vld [vmem:[#allocation5] sm:$0xff] }
 0x1f3   : > { %2019 = vmax.xlane.f32.xlu0 %v2018_v24 }
 0x1f4   : > { %v663_v62 = vpop.xlane.xlu1 %662 }
 0x1f5   : > { %v3832_v2 = vmax.f32 %v638_v60, %v663_v62 }
 0x1f7   : > { %v1981_v48 = vpop.f32.mrf.mxu0  ;;  %961 = vst.msk [vmem:[#allocation3 + $0x38] sm:$0xff] %vm808_vm4, %v3832_v2 }
 0x1f8   : > { %v3815_v50 = vmul.f32 0.35355338, %v1981_v48 }
 0x1f9   : > { %v1042_v24 = vpop.f32.mrf.mxu2 }
 0x1fa   : > { %4962 = vst [vmem:[#allocation9_spill] sm:$0xff] %v3815_v50  ;;  %v3873_v39 = vmul.f32 0.35355338, %v1042_v24 }
 0x1fd   : > { %832 = vperm.xlu2 %3168, %v3797_v29  }
 0x204   : > { %827 = vperm.xlu1 %3170, %v3800_v30  }
 0x205   : > { %713 = vperm.xlu2 %3168, %v3772_v5   ;;  %v684_v5 = vmul.f32 1.442695, %v674_v4 }
 0x207   : > { %703 = vperm.xlu0 %3169, %v665_v56   ;;  %v2021_v56 = vsel %vm4954_vm3, %v3815_v50, -inf  ;;  %v818_v50 = vld [vmem:[#allocation5 + $0x8] sm:$0xff] }
 0x216   : > { %v699_v34 = vpop.permute.xlu2 %698 }
 0x217   : > { %v736_v37 = vsub.f32 %v3679_v63, %v699_v34  ;;  %v3818_v63 = vmax.f32 %v3809_v43, %v660_v49  ;;  %v1079_v34 = vsel %vm4954_vm3, %v3869_v33, -inf }
 0x219   : > { %v744_v38 = vmul.f32 1.442695, %v736_v37  ;;  %v678_v52 = vsub.f32 %v3809_v43, %v3818_v63  ;;  %960 = vst.msk [vmem:[#allocation3 + $0x30] sm:$0xff] %vm808_vm4, %v3818_v63  ;;  %v1045_v37 = vpop.f32.mrf.mxu2 }
 0x21a   : > { %v3875_v44 = vmul.f32 0.35355338, %v1045_v37 }
 0x21b   : > { %3213 = vpow2.f32 %v744_v38 }
 0x21c   : > { %3215 = vpow2.f32 %v684_v5  ;;  %v1085_v62 = vsel %vm4954_vm3, %v3875_v44, -inf }
 0x21d   : > { %3217 = vpow2.f32 %v686_v8  ;;  %v679_v8 = vsub.f32 %v638_v60, %v3832_v2  ;;  %v692_v60 = vmul.f32 1.442695, %v678_v52 }
 0x21e   : > { %3219 = vpow2.f32 %v688_v14 }
 0x21f   : > { %3221 = vpow2.f32 %v690_v16 }
 0x221   : > { %v3805_v40 = vpop.eup %3213 }
 0x222   : > { %2995 = vmatmul.msk.f32.vlgmr.msra.gmra.mxu1 %vm4954_vm3, %v3805_v40  ;;  %v3845_v18 = vpop.eup %3215 }
 0x223   : > { %v3848_v59 = vpop.eup %3217 }
 0x224   : > { %v3852_v6 = vpop.eup %3219 }
 0x225   : > { %v3854_v7 = vpop.eup %3221 }
 0x22e   : > { %1077 = vmax.xlane.f32.xlu2 %v1076_v54  ;;  %1071 = vmax.xlane.f32.xlu1 %v1070_v55  ;;  %v3422_v54 = vmov 1  }
 0x231   : > { %2022 = vmax.xlane.f32.xlu0 %v2021_v56 }
 0x239   : > { %1074 = vmax.xlane.f32.xlu0 %v1073_v3  ;;  %v1082_v3 = vsel %vm4954_vm3, %v3873_v39, -inf }
 0x246   : > { %718 = vperm.xlu2 %3168, %v3781_v10  }
 0x247   : > { %708 = vperm.xlu1 %3170, %v3759_v61   ;;  %v3858_v61 = vld [vmem:[#allocation3] sm:$0xff] }
 0x24d   : > { %837 = vperm.xlu0 %3169, %v3845_v18  }
 0x24e   : > { %728 = vperm.xlu2 %3168, %v3818_v63  }
 0x24f   : > { %842 = vperm.xlu1 %3170, %v3848_v59  }
 0x255   : > { %847 = vperm.xlu0 %3169, %v3852_v6  }
 0x256   : > { %852 = vperm.xlu2 %3168, %v3854_v7  }
 0x258   : > { %v1069_v10 = vpop.xlane.xlu2 %1068 }
 0x259   : > { %v3861_v15 = vmax.f32 %v3858_v61, %v1069_v10 }
 0x25b   : > { %1430 = vst.msk [vmem:[#allocation3] sm:$0xff] %vm1235_vm5, %v3861_v15 }
 0x25e   : > { %3188 = vset.pattern.permute.xlu2 %v3422_v54  ;;  %v3887_v14 = vpop.xlane.xlu1 %2016 }
 0x25f   : > { %4964 = vst [vmem:[#allocation11_spill] sm:$0xff] %v3887_v14 }
 0x260   : > { %v3867_v26 = vpop.permute.xlu2 %832 }
 0x261   : > { %v866_v11 = vmul.f32 %v3867_v26, %v818_v50 }
 0x266   : > { %v3865_v25 = vpop.xlane.xlu0 %2019 }
 0x267   : > { %4963 = vst [vmem:[#allocation10_spill] sm:$0xff] %v3865_v25 }
 0x268   : > { %v714_v48 = vpop.permute.xlu2 %713 }
 0x269   : > { %v739_v56 = vsub.f32 %v3707_v23, %v714_v48  ;;  %v694_v23 = vmul.f32 1.442695, %v679_v8 }
 0x26b   : > { %v750_v4 = vmul.f32 1.442695, %v739_v56  ;;  %v3915_v56 = vld [vmem:[#allocation3 + $0x10] sm:$0xff] }
 0x276   : > { %v828_v10 = vpop.permute.xlu1 %827 }
 0x277   : > { %v865_v24 = vmul.f32 %v828_v10, %v817_v20 }
 0x279   : > { %v704_v38 = vpop.permute.xlu0 %703  ;;  %1080 = vmax.xlane.f32.xlu1 %v1079_v34 }
 0x27a   : > { %v737_v49 = vsub.f32 %v3692_v12, %v704_v38 }
 0x27c   : > { %v746_v55 = vmul.f32 1.442695, %v737_v49  ;;  %v3900_v49 = vld [vmem:[#allocation3 + $0x8] sm:$0xff] }
 0x27e   : > { %3223 = vpow2.f32 %v746_v55 }
 0x27f   : > { %1086 = vmax.xlane.f32.xlu2 %v1085_v62  ;;  %1083 = vmax.xlane.f32.xlu0 %v1082_v3  ;;  %3225 = vpow2.f32 %v750_v4 }
 0x280   : > { %3227 = vpow2.f32 %v694_v23 }
 0x281   : > { %3229 = vpow2.f32 %v692_v60 }
 0x284   : > { %v3224_v5 = vpop.eup %3223 }
 0x285   : > { %2996 = vmatmul.msk.f32.gmra.mxu1 %vm4954_vm3, %v3224_v5  ;;  %v779_v12 = vsel %vm4954_vm3, %v3224_v5, 0.0  ;;  %v3226_v9 = vpop.eup %3225 }
 0x286   : > { %v785_v13 = vsel %vm4954_vm3, %v3226_v9, 0.0  ;;  %v3889_v16 = vpop.eup %3227 }
 0x287   : > { %780 = vadd.xlane.f32.xlu2 %v779_v12  ;;  %v3898_v38 = vpop.eup %3229 }
 0x28f   : > { %786 = vadd.xlane.f32.xlu2 %v785_v13 }
 0x292   : > { %723 = vperm.xlu1 %3170, %v3789_v19   ;;  %v1062_v19 = vld [vmem:[#allocation3 + $0x18] sm:$0xff] }
 0x293   : > { %862 = vperm.xlu0 %3169, %v3889_v16  }
 0x29a   : > { %733 = vperm.xlu1 %3170, %v3832_v2  }
 0x29b   : > { %3171 = vset.pattern.permute.xlu0 %v3422_v54 }
 0x29c   : > { %1125 = vperm.xlu0 %3171, %v3861_v15  }
 0x29f   : > { %v914_v34 = vpop.f32.mrf.mxu1 }
 0x2a0   : > { %v938_v37 = vadd.f32 %v914_v34, %v865_v24  ;;  %v1048_v24 = vpop.f32.mrf.mxu2 }
 0x2a1   : > { %v1078_v48 = vpop.xlane.xlu2 %1077  ;;  %v1072_v55 = vpop.xlane.xlu1 %1071 }
 0x2a2   : > { %946 = vst.msk [vmem:[#allocation5] sm:$0xff] %vm4958_vm2, %v938_v37  ;;  %v3903_v43 = vmax.f32 %v1062_v19, %v1078_v48  ;;  %v3906_v63 = vmax.f32 %v3900_v49, %v1072_v55  ;;  %857 = vperm.xlu1 %3170, %v3898_v38   ;;  %v1099_v48 = vsub.f32 %v3858_v61, %v3861_v15 }
 0x2a4   : > { %1433 = vst.msk [vmem:[#allocation3 + $0x18] sm:$0xff] %vm1235_vm5, %v3903_v43  ;;  %v3911_v52 = vpop.xlane.xlu0 %2022 }
 0x2a5   : > { %4965 = vst [vmem:[#allocation12_spill] sm:$0xff] %v3911_v52 }
 0x2a6   : > { %1431 = vst.msk [vmem:[#allocation3 + $0x8] sm:$0xff] %vm1235_vm5, %v3906_v63 }
 0x2a9   : > { %v719_v2 = vpop.permute.xlu2 %718 }
 0x2aa   : > { %3172 = vset.pattern.permute.xlu1 %v3422_v54  ;;  %v740_v34 = vsub.f32 %v3715_v28, %v719_v2  ;;  %v1102_v28 = vsub.f32 %v1062_v19, %v3903_v43 }
 0x2ac   : > { %v1075_v62 = vpop.xlane.xlu0 %1074  ;;  %v752_v37 = vmul.f32 1.442695, %v740_v34  ;;  %v1113_v61 = vmul.f32 1.442695, %v1102_v28  ;;  %v1064_v34 = vld [vmem:[#allocation3 + $0x28] sm:$0xff] }
 0x2ad   : > { %v3918_v3 = vmax.f32 %v3915_v56, %v1075_v62  ;;  %v1107_v62 = vmul.f32 1.442695, %v1099_v48 }
 0x2af   : > { %1432 = vst.msk [vmem:[#allocation3 + $0x10] sm:$0xff] %vm1235_vm5, %v3918_v3 }
 0x2b1   : > { %v729_v5 = vpop.permute.xlu2 %728 }
 0x2b2   : > { %v742_v8 = vsub.f32 %v3741_v45, %v729_v5  ;;  %v776_v45 = vsel %vm4954_vm3, %v3805_v40, 0.0  ;;  %v3178_v40 = vpack.i.bf16 %v3619_v42, %v3613_v41  ;;  %v3951_v5 = vpop.f32.mrf.mxu0 }
 0x2b4   : > { %v756_v12 = vmul.f32 1.442695, %v742_v8 }
 0x2b6   : > { %3231 = vpow2.f32 %v756_v12 }
 0x2b9   : > { %v709_v23 = vpop.permute.xlu1 %708  ;;  %v3964_v19 = vpop.permute.xlu2 %852 }
 0x2ba   : > { %v738_v54 = vsub.f32 %v3698_v17, %v709_v23  ;;  %v3937_v17 = vmul.f32 0.35355338, %v1048_v24  ;;  %v3959_v41 = vpop.f32.mrf.mxu0  ;;  %v3968_v23 = vld [vmem:[#allocation3 + $0x20] sm:$0xff] }
 0x2bc   : > { %v3926_v13 = vpop.eup %3231  ;;  %v748_v60 = vmul.f32 1.442695, %v738_v54  ;;  %v1088_v55 = vsel %vm4954_vm3, %v3937_v17, -inf }
 0x2bd   : > { %v794_v10 = vsel %vm4954_vm3, %v3926_v13, 0.0 }
 0x2be   : > { %3233 = vpow2.f32 %v748_v60  ;;  %795 = vadd.xlane.f32.xlu2 %v794_v10 }
 0x2bf   : > { %3235 = vpow2.f32 %v752_v37 }
 0x2c0   : > { %3237 = vpow2.f32 %v1107_v62  ;;  %v761_v62 = vld [vmem:[#allocation4 + $0x8] sm:$0xff] }
 0x2c1   : > { %3239 = vpow2.f32 %v1113_v61  ;;  %v3961_v42 = vpop.permute.xlu1 %842  ;;  %v769_v28 = vmul.f32 %v3797_v29, %v761_v62 }
 0x2c2   : > { %v3970_v60 = vpop.f32.mrf.mxu0 }
 0x2c4   : > { %v3930_v20 = vpop.eup %3233 }
 0x2c5   : > { %2997 = vmatmul.msk.f32.gmra.mxu1 %vm4954_vm3, %v3930_v20  ;;  %v3236_v2 = vpop.eup %3235 }
 0x2c6   : > { %777 = vadd.xlane.f32.xlu0 %v776_v45  ;;  %v3949_v15 = vpop.eup %3237  ;;  %v3977_v45 = vld [vmem:[#allocation3 + $0x30] sm:$0xff] }
 0x2c7   : > { %v3956_v8 = vpop.eup %3239 }
 0x2cc   : > { %1089 = vmax.xlane.f32.xlu1 %v1088_v55 }
 0x2cd   : > { %2998 = vmatmul.msk.f32.gmra.mxu1 %vm4954_vm3, %v3226_v9  ;;  %v3954_v9 = vpop.permute.xlu0 %837 }
 0x2d5   : > { %2999 = vmatmul.msk.f32.gmra.mxu1 %vm4954_vm3, %v3236_v2  ;;  %v3966_v12 = vpop.permute.xlu0 %847 }
 0x2d6   : > { %3179 = vrot.lane.b32.xlu2 %v3178_v40, %s3419_s25  ;;  %v1993_v40 = vpop.f32.mrf.mxu0 }
 0x2d7   : > { %v3986_v61 = vmul.f32 0.35355338, %v1993_v40 }
 0x2da   : > { %1254 = vperm.xlu0 %3171, %v3949_v15  }
 0x2e2   : > { %1269 = vperm.xlu0 %3171, %v3956_v8  }
 0x2e5   : > { %1135 = vperm.xlu1 %3172, %v3918_v3  }
 0x2ec   : > { %v1081_v54 = vpop.xlane.xlu1 %1080 }
 0x2ed   : > { %v3973_v10 = vmax.f32 %v3968_v23, %v1081_v54 }
 0x2ef   : > { %1434 = vst.msk [vmem:[#allocation3 + $0x20] sm:$0xff] %vm1235_vm5, %v3973_v10 }
 0x2f2   : > { %v1087_v24 = vpop.xlane.xlu2 %1086  ;;  %v1084_v37 = vpop.xlane.xlu0 %1083 }
 0x2f3   : > { %v3980_v48 = vmax.f32 %v3977_v45, %v1087_v24  ;;  %v1096_v55 = vmax.f32 %v1064_v34, %v1084_v37  ;;  %v2033_v24 = vsel %vm4954_vm3, %v3986_v61, -inf  ;;  %v763_v37 = vld [vmem:[#allocation4 + $0x18] sm:$0xff] }
 0x2f4   : > { %v771_v21 = vmul.f32 %v3848_v59, %v763_v37  ;;  %v1100_v37 = vsub.f32 %v3900_v49, %v3906_v63 }
 0x2f5   : > { %1436 = vst.msk [vmem:[#allocation3 + $0x30] sm:$0xff] %vm1235_vm5, %v3980_v48 }
 0x2f6   : > { %1435 = vst.msk [vmem:[#allocation3 + $0x28] sm:$0xff] %vm1235_vm5, %v1096_v55 }
 0x2fa   : > { %v781_v54 = vpop.xlane.xlu2 %780 }
 0x2fb   : > { %v801_v4 = vadd.f32 %v781_v54, %v769_v28  ;;  %v788_v54 = vsel %vm4954_vm3, %v3236_v2, 0.0 }
 0x2fd   : > { %810 = vst.msk [vmem:[#allocation4 + $0x8] sm:$0xff] %vm808_vm4, %v801_v4 }
 0x2ff   : > { %2034 = vmax.xlane.f32.xlu2 %v2033_v24 }
 0x302   : > { %v917_v52 = vpop.f32.mrf.mxu1  ;;  %v787_v14 = vpop.xlane.xlu2 %786 }
 0x303   : > { %v939_v25 = vadd.f32 %v917_v52, %v866_v11  ;;  %v803_v29 = vadd.f32 %v787_v14, %v771_v21  ;;  %v782_v11 = vsel %vm4954_vm3, %v3930_v20, 0.0 }
 0x304   : > { %v724_v62 = vpop.permute.xlu1 %723 }
 0x305   : > { %947 = vst.msk [vmem:[#allocation5 + $0x8] sm:$0xff] %vm4958_vm2, %v939_v25  ;;  %v741_v40 = vsub.f32 %v3724_v32, %v724_v62  ;;  %v3995_v4 = vpop.permute.xlu0 %862  ;;  %v1104_v32 = vsub.f32 %v1064_v34, %v1096_v55  ;;  %v760_v62 = vld [vmem:[#allocation4] sm:$0xff] }
 0x306   : > { %812 = vst.msk [vmem:[#allocation4 + $0x18] sm:$0xff] %vm808_vm4, %v803_v29 }
 0x307   : > { %v754_v28 = vmul.f32 1.442695, %v741_v40  ;;  %v1117_v52 = vmul.f32 1.442695, %v1104_v32 }
 0x309   : > { %3241 = vpow2.f32 %v754_v28 }
 0x30c   : > { %789 = vadd.xlane.f32.xlu0 %v788_v54  ;;  %v734_v50 = vpop.permute.xlu1 %733  ;;  %v1066_v54 = vld [vmem:[#allocation3 + $0x38] sm:$0xff] }
 0x30d   : > { %v743_v26 = vsub.f32 %v3746_v51, %v734_v50 }
 0x30e   : > { %v1126_v59 = vpop.permute.xlu0 %1125 }
 0x30f   : > { %v4001_v21 = vpop.eup %3241  ;;  %v1163_v25 = vsub.f32 %v3765_v1, %v1126_v59  ;;  %783 = vadd.xlane.f32.xlu1 %v782_v11  ;;  %v758_v2 = vmul.f32 1.442695, %v743_v26  ;;  %v4966_v1 = vsub.f32 %v3915_v56, %v3918_v3  ;;  %v1103_v56 = vsub.f32 %v3968_v23, %v3973_v10  ;;  %v820_v26 = vld [vmem:[#allocation5 + $0x18] sm:$0xff] }
 0x310   : > { %3000 = vmatmul.msk.f32.gmra.mxu1 %vm4954_vm3, %v4001_v21 }
 0x311   : > { %v1171_v14 = vmul.f32 1.442695, %v1163_v25  ;;  %v1111_v51 = vmul.f32 1.442695, %v4966_v1  ;;  %v1115_v49 = vmul.f32 1.442695, %v1103_v56 }
 0x313   : > { %3243 = vpow2.f32 %v1171_v14  ;;  %v868_v14 = vmul.f32 %v3961_v42, %v820_v26 }
 0x314   : > { %3245 = vpow2.f32 %v1117_v52  ;;  %v4044_v40 = vpop.permute.xlu1 %857 }
 0x315   : > { %3247 = vpow2.f32 %v758_v2 }
 0x316   : > { %3249 = vpow2.f32 %v1111_v51 }
 0x317   : > { %1130 = vperm.xlu2 %3188, %v3906_v63  }
 0x318   : > { %3001 = vmatmul.msk.f32.gmra.mxu1 %vm4954_vm3, %v3926_v13  ;;  %v1109_v13 = vmul.f32 1.442695, %v1100_v37 }
 0x319   : > { %v4010_v20 = vpop.eup %3243 }
 0x31a   : > { %3015 = vmatmul.msk.f32.vlgmr.msra.gmra.mxu3 %vm4954_vm3, %v4010_v20  ;;  %v4017_v34 = vpop.eup %3245  ;;  %3251 = vpow2.f32 %v1109_v13 }
 0x31b   : > { %v4019_v24 = vpop.eup %3247  ;;  %3253 = vpow2.f32 %v1115_v49 }
 0x31c   : > { %v4027_v29 = vpop.eup %3249 }
 0x31f   : > { %1140 = vperm.xlu2 %3188, %v3903_v43   ;;  %v766_v43 = vld [vmem:[#allocation4 + $0x30] sm:$0xff] }
 0x320   : > { %1279 = vperm.xlu0 %3171, %v4017_v34   ;;  %3002 = vmatmul.msk.f32.gmra.mxu1 %vm4954_vm3, %v4019_v24  ;;  %v4034_v63 = vpop.eup %3251  ;;  %v774_v3 = vmul.f32 %v3898_v38, %v766_v43  ;;  %v819_v38 = vld [vmem:[#allocation5 + $0x10] sm:$0xff] }
 0x321   : > { %v867_v11 = vmul.f32 %v3954_v9, %v819_v38  ;;  %v821_v9 = vld [vmem:[#allocation5 + $0x20] sm:$0xff] }
 0x322   : > { %v869_v1 = vmul.f32 %v3966_v12, %v821_v9  ;;  %v1105_v12 = vsub.f32 %v3977_v45, %v3980_v48 }
 0x324   : > { %v1119_v56 = vmul.f32 1.442695, %v1105_v12 }
 0x327   : > { %1150 = vperm.xlu2 %3188, %v1096_v55  }
 0x328   : > { %1264 = vperm.xlu1 %3172, %v4027_v29   ;;  %3027 = vmatmul.msk.f32.vlgmr.msrb.gmra.mxu1 %vm4958_vm2, %v3705_v22  ;;  %v4042_v22 = vpop.eup %3253 }
 0x32f   : > { %1259 = vperm.xlu2 %3188, %v4034_v63  }
 0x330   : > { %1145 = vperm.xlu1 %3172, %v3973_v10   ;;  %3028 = vmatmul.msk.f32.gmra.mxu1 %vm4958_vm2, %v3713_v27  ;;  %v768_v10 = vmul.f32 %v3800_v30, %v760_v62 }
 0x331   : > { %v796_v23 = vpop.xlane.xlu2 %795 }
 0x332   : > { %v806_v55 = vadd.f32 %v796_v23, %v774_v3 }
 0x334   : > { %815 = vst.msk [vmem:[#allocation4 + $0x30] sm:$0xff] %vm808_vm4, %v806_v55 }
 0x337   : > { %1274 = vperm.xlu2 %3188, %v4042_v22  }
 0x338   : > { %3029 = vmatmul.msk.f32.gmra.mxu1 %vm4958_vm2, %v3722_v31 }
 0x339   : > { %v778_v28 = vpop.xlane.xlu0 %777  ;;  %v4073_v42 = vpop.permute.xlu2 %3179 }
 0x33a   : > { %v800_v27 = vadd.f32 %v778_v28, %v768_v10 }
 0x33c   : > { %809 = vst.msk [vmem:[#allocation4] sm:$0xff] %vm808_vm4, %v800_v27 }
 0x33f   : > { %v1090_v50 = vpop.xlane.xlu1 %1089 }
 0x340   : > { %v1098_v59 = vmax.f32 %v1066_v54, %v1090_v50  ;;  %3030 = vmatmul.msk.f32.gmra.mxu1 %vm4958_vm2, %v3733_v35 }
 0x342   : > { %v1106_v25 = vsub.f32 %v1066_v54, %v1098_v59  ;;  %1437 = vst.msk [vmem:[#allocation3 + $0x38] sm:$0xff] %vm1235_vm5, %v1098_v59  ;;  %v920_v32 = vpop.f32.mrf.mxu1  ;;  %1160 = vperm.xlu0 %3171, %v1098_v59  }
 0x343   : > { %v940_v31 = vadd.f32 %v920_v32, %v867_v11  ;;  %v3337_v11 = vld [vmem:[%s3528_s28 + $0x18] sm:$0xff] }
 0x344   : > { %v1121_v30 = vmul.f32 1.442695, %v1106_v25  ;;  %v3338_v25 = vld [vmem:[%s3528_s28 + $0x10] sm:$0xff] }
 0x345   : > { %948 = vst.msk [vmem:[#allocation5 + $0x10] sm:$0xff] %vm4958_vm2, %v940_v31  ;;  %v3173_v32 = vpack.i.bf16 %v3338_v25, %v3337_v11 }
 0x346   : > { %3255 = vpow2.f32 %v1121_v30 }
 0x347   : > { %3257 = vpow2.f32 %v1119_v56  ;;  %v4122_v56 = vmul.f32 0.35355338, %v3959_v41 }
 0x348   : > { %3031 = vmatmul.msk.f32.gmra.mxu1 %vm4958_vm2, %v3735_v36  ;;  %v791_v36 = vsel %vm4954_vm3, %v4001_v21, 0.0 }
 0x34a   : > { %v923_v52 = vpop.f32.mrf.mxu1 }
 0x34b   : > { %v941_v35 = vadd.f32 %v923_v52, %v868_v14 }
 0x34c   : > { %v4059_v2 = vpop.eup %3255  ;;  %v4079_v13 = vpop.permute.xlu0 %1254 }
 0x34d   : > { %949 = vst.msk [vmem:[#allocation5 + $0x18] sm:$0xff] %vm4958_vm2, %v941_v35  ;;  %1289 = vperm.xlu2 %3188, %v4059_v2   ;;  %v4093_v49 = vpop.eup %3257  ;;  %v823_v35 = vld [vmem:[#allocation5 + $0x30] sm:$0xff] }
 0x34e   : > { %v871_v9 = vmul.f32 %v4044_v40, %v823_v35 }
 0x350   : > { %3032 = vmatmul.msk.f32.gmra.mxu1 %vm4958_vm2, %v3753_v58  ;;  %v797_v58 = vsel %vm4954_vm3, %v4019_v24, 0.0  ;;  %v1203_v24 = vsel %vm4954_vm3, %v4010_v20, 0.0  ;;  %v762_v20 = vld [vmem:[#allocation4 + $0x10] sm:$0xff] }
 0x351   : > { %v770_v27 = vmul.f32 %v3845_v18, %v762_v20  ;;  %v822_v18 = vld [vmem:[#allocation5 + $0x28] sm:$0xff] }
 0x352   : > { %v926_v51 = vpop.f32.mrf.mxu1 }
 0x353   : > { %v942_v37 = vadd.f32 %v926_v51, %v869_v1 }
 0x354   : > { %v4091_v45 = vpop.permute.xlu0 %1269 }
 0x355   : > { %950 = vst.msk [vmem:[#allocation5 + $0x20] sm:$0xff] %vm4958_vm2, %v942_v37 }
 0x358   : > { %3033 = vmatmul.msk.f32.gmra.mxu1 %vm4958_vm2, %v3763_v0  ;;  %v4082_v0 = vmul.f32 0.35355338, %v3951_v5  ;;  %v1136_v5 = vpop.permute.xlu1 %1135 }
 0x359   : > { %v1165_v55 = vsub.f32 %v3830_v57, %v1136_v5  ;;  %v2027_v5 = vsel %vm4954_vm3, %v4122_v56, -inf }
 0x35a   : > { %792 = vadd.xlane.f32.xlu1 %v791_v36 }
 0x35b   : > { %v1175_v38 = vmul.f32 1.442695, %v1165_v55 }
 0x360   : > { %3034 = vmatmul.msk.f32.gmra.mxu1 %vm4958_vm2, %v3750_v53  ;;  %v2024_v53 = vsel %vm4954_vm3, %v4082_v0, -inf }
 0x36c   : > { %798 = vadd.xlane.f32.xlu0 %v797_v58 }
 0x372   : > { %v4084_v21 = vpop.xlane.xlu2 %2034 }
 0x373   : > { %1155 = vperm.xlu1 %3172, %v3980_v48   ;;  %v764_v48 = vld [vmem:[#allocation4 + $0x20] sm:$0xff] }
 0x374   : > { %2025 = vmax.xlane.f32.xlu0 %v2024_v53  ;;  %v772_v62 = vmul.f32 %v3852_v6, %v764_v48  ;;  %v4132_v48 = vmul.f32 0.35355338, %v3970_v60 }
 0x376   : > { %1204 = vadd.xlane.f32.xlu2 %v1203_v24 }
 0x37a   : > { %v1131_v43 = vpop.permute.xlu2 %1130 }
 0x37b   : > { %v1164_v3 = vsub.f32 %v3811_v46, %v1131_v43  ;;  %1284 = vperm.xlu1 %3172, %v4093_v49  }
 0x37d   : > { %v1173_v23 = vmul.f32 1.442695, %v1164_v3 }
 0x37f   : > { %3259 = vpow2.f32 %v1173_v23  ;;  %v790_v10 = vpop.xlane.xlu0 %789 }
 0x380   : > { %v804_v28 = vadd.f32 %v790_v10, %v772_v62  ;;  %3261 = vpow2.f32 %v1175_v38 }
 0x382   : > { %813 = vst.msk [vmem:[#allocation4 + $0x20] sm:$0xff] %vm808_vm4, %v804_v28  ;;  %v1141_v46 = vpop.permute.xlu2 %1140  ;;  %v784_v54 = vpop.xlane.xlu1 %783  ;;  %v3339_v28 = vld [vmem:[%s3528_s28 + $0x8] sm:$0xff] }
 0x383   : > { %v1166_v50 = vsub.f32 %v3813_v47, %v1141_v46  ;;  %v802_v59 = vadd.f32 %v784_v54, %v770_v27  ;;  %v870_v47 = vmul.f32 %v3964_v19, %v822_v18  ;;  %v824_v19 = vld [vmem:[#allocation5 + $0x38] sm:$0xff]  ;;  %v3340_v27 = vld [vmem:[%s3528_s28] sm:$0xff]  ;;  %s3423_s28 = smov 8  }
 0x384   : > { %v872_v36 = vmul.f32 %v3995_v4, %v824_v19  ;;  %v3189_v38 = vpack.i.bf16 %v3340_v27, %v3339_v28  ;;  %v1187_v19 = vld [vmem:[#allocation4] sm:$0xff] }
 0x385   : > { %v4104_v57 = vpop.eup %3259  ;;  %v1177_v6 = vmul.f32 1.442695, %v1166_v50  ;;  %811 = vst.msk [vmem:[#allocation4 + $0x10] sm:$0xff] %vm808_vm4, %v802_v59  ;;  %v765_v59 = vld [vmem:[#allocation4 + $0x28] sm:$0xff] }
 0x386   : > { %3016 = vmatmul.msk.f32.gmra.mxu3 %vm4954_vm3, %v4104_v57  ;;  %v3262_v31 = vpop.eup %3261  ;;  %v773_v11 = vmul.f32 %v3854_v7, %v765_v59  ;;  %v3182_v59 = vunpack.i.h.bf16 %v4073_v42 }
 0x387   : > { %3263 = vpow2.f32 %v1177_v6 }
 0x388   : > { %3174 = vrot.lane.b32.xlu0 %v3173_v32, %s3419_s25 }
 0x38a   : > { %v1151_v24 = vpop.permute.xlu2 %1150 }
 0x38b   : > { %v1168_v4 = vsub.f32 %v3873_v39, %v1151_v24  ;;  %v1209_v39 = vsel %vm4954_vm3, %v3262_v31, 0.0 }
 0x38d   : > { %v3264_v30 = vpop.eup %3263  ;;  %v929_v26 = vpop.f32.mrf.mxu1  ;;  %v1181_v41 = vmul.f32 1.442695, %v1168_v4 }
 0x38e   : > { %v943_v14 = vadd.f32 %v929_v26, %v870_v47  ;;  %3017 = vmatmul.msk.f32.gmra.mxu3 %vm4954_vm3, %v3262_v31  ;;  %v1212_v52 = vsel %vm4954_vm3, %v3264_v30, 0.0 }
 0x38f   : > { %1213 = vadd.xlane.f32.xlu2 %v1212_v52  ;;  %v767_v52 = vld [vmem:[#allocation4 + $0x38] sm:$0xff] }
 0x390   : > { %951 = vst.msk [vmem:[#allocation5 + $0x28] sm:$0xff] %vm4958_vm2, %v943_v14  ;;  %3184 = vrot.lane.b32.xlu0 %v3173_v32, %s3420_s15  ;;  %v775_v7 = vmul.f32 %v3889_v16, %v767_v52 }
 0x392   : > { %v4154_v31 = vpop.permute.xlu0 %1279  ;;  %v4156_v47 = vpop.permute.xlu2 %1259 }
 0x395   : > { %v932_v1 = vpop.f32.mrf.mxu1 }
 0x396   : > { %v944_v51 = vadd.f32 %v932_v1, %v871_v9  ;;  %3018 = vmatmul.msk.f32.gmra.mxu3 %vm4954_vm3, %v3264_v30 }
 0x398   : > { %952 = vst.msk [vmem:[#allocation5 + $0x30] sm:$0xff] %vm4958_vm2, %v944_v51 }
 0x39a   : > { %v4118_v37 = vpop.permute.xlu1 %1264  ;;  %v4161_v14 = vpop.permute.xlu2 %1274 }
 0x39d   : > { %v935_v58 = vpop.f32.mrf.mxu1  ;;  %v1357_v27 = vpop.f32.mrf.mxu3 }
 0x39e   : > { %v945_v12 = vadd.f32 %v935_v58, %v872_v36 }
 0x3a0   : > { %953 = vst.msk [vmem:[#allocation5 + $0x38] sm:$0xff] %vm4958_vm2, %v945_v12  ;;  %v1195_v12 = vmul.f32 %v3949_v15, %v1187_v19 }
 0x3a2   : > { %v1146_v53 = vpop.permute.xlu1 %1145 }
 0x3a3   : > { %v1167_v40 = vsub.f32 %v3869_v33, %v1146_v53  ;;  %v2030_v33 = vsel %vm4954_vm3, %v4132_v48, -inf }
 0x3a5   : > { %v1179_v43 = vmul.f32 1.442695, %v1167_v40  ;;  %2028 = vmax.xlane.f32.xlu1 %v2027_v5  ;;  %v4128_v3 = vpop.f32.mrf.mxu1  ;;  %v1206_v5 = vsel %vm4954_vm3, %v4104_v57, 0.0 }
 0x3a7   : > { %3265 = vpow2.f32 %v1179_v43  ;;  %v4164_v1 = vpop.permute.xlu2 %1289 }
 0x3a8   : > { %3267 = vpow2.f32 %v1181_v41 }
 0x3ad   : > { %v3266_v23 = vpop.eup %3265  ;;  %2031 = vmax.xlane.f32.xlu1 %v2030_v33  ;;  %v1506_v55 = vpop.f32.mrf.mxu1 }
 0x3ae   : > { %3019 = vmatmul.msk.f32.gmra.mxu3 %vm4954_vm3, %v3266_v23  ;;  %v3268_v62 = vpop.eup %3267  ;;  %v4144_v46 = vmul.f32 0.35355338, %v1506_v55  ;;  %v1215_v15 = vsel %vm4954_vm3, %v3266_v23, 0.0  ;;  %v3181_v23 = vunpack.i.l.bf16 %v4073_v42 }
 0x3af   : > { %v1218_v10 = vsel %vm4954_vm3, %v3268_v62, 0.0 }
 0x3b0   : > { %v1546_v50 = vsel %vm4954_vm3, %v4144_v46, -inf }
 0x3b4   : > { %v1161_v26 = vpop.permute.xlu0 %1160 }
 0x3b5   : > { %v4137_v20 = vpop.f32.mrf.mxu1  ;;  %v1170_v40 = vsub.f32 %v3937_v17, %v1161_v26  ;;  %v4178_v17 = vmul.f32 0.35355338, %v4128_v3 }
 0x3b6   : > { %3020 = vmatmul.msk.f32.gmra.mxu3 %vm4954_vm3, %v3268_v62 }
 0x3b7   : > { %v1185_v16 = vmul.f32 1.442695, %v1170_v40  ;;  %v1543_v57 = vsel %vm4954_vm3, %v4178_v17, -inf }
 0x3ba   : > { %1210 = vadd.xlane.f32.xlu0 %v1209_v39 }
 0x3bd   : > { %v1512_v60 = vpop.f32.mrf.mxu1 }
 0x3be   : > { %v4184_v39 = vmul.f32 0.35355338, %v1512_v60 }
 0x3c2   : > { %1219 = vadd.xlane.f32.xlu0 %v1218_v10  ;;  %v1190_v10 = vld [vmem:[#allocation4 + $0x18] sm:$0xff] }
 0x3c5   : > { %v4146_v54 = vpop.f32.mrf.mxu1 }
 0x3c6   : > { %3190 = vrot.lane.b32.xlu1 %v3189_v38, %s3420_s15  ;;  %v1198_v38 = vmul.f32 %v3956_v8, %v1190_v10 }
 0x3ca   : > { %1547 = vmax.xlane.f32.xlu0 %v1546_v50  ;;  %v1552_v50 = vsel %vm4954_vm3, %v4184_v39, -inf }
 0x3cd   : > { %v1518_v25 = vpop.f32.mrf.mxu1  ;;  %v793_v32 = vpop.xlane.xlu1 %792 }
 0x3ce   : > { %v4152_v6 = vmul.f32 0.35355338, %v1518_v25  ;;  %v805_v18 = vadd.f32 %v793_v32, %v773_v11  ;;  %v4193_v11 = vmul.f32 0.35355338, %v4137_v20  ;;  %v4196_v32 = vmul.f32 0.35355338, %v4146_v54 }
 0x3d0   : > { %814 = vst.msk [vmem:[#allocation4 + $0x28] sm:$0xff] %vm808_vm4, %v805_v18  ;;  %v1558_v30 = vsel %vm4954_vm3, %v4152_v6, -inf  ;;  %v1549_v8 = vsel %vm4954_vm3, %v4193_v11, -inf  ;;  %v1555_v42 = vsel %vm4954_vm3, %v4196_v32, -inf }
 0x3d2   : > { %1559 = vmax.xlane.f32.xlu0 %v1558_v30 }
 0x3d5   : > { %v1521_v28 = vpop.f32.mrf.mxu1 }
 0x3d6   : > { %v4204_v20 = vmul.f32 0.35355338, %v1521_v28 }
 0x3d8   : > { %v1561_v54 = vsel %vm4954_vm3, %v4204_v20, -inf }
 0x3dd   : > { %v1524_v30 = vpop.f32.mrf.mxu1 }
 0x3de   : > { %v4206_v26 = vmul.f32 0.35355338, %v1524_v30 }
 0x3df   : > { %v799_v35 = vpop.xlane.xlu0 %798 }
 0x3e0   : > { %v807_v9 = vadd.f32 %v799_v35, %v775_v7  ;;  %v1564_v52 = vsel %vm4954_vm3, %v4206_v26, -inf }
 0x3e2   : > { %816 = vst.msk [vmem:[#allocation4 + $0x38] sm:$0xff] %vm808_vm4, %v807_v9 }
 0x3e5   : > { %v1156_v51 = vpop.permute.xlu1 %1155 }
 0x3e6   : > { %v1169_v36 = vsub.f32 %v3875_v44, %v1156_v51 }
 0x3e7   : > { %v4175_v4 = vpop.xlane.xlu0 %2025 }
 0x3e8   : > { %v1183_v58 = vmul.f32 1.442695, %v1169_v36  ;;  %v1189_v36 = vld [vmem:[#allocation4 + $0x10] sm:$0xff] }
 0x3e9   : > { %v1205_v53 = vpop.xlane.xlu2 %1204 }
 0x3ea   : > { %3269 = vpow2.f32 %v1183_v58  ;;  %v1227_v24 = vadd.f32 %v1205_v53, %v1195_v12  ;;  %v1197_v58 = vmul.f32 %v4027_v29, %v1189_v36  ;;  %v4266_v36 = vld [vmem:[#allocation3] sm:$0xff] }
 0x3eb   : > { %3271 = vpow2.f32 %v1185_v16 }
 0x3ec   : > { %1236 = vst.msk [vmem:[#allocation4] sm:$0xff] %vm1235_vm5, %v1227_v24  ;;  %v1192_v24 = vld [vmem:[#allocation4 + $0x28] sm:$0xff] }
 0x3ed   : > { %v1200_v16 = vmul.f32 %v4017_v34, %v1192_v24  ;;  %v4221_v29 = vpop.permute.xlu1 %1284  ;;  %v4277_v24 = vld [vmem:[#allocation3 + $0x18] sm:$0xff] }
 0x3f0   : > { %v3270_v43 = vpop.eup %3269  ;;  %1207 = vadd.xlane.f32.xlu1 %v1206_v5 }
 0x3f1   : > { %3021 = vmatmul.msk.f32.gmra.mxu3 %vm4954_vm3, %v3270_v43  ;;  %v1221_v44 = vsel %vm4954_vm3, %v3270_v43, 0.0  ;;  %v3272_v41 = vpop.eup %3271 }
 0x3f2   : > { %1222 = vadd.xlane.f32.xlu2 %v1221_v44  ;;  %v1224_v3 = vsel %vm4954_vm3, %v3272_v41, 0.0 }
 0x3f8   : > { %1216 = vadd.xlane.f32.xlu1 %v1215_v15  ;;  %v4223_v15 = vld [vmem:[#allocation3 + $0x8] sm:$0xff] }
 0x3f9   : > { %3022 = vmatmul.msk.f32.gmra.mxu3 %vm4954_vm3, %v3272_v41 }
 0x3fa   : > { %v3175_v33 = vpop.permute.xlu0 %3174  ;;  %1544 = vmax.xlane.f32.xlu2 %v1543_v57 }
 0x3fb   : > { %v3176_v55 = vunpack.i.l.bf16 %v3175_v33  ;;  %v3177_v62 = vunpack.i.h.bf16 %v3175_v33  ;;  %v4232_v33 = vld [vmem:[#allocation3 + $0x28] sm:$0xff] }
 0x3fd   : > { %1824 = vmatpush.msrb.mxu3 %v3176_v55 }
 0x3ff   : > { %1825 = vmatpush.msrb.mxu3 %v3177_v62 }
 0x400   : > { %1225 = vadd.xlane.f32.xlu1 %v1224_v3  ;;  %v4967_v3 = vld [vmem:[#allocation10_spill] sm:$0xff] }
 0x401   : > { %1826 = vmatpush.msrb.mxu3 %v3181_v23 }
 0x402   : > { %v1214_v60 = vpop.xlane.xlu2 %1213  ;;  %1553 = vmax.xlane.f32.xlu2 %v1552_v50  ;;  %v3185_v7 = vpop.permute.xlu0 %3184  ;;  %v3424_v50 = vmov 2  }
 0x403   : > { %v1230_v25 = vadd.f32 %v1214_v60, %v1198_v38  ;;  %1827 = vmatpush.msrb.mxu3 %v3182_v59  ;;  %v3186_v35 = vunpack.i.l.bf16 %v3185_v7  ;;  %v3187_v9 = vunpack.i.h.bf16 %v3185_v7  ;;  %3194 = vset.pattern.permute.xlu0 %v3424_v50 }
 0x404   : > { %3197 = vset.pattern.permute.xlu2 %v3424_v50  ;;  %3195 = vset.pattern.permute.xlu1 %v3424_v50 }
 0x405   : > { %1239 = vst.msk [vmem:[#allocation4 + $0x18] sm:$0xff] %vm1235_vm5, %v1230_v25  ;;  %2296 = vmatpush.msrb.mxu2 %v3186_v35  ;;  %v1188_v25 = vld [vmem:[#allocation4 + $0x8] sm:$0xff]  ;;  %v1191_v35 = vld [vmem:[#allocation4 + $0x20] sm:$0xff] }
 0x407   : > { %2297 = vmatpush.msrb.mxu2 %v3187_v9  ;;  %v1199_v9 = vmul.f32 %v4042_v22, %v1191_v35 }
 0x408   : > { %1550 = vmax.xlane.f32.xlu1 %v1549_v8  ;;  %v1193_v8 = vld [vmem:[#allocation4 + $0x30] sm:$0xff] }
 0x409   : > { %v1360_v18 = vpop.f32.mrf.mxu3 }
 0x40a   : > { %1391 = vrot.lane.b32.xlu0 %v1360_v18, %s3423_s28  ;;  %1556 = vmax.xlane.f32.xlu2 %v1555_v42  ;;  %v1196_v18 = vmul.f32 %v4034_v63, %v1188_v25  ;;  %v4298_v25 = vld [vmem:[#allocation3 + $0x10] sm:$0xff] }
 0x410   : > { %1562 = vmax.xlane.f32.xlu1 %v1561_v54  ;;  %v1201_v54 = vmul.f32 %v4093_v49, %v1193_v8  ;;  %v1194_v49 = vld [vmem:[#allocation4 + $0x38] sm:$0xff] }
 0x411   : > { %v1363_v51 = vpop.f32.mrf.mxu3 }
 0x412   : > { %1565 = vmax.xlane.f32.xlu2 %v1564_v52 }
 0x418   : > { %v4230_v34 = vpop.xlane.xlu1 %2028 }
 0x419   : > { %v1366_v19 = vpop.f32.mrf.mxu3 }
 0x429   : > { %1393 = vrot.lane.b32.xlu1 %v1363_v51, %s3423_s28 }
 0x42a   : > { %1389 = vrot.lane.b32.xlu2 %v1357_v27, %s3423_s28  ;;  %v2032_v27 = vpop.xlane.xlu1 %2031 }
 0x42d   : > { %v1211_v12 = vpop.xlane.xlu0 %1210 }
 0x42e   : > { %v1229_v53 = vadd.f32 %v1211_v12, %v1197_v58  ;;  %v1202_v12 = vmul.f32 %v4059_v2, %v1194_v49  ;;  %v4968_v2 = vld [vmem:[#allocation11_spill] sm:$0xff] }
 0x430   : > { %1238 = vst.msk [vmem:[#allocation4 + $0x10] sm:$0xff] %vm1235_vm5, %v1229_v53 }
 0x431   : > { %v1369_v40 = vpop.f32.mrf.mxu3 }
 0x432   : > { %1397 = vrot.lane.b32.xlu0 %v1369_v40, %s3423_s28  ;;  %1395 = vrot.lane.b32.xlu2 %v1366_v19, %s3423_s28 }
 0x435   : > { %v1220_v5 = vpop.xlane.xlu0 %1219 }
 0x436   : > { %v1232_v43 = vadd.f32 %v1220_v5, %v1200_v16 }
 0x438   : > { %1241 = vst.msk [vmem:[#allocation4 + $0x28] sm:$0xff] %vm1235_vm5, %v1232_v43  ;;  %v4259_v60 = vpop.permute.xlu1 %3190 }
 0x439   : > { %v1372_v44 = vpop.f32.mrf.mxu3 }
 0x43a   : > { %1399 = vrot.lane.b32.xlu1 %v1372_v44, %s3423_s28  ;;  %v3425_v44 = vmov 3  }
 0x43d   : > { %v1548_v41 = vpop.xlane.xlu0 %1547 }
 0x43e   : > { %v4226_v57 = vmax.f32 %v4223_v15, %v1548_v41 }
 0x440   : > { %1903 = vst.msk [vmem:[#allocation3 + $0x8] sm:$0xff] %vm1711_vm6, %v4226_v57 }
 0x445   : > { %v1560_v55 = vpop.xlane.xlu0 %1559 }
 0x446   : > { %v4235_v62 = vmax.f32 %v4232_v33, %v1560_v55  ;;  %v1245_v55 = vld [vmem:[#allocation5 + $0x8] sm:$0xff] }
 0x447   : > { %v4237_v10 = vld [vmem:[#allocation3 + $0x8] sm:$0xff] }
 0x448   : > { %1907 = vst.msk [vmem:[#allocation3 + $0x28] sm:$0xff] %vm1711_vm6, %v4235_v62  ;;  %v4243_v23 = vmax.f32 %v4237_v10, %v4967_v3 }
 0x44a   : > { %v2048_v28 = vsub.f32 %v4237_v10, %v4243_v23  ;;  %2375 = vst.msk [vmem:[#allocation3 + $0x8] sm:$0xff] %vm2183_vm7, %v4243_v23 }
 0x44f   : > { %v4249_v38 = vld [vmem:[#allocation3 + $0x28] sm:$0xff] }
 0x450   : > { %v4254_v59 = vmax.f32 %v4249_v38, %v2032_v27  ;;  %v1293_v27 = vmul.f32 %v4156_v47, %v1245_v55 }
 0x452   : > { %2379 = vst.msk [vmem:[#allocation3 + $0x28] sm:$0xff] %vm2183_vm7, %v4254_v59 }
 0x463   : > { %v1208_v42 = vpop.xlane.xlu1 %1207 }
 0x464   : > { %v1228_v30 = vadd.f32 %v1208_v42, %v1196_v18 }
 0x465   : > { %v1223_v52 = vpop.xlane.xlu2 %1222 }
 0x466   : > { %1237 = vst.msk [vmem:[#allocation4 + $0x8] sm:$0xff] %vm1235_vm5, %v1228_v30  ;;  %v1233_v7 = vadd.f32 %v1223_v52, %v1201_v54  ;;  %v4304_v52 = vld [vmem:[#allocation3 + $0x20] sm:$0xff] }
 0x468   : > { %1242 = vst.msk [vmem:[#allocation4 + $0x30] sm:$0xff] %vm1235_vm5, %v1233_v7 }
 0x46b   : > { %v1217_v51 = vpop.xlane.xlu1 %1216 }
 0x46c   : > { %v1231_v19 = vadd.f32 %v1217_v51, %v1199_v9 }
 0x46d   : > { %v1545_v58 = vpop.xlane.xlu2 %1544 }
 0x46e   : > { %1240 = vst.msk [vmem:[#allocation4 + $0x20] sm:$0xff] %vm1235_vm5, %v1231_v19  ;;  %v4270_v63 = vmax.f32 %v4266_v36, %v1545_v58  ;;  %v4326_v19 = vld [vmem:[#allocation3 + $0x30] sm:$0xff] }
 0x470   : > { %1902 = vst.msk [vmem:[#allocation3] sm:$0xff] %vm1711_vm6, %v4270_v63  ;;  %1601 = vperm.xlu0 %3194, %v4270_v63  }
 0x473   : > { %v1226_v53 = vpop.xlane.xlu1 %1225 }
 0x474   : > { %v1234_v22 = vadd.f32 %v1226_v53, %v1202_v12  ;;  %v1375_v40 = vpop.f32.mrf.mxu3  ;;  %v4332_v12 = vld [vmem:[#allocation3 + $0x38] sm:$0xff] }
 0x475   : > { %1401 = vrot.lane.b32.xlu2 %v1375_v40, %s3423_s28  ;;  %v1554_v16 = vpop.xlane.xlu2 %1553 }
 0x476   : > { %1243 = vst.msk [vmem:[#allocation4 + $0x38] sm:$0xff] %vm1235_vm5, %v1234_v22  ;;  %v4281_v5 = vmax.f32 %v4277_v24, %v1554_v16  ;;  %v4969_v16 = vld [vmem:[#allocation12_spill] sm:$0xff] }
 0x477   : > { %v4283_v43 = vld [vmem:[#allocation3] sm:$0xff] }
 0x478   : > { %1905 = vst.msk [vmem:[#allocation3 + $0x18] sm:$0xff] %vm1711_vm6, %v4281_v5  ;;  %3198 = vset.pattern.permute.xlu0 %v3425_v44  ;;  %v4290_v41 = vmax.f32 %v4283_v43, %v4968_v2 }
 0x479   : > { %2078 = vperm.xlu0 %3198, %v4243_v23  }
 0x47a   : > { %v2047_v3 = vsub.f32 %v4283_v43, %v4290_v41  ;;  %2374 = vst.msk [vmem:[#allocation3] sm:$0xff] %vm2183_vm7, %v4290_v41 }
 0x47b   : > { %v1551_v8 = vpop.xlane.xlu1 %1550 }
 0x47c   : > { %v4301_v18 = vmax.f32 %v4298_v25, %v1551_v8  ;;  %v1392_v42 = vpop.permute.xlu0 %1391  ;;  %v1378_v30 = vpop.f32.mrf.mxu3 }
 0x47d   : > { %v1414_v54 = vadd.f32 %v1392_v42, %v1293_v27  ;;  %1403 = vrot.lane.b32.xlu1 %v1378_v30, %s3423_s28  ;;  %v1557_v7 = vpop.xlane.xlu2 %1556  ;;  %v3192_v42 = vunpack.i.l.bf16 %v4259_v60 }
 0x47e   : > { %1904 = vst.msk [vmem:[#allocation3 + $0x10] sm:$0xff] %vm1711_vm6, %v4301_v18  ;;  %v4309_v47 = vmax.f32 %v4304_v52, %v1557_v7  ;;  %1611 = vperm.xlu2 %3197, %v4301_v18   ;;  %v3193_v7 = vunpack.i.h.bf16 %v4259_v60  ;;  %v1247_v60 = vld [vmem:[#allocation5 + $0x18] sm:$0xff] }
 0x47f   : > { %1423 = vst.msk [vmem:[#allocation5 + $0x8] sm:$0xff] %vm4957_vm8, %v1414_v54  ;;  %v4313_v35 = vld [vmem:[#allocation3 + $0x18] sm:$0xff]  ;;  %v1244_v54 = vld [vmem:[#allocation5] sm:$0xff]  ;;  %2298 = vmatpush.msrb.mxu2 %v3192_v42  ;;  %v1575_v42 = vsub.f32 %v4266_v36, %v4270_v63  ;;  %v1577_v36 = vsub.f32 %v4298_v25, %v4301_v18 }
 0x480   : > { %1906 = vst.msk [vmem:[#allocation3 + $0x20] sm:$0xff] %vm1711_vm6, %v4309_v47  ;;  %v4319_v9 = vmax.f32 %v4313_v35, %v4175_v4  ;;  %v1248_v25 = vld [vmem:[#allocation5 + $0x20] sm:$0xff] }
 0x481   : > { %3200 = vset.pattern.permute.xlu0 %v3424_v50  ;;  %2299 = vmatpush.msrb.mxu2 %v3193_v7  ;;  %v1583_v7 = vmul.f32 1.442695, %v1575_v42 }
 0x482   : > { %v2050_v51 = vsub.f32 %v4313_v35, %v4319_v9  ;;  %2377 = vst.msk [vmem:[#allocation3 + $0x18] sm:$0xff] %vm2183_vm7, %v4319_v9 }
 0x483   : > { %v1563_v58 = vpop.xlane.xlu1 %1562  ;;  %3273 = vpow2.f32 %v1583_v7 }
 0x484   : > { %v4329_v49 = vmax.f32 %v4326_v19, %v1563_v58  ;;  %v1292_v58 = vmul.f32 %v4079_v13, %v1244_v54  ;;  %v1295_v54 = vmul.f32 %v4091_v45, %v1247_v60  ;;  %v1587_v60 = vmul.f32 1.442695, %v1577_v36 }
 0x485   : > { %1606 = vperm.xlu1 %3195, %v4226_v57   ;;  %v1566_v4 = vpop.xlane.xlu2 %1565  ;;  %v4334_v53 = vld [vmem:[#allocation3 + $0x10] sm:$0xff] }
 0x486   : > { %1908 = vst.msk [vmem:[#allocation3 + $0x30] sm:$0xff] %vm1711_vm6, %v4329_v49  ;;  %v4341_v40 = vmax.f32 %v4332_v12, %v1566_v4  ;;  %1616 = vperm.xlu2 %3197, %v4281_v5   ;;  %v4346_v2 = vmax.f32 %v4334_v53, %v4969_v16  ;;  %3275 = vpow2.f32 %v1587_v60 }
 0x487   : > { %v4348_v55 = vld [vmem:[#allocation3 + $0x20] sm:$0xff] }
 0x488   : > { %v1582_v27 = vsub.f32 %v4332_v12, %v4341_v40  ;;  %1909 = vst.msk [vmem:[#allocation3 + $0x38] sm:$0xff] %vm1711_vm6, %v4341_v40  ;;  %1636 = vperm.xlu0 %3200, %v4341_v40   ;;  %v4357_v8 = vmax.f32 %v4348_v55, %v4230_v34  ;;  %v1251_v12 = vld [vmem:[#allocation5 + $0x38] sm:$0xff] }
 0x489   : > { %2376 = vst.msk [vmem:[#allocation3 + $0x10] sm:$0xff] %vm2183_vm7, %v4346_v2  ;;  %v4394_v42 = vpop.eup %3273 }
 0x48a   : > { %v2051_v30 = vsub.f32 %v4348_v55, %v4357_v8  ;;  %2378 = vst.msk [vmem:[#allocation3 + $0x20] sm:$0xff] %vm2183_vm7, %v4357_v8  ;;  %v2052_v55 = vsub.f32 %v4249_v38, %v4254_v59  ;;  %v1597_v38 = vmul.f32 1.442695, %v1582_v27  ;;  %v1299_v27 = vmul.f32 %v4164_v1, %v1251_v12  ;;  %v4972_v12 = vld [vmem:[#allocation9_spill] sm:$0xff] }
 0x48d   : > { %3196 = vset.pattern.permute.xlu1 %v3425_v44  ;;  %v1390_v34 = vpop.permute.xlu2 %1389  ;;  %v4369_v4 = vld [vmem:[#allocation3 + $0x30] sm:$0xff] }
 0x48e   : > { %v1413_v16 = vadd.f32 %v1390_v34, %v1292_v58  ;;  %2073 = vperm.xlu1 %3196, %v4290_v41   ;;  %1626 = vperm.xlu2 %3197, %v4235_v62   ;;  %v4375_v22 = vmax.f32 %v4369_v4, %v4084_v21  ;;  %v1246_v21 = vld [vmem:[#allocation5 + $0x10] sm:$0xff]  ;;  %v2063_v41 = vmul.f32 1.442695, %v2051_v30 }
 0x48f   : > { %v1294_v45 = vmul.f32 %v4118_v37, %v1246_v21  ;;  %v1296_v37 = vmul.f32 %v4161_v14, %v1248_v25  ;;  %v1249_v21 = vld [vmem:[#allocation5 + $0x28] sm:$0xff]  ;;  %v1576_v25 = vsub.f32 %v4223_v15, %v4226_v57  ;;  %v2049_v15 = vsub.f32 %v4334_v53, %v4346_v2 }
 0x490   : > { %1422 = vst.msk [vmem:[#allocation5] sm:$0xff] %vm4957_vm8, %v1413_v16  ;;  %v2053_v13 = vsub.f32 %v4369_v4, %v4375_v22  ;;  %v1297_v14 = vmul.f32 %v4154_v31, %v1249_v21  ;;  %v2057_v57 = vmul.f32 1.442695, %v2048_v28  ;;  %v2061_v28 = vmul.f32 1.442695, %v2050_v51 }
 0x491   : > { %2380 = vst.msk [vmem:[#allocation3 + $0x30] sm:$0xff] %vm2183_vm7, %v4375_v22 }
 0x495   : > { %v1396_v58 = vpop.permute.xlu2 %1395 }
 0x496   : > { %v1416_v34 = vadd.f32 %v1396_v58, %v1295_v54  ;;  %3199 = vset.pattern.permute.xlu1 %v3424_v50  ;;  %3202 = vset.pattern.permute.xlu2 %v3425_v44  ;;  %v1578_v54 = vsub.f32 %v4277_v24, %v4281_v5  ;;  %v1579_v24 = vsub.f32 %v4304_v52, %v4309_v47  ;;  %v1996_v5 = vpop.f32.mrf.mxu0 }
 0x497   : > { %1621 = vperm.xlu1 %3199, %v4309_v47   ;;  %2098 = vperm.xlu2 %3202, %v4254_v59  }
 0x498   : > { %1425 = vst.msk [vmem:[#allocation5 + $0x18] sm:$0xff] %vm4957_vm8, %v1416_v34  ;;  %v1589_v7 = vmul.f32 1.442695, %v1578_v54  ;;  %v4402_v34 = vpop.eup %3275  ;;  %v1580_v54 = vsub.f32 %v4232_v33, %v4235_v62  ;;  %v2055_v33 = vmul.f32 1.442695, %v2047_v3  ;;  %v1250_v3 = vld [vmem:[#allocation5 + $0x30] sm:$0xff] }
 0x499   : > { %v1298_v23 = vmul.f32 %v4221_v29, %v1250_v3  ;;  %v2067_v29 = vmul.f32 1.442695, %v2053_v13 }
 0x49a   : > { %3277 = vpow2.f32 %v1589_v7  ;;  %v1593_v52 = vmul.f32 1.442695, %v1580_v54  ;;  %v2059_v7 = vmul.f32 1.442695, %v2049_v15 }
 0x49b   : > { %v1394_v63 = vpop.permute.xlu1 %1393 }
 0x49c   : > { %v1415_v16 = vadd.f32 %v1394_v63, %v1294_v45  ;;  %v4411_v45 = vmul.f32 0.35355338, %v1996_v5  ;;  %v1591_v63 = vmul.f32 1.442695, %v1579_v24 }
 0x49e   : > { %1424 = vst.msk [vmem:[#allocation5 + $0x10] sm:$0xff] %vm4957_vm8, %v1415_v16  ;;  %3279 = vpow2.f32 %v1591_v63  ;;  %v2036_v31 = vsel %vm4954_vm3, %v4411_v45, -inf }
 0x49f   : > { %3203 = vset.pattern.permute.xlu2 %v3424_v50  ;;  %1631 = vperm.xlu1 %3199, %v4329_v49   ;;  %3281 = vpow2.f32 %v1593_v52 }
 0x4a0   : > { %1730 = vperm.xlu2 %3203, %v4394_v42   ;;  %v4413_v60 = vpop.eup %3277 }
 0x4a4   : > { %v1398_v18 = vpop.permute.xlu0 %1397  ;;  %v4422_v47 = vpop.eup %3279 }
 0x4a5   : > { %v1417_v58 = vadd.f32 %v1398_v18, %v1296_v37  ;;  %v1585_v37 = vmul.f32 1.442695, %v1576_v25  ;;  %v4431_v62 = vpop.eup %3281 }
 0x4a7   : > { %1426 = vst.msk [vmem:[#allocation5 + $0x20] sm:$0xff] %vm4957_vm8, %v1417_v58  ;;  %3201 = vset.pattern.permute.xlu1 %v3425_v44  ;;  %3283 = vpow2.f32 %v1585_v37 }
 0x4a8   : > { %1740 = vperm.xlu2 %3203, %v4402_v34   ;;  %2083 = vperm.xlu1 %3201, %v4346_v2   ;;  %3285 = vpow2.f32 %v2055_v33  ;;  %v4971_v33 = vld [vmem:[#allocation7_spill] sm:$0xff] }
 0x4a9   : > { %3287 = vpow2.f32 %v2057_v57 }
 0x4aa   : > { %3289 = vpow2.f32 %v2059_v7 }
 0x4ab   : > { %3291 = vpow2.f32 %v2063_v41 }
 0x4ac   : > { %v1400_v36 = vpop.permute.xlu1 %1399  ;;  %3293 = vpow2.f32 %v2061_v28 }
 0x4ad   : > { %v1418_v16 = vadd.f32 %v1400_v36, %v1297_v14  ;;  %v4440_v18 = vpop.eup %3283  ;;  %3295 = vpow2.f32 %v2067_v29  ;;  %v4970_v14 = vld [vmem:[#allocation8_spill] sm:$0xff] }
 0x4ae   : > { %v4443_v43 = vpop.eup %3285 }
 0x4af   : > { %1427 = vst.msk [vmem:[#allocation5 + $0x28] sm:$0xff] %vm4957_vm8, %v1418_v16  ;;  %v4450_v10 = vpop.eup %3287 }
 0x4b0   : > { %1745 = vperm.xlu2 %3203, %v4413_v60   ;;  %2088 = vperm.xlu1 %3201, %v4319_v9   ;;  %v4458_v2 = vpop.eup %3289  ;;  %v2065_v9 = vmul.f32 1.442695, %v2052_v55 }
 0x4b1   : > { %v4467_v35 = vpop.eup %3291 }
 0x4b2   : > { %2037 = vmax.xlane.f32.xlu0 %v2036_v31  ;;  %v4470_v51 = vpop.eup %3293  ;;  %3297 = vpow2.f32 %v2065_v9 }
 0x4b3   : > { %3299 = vpow2.f32 %v1597_v38 }
 0x4b8   : > { %1750 = vperm.xlu2 %3203, %v4422_v47   ;;  %2093 = vperm.xlu1 %3201, %v4357_v8   ;;  %v4473_v8 = vpop.eup %3295 }
 0x4b9   : > { %v4479_v59 = vpop.eup %3297 }
 0x4ba   : > { %v4483_v13 = vpop.eup %3299 }
 0x4c0   : > { %1755 = vperm.xlu2 %3203, %v4431_v62   ;;  %2103 = vperm.xlu1 %3201, %v4375_v22  }
 0x4c6   : > { %1735 = vperm.xlu0 %3200, %v4440_v18  }
 0x4c8   : > { %3205 = vset.pattern.permute.xlu2 %v3425_v44 }
 0x4c9   : > { %2202 = vperm.xlu2 %3205, %v4443_v43  }
 0x4ce   : > { %3206 = vset.pattern.permute.xlu0 %v3425_v44 }
 0x4cf   : > { %2207 = vperm.xlu0 %3206, %v4450_v10   ;;  %v1402_v53 = vpop.permute.xlu2 %1401 }
 0x4d0   : > { %v1419_v58 = vadd.f32 %v1402_v53, %v1298_v23 }
 0x4d1   : > { %2212 = vperm.xlu2 %3205, %v4458_v2  }
 0x4d2   : > { %1428 = vst.msk [vmem:[#allocation5 + $0x30] sm:$0xff] %vm4957_vm8, %v1419_v58 }
 0x4d7   : > { %2222 = vperm.xlu0 %3206, %v4467_v35  }
 0x4d8   : > { %v1612_v5 = vpop.permute.xlu2 %1611 }
 0x4d9   : > { %2217 = vperm.xlu2 %3205, %v4470_v51   ;;  %v1641_v1 = vsub.f32 %v4193_v11, %v1612_v5 }
 0x4db   : > { %v1651_v52 = vmul.f32 1.442695, %v1641_v1  ;;  %v4973_v1 = vsub.f32 %v4326_v19, %v4329_v49 }
 0x4df   : > { %2232 = vperm.xlu0 %3206, %v4473_v8  }
 0x4e0   : > { %v1617_v37 = vpop.permute.xlu2 %1616 }
 0x4e1   : > { %2227 = vperm.xlu2 %3205, %v4479_v59  }
 0x4e2   : > { %v1602_v22 = vpop.permute.xlu0 %1601 }
 0x4e3   : > { %v1639_v30 = vsub.f32 %v4178_v17, %v1602_v22 }
 0x4e5   : > { %v1647_v4 = vmul.f32 1.442695, %v1639_v30 }
 0x4e7   : > { %3301 = vpow2.f32 %v1647_v4 }
 0x4e8   : > { %v1627_v58 = vpop.permute.xlu2 %1626 }
 0x4e9   : > { %3207 = vset.pattern.permute.xlu2 %v3424_v50  ;;  %v1644_v38 = vsub.f32 %v4152_v6, %v1627_v58 }
 0x4ea   : > { %1765 = vperm.xlu2 %3207, %v4483_v13  }
 0x4eb   : > { %v2079_v17 = vpop.permute.xlu0 %2078 }
 0x4ec   : > { %v2112_v36 = vsub.f32 %v4970_v14, %v2079_v17 }
 0x4ed   : > { %v4487_v40 = vpop.eup %3301 }
 0x4ee   : > { %3035 = vmatmul.msk.f32.vlgmr.msrb.gmra.mxu3 %vm4954_vm3, %v4487_v40  ;;  %v2121_v31 = vmul.f32 1.442695, %v2112_v36 }
 0x4ef   : > { %v1404_v21 = vpop.permute.xlu1 %1403 }
 0x4f0   : > { %v1420_v24 = vadd.f32 %v1404_v21, %v1299_v27 }
 0x4f2   : > { %1429 = vst.msk [vmem:[#allocation5 + $0x38] sm:$0xff] %vm4957_vm8, %v1420_v24  ;;  %3208 = vset.pattern.permute.xlu2 %v3425_v44 }
 0x4f7   : > { %v1607_v63 = vpop.permute.xlu1 %1606 }
 0x4f8   : > { %v1640_v16 = vsub.f32 %v4144_v46, %v1607_v63  ;;  %v1642_v46 = vsub.f32 %v4184_v39, %v1617_v37 }
 0x4fa   : > { %v1649_v54 = vmul.f32 1.442695, %v1640_v16  ;;  %v1653_v41 = vmul.f32 1.442695, %v1642_v46  ;;  %v1637_v21 = vpop.permute.xlu0 %1636 }
 0x4fb   : > { %v1646_v14 = vsub.f32 %v4206_v26, %v1637_v21 }
 0x4fc   : > { %3303 = vpow2.f32 %v1649_v54 }
 0x4fd   : > { %3305 = vpow2.f32 %v2121_v31  ;;  %v2014_v31 = vld [vmem:[#allocation3 + $0x38] sm:$0xff]  ;;  %v1661_v37 = vmul.f32 1.442695, %v1646_v14 }
 0x4fe   : > { %3307 = vpow2.f32 %v1651_v52  ;;  %v1595_v52 = vmul.f32 1.442695, %v4973_v1  ;;  %v1669_v1 = vld [vmem:[#allocation4 + $0x30] sm:$0xff] }
 0x500   : > { %v2074_v25 = vpop.permute.xlu1 %2073 }
 0x501   : > { %v2111_v15 = vsub.f32 %v4971_v33, %v2074_v25 }
 0x502   : > { %v4498_v57 = vpop.eup %3303 }
 0x503   : > { %v2119_v44 = vmul.f32 1.442695, %v2111_v15  ;;  %3036 = vmatmul.msk.f32.gmra.mxu3 %vm4954_vm3, %v4498_v57  ;;  %v3306_v7 = vpop.eup %3305 }
 0x504   : > { %v2154_v11 = vsel %vm4954_vm3, %v3306_v7, 0.0  ;;  %v4504_v23 = vpop.eup %3307 }
 0x505   : > { %3309 = vpow2.f32 %v2119_v44  ;;  %v2099_v44 = vpop.permute.xlu2 %2098 }
 0x506   : > { %3311 = vpow2.f32 %v1653_v41  ;;  %v2116_v46 = vsub.f32 %v4132_v48, %v2099_v44 }
 0x509   : > { %2155 = vadd.xlane.f32.xlu0 %v2154_v11  ;;  %v1622_v3 = vpop.permute.xlu1 %1621 }
 0x50a   : > { %v1643_v53 = vsub.f32 %v4196_v32, %v1622_v3  ;;  %v1657_v32 = vmul.f32 1.442695, %v1644_v38  ;;  %v2129_v3 = vmul.f32 1.442695, %v2116_v46  ;;  %v1685_v38 = vsel %vm4954_vm3, %v4504_v23, 0.0 }
 0x50b   : > { %v4506_v28 = vpop.eup %3309  ;;  %3037 = vmatmul.msk.f32.gmra.mxu3 %vm4954_vm3, %v4504_v23 }
 0x50c   : > { %3055 = vmatmul.msk.f32.vlgmr.msrb.gmra.mxu2 %vm4954_vm3, %v4506_v28  ;;  %v1655_v39 = vmul.f32 1.442695, %v1643_v53  ;;  %v4513_v29 = vpop.eup %3311 }
 0x50e   : > { %3313 = vpow2.f32 %v1655_v39 }
 0x511   : > { %v1632_v55 = vpop.permute.xlu1 %1631 }
 0x512   : > { %v1645_v9 = vsub.f32 %v4204_v20, %v1632_v55  ;;  %v2151_v55 = vsel %vm4954_vm3, %v4506_v28, 0.0  ;;  %v1688_v28 = vsel %vm4954_vm3, %v4513_v29, 0.0 }
 0x513   : > { %3038 = vmatmul.msk.f32.gmra.mxu3 %vm4954_vm3, %v4513_v29 }
 0x514   : > { %v1659_v22 = vmul.f32 1.442695, %v1645_v9  ;;  %3056 = vmatmul.msk.f32.gmra.mxu2 %vm4954_vm3, %v3306_v7  ;;  %v4520_v30 = vpop.eup %3313  ;;  %v1679_v9 = vsel %vm4954_vm3, %v4487_v40, 0.0 }
 0x516   : > { %3315 = vpow2.f32 %v1659_v22  ;;  %v1682_v22 = vsel %vm4954_vm3, %v4498_v57, 0.0  ;;  %v1691_v57 = vsel %vm4954_vm3, %v4520_v30, 0.0 }
 0x517   : > { %3317 = vpow2.f32 %v1657_v32  ;;  %v4560_v32 = vpop.permute.xlu2 %1730 }
 0x51a   : > { %v2084_v4 = vpop.permute.xlu1 %2083 }
 0x51b   : > { %v2113_v27 = vsub.f32 %v4972_v12, %v2084_v4  ;;  %3039 = vmatmul.msk.f32.gmra.mxu3 %vm4954_vm3, %v4520_v30 }
 0x51c   : > { %v3316_v20 = vpop.eup %3315 }
 0x51d   : > { %v2123_v24 = vmul.f32 1.442695, %v2113_v27  ;;  %v1697_v6 = vsel %vm4954_vm3, %v3316_v20, 0.0  ;;  %v4526_v17 = vpop.eup %3317 }
 0x51e   : > { %1698 = vadd.xlane.f32.xlu0 %v1697_v6 }
 0x51f   : > { %3319 = vpow2.f32 %v2123_v24  ;;  %v4567_v12 = vpop.permute.xlu2 %1740  ;;  %v1694_v24 = vsel %vm4954_vm3, %v4526_v17, 0.0 }
 0x522   : > { %v2089_v5 = vpop.permute.xlu1 %2088 }
 0x523   : > { %v2114_v36 = vsub.f32 %v4082_v0, %v2089_v5  ;;  %3040 = vmatmul.msk.f32.gmra.mxu3 %vm4954_vm3, %v4526_v17 }
 0x525   : > { %v3320_v63 = vpop.eup %3319  ;;  %v2125_v16 = vmul.f32 1.442695, %v2114_v36  ;;  %v2038_v54 = vpop.xlane.xlu0 %2037 }
 0x526   : > { %v2046_v25 = vmax.f32 %v2014_v31, %v2038_v54  ;;  %3057 = vmatmul.msk.f32.gmra.mxu2 %vm4954_vm3, %v3320_v63  ;;  %v2157_v4 = vsel %vm4954_vm3, %v3320_v63, 0.0 }
 0x527   : > { %3321 = vpow2.f32 %v2125_v16  ;;  %v4575_v21 = vpop.permute.xlu2 %1745 }
 0x528   : > { %v2054_v33 = vsub.f32 %v2014_v31, %v2046_v25  ;;  %2381 = vst.msk [vmem:[#allocation3 + $0x38] sm:$0xff] %vm2183_vm7, %v2046_v25  ;;  %2108 = vperm.xlu1 %3201, %v2046_v25   ;;  %3323 = vpow2.f32 %v1595_v52 }
 0x529   : > { %3325 = vpow2.f32 %v1661_v37 }
 0x52a   : > { %v2069_v0 = vmul.f32 1.442695, %v2054_v33  ;;  %v2094_v26 = vpop.permute.xlu1 %2093 }
 0x52b   : > { %v2115_v15 = vsub.f32 %v4122_v56, %v2094_v26  ;;  %3041 = vmatmul.msk.f32.gmra.mxu3 %vm4954_vm3, %v3316_v20 }
 0x52c   : > { %3327 = vpow2.f32 %v2069_v0 }
 0x52d   : > { %v3322_v19 = vpop.eup %3321  ;;  %v2127_v49 = vmul.f32 1.442695, %v2115_v15 }
 0x52e   : > { %3058 = vmatmul.msk.f32.gmra.mxu2 %vm4954_vm3, %v3322_v19  ;;  %v3324_v7 = vpop.eup %3323  ;;  %v2160_v27 = vsel %vm4954_vm3, %v3322_v19, 0.0 }
 0x52f   : > { %3329 = vpow2.f32 %v2127_v49  ;;  %v3326_v41 = vpop.eup %3325  ;;  %v4583_v30 = vpop.permute.xlu2 %1750  ;;  %v1677_v17 = vmul.f32 %v3324_v7, %v1669_v1 }
 0x530   : > { %3204 = vset.pattern.permute.xlu1 %v3424_v50  ;;  %3331 = vpow2.f32 %v2129_v3  ;;  %v1700_v63 = vsel %vm4954_vm3, %v3326_v41, 0.0 }
 0x531   : > { %1760 = vperm.xlu1 %3204, %v3324_v7  }
 0x532   : > { %v4542_v11 = vpop.eup %3327  ;;  %v2104_v56 = vpop.permute.xlu1 %2103 }
 0x533   : > { %2237 = vperm.xlu2 %3208, %v4542_v11   ;;  %3042 = vmatmul.msk.f32.gmra.mxu3 %vm4954_vm3, %v3326_v41  ;;  %v2117_v48 = vsub.f32 %v3986_v61, %v2104_v56 }
 0x535   : > { %v3330_v53 = vpop.eup %3329  ;;  %v2131_v39 = vmul.f32 1.442695, %v2117_v48 }
 0x536   : > { %3059 = vmatmul.msk.f32.gmra.mxu2 %vm4954_vm3, %v3330_v53  ;;  %v3332_v58 = vpop.eup %3331  ;;  %v2163_v29 = vsel %vm4954_vm3, %v3330_v53, 0.0 }
 0x537   : > { %3333 = vpow2.f32 %v2131_v39  ;;  %v2166_v5 = vsel %vm4954_vm3, %v3332_v58, 0.0  ;;  %v4588_v16 = vpop.permute.xlu2 %1755 }
 0x538   : > { %v4556_v61 = vpop.permute.xlu0 %1735 }
 0x53d   : > { %v3334_v50 = vpop.eup %3333 }
 0x53e   : > { %3060 = vmatmul.msk.f32.gmra.mxu2 %vm4954_vm3, %v3332_v58  ;;  %v2169_v37 = vsel %vm4954_vm3, %v3334_v50, 0.0 }
 0x53f   : > { %v4594_v0 = vpop.permute.xlu2 %2202 }
 0x541   : > { %v4565_v40 = vpop.permute.xlu0 %2207 }
 0x546   : > { %3061 = vmatmul.msk.f32.gmra.mxu2 %vm4954_vm3, %v3334_v50 }
 0x547   : > { %v4600_v49 = vpop.permute.xlu2 %2212 }
 0x549   : > { %v4573_v20 = vpop.permute.xlu0 %2222 }
 0x54f   : > { %v4604_v53 = vpop.permute.xlu2 %2217 }
 0x551   : > { %v4580_v6 = vpop.permute.xlu0 %2232 }
 0x557   : > { %v4608_v39 = vpop.permute.xlu2 %2227 }
 0x55b   : > { %2152 = vadd.xlane.f32.xlu1 %v2151_v55 }
 0x55c   : > { %1680 = vadd.xlane.f32.xlu2 %v1679_v9 }
 0x55f   : > { %v4612_v55 = vpop.permute.xlu2 %1765 }
 0x563   : > { %1686 = vadd.xlane.f32.xlu1 %v1685_v38 }
 0x564   : > { %1683 = vadd.xlane.f32.xlu2 %v1682_v22 }
 0x56b   : > { %2158 = vadd.xlane.f32.xlu1 %v2157_v4 }
 0x56c   : > { %1689 = vadd.xlane.f32.xlu2 %v1688_v28  ;;  %v1663_v28 = vld [vmem:[#allocation4] sm:$0xff] }
 0x571   : > { %v1829_v23 = vpop.f32.mrf.mxu3 }
 0x572   : > { %1861 = vrot.lane.b32.xlu0 %v1829_v23, %s3426_s16 }
 0x573   : > { %1692 = vadd.xlane.f32.xlu1 %v1691_v57  ;;  %v1671_v57 = vmul.f32 %v4394_v42, %v1663_v28 }
 0x574   : > { %2161 = vadd.xlane.f32.xlu2 %v2160_v27 }
 0x57b   : > { %2164 = vadd.xlane.f32.xlu1 %v2163_v29 }
 0x57c   : > { %1695 = vadd.xlane.f32.xlu2 %v1694_v24  ;;  %v4585_v36 = vpop.xlane.xlu0 %2155  ;;  %v1664_v24 = vld [vmem:[#allocation4 + $0x8] sm:$0xff] }
 0x583   : > { %2167 = vadd.xlane.f32.xlu1 %v2166_v5  ;;  %v1665_v5 = vld [vmem:[#allocation4 + $0x10] sm:$0xff] }
 0x586   : > { %v1832_v14 = vpop.f32.mrf.mxu3 }
 0x58b   : > { %1701 = vadd.xlane.f32.xlu1 %v1700_v63 }
 0x58d   : > { %v4618_v22 = vpop.permute.xlu2 %2237 }
 0x58e   : > { %v1835_v54 = vpop.f32.mrf.mxu3 }
 0x58f   : > { %v2301_v31 = vpop.f32.mrf.mxu2 }
 0x590   : > { %2333 = vrot.lane.b32.xlu0 %v2301_v31, %s3427_s14 }
 0x591   : > { %v1699_v52 = vpop.xlane.xlu0 %1698 }
 0x592   : > { %v1709_v25 = vadd.f32 %v1699_v52, %v1677_v17 }
 0x593   : > { %2170 = vadd.xlane.f32.xlu1 %v2169_v37  ;;  %v1666_v37 = vld [vmem:[#allocation4 + $0x18] sm:$0xff] }
 0x594   : > { %1718 = vst.msk [vmem:[#allocation4 + $0x30] sm:$0xff] %vm1711_vm6, %v1709_v25  ;;  %1863 = vrot.lane.b32.xlu2 %v1832_v14, %s3426_s16  ;;  %v1673_v14 = vmul.f32 %v4402_v34, %v1665_v5  ;;  %v1674_v34 = vmul.f32 %v4413_v60, %v1666_v37 }
 0x596   : > { %v1838_v33 = vpop.f32.mrf.mxu3 }
 0x597   : > { %v2304_v46 = vpop.f32.mrf.mxu2 }
 0x598   : > { %1865 = vrot.lane.b32.xlu0 %v1835_v54, %s3426_s16  ;;  %v1672_v54 = vmul.f32 %v4440_v18, %v1664_v24  ;;  %v1721_v24 = vld [vmem:[#allocation5 + $0x8] sm:$0xff] }
 0x59a   : > { %v2109_v26 = vpop.permute.xlu1 %2108 }
 0x59b   : > { %v2118_v15 = vsub.f32 %v4411_v45, %v2109_v26 }
 0x59c   : > { %1867 = vrot.lane.b32.xlu2 %v1838_v33, %s3426_s16 }
 0x59d   : > { %v2133_v44 = vmul.f32 1.442695, %v2118_v15 }
 0x59e   : > { %v1841_v19 = vpop.f32.mrf.mxu3 }
 0x59f   : > { %3335 = vpow2.f32 %v2133_v44 }
 0x5a0   : > { %1869 = vrot.lane.b32.xlu0 %v1841_v19, %s3426_s16 }
 0x5a3   : > { %v4616_v38 = vpop.permute.xlu1 %1760 }
 0x5a5   : > { %v3336_v7 = vpop.eup %3335 }
 0x5a6   : > { %v1844_v41 = vpop.f32.mrf.mxu3  ;;  %3062 = vmatmul.msk.f32.gmra.mxu2 %vm4954_vm3, %v3336_v7  ;;  %v2172_v3 = vsel %vm4954_vm3, %v3336_v7, 0.0 }
 0x5a7   : > { %2173 = vadd.xlane.f32.xlu1 %v2172_v3 }
 0x5a9   : > { %v2307_v56 = vpop.f32.mrf.mxu2 }
 0x5ae   : > { %v1847_v45 = vpop.f32.mrf.mxu3 }
 0x5af   : > { %1873 = vrot.lane.b32.xlu2 %v1847_v45, %s3426_s16  ;;  %v1667_v45 = vld [vmem:[#allocation4 + $0x20] sm:$0xff] }
 0x5b1   : > { %v2310_v48 = vpop.f32.mrf.mxu2 }
 0x5b2   : > { %2339 = vrot.lane.b32.xlu0 %v2310_v48, %s3427_s14  ;;  %v1675_v48 = vmul.f32 %v4422_v47, %v1667_v45 }
 0x5b6   : > { %v1850_v58 = vpop.f32.mrf.mxu3 }
 0x5b7   : > { %2337 = vrot.lane.b32.xlu2 %v2307_v56, %s3427_s14 }
 0x5b9   : > { %v2313_v50 = vpop.f32.mrf.mxu2 }
 0x5ba   : > { %1875 = vrot.lane.b32.xlu0 %v1850_v58, %s3426_s16 }
 0x5c0   : > { %1871 = vrot.lane.b32.xlu1 %v1844_v41, %s3426_s16 }
 0x5c1   : > { %v2316_v9 = vpop.f32.mrf.mxu2 }
 0x5c2   : > { %2341 = vrot.lane.b32.xlu0 %v2313_v50, %s3427_s14 }
 0x5c8   : > { %2335 = vrot.lane.b32.xlu1 %v2304_v46, %s3427_s14  ;;  %v1720_v46 = vld [vmem:[#allocation5] sm:$0xff] }
 0x5c9   : > { %v2319_v4 = vpop.f32.mrf.mxu2 }
 0x5ca   : > { %2345 = vrot.lane.b32.xlu2 %v2319_v4, %s3427_s14 }
 0x5ce   : > { %v2153_v23 = vpop.xlane.xlu1 %2152 }
 0x5cf   : > { %v1681_v27 = vpop.xlane.xlu2 %1680 }
 0x5d0   : > { %v1703_v29 = vadd.f32 %v1681_v27, %v1671_v57  ;;  %2343 = vrot.lane.b32.xlu1 %v2316_v9, %s3427_s14  ;;  %v1668_v9 = vld [vmem:[#allocation4 + $0x28] sm:$0xff] }
 0x5d1   : > { %v1676_v28 = vmul.f32 %v4431_v62, %v1668_v9 }
 0x5d2   : > { %1712 = vst.msk [vmem:[#allocation4] sm:$0xff] %vm1711_vm6, %v1703_v29 }
 0x5d6   : > { %v1687_v63 = vpop.xlane.xlu1 %1686 }
 0x5d7   : > { %v1705_v31 = vadd.f32 %v1687_v63, %v1673_v14  ;;  %v1684_v1 = vpop.xlane.xlu2 %1683 }
 0x5d8   : > { %v1704_v17 = vadd.f32 %v1684_v1, %v1672_v54  ;;  %v1670_v1 = vld [vmem:[#allocation4 + $0x38] sm:$0xff] }
 0x5d9   : > { %v2135_v52 = vld [vmem:[#allocation4] sm:$0xff]  ;;  %1714 = vst.msk [vmem:[#allocation4 + $0x10] sm:$0xff] %vm1711_vm6, %v1705_v31 }
 0x5da   : > { %v2143_v42 = vmul.f32 %v4443_v43, %v2135_v52  ;;  %1713 = vst.msk [vmem:[#allocation4 + $0x8] sm:$0xff] %vm1711_vm6, %v1704_v17  ;;  %v1768_v43 = vmul.f32 %v4560_v32, %v1720_v46  ;;  %v1723_v17 = vld [vmem:[#allocation5 + $0x18] sm:$0xff] }
 0x5db   : > { %v1771_v52 = vmul.f32 %v4575_v21, %v1723_v17 }
 0x5dc   : > { %v2175_v25 = vadd.f32 %v2153_v23, %v2143_v42 }
 0x5de   : > { %2184 = vst.msk [vmem:[#allocation4] sm:$0xff] %vm2183_vm7, %v2175_v25  ;;  %v2159_v33 = vpop.xlane.xlu1 %2158 }
 0x5df   : > { %v1690_v26 = vpop.xlane.xlu2 %1689 }
 0x5e0   : > { %v2137_v15 = vld [vmem:[#allocation4 + $0x10] sm:$0xff]  ;;  %v1706_v18 = vadd.f32 %v1690_v26, %v1674_v34 }
 0x5e1   : > { %v2136_v44 = vld [vmem:[#allocation4 + $0x8] sm:$0xff]  ;;  %v2145_v19 = vmul.f32 %v4458_v2, %v2137_v15  ;;  %v2141_v26 = vld [vmem:[#allocation4 + $0x30] sm:$0xff] }
 0x5e2   : > { %v2144_v7 = vmul.f32 %v4450_v10, %v2136_v44  ;;  %1715 = vst.msk [vmem:[#allocation4 + $0x18] sm:$0xff] %vm1711_vm6, %v1706_v18  ;;  %v1726_v18 = vld [vmem:[#allocation5 + $0x30] sm:$0xff] }
 0x5e3   : > { %v2177_v41 = vadd.f32 %v2159_v33, %v2145_v19  ;;  %v1722_v19 = vld [vmem:[#allocation5 + $0x10] sm:$0xff]  ;;  %v1774_v46 = vmul.f32 %v4616_v38, %v1726_v18 }
 0x5e4   : > { %v2176_v3 = vadd.f32 %v4585_v36, %v2144_v7  ;;  %v1862_v56 = vpop.permute.xlu0 %1861  ;;  %v1770_v7 = vmul.f32 %v4567_v12, %v1722_v19 }
 0x5e5   : > { %2186 = vst.msk [vmem:[#allocation4 + $0x10] sm:$0xff] %vm2183_vm7, %v2177_v41  ;;  %v1885_v60 = vadd.f32 %v1862_v56, %v1768_v43  ;;  %v1724_v56 = vld [vmem:[#allocation5 + $0x20] sm:$0xff] }
 0x5e6   : > { %2185 = vst.msk [vmem:[#allocation4 + $0x8] sm:$0xff] %vm2183_vm7, %v2176_v3  ;;  %v1693_v2 = vpop.xlane.xlu1 %1692 }
 0x5e7   : > { %1894 = vst.msk [vmem:[#allocation5] sm:$0xff] %vm4956_vm9, %v1885_v60  ;;  %v1707_v10 = vadd.f32 %v1693_v2, %v1675_v48  ;;  %v2162_v58 = vpop.xlane.xlu2 %2161 }
 0x5e9   : > { %1716 = vst.msk [vmem:[#allocation4 + $0x20] sm:$0xff] %vm1711_vm6, %v1707_v10  ;;  %v2138_v32 = vld [vmem:[#allocation4 + $0x18] sm:$0xff] }
 0x5ea   : > { %v2146_v36 = vmul.f32 %v4470_v51, %v2138_v32  ;;  %v1769_v51 = vmul.f32 %v4556_v61, %v1721_v24 }
 0x5ec   : > { %v2178_v50 = vadd.f32 %v2162_v58, %v2146_v36 }
 0x5ee   : > { %2187 = vst.msk [vmem:[#allocation4 + $0x18] sm:$0xff] %vm2183_vm7, %v2178_v50  ;;  %v2165_v4 = vpop.xlane.xlu1 %2164  ;;  %v2192_v25 = vld [vmem:[#allocation5] sm:$0xff] }
 0x5ef   : > { %v1696_v47 = vpop.xlane.xlu2 %1695 }
 0x5f0   : > { %v2139_v23 = vld [vmem:[#allocation4 + $0x20] sm:$0xff]  ;;  %v1708_v57 = vadd.f32 %v1696_v47, %v1676_v28 }
 0x5f1   : > { %v2147_v27 = vmul.f32 %v4467_v35, %v2139_v23  ;;  %v1678_v35 = vmul.f32 %v4483_v13, %v1670_v1  ;;  %v2149_v13 = vmul.f32 %v4473_v8, %v2141_v26  ;;  %v1772_v8 = vmul.f32 %v4583_v30, %v1724_v56 }
 0x5f2   : > { %1717 = vst.msk [vmem:[#allocation4 + $0x28] sm:$0xff] %vm1711_vm6, %v1708_v57 }
 0x5f3   : > { %v2179_v29 = vadd.f32 %v2165_v4, %v2147_v27 }
 0x5f5   : > { %2188 = vst.msk [vmem:[#allocation4 + $0x20] sm:$0xff] %vm2183_vm7, %v2179_v29 }
 0x5f6   : > { %v2168_v5 = vpop.xlane.xlu1 %2167 }
 0x5f7   : > { %v1864_v14 = vpop.permute.xlu2 %1863 }
 0x5f8   : > { %v1886_v63 = vadd.f32 %v1864_v14, %v1769_v51 }
 0x5f9   : > { %v2140_v54 = vld [vmem:[#allocation4 + $0x28] sm:$0xff] }
 0x5fa   : > { %v2148_v31 = vmul.f32 %v4479_v59, %v2140_v54  ;;  %1895 = vst.msk [vmem:[#allocation5 + $0x8] sm:$0xff] %vm4956_vm9, %v1886_v63  ;;  %v2240_v59 = vmul.f32 %v4594_v0, %v2192_v25 }
 0x5fc   : > { %v2180_v62 = vadd.f32 %v2168_v5, %v2148_v31 }
 0x5fe   : > { %2189 = vst.msk [vmem:[#allocation4 + $0x28] sm:$0xff] %vm2183_vm7, %v2180_v62  ;;  %v1702_v42 = vpop.xlane.xlu1 %1701 }
 0x5ff   : > { %v1710_v61 = vadd.f32 %v1702_v42, %v1678_v35  ;;  %v1868_v37 = vpop.permute.xlu2 %1867 }
 0x600   : > { %v1888_v33 = vadd.f32 %v1868_v37, %v1771_v52 }
 0x601   : > { %1719 = vst.msk [vmem:[#allocation4 + $0x38] sm:$0xff] %vm1711_vm6, %v1710_v61  ;;  %v2193_v62 = vld [vmem:[#allocation5 + $0x8] sm:$0xff] }
 0x602   : > { %1897 = vst.msk [vmem:[#allocation5 + $0x18] sm:$0xff] %vm4956_vm9, %v1888_v33  ;;  %v2334_v34 = vpop.permute.xlu0 %2333 }
 0x603   : > { %v2357_v15 = vadd.f32 %v2334_v34, %v2240_v59 }
 0x605   : > { %2366 = vst.msk [vmem:[#allocation5] sm:$0xff] %vm4955_vm10, %v2357_v15 }
 0x606   : > { %v2171_v21 = vpop.xlane.xlu1 %2170 }
 0x607   : > { %v2181_v44 = vadd.f32 %v2171_v21, %v2149_v13 }
 0x608   : > { %v2142_v2 = vld [vmem:[#allocation4 + $0x38] sm:$0xff] }
 0x609   : > { %2190 = vst.msk [vmem:[#allocation4 + $0x30] sm:$0xff] %vm2183_vm7, %v2181_v44  ;;  %v1874_v0 = vpop.permute.xlu2 %1873  ;;  %v2150_v58 = vmul.f32 %v4542_v11, %v2142_v2  ;;  %v2195_v50 = vld [vmem:[#allocation5 + $0x18] sm:$0xff] }
 0x60a   : > { %v1891_v43 = vadd.f32 %v1874_v0, %v1774_v46  ;;  %v1866_v41 = vpop.permute.xlu0 %1865  ;;  %v2243_v9 = vmul.f32 %v4604_v53, %v2195_v50  ;;  %v1727_v11 = vld [vmem:[#allocation5 + $0x38] sm:$0xff]  ;;  %v1725_v53 = vld [vmem:[#allocation5 + $0x28] sm:$0xff] }
 0x60b   : > { %v1887_v3 = vadd.f32 %v1866_v41, %v1770_v7  ;;  %v1775_v27 = vmul.f32 %v4612_v55, %v1727_v11  ;;  %v1773_v51 = vmul.f32 %v4588_v16, %v1725_v53  ;;  %v2241_v55 = vmul.f32 %v4565_v40, %v2193_v62 }
 0x60c   : > { %1900 = vst.msk [vmem:[#allocation5 + $0x30] sm:$0xff] %vm4956_vm9, %v1891_v43 }
 0x60d   : > { %1896 = vst.msk [vmem:[#allocation5 + $0x10] sm:$0xff] %vm4956_vm9, %v1887_v3 }
 0x611   : > { %v2338_v12 = vpop.permute.xlu2 %2337 }
 0x612   : > { %v1870_v45 = vpop.permute.xlu0 %1869 }
 0x613   : > { %v1889_v60 = vadd.f32 %v1870_v45, %v1772_v8  ;;  %v2198_v30 = vld [vmem:[#allocation5 + $0x30] sm:$0xff] }
 0x614   : > { %v2194_v48 = vld [vmem:[#allocation5 + $0x10] sm:$0xff]  ;;  %v2246_v4 = vmul.f32 %v4580_v6, %v2198_v30 }
 0x615   : > { %v2242_v38 = vmul.f32 %v4600_v49, %v2194_v48  ;;  %1898 = vst.msk [vmem:[#allocation5 + $0x20] sm:$0xff] %vm4956_vm9, %v1889_v60 }
 0x617   : > { %v2359_v10 = vadd.f32 %v2338_v12, %v2242_v38 }
 0x619   : > { %2368 = vst.msk [vmem:[#allocation5 + $0x10] sm:$0xff] %vm4955_vm10, %v2359_v10 }
 0x61a   : > { %v2174_v32 = vpop.xlane.xlu1 %2173 }
 0x61b   : > { %v2182_v36 = vadd.f32 %v2174_v32, %v2150_v58 }
 0x61c   : > { %v2196_v6 = vld [vmem:[#allocation5 + $0x20] sm:$0xff] }
 0x61d   : > { %2191 = vst.msk [vmem:[#allocation4 + $0x38] sm:$0xff] %vm2183_vm7, %v2182_v36  ;;  %v2244_v63 = vmul.f32 %v4573_v20, %v2196_v6 }
 0x624   : > { %v2340_v49 = vpop.permute.xlu0 %2339  ;;  %v2346_v28 = vpop.permute.xlu2 %2345 }
 0x625   : > { %v2360_v47 = vadd.f32 %v2340_v49, %v2243_v9  ;;  %v2363_v23 = vadd.f32 %v2346_v28, %v2246_v4 }
 0x627   : > { %2369 = vst.msk [vmem:[#allocation5 + $0x18] sm:$0xff] %vm4955_vm10, %v2360_v47 }
 0x628   : > { %2372 = vst.msk [vmem:[#allocation5 + $0x30] sm:$0xff] %vm4955_vm10, %v2363_v23 }
 0x629   : > { %v2322_v57 = vpop.f32.mrf.mxu2 }
 0x62a   : > { %2347 = vrot.lane.b32.xlu0 %v2322_v57, %s3427_s14 }
 0x62c   : > { %v1876_v29 = vpop.permute.xlu0 %1875 }
 0x62d   : > { %v1892_v24 = vadd.f32 %v1876_v29, %v1775_v27 }
 0x62f   : > { %1901 = vst.msk [vmem:[#allocation5 + $0x38] sm:$0xff] %vm4956_vm9, %v1892_v24 }
 0x632   : > { %v1872_v5 = vpop.permute.xlu1 %1871 }
 0x633   : > { %v1890_v14 = vadd.f32 %v1872_v5, %v1773_v51 }
 0x634   : > { %v2342_v54 = vpop.permute.xlu0 %2341 }
 0x635   : > { %1899 = vst.msk [vmem:[#allocation5 + $0x28] sm:$0xff] %vm4956_vm9, %v1890_v14  ;;  %v2361_v31 = vadd.f32 %v2342_v54, %v2244_v63 }
 0x636   : > { %v2199_v20 = vld [vmem:[#allocation5 + $0x38] sm:$0xff] }
 0x637   : > { %2370 = vst.msk [vmem:[#allocation5 + $0x20] sm:$0xff] %vm4955_vm10, %v2361_v31  ;;  %v2247_v25 = vmul.f32 %v4618_v22, %v2199_v20 }
 0x63a   : > { %v2336_v1 = vpop.permute.xlu1 %2335 }
 0x63b   : > { %v2358_v17 = vadd.f32 %v2336_v1, %v2241_v55 }
 0x63c   : > { %v2197_v35 = vld [vmem:[#allocation5 + $0x28] sm:$0xff] }
 0x63d   : > { %2367 = vst.msk [vmem:[#allocation5 + $0x8] sm:$0xff] %vm4955_vm10, %v2358_v17  ;;  %v2245_v16 = vmul.f32 %v4608_v39, %v2197_v35 }
 0x642   : > { %v2344_v52 = vpop.permute.xlu1 %2343 }
 0x643   : > { %v2362_v42 = vadd.f32 %v2344_v52, %v2245_v16 }
 0x645   : > { %2371 = vst.msk [vmem:[#allocation5 + $0x28] sm:$0xff] %vm4955_vm10, %v2362_v42 }
 0x69b   : > { %2385 = sbr.rel (%p3063_p8) target bundleno = 2069 (0x815), region = 60 }
 0x69c   : > { %v2348_v61 = vpop.permute.xlu0 %2347 }
 0x69d   : > { %v2364_v37 = vadd.f32 %v2348_v61, %v2247_v25 }
 0x69f   : > { %2373 = vst.msk [vmem:[#allocation5 + $0x38] sm:$0xff] %vm4955_vm10, %v2364_v37 }
 0x6a0   : > { %v2391_v40 = vld [vmem:[#allocation4 + $0x28] sm:$0xff]  ;;  %v4688_v33 = vld [vmem:[#allocation4 + $0x20] sm:$0xff]  ;;  %v3428_v39 = vmov 0   ;;  %v4696_v26 = vld [vmem:[#allocation4 + $0x38] sm:$0xff]  ;;  %v3430_v47 = vmov 2   ;;  %v3431_v23 = vmov 3  }
 0x6a1   : > { %v4690_v59 = vld [vmem:[#allocation4] sm:$0xff]  ;;  %3343 = vset.pattern.permute.xlu2 %v3428_v39  ;;  %3342 = vset.pattern.permute.xlu1 %v3428_v39  ;;  %3360 = vrcp.f32 %v2391_v40  ;;  %v2473_v22 = vand.u32 2147483647, %v2391_v40  ;;  %v2475_v34 = vand.u32 2147483648, %v2391_v40  ;;  %v2459_v15 = vand.u32 2147483647, %v4688_v33 }
 0x6a2   : > { %3341 = vset.pattern.permute.xlu0 %v3428_v39  ;;  %3362 = vrcp.f32 %v4688_v33  ;;  %v2461_v13 = vand.u32 2147483648, %v4688_v33  ;;  %v4701_v21 = vld [vmem:[#allocation4 + $0x30] sm:$0xff]  ;;  %v2403_v18 = vand.u32 2147483647, %v4690_v59  ;;  %vm2469_vm11 = vweird.f32 %v2391_v40  ;;  %v4727_v48 = vld [vmem:[#allocation4 + $0x8] sm:$0xff] }
 0x6a3   : > { %3364 = vrcp.f32 %v4690_v59  ;;  %vm2455_vm12 = vweird.f32 %v4688_v33  ;;  %v2405_v44 = vand.u32 2147483648, %v4690_v59  ;;  %v4707_v19 = vld [vmem:[#allocation4 + $0x10] sm:$0xff]  ;;  %vm4709_vm13 = vcmp.eq.f32.partialorder %v2473_v22, 8.507059e+37 }
 0x6a4   : > { %3366 = vrcp.f32 %v4696_v26  ;;  %v2476_v7 = vor.u32 1.1754944e-38, %v2475_v34  ;;  %vm2399_vm14 = vweird.f32 %v4690_v59  ;;  %vm4715_vm15 = vcmp.eq.f32.partialorder %v2459_v15, 8.507059e+37 }
 0x6a5   : > { %3368 = vrcp.f32 %v4701_v21  ;;  %v2462_v41 = vor.u32 1.1754944e-38, %v2461_v13  ;;  %vm2497_vm0 = vweird.f32 %v4696_v26  ;;  %v2501_v3 = vand.u32 2147483647, %v4696_v26 }
 0x6a6   : > { %vm4721_vm1 = vcmp.eq.f32.partialorder %v2403_v18, 8.507059e+37  ;;  %v2503_v60 = vand.u32 2147483648, %v4696_v26  ;;  %3370 = vrcp.f32 %v4707_v19  ;;  %v2406_v2 = vor.u32 1.1754944e-38, %v2405_v44 }
 0x6a7   : > { %v3361_v0 = vpop.eup %3360  ;;  %vm2483_vm4 = vweird.f32 %v4701_v21  ;;  %v2487_v10 = vand.u32 2147483647, %v4701_v21  ;;  %v2489_v36 = vand.u32 2147483648, %v4701_v21  ;;  %vm2427_vm7 = vweird.f32 %v4707_v19 }
 0x6a8   : > { %v3363_v56 = vpop.eup %3362  ;;  %v2465_v8 = vmul.f32 %v3361_v0, %v2391_v40  ;;  %vm2470_vm5 = vweird.f32 %v3361_v0  ;;  %3372 = vrcp.f32 %v4727_v48  ;;  %vm4742_vm10 = vcmp.eq.f32.partialorder %v2501_v3, 8.507059e+37 }
 0x6a9   : > { %v3365_v38 = vpop.eup %3364  ;;  %v2451_v12 = vmul.f32 %v3363_v56, %v4688_v33  ;;  %vm2456_vm6 = vweird.f32 %v3363_v56  ;;  %vm4747_vm9 = vmor %vm2469_vm11, %vm2470_vm5  ;;  %v2431_v27 = vand.u32 2147483647, %v4707_v19  ;;  %v2433_v29 = vand.u32 2147483648, %v4707_v19 }
 0x6aa   : > { %v2466_v58 = vsub.f32 1.0, %v2465_v8  ;;  %v2395_v32 = vmul.f32 %v3365_v38, %v4690_v59  ;;  %v4734_v50 = vpop.eup %3366  ;;  %vm2400_vm3 = vweird.f32 %v3365_v38  ;;  %vm4758_vm8 = vmor %vm2455_vm12, %vm2456_vm6  ;;  %v2389_v59 = vld [vmem:[#allocation4 + $0x18] sm:$0xff]  ;;  %v2504_v34 = vor.u32 1.1754944e-38, %v2503_v60 }
 0x6ab   : > { %v2452_v30 = vsub.f32 1.0, %v2451_v12  ;;  %v4738_v9 = vpop.eup %3368  ;;  %v2493_v28 = vmul.f32 %v4734_v50, %v4696_v26  ;;  %vm2498_vm11 = vweird.f32 %v4734_v50  ;;  %vm4766_vm5 = vmor %vm2399_vm14, %vm2400_vm3  ;;  %3374 = vrcp.f32 %v2389_v59 }
 0x6ac   : > { %v2467_v4 = vmul.f32 %v3361_v0, %v2466_v58  ;;  %v2396_v49 = vsub.f32 1.0, %v2395_v32  ;;  %v2479_v11 = vmul.f32 %v4738_v9, %v4701_v21  ;;  %v3371_v24 = vpop.eup %3370  ;;  %vm2484_vm2 = vweird.f32 %v4738_v9  ;;  %vm4783_vm3 = vmor %vm2497_vm0, %vm2498_vm11 }
 0x6ad   : > { %v2453_v57 = vmul.f32 %v3363_v56, %v2452_v30  ;;  %v2494_v5 = vsub.f32 1.0, %v2493_v28  ;;  %v2423_v31 = vmul.f32 %v3371_v24, %v4707_v19  ;;  %vm2428_vm12 = vweird.f32 %v3371_v24 }
 0x6ae   : > { %v2468_v53 = vadd.f32 %v3361_v0, %v2467_v4  ;;  %v2397_v51 = vmul.f32 %v3365_v38, %v2396_v49  ;;  %v2480_v54 = vsub.f32 1.0, %v2479_v11  ;;  %v3373_v17 = vpop.eup %3372  ;;  %v2490_v21 = vor.u32 1.1754944e-38, %v2489_v36 }
 0x6af   : > { %v2454_v14 = vadd.f32 %v3363_v56, %v2453_v57  ;;  %v2495_v1 = vmul.f32 %v4734_v50, %v2494_v5  ;;  %v2424_v20 = vsub.f32 1.0, %v2423_v31  ;;  %v2409_v33 = vmul.f32 %v3373_v17, %v4727_v48  ;;  %v2510_v5 = vld [vmem:[#allocation5 + $0x20] sm:$0xff] }
 0x6b0   : > { %v2472_v62 = vsel %vm4747_vm9, %v3361_v0, %v2468_v53  ;;  %v2398_v55 = vadd.f32 %v3365_v38, %v2397_v51  ;;  %v2481_v42 = vmul.f32 %v4738_v9, %v2480_v54  ;;  %vm4818_vm9 = vmor %vm2427_vm7, %vm2428_vm12  ;;  %v2434_v0 = vor.u32 1.1754944e-38, %v2433_v29  ;;  %v2507_v53 = vld [vmem:[#allocation5 + $0x8] sm:$0xff] }
 0x6b1   : > { %v4777_v35 = vsel %vm4709_vm13, %v2476_v7, %v2472_v62  ;;  %v2458_v16 = vsel %vm4758_vm8, %v3363_v56, %v2454_v14  ;;  %v2496_v37 = vadd.f32 %v4734_v50, %v2495_v1  ;;  %vm4800_vm8 = vmor %vm2483_vm4, %vm2484_vm2  ;;  %v2425_v15 = vmul.f32 %v3371_v24, %v2424_v20  ;;  %v2506_v14 = vld [vmem:[#allocation5] sm:$0xff]  ;;  %v2512_v1 = vld [vmem:[#allocation5 + $0x30] sm:$0xff] }
 0x6b2   : > { %2541 = vperm.xlu2 %3343, %v4777_v35   ;;  %v4791_v25 = vsel %vm4715_vm15, %v2462_v41, %v2458_v16  ;;  %v2402_v61 = vsel %vm4766_vm5, %v3365_v38, %v2398_v55  ;;  %v2482_v26 = vadd.f32 %v4738_v9, %v2481_v42  ;;  %vm2488_vm2 = vcmp.eq.f32.partialorder %v2487_v10, 8.507059e+37  ;;  %v3375_v38 = vpop.eup %3374 }
 0x6b3   : > { %2536 = vperm.xlu0 %3341, %v4791_v25   ;;  %v4808_v22 = vsel %vm4721_vm1, %v2406_v2, %v2402_v61  ;;  %v2500_v13 = vsel %vm4783_vm3, %v4734_v50, %v2496_v37  ;;  %v2410_v44 = vsub.f32 1.0, %v2409_v33  ;;  %v2426_v7 = vadd.f32 %v3371_v24, %v2425_v15 }
 0x6b4   : > { %2516 = vperm.xlu1 %3342, %v4808_v22   ;;  %v2486_v46 = vsel %vm4800_vm8, %v4738_v9, %v2482_v26  ;;  %vm2432_vm13 = vcmp.eq.f32.partialorder %v2431_v27, 8.507059e+37  ;;  %vm2413_vm14 = vweird.f32 %v4727_v48  ;;  %vm2414_vm15 = vweird.f32 %v3373_v17  ;;  %v2513_v27 = vld [vmem:[#allocation5 + $0x38] sm:$0xff] }
 0x6b5   : > { %v2411_v43 = vmul.f32 %v3373_v17, %v2410_v44  ;;  %v4828_v19 = vsel %vm4742_vm10, %v2504_v34, %v2500_v13  ;;  %v2430_v41 = vsel %vm4818_vm9, %v3371_v24, %v2426_v7  ;;  %v2419_v3 = vand.u32 2147483648, %v4727_v48  ;;  %vm2415_vm0 = vmor %vm2413_vm14, %vm2414_vm15  ;;  %v2749_v44 = vld [vmem:[%s4947_s5 + $0x18] sm:$0xff] }
 0x6b6   : > { %v2491_v56 = vsel %vm2488_vm2, %v2490_v21, %v2486_v46  ;;  %v2417_v45 = vand.u32 2147483647, %v4727_v48  ;;  %v2435_v60 = vsel %vm2432_vm13, %v2434_v0, %v2430_v41  ;;  %v2437_v10 = vmul.f32 %v3375_v38, %v2389_v59  ;;  %v2509_v7 = vld [vmem:[#allocation5 + $0x18] sm:$0xff]  ;;  %2790 = vmatpush.msra.mxu0 %v2749_v44  ;;  %3089 = vmatpush.msra.mxu1 %v2749_v44  ;;  %v2748_v41 = vld [vmem:[%s4947_s5 + $0x10] sm:$0xff] }
 0x6b7   : > { %v2412_v8 = vadd.f32 %v3373_v17, %v2411_v43  ;;  %v2420_v12 = vor.u32 1.1754944e-38, %v2419_v3  ;;  %vm2441_vm1 = vweird.f32 %v2389_v59  ;;  %vm2442_vm4 = vweird.f32 %v3375_v38  ;;  %v2747_v3 = vld [vmem:[%s4947_s5 + $0x8] sm:$0xff]  ;;  %3090 = vmatpush.msra.mxu2 %v2749_v44  ;;  %3091 = vmatpush.msra.mxu3 %v2749_v44 }
 0x6b8   : > { %vm2418_vm10 = vcmp.eq.f32.partialorder %v2417_v45, 8.507059e+37  ;;  %v2438_v58 = vsub.f32 1.0, %v2437_v10  ;;  %v3429_v50 = vmov 1   ;;  %v2447_v48 = vand.u32 2147483648, %v2389_v59  ;;  %vm2443_vm6 = vmor %vm2441_vm1, %vm2442_vm4  ;;  %2791 = vmatpush.msra.mxu0 %v2748_v41  ;;  %3092 = vmatpush.msra.mxu1 %v2748_v41 }
 0x6b9   : > { %v2416_v2 = vsel %vm2415_vm0, %v3373_v17, %v2412_v8  ;;  %v2445_v9 = vand.u32 2147483647, %v2389_v59  ;;  %vm4994_vm11 = vcmask 64512   ;;  %vm5001_vm13 = vcmask 130112   ;;  %3093 = vmatpush.msra.mxu2 %v2748_v41  ;;  %3094 = vmatpush.msra.mxu3 %v2748_v41 }
 0x6ba   : > { %2551 = vperm.xlu2 %3343, %v4828_v19   ;;  %v2421_v32 = vsel %vm2418_vm10, %v2420_v12, %v2416_v2  ;;  %v2439_v36 = vmul.f32 %v3375_v38, %v2438_v58  ;;  %v2448_v4 = vor.u32 1.1754944e-38, %v2447_v48  ;;  %vm4995_vm5 = vmmov %vm4994_vm11  ;;  %2792 = vmatpush.msra.mxu0 %v2747_v3  ;;  %vm5007_vm4 = vcmask 195712  }
 0x6bb   : > { %2546 = vperm.xlu0 %3341, %v2491_v56   ;;  %vm2446_vm7 = vcmp.eq.f32.partialorder %v2445_v9, 8.507059e+37  ;;  %vm4996_vm12 = vmmov %vm4995_vm5  ;;  %3095 = vmatpush.msra.mxu1 %v2747_v3 }
 0x6bc   : > { %2526 = vperm.xlu1 %3342, %v2435_v60   ;;  %v2440_v30 = vadd.f32 %v3375_v38, %v2439_v36  ;;  %vm4997_vm3 = vmmov %vm4995_vm5  ;;  %3096 = vmatpush.msra.mxu2 %v2747_v3 }
 0x6bd   : > { %vm4998_vm8 = vmmov %vm4997_vm3  ;;  %3097 = vmatpush.msra.mxu3 %v2747_v3 }
 0x6be   : > { %v2444_v49 = vsel %vm2443_vm6, %v3375_v38, %v2440_v30  ;;  %vm4999_vm2 = vmmov %vm4997_vm3  ;;  %v2746_v38 = vld [vmem:[%s4947_s5] sm:$0xff] }
 0x6bf   : > { %v2449_v28 = vsel %vm2446_vm7, %v2448_v4, %v2444_v49  ;;  %vm5000_vm9 = vmmov %vm4999_vm2  ;;  %2793 = vmatpush.msra.mxu0 %v2746_v38  ;;  %3098 = vmatpush.msra.mxu1 %v2746_v38 }
 0x6c0   : > { %vm5002_vm14 = vmmov %vm5001_vm13  ;;  %3099 = vmatpush.msra.mxu2 %v2746_v38  ;;  %3100 = vmatpush.msra.mxu3 %v2746_v38 }
 0x6c1   : > { %vm5003_vm15 = vmmov %vm5001_vm13 }
 0x6c2   : > { %2521 = vperm.xlu2 %3343, %v2421_v32   ;;  %vm5004_vm0 = vmmov %vm5001_vm13 }
 0x6c3   : > { %3344 = vset.pattern.permute.xlu0 %v3429_v50  ;;  %vm5005_vm10 = vmmov %vm5004_vm0 }
 0x6c4   : > { %3345 = vset.pattern.permute.xlu1 %v3429_v50  ;;  %2595 = vperm.xlu0 %3344, %v4791_v25   ;;  %vm5006_vm1 = vmmov %vm5004_vm0 }
 0x6c5   : > { %2603 = vperm.xlu1 %3345, %v2491_v56   ;;  %vm5008_vm6 = vmmov %vm4999_vm2 }
 0x6c6   : > { %vm5009_vm7 = vmmov %vm5007_vm4 }
 0x6ca   : > { %3347 = vset.pattern.permute.xlu2 %v3429_v50 }
 0x6cb   : > { %2579 = vperm.xlu2 %3347, %v4808_v22  }
 0x6cc   : > { %2587 = vperm.xlu0 %3344, %v2435_v60  }
 0x6cd   : > { %3346 = vset.pattern.permute.xlu1 %v3428_v39  ;;  %v2511_v39 = vld [vmem:[#allocation5 + $0x28] sm:$0xff] }
 0x6ce   : > { %2531 = vperm.xlu1 %3346, %v2449_v28  }
 0x6d3   : > { %2607 = vperm.xlu2 %3347, %v4828_v19  }
 0x6d4   : > { %3349 = vset.pattern.permute.xlu0 %v3430_v47 }
 0x6d5   : > { %2651 = vperm.xlu0 %3349, %v4791_v25  }
 0x6d6   : > { %3348 = vset.pattern.permute.xlu1 %v3429_v50 }
 0x6d7   : > { %2599 = vperm.xlu1 %3348, %v4777_v35  }
 0x6db   : > { %2583 = vperm.xlu2 %3347, %v2421_v32  }
 0x6dd   : > { %2643 = vperm.xlu0 %3349, %v2435_v60  }
 0x6df   : > { %3350 = vset.pattern.permute.xlu1 %v3430_v47 }
 0x6e0   : > { %2659 = vperm.xlu1 %3350, %v2491_v56  }
 0x6e3   : > { %3352 = vset.pattern.permute.xlu2 %v3430_v47 }
 0x6e4   : > { %2635 = vperm.xlu2 %3352, %v4808_v22  }
 0x6e5   : > { %3354 = vset.pattern.permute.xlu0 %v3431_v23 }
 0x6e6   : > { %2707 = vperm.xlu0 %3354, %v4791_v25  }
 0x6e8   : > { %3351 = vset.pattern.permute.xlu1 %v3429_v50 }
 0x6e9   : > { %2591 = vperm.xlu1 %3351, %v2449_v28  }
 0x6ec   : > { %2663 = vperm.xlu2 %3352, %v4828_v19  }
 0x6ee   : > { %2699 = vperm.xlu0 %3354, %v2435_v60  }
 0x6f1   : > { %3353 = vset.pattern.permute.xlu1 %v3430_v47 }
 0x6f2   : > { %2655 = vperm.xlu1 %3353, %v4777_v35  }
 0x6f4   : > { %2639 = vperm.xlu2 %3352, %v2421_v32  }
 0x6f6   : > { %2695 = vperm.xlu0 %3354, %v2421_v32  }
 0x6fa   : > { %3355 = vset.pattern.permute.xlu1 %v3431_v23 }
 0x6fb   : > { %2715 = vperm.xlu1 %3355, %v2491_v56  }
 0x6fc   : > { %3357 = vset.pattern.permute.xlu2 %v3431_v23 }
 0x6fd   : > { %2691 = vperm.xlu2 %3357, %v4808_v22  }
 0x703   : > { %3356 = vset.pattern.permute.xlu1 %v3430_v47 }
 0x704   : > { %2647 = vperm.xlu1 %3356, %v2449_v28  }
 0x705   : > { %2719 = vperm.xlu2 %3357, %v4828_v19  }
 0x70c   : > { %3358 = vset.pattern.permute.xlu1 %v3431_v23  ;;  %v2542_v57 = vpop.permute.xlu2 %2541 }
 0x70d   : > { %2711 = vperm.xlu1 %3358, %v4777_v35   ;;  %v2559_v11 = vmul.f32 %v2542_v57, %v2511_v39  ;;  %v2508_v35 = vld [vmem:[#allocation5 + $0x10] sm:$0xff] }
 0x70f   : > { %2567 = vst.msk [vmem:[#allocation5 + $0x28] sm:$0xff] %vm4994_vm11, %v2559_v11  ;;  %vm5010_vm11 = vmmov %vm5007_vm4 }
 0x714   : > { %v2552_v29 = vpop.permute.xlu2 %2551 }
 0x715   : > { %2703 = vperm.xlu1 %3358, %v2449_v28   ;;  %v2561_v24 = vmul.f32 %v2552_v29, %v2513_v27 }
 0x716   : > { %v2575_v50 = vld [vmem:[#allocation5 + $0x28] sm:$0xff] }
 0x717   : > { %2569 = vst.msk [vmem:[#allocation5 + $0x38] sm:$0xff] %vm4995_vm5, %v2561_v24  ;;  %vm5011_vm5 = vmmov %vm5004_vm0 }
 0x71c   : > { %v2522_v6 = vpop.permute.xlu2 %2521 }
 0x71d   : > { %v2555_v51 = vmul.f32 %v2522_v6, %v2507_v53 }
 0x71e   : > { %v2577_v17 = vld [vmem:[#allocation5 + $0x38] sm:$0xff] }
 0x71f   : > { %2563 = vst.msk [vmem:[#allocation5 + $0x8] sm:$0xff] %vm4996_vm12, %v2555_v51  ;;  %vm5012_vm12 = vmmov %vm5007_vm4 }
 0x725   : > { %v2537_v63 = vpop.permute.xlu0 %2536  ;;  %v2580_v54 = vpop.permute.xlu2 %2579 }
 0x726   : > { %v2558_v31 = vmul.f32 %v2537_v63, %v2510_v5  ;;  %v2517_v62 = vpop.permute.xlu1 %2516  ;;  %v2571_v33 = vld [vmem:[#allocation5 + $0x8] sm:$0xff] }
 0x727   : > { %v2554_v55 = vmul.f32 %v2517_v62, %v2506_v14 }
 0x728   : > { %2566 = vst.msk [vmem:[#allocation5 + $0x20] sm:$0xff] %vm4997_vm3, %v2558_v31  ;;  %vm5013_vm3 = vmmov %vm5007_vm4 }
 0x729   : > { %2562 = vst.msk [vmem:[#allocation5] sm:$0xff] %vm4998_vm8, %v2554_v55  ;;  %vm5014_vm8 = vmmov %vm5013_vm3 }
 0x72d   : > { %v2547_v16 = vpop.permute.xlu0 %2546  ;;  %v2608_v52 = vpop.permute.xlu2 %2607 }
 0x72e   : > { %v2560_v42 = vmul.f32 %v2547_v16, %v2512_v1  ;;  %v2527_v20 = vpop.permute.xlu1 %2526  ;;  %v2617_v25 = vmul.f32 %v2608_v52, %v2577_v17 }
 0x72f   : > { %v2556_v61 = vmul.f32 %v2527_v20, %v2508_v35  ;;  %v2574_v59 = vld [vmem:[#allocation5 + $0x20] sm:$0xff] }
 0x730   : > { %v2570_v37 = vld [vmem:[#allocation5] sm:$0xff]  ;;  %2568 = vst.msk [vmem:[#allocation5 + $0x30] sm:$0xff] %vm4999_vm2, %v2560_v42  ;;  %vm5015_vm2 = vcmask 261312  }
 0x731   : > { %v2610_v40 = vmul.f32 %v2580_v54, %v2570_v37  ;;  %2564 = vst.msk [vmem:[#allocation5 + $0x10] sm:$0xff] %vm5000_vm9, %v2556_v61  ;;  %vm5016_vm9 = vmmov %vm5015_vm2 }
 0x732   : > { %2625 = vst.msk [vmem:[#allocation5 + $0x38] sm:$0xff] %vm5001_vm13, %v2617_v25  ;;  %vm5017_vm13 = vmmov %vm5004_vm0 }
 0x733   : > { %2618 = vst.msk [vmem:[#allocation5] sm:$0xff] %vm5002_vm14, %v2610_v40  ;;  %vm5018_vm14 = vmmov %vm5015_vm2 }
 0x735   : > { %v2584_v22 = vpop.permute.xlu2 %2583 }
 0x736   : > { %v2596_v34 = vpop.permute.xlu0 %2595  ;;  %v2611_v26 = vmul.f32 %v2584_v22, %v2571_v33 }
 0x737   : > { %v2614_v15 = vmul.f32 %v2596_v34, %v2574_v59  ;;  %v2576_v13 = vld [vmem:[#allocation5 + $0x30] sm:$0xff]  ;;  %v2604_v21 = vpop.permute.xlu1 %2603 }
 0x738   : > { %v2616_v18 = vmul.f32 %v2604_v21, %v2576_v13  ;;  %2619 = vst.msk [vmem:[#allocation5 + $0x8] sm:$0xff] %vm5003_vm15, %v2611_v26  ;;  %v2572_v46 = vld [vmem:[#allocation5 + $0x10] sm:$0xff]  ;;  %vm5019_vm15 = vcmask 261120  }
 0x739   : > { %2622 = vst.msk [vmem:[#allocation5 + $0x20] sm:$0xff] %vm5004_vm0, %v2614_v15  ;;  %v2633_v2 = vld [vmem:[#allocation5 + $0x38] sm:$0xff]  ;;  %vm5020_vm0 = vmmov %vm5015_vm2 }
 0x73a   : > { %2624 = vst.msk [vmem:[#allocation5 + $0x30] sm:$0xff] %vm5005_vm10, %v2616_v18  ;;  %v2626_v19 = vld [vmem:[#allocation5] sm:$0xff]  ;;  %vm5021_vm10 = vmmov %vm5019_vm15 }
 0x73e   : > { %v2588_v0 = vpop.permute.xlu0 %2587  ;;  %v2636_v43 = vpop.permute.xlu2 %2635 }
 0x73f   : > { %v2612_v56 = vmul.f32 %v2588_v0, %v2572_v46  ;;  %v2666_v8 = vmul.f32 %v2636_v43, %v2626_v19  ;;  %v2627_v9 = vld [vmem:[#allocation5 + $0x8] sm:$0xff] }
 0x740   : > { %v2532_v45 = vpop.permute.xlu1 %2531  ;;  %v2630_v12 = vld [vmem:[#allocation5 + $0x20] sm:$0xff] }
 0x741   : > { %2620 = vst.msk [vmem:[#allocation5 + $0x10] sm:$0xff] %vm5006_vm1, %v2612_v56  ;;  %v2557_v60 = vmul.f32 %v2532_v45, %v2509_v7  ;;  %v2632_v39 = vld [vmem:[#allocation5 + $0x30] sm:$0xff]  ;;  %vm5022_vm1 = vmmov %vm5013_vm3  ;;  %v3359_v56 = vld [vmem:[%s4948_s6] ss:$0 sm:$0xff] }
 0x742   : > { %2674 = vst.msk [vmem:[#allocation5] sm:$0xff] %vm5007_vm4, %v2666_v8  ;;  %vm5023_vm4 = vmmov %vm5020_vm0  ;;  %v2819_v45 = vld [vmem:[%s3518_s22] sm:$0xff] }
 0x743   : > { %2565 = vst.msk [vmem:[#allocation5 + $0x18] sm:$0xff] %vm5008_vm6, %v2557_v60  ;;  %vm5024_vm6 = vmmov %vm5021_vm10 }
 0x746   : > { %v2664_v10 = vpop.permute.xlu2 %2663 }
 0x747   : > { %v2652_v58 = vpop.permute.xlu0 %2651  ;;  %v2673_v32 = vmul.f32 %v2664_v10, %v2633_v2  ;;  %v2823_v2 = vld [vmem:[%s3518_s22 + $0x20] sm:$0xff] }
 0x748   : > { %v2670_v36 = vmul.f32 %v2652_v58, %v2630_v12  ;;  %v2628_v28 = vld [vmem:[#allocation5 + $0x10] sm:$0xff] }
 0x749   : > { %2681 = vst.msk [vmem:[#allocation5 + $0x38] sm:$0xff] %vm5009_vm7, %v2673_v32  ;;  %v2600_v48 = vpop.permute.xlu1 %2599  ;;  %v2682_v24 = vld [vmem:[#allocation5] sm:$0xff]  ;;  %vm5025_vm7 = vmmov %vm5020_vm0  ;;  %v2821_v32 = vld [vmem:[%s3518_s22 + $0x10] sm:$0xff] }
 0x74a   : > { %2678 = vst.msk [vmem:[#allocation5 + $0x20] sm:$0xff] %vm5010_vm11, %v2670_v36  ;;  %v2615_v30 = vmul.f32 %v2600_v48, %v2575_v50  ;;  %v2573_v5 = vld [vmem:[#allocation5 + $0x18] sm:$0xff]  ;;  %vm5026_vm11 = vmmov %vm5024_vm6 }
 0x74c   : > { %2623 = vst.msk [vmem:[#allocation5 + $0x28] sm:$0xff] %vm5011_vm5, %v2615_v30  ;;  %vm5027_vm5 = vmmov %vm5024_vm6 }
 0x74e   : > { %v2640_v4 = vpop.permute.xlu2 %2639 }
 0x74f   : > { %v2644_v49 = vpop.permute.xlu0 %2643  ;;  %v2667_v47 = vmul.f32 %v2640_v4, %v2627_v9  ;;  %v2820_v9 = vld [vmem:[%s3518_s22 + $0x8] sm:$0xff] }
 0x750   : > { %v2668_v23 = vmul.f32 %v2644_v49, %v2628_v28  ;;  %v2689_v54 = vld [vmem:[#allocation5 + $0x38] sm:$0xff] }
 0x751   : > { %2675 = vst.msk [vmem:[#allocation5 + $0x8] sm:$0xff] %vm5012_vm12, %v2667_v47  ;;  %v2686_v27 = vld [vmem:[#allocation5 + $0x20] sm:$0xff]  ;;  %vm5028_vm12 = vmmov %vm5022_vm1  ;;  %v2825_v47 = vld [vmem:[%s3518_s22 + $0x30] sm:$0xff] }
 0x752   : > { %2676 = vst.msk [vmem:[#allocation5 + $0x10] sm:$0xff] %vm5013_vm3, %v2668_v23  ;;  %v2660_v57 = vpop.permute.xlu1 %2659  ;;  %vm5029_vm3 = vmmov %vm5027_vm5 }
 0x753   : > { %v2672_v11 = vmul.f32 %v2660_v57, %v2632_v39  ;;  %v2631_v52 = vld [vmem:[#allocation5 + $0x28] sm:$0xff] }
 0x755   : > { %2680 = vst.msk [vmem:[#allocation5 + $0x30] sm:$0xff] %vm5014_vm8, %v2672_v11  ;;  %vm5030_vm8 = vmmov %vm5020_vm0  ;;  %v2826_v11 = vld [vmem:[%s3518_s22 + $0x38] sm:$0xff] }
 0x757   : > { %v2692_v29 = vpop.permute.xlu2 %2691 }
 0x758   : > { %v2708_v53 = vpop.permute.xlu0 %2707  ;;  %v2722_v6 = vmul.f32 %v2692_v29, %v2682_v24  ;;  %v2683_v61 = vld [vmem:[#allocation5 + $0x8] sm:$0xff] }
 0x759   : > { %v2726_v51 = vmul.f32 %v2708_v53, %v2686_v27  ;;  %v2684_v55 = vld [vmem:[#allocation5 + $0x10] sm:$0xff]  ;;  %v2824_v53 = vld [vmem:[%s3518_s22 + $0x28] sm:$0xff] }
 0x75a   : > { %2730 = vst.msk [vmem:[#allocation5] sm:$0xff] %vm5015_vm2, %v2722_v6  ;;  %vm5031_vm2 = vmmov %vm5020_vm0 }
 0x75b   : > { %2734 = vst.msk [vmem:[#allocation5 + $0x20] sm:$0xff] %vm5016_vm9, %v2726_v51  ;;  %v2592_v14 = vpop.permute.xlu1 %2591  ;;  %vm5032_vm9 = vmmov %vm5029_vm3 }
 0x75c   : > { %v2613_v63 = vmul.f32 %v2592_v14, %v2573_v5  ;;  %v2688_v33 = vld [vmem:[#allocation5 + $0x30] sm:$0xff]  ;;  %v2822_v5 = vld [vmem:[%s3518_s22 + $0x18] sm:$0xff] }
 0x75e   : > { %2621 = vst.msk [vmem:[#allocation5 + $0x18] sm:$0xff] %vm5017_vm13, %v2613_v63  ;;  %vm5033_vm13 = vmmov %vm5029_vm3 }
 0x75f   : > { %v2720_v31 = vpop.permute.xlu2 %2719 }
 0x760   : > { %v2700_v62 = vpop.permute.xlu0 %2699  ;;  %v2729_v1 = vmul.f32 %v2720_v31, %v2689_v54 }
 0x761   : > { %v2724_v17 = vmul.f32 %v2700_v62, %v2684_v55  ;;  %v2738_v35 = vld [vmem:[#allocation5] sm:$0xff] }
 0x762   : > { %2737 = vst.msk [vmem:[#allocation5 + $0x38] sm:$0xff] %vm5018_vm14, %v2729_v1  ;;  %3064 = vmatmul.msk.f32.vlgmr.msra.gmra.mxu0 %vm5019_vm15, %v2738_v35  ;;  %v2742_v16 = vld [vmem:[#allocation5 + $0x20] sm:$0xff]  ;;  %vm5034_vm14 = vmmov %vm5029_vm3 }
 0x763   : > { %2732 = vst.msk [vmem:[#allocation5 + $0x10] sm:$0xff] %vm5020_vm0, %v2724_v17  ;;  %3068 = vmatmul.msk.f32.vlgmr.msra.gmra.mxu2 %vm5021_vm10, %v2742_v16  ;;  %vm5035_vm15 = vmmov %vm5029_vm3 }
 0x764   : > { %v2656_v42 = vpop.permute.xlu1 %2655  ;;  %vm5036_vm0 = vmmov %vm5029_vm3 }
 0x765   : > { %v2671_v20 = vmul.f32 %v2656_v42, %v2631_v52  ;;  %v2629_v26 = vld [vmem:[#allocation5 + $0x18] sm:$0xff]  ;;  %vm5037_vm10 = vmmov %vm5036_vm0 }
 0x767   : > { %2679 = vst.msk [vmem:[#allocation5 + $0x28] sm:$0xff] %vm5022_vm1, %v2671_v20  ;;  %vm5038_vm1 = vmmov %vm5036_vm0 }
 0x768   : > { %v2696_v25 = vpop.permute.xlu0 %2695 }
 0x769   : > { %v2723_v37 = vmul.f32 %v2696_v25, %v2683_v61  ;;  %v2745_v46 = vld [vmem:[#allocation5 + $0x38] sm:$0xff] }
 0x76a   : > { %v2740_v40 = vld [vmem:[#allocation5 + $0x10] sm:$0xff] }
 0x76b   : > { %2731 = vst.msk [vmem:[#allocation5 + $0x8] sm:$0xff] %vm5023_vm4, %v2723_v37  ;;  %3066 = vmatmul.msk.f32.vlgmr.msra.gmra.mxu1 %vm5024_vm6, %v2740_v40  ;;  %vm5039_vm4 = vmmov %vm5036_vm0 }
 0x76c   : > { %vm5040_vm6 = vmmov %vm5036_vm0 }
 0x76d   : > { %v2716_v59 = vpop.permute.xlu1 %2715 }
 0x76e   : > { %v2728_v22 = vmul.f32 %v2716_v59, %v2688_v33  ;;  %v2687_v18 = vld [vmem:[#allocation5 + $0x28] sm:$0xff] }
 0x770   : > { %2736 = vst.msk [vmem:[#allocation5 + $0x30] sm:$0xff] %vm5025_vm7, %v2728_v22  ;;  %vm5041_vm7 = vmmov %vm5036_vm0 }
 0x772   : > { %v2739_v34 = vld [vmem:[#allocation5 + $0x8] sm:$0xff] }
 0x773   : > { %3065 = vmatmul.msk.f32.gmra.mxu0 %vm5026_vm11, %v2739_v34 }
 0x776   : > { %v2648_v15 = vpop.permute.xlu1 %2647 }
 0x777   : > { %v2669_v13 = vmul.f32 %v2648_v15, %v2629_v26  ;;  %v2744_v21 = vld [vmem:[#allocation5 + $0x30] sm:$0xff] }
 0x778   : > { %3070 = vmatmul.msk.f32.vlgmr.msra.gmra.mxu3 %vm5027_vm5, %v2744_v21 }
 0x779   : > { %2677 = vst.msk [vmem:[#allocation5 + $0x18] sm:$0xff] %vm5028_vm12, %v2669_v13 }
 0x77f   : > { %v2712_v44 = vpop.permute.xlu1 %2711 }
 0x780   : > { %v2727_v7 = vmul.f32 %v2712_v44, %v2687_v18  ;;  %3071 = vmatmul.msk.f32.gmra.mxu3 %vm5029_vm3, %v2745_v46  ;;  %v2685_v0 = vld [vmem:[#allocation5 + $0x18] sm:$0xff] }
 0x782   : > { %2735 = vst.msk [vmem:[#allocation5 + $0x28] sm:$0xff] %vm5030_vm8, %v2727_v7 }
 0x787   : > { %v2704_v43 = vpop.permute.xlu1 %2703 }
 0x788   : > { %v2725_v19 = vmul.f32 %v2704_v43, %v2685_v0 }
 0x789   : > { %v2743_v41 = vld [vmem:[#allocation5 + $0x28] sm:$0xff] }
 0x78a   : > { %2733 = vst.msk [vmem:[#allocation5 + $0x18] sm:$0xff] %vm5031_vm2, %v2725_v19  ;;  %3069 = vmatmul.msk.f32.gmra.mxu2 %vm5032_vm9, %v2743_v41 }
 0x791   : > { %v2741_v3 = vld [vmem:[#allocation5 + $0x18] sm:$0xff] }
 0x792   : > { %3067 = vmatmul.msk.f32.gmra.mxu1 %vm5033_vm13, %v2741_v3 }
 0x7df   : > { %v2795_v8 = vpop.f32.mrf.mxu0 }
 0x7e0   : > { %v2796_v60 = vadd.f32 %v3359_v56, %v2795_v8 }
 0x7e2   : > { %v2827_v38 = vadd.f32 %v2819_v45, %v2796_v60 }
 0x7e4   : > { %2835 = vst.msk [vmem:[%s3533_s12] sm:$0xff] %vm5034_vm14, %v2827_v38 }
 0x7e6   : > { %v2807_v12 = vpop.f32.mrf.mxu2 }
 0x7e7   : > { %v2808_v10 = vadd.f32 %v3359_v56, %v2807_v12 }
 0x7e8   : > { %v2801_v58 = vpop.f32.mrf.mxu1 }
 0x7e9   : > { %v2802_v36 = vadd.f32 %v3359_v56, %v2801_v58  ;;  %v2831_v50 = vadd.f32 %v2823_v2, %v2808_v10 }
 0x7eb   : > { %v2829_v48 = vadd.f32 %v2821_v32, %v2802_v36  ;;  %2839 = vst.msk [vmem:[%s3533_s12 + $0x20] sm:$0xff] %vm5035_vm15, %v2831_v50 }
 0x7ed   : > { %2837 = vst.msk [vmem:[%s3533_s12 + $0x10] sm:$0xff] %vm5036_vm0, %v2829_v48 }
 0x7f0   : > { %v2798_v30 = vpop.f32.mrf.mxu0 }
 0x7f1   : > { %v2799_v4 = vadd.f32 %v3359_v56, %v2798_v30 }
 0x7f3   : > { %v2828_v49 = vadd.f32 %v2820_v9, %v2799_v4 }
 0x7f5   : > { %2836 = vst.msk [vmem:[%s3533_s12 + $0x8] sm:$0xff] %vm5037_vm10, %v2828_v49 }
 0x7fb   : > { %v2813_v28 = vpop.f32.mrf.mxu3 }
 0x7fc   : > { %v2814_v23 = vadd.f32 %v3359_v56, %v2813_v28 }
 0x7fe   : > { %v2833_v39 = vadd.f32 %v2825_v47, %v2814_v23 }
 0x800   : > { %2841 = vst.msk [vmem:[%s3533_s12 + $0x30] sm:$0xff] %vm5038_vm1, %v2833_v39 }
 0x803   : > { %v2816_v57 = vpop.f32.mrf.mxu3 }
 0x804   : > { %v2817_v27 = vadd.f32 %v3359_v56, %v2816_v57 }
 0x806   : > { %v2834_v29 = vadd.f32 %v2826_v11, %v2817_v27 }
 0x808   : > { %2842 = vst.msk [vmem:[%s3533_s12 + $0x38] sm:$0xff] %vm5039_vm4, %v2834_v29 }
 0x80d   : > { %v2810_v24 = vpop.f32.mrf.mxu2 }
 0x80e   : > { %v2811_v6 = vadd.f32 %v3359_v56, %v2810_v24 }
 0x80f   : > { %v2804_v51 = vpop.f32.mrf.mxu1 }
 0x810   : > { %v2832_v14 = vadd.f32 %v2824_v53, %v2811_v6  ;;  %v2805_v63 = vadd.f32 %v3359_v56, %v2804_v51 }
 0x812   : > { %2840 = vst.msk [vmem:[%s3533_s12 + $0x28] sm:$0xff] %vm5040_vm6, %v2832_v14  ;;  %v2830_v54 = vadd.f32 %v2822_v5, %v2805_v63 }
 0x814   : > { %2838 = vst.msk [vmem:[%s3533_s12 + $0x18] sm:$0xff] %vm5041_vm7, %v2830_v54 }
 0x815 PF: > { %s18_s9 = sadd.s32 1, %s3414_s9   ;;  %s5042_s26 = sld [smem:[#allocation6_spill]] }
 0x816   : > { %p15_p9 = scmp.ge.s32.totalorder %s18_s9, 6   ;;  %s5043_s27 = smov %s3406_s29 }
 0x817   : > { %s5044_s28 = smov %s3410_s30  ;;  %s5045_s29 = smov %s5048_s10 }
 0x818   :  { %17 = sbr.rel (!%p15_p9) target bundleno = 3 (0x3), region = 99 }
 0x81b   : > { %s5046_s30 = smov %s5042_s26 }

</bundles_post_ra>
